<compile_context>
chip_gen: v5e
topology: v5e:2x2
jax: 0.10.0
libtpu: 0.0.40
codegen_flags: <defaults>
</compile_context>

<pallas_src>
import functools

import jax
import jax.numpy as jnp
from jax import lax
from jax.experimental import pallas as pl
from jax.experimental.pallas import tpu as pltpu

LANES = 128  # lane width: channel / folded-tap contraction padding


# ---------------------------------------------------------------------------
# Fused kernel: ConvTranspose2d(+bias) -> crop/pad -> concat -> [conv->FN->ReLU]*n
# ---------------------------------------------------------------------------
def _fused_upsampling_kernel(x1c_ref, x2_ref, wt_ref, bt_ref, *rest,
                             n_blocks, cins, k, Wp, Wo, L_out, hw, pad_off,
                             eps, up_box):
    """One batch element, everything resident in VMEM.

    x1c_ref : (1, L_out, 128) bf16  im2col of x1 (taps folded into lanes) for the
                                    equivalent stride-1 conv of the ConvTranspose
    x2_ref  : (1, L_out, 128) bf16  x2 in slack layout, channels in lanes [0, C2)
    wt_ref  : (128, 128)      bf16  ConvTranspose weight, out cols at lanes [C2, C2+Cout)
    bt_ref  : (1, 128)        f32   ConvTranspose bias (same lane placement)
    rest    : [w_i, fn_scale_i, fn_bias_i] * n_blocks, out_ref, a_scratch

    "slack layout" = row-major over (Ho, Wp) with Wp = Wo + k - 1; the k-1 extra columns
    per row are excluded from all statistics and re-zeroed before reuse.
    """
    o_ref = rest[3 * n_blocks]
    a_ref = rest[3 * n_blocks + 1]

    # Valid-column mask of the slack layout, generated in-kernel.  Row/col indices are
    # derived via an f32 divide + truncation (exact for these ranges) so no integer
    # div/rem lowering is needed.
    lidx = lax.broadcasted_iota(jnp.int32, (L_out, 1), 0)
    row = (lidx.astype(jnp.float32) / Wp).astype(jnp.int32)
    col = lidx - row * Wp
    valid = col < Wo

    # --- ConvTranspose2d + bias: ONE MXU dot over the wrapper-built im2col ------------
    up = jnp.dot(x1c_ref[0], wt_ref[...],
                 preferred_element_type=jnp.float32) + bt_ref[...]
    if up_box is not None:  # F.pad added a zero border around the ConvTranspose output
        top, bot, lft, rgt = up_box
        inside = ((row >= top) & (row < (L_out // Wp) - bot) &
                  (col >= lft) & (col < Wo - rgt))
        up = jnp.where(inside, up, 0.0)

    # torch.cat([x2, x1_up], dim=1): disjoint lane ranges -> a single add.
    cur = jnp.where(valid, x2_ref[0].astype(jnp.float32) + up, 0.0)

    if n_blocks:
        # Fresh zero border/tail of the padded activation buffer (tiny store); the
        # interior is overwritten by every block below.
        a_ref[...] = jnp.zeros_like(a_ref)

    # --- [Conv2d(bias=False) -> FeatureNorm -> ReLU] * n_blocks ------------------------
    for i in range(n_blocks):
        w_ref, sc_ref, fb_ref = rest[3 * i:3 * i + 3]
        ci = cins[i]                       # real input channels of this block

        # Drop the activation at its padded position inside the flat (Hp*Wp) buffer.
        a_ref[pad_off:pad_off + L_out, :] = cur

        # In-VMEM mini-im2col: tap t's overlapping row window is lane-rolled into lanes
        # [t*ci, (t+1)*ci) (lanes >= ci are guaranteed zero) and summed, producing a
        # single 128-deep contraction for the MXU.
        p = None
        for dy in range(k):
            for dx in range(k):
                t = dy * k + dx
                win = a_ref[dy * Wp + dx:dy * Wp + dx + L_out, :]
                if t:
                    win = pltpu.roll(win, t * ci, axis=1)
                p = win if p is None else p + win

        acc = jnp.dot(p.astype(jnp.bfloat16), w_ref[...],
                      preferred_element_type=jnp.float32)          # (L_out, 128) f32

        # FeatureNorm (scale*(x-mean)/sqrt(std+eps)+bias, std unbiased over H*W) + ReLU.
        # Slack columns are excluded from the stats and re-zeroed so the next block's
        # zero-padding border stays intact.
        mean = jnp.sum(jnp.where(valid, acc, 0.0), axis=0, keepdims=True) / hw
        d = acc - mean
        var = jnp.sum(jnp.where(valid, d * d, 0.0), axis=0, keepdims=True) / (hw - 1)
        inv_s = sc_ref[...] * lax.rsqrt(jnp.sqrt(var) + eps)       # scale folded in
        y = d * inv_s + fb_ref[...]
        cur = jnp.where(valid, jnp.maximum(y, 0.0), 0.0)

    o_ref[...] = cur[None].astype(o_ref.dtype)


# ---------------------------------------------------------------------------
# Wrapper-side layout plumbing (weight packing, im2col of the external inputs)
# ---------------------------------------------------------------------------
def _pack_conv_weight(w_oihw):
    """PyTorch Conv2d weight (Cout, Cin, k, k) -> (128, 128) bf16, row = t*Cin + ci."""
    Cout, Cin, k, _ = w_oihw.shape
    wm = jnp.transpose(w_oihw, (2, 3, 1, 0)).reshape(k * k * Cin, Cout)
    wm = jnp.pad(wm, ((0, LANES - k * k * Cin), (0, LANES - Cout)))
    return wm.astype(jnp.bfloat16)


def _pack_convt_weight(w_iohw, col_off):
    """ConvTranspose2d weight (Cin, Cout, k, k) -> equivalent-conv (128, 128) bf16 with
    output channels at lanes [col_off, col_off+Cout) (fuses the channel concat)."""
    Cin, Cout, k, _ = w_iohw.shape
    w_eq = jnp.flip(w_iohw, axis=(2, 3))
    wm = jnp.transpose(w_eq, (2, 3, 0, 1)).reshape(k * k * Cin, Cout)
    wm = jnp.pad(wm, ((0, LANES - k * k * Cin), (col_off, LANES - col_off - Cout)))
    return wm.astype(jnp.bfloat16)


def _lane_vec(v, off=0):
    """(C,) -> (1, 128) f32 with values at lanes [off, off+C), zeros elsewhere."""
    v = v.reshape(1, -1)
    return jnp.pad(v, ((0, 0), (off, LANES - off - v.shape[-1]))).astype(jnp.float32)


# ---------------------------------------------------------------------------
# UpSampling module: params + forward
# ---------------------------------------------------------------------------
def init_upsampling_params(key, n_conv_blocks, in_channels, out_channels,
                           n_channels_connected, kernel_size):
    k = kernel_size
    keys = jax.random.split(key, 2 + n_conv_blocks)
    wt = jax.random.normal(keys[0], (in_channels, out_channels, k, k), jnp.float32) * 0.1
    bt = jax.random.uniform(keys[1], (out_channels,), jnp.float32, -0.1, 0.1)
    conv_ws, fn_scales, fn_biases = [], [], []
    cin = n_channels_connected + out_channels
    for i in range(n_conv_blocks):
        fan_in, fan_out = cin * k * k, out_channels * k * k
        std = (2.0 / (fan_in + fan_out)) ** 0.5              # xavier_normal_
        conv_ws.append(jax.random.normal(keys[2 + i], (out_channels, cin, k, k),
                                         jnp.float32) * std)
        fn_scales.append(jnp.ones((out_channels,), jnp.float32))   # FeatureNorm scale
        fn_biases.append(jnp.zeros((out_channels,), jnp.float32))  # FeatureNorm bias
        cin = out_channels
    return dict(wt=wt, bt=bt, conv_ws=conv_ws, fn_scales=fn_scales, fn_biases=fn_biases)


def upsampling_forward(params, x1_nchw, x2_nchw, kernel_size, padding, stride=2):
    k = kernel_size
    x1 = jnp.transpose(x1_nchw, (0, 2, 3, 1)).astype(jnp.float32)   # NHWC
    x2 = jnp.transpose(x2_nchw, (0, 2, 3, 1)).astype(jnp.float32)
    N, H2, W2, C2 = x2.shape
    H1, W1, C1 = x1.shape[1], x1.shape[2], x1.shape[3]
    Cout = params['wt'].shape[1]
    n_blocks = len(params['conv_ws'])

    # Fused path assumes 'same' conv blocks (the module's intended configuration).
    # TODO(synk): general padding would need per-block spatial layouts.
    assert k == 2 * padding + 1, "fused kernel assumes kernel_size == 2*padding + 1"
    assert k * k * max(C1, C2 + Cout, Cout) <= LANES, "folded taps must fit 128 lanes"

    Wp = W2 + (k - 1)                 # slack-layout row width == padded conv row width
    Wo = W2
    L_out = H2 * Wp
    hw = H2 * W2
    pad_off = padding * Wp + padding
    Lp = -(-max(L_out + (k - 1) * (Wp + 1), pad_off + L_out) // 8) * 8

    # im2col of x1 for the ConvTranspose's equivalent stride-1 conv; the F.pad crop/pad
    # is folded into the padding of the zero-dilated input.
    Hd, Wd = (H1 - 1) * stride + 1, (W1 - 1) * stride + 1
    xd = jnp.zeros((N, Hd, Wd, C1), x1.dtype).at[:, ::stride, ::stride, :].set(x1)
    dY, dX = H2 - (Hd + k - 1), W2 - (Wd + k - 1)
    tpad, bpad = (k - 1) + dY // 2, (k - 1) + (dY - dY // 2)
    lpad, rpad = (k - 1) + dX // 2, (k - 1) + (dX - dX // 2)
    xd = xd[:, max(0, -tpad):Hd - max(0, -bpad), max(0, -lpad):Wd - max(0, -rpad), :]
    xq = jnp.pad(xd, ((0, 0), (max(0, tpad), max(0, bpad)),
                      (max(0, lpad), max(0, rpad)), (0, 0)))
    assert xq.shape[1] == H2 + k - 1 and xq.shape[2] == W2 + k - 1
    cols = [xq[:, dy:dy + H2, dx:dx + W2, :] for dy in range(k) for dx in range(k)]
    x1c = jnp.concatenate(cols, axis=-1)                       # (N, H2, W2, k*k*C1)
    x1c = jnp.pad(x1c, ((0, 0), (0, 0), (0, k - 1), (0, LANES - k * k * C1)))
    x1c = x1c.reshape(N, L_out, LANES).astype(jnp.bfloat16)
    # any border that F.pad *adds* around the ConvTranspose output must stay zero
    up_box = (max(0, dY // 2), max(0, dY - dY // 2), max(0, dX // 2), max(0, dX - dX // 2))
    up_box = up_box if any(up_box) else None

    # x2 in slack layout with its channels pre-placed in lanes [0, C2)
    x2s = jnp.pad(x2, ((0, 0), (0, 0), (0, k - 1), (0, LANES - C2)))
    x2s = x2s.reshape(N, L_out, LANES).astype(jnp.bfloat16)

    # lane-packed weights / FeatureNorm params
    wt_mat = _pack_convt_weight(params['wt'], C2)
    bt = _lane_vec(params['bt'], C2)
    blk_args, cins = [], []
    cin = C2 + Cout
    for i in range(n_blocks):
        blk_args += [_pack_conv_weight(params['conv_ws'][i]),
                     _lane_vec(params['fn_scales'][i]),
                     _lane_vec(params['fn_biases'][i])]
        cins.append(cin)
        cin = Cout

    kernel = functools.partial(
        _fused_upsampling_kernel, n_blocks=n_blocks, cins=tuple(cins), k=k, Wp=Wp,
        Wo=Wo, L_out=L_out, hw=hw, pad_off=pad_off, eps=1e-3, up_box=up_box)

    act_spec = pl.BlockSpec((1, L_out, LANES), lambda n: (n, 0, 0))
    mat_spec = pl.BlockSpec((LANES, LANES), lambda n: (0, 0))
    vec_spec = pl.BlockSpec((1, LANES), lambda n: (0, 0))
    in_specs = ([act_spec, act_spec, mat_spec, vec_spec]
                + [mat_spec, vec_spec, vec_spec] * n_blocks)

    out = pl.pallas_call(
        kernel,
        out_shape=jax.ShapeDtypeStruct((N, L_out, LANES), jnp.float32),
        grid_spec=pltpu.PrefetchScalarGridSpec(
            num_scalar_prefetch=0,
            grid=(N,),
            in_specs=in_specs,
            out_specs=pl.BlockSpec((1, L_out, LANES), lambda n: (n, 0, 0)),
            scratch_shapes=[pltpu.VMEM((Lp, LANES), jnp.float32)],
        ),
        compiler_params=pltpu.CompilerParams(
            dimension_semantics=("parallel",),
            vmem_limit_bytes=32 * 1024 * 1024,
        ),
    )(x1c, x2s, wt_mat, bt, *blk_args)

    c_final = Cout if n_blocks else C2 + Cout
    out = out.reshape(N, H2, Wp, LANES)[:, :, :W2, :c_final]   # drop slack cols + lanes
    return jnp.transpose(out, (0, 3, 1, 2))                    # back to NCHW


if __name__ == "__main__":
    key = jax.random.PRNGKey(0)
    n_conv_blocks = 2
    in_channels, out_channels, n_channels_connected = 8, 4, 4
    kernel_size, padding, stride = 3, 1, 2

    k1, k2, kp = jax.random.split(key, 3)
    x1 = jax.random.normal(k1, (2, in_channels, 8, 8), jnp.float32)              # NCHW
    x2 = jax.random.normal(k2, (2, n_channels_connected, 16, 16), jnp.float32)   # NCHW

    params = init_upsampling_params(kp, n_conv_blocks, in_channels, out_channels,
                                    n_channels_connected, kernel_size)

    fwd = jax.jit(functools.partial(upsampling_forward, kernel_size=kernel_size,
                                    padding=padding, stride=stride))
    out = fwd(params, x1, x2)
    jax.block_until_ready(out)
    assert out.shape == (2, out_channels, 16, 16), out.shape
    assert bool(jnp.isfinite(out).all())
    print("KERNEL_OK")
</pallas_src>

<mosaic_0001>
module attributes {stable_mosaic.version = 11 : i64} {
  func.func @_fused_upsampling_kernel(%arg0: i32, %arg1: memref<1x288x128xbf16, #tpu.memory_space<vmem>>, %arg2: memref<1x288x128xbf16, #tpu.memory_space<vmem>>, %arg3: memref<128x128xbf16, #tpu.memory_space<vmem>>, %arg4: memref<1x128xf32, #tpu.memory_space<vmem>>, %arg5: memref<128x128xbf16, #tpu.memory_space<vmem>>, %arg6: memref<1x128xf32, #tpu.memory_space<vmem>>, %arg7: memref<1x128xf32, #tpu.memory_space<vmem>>, %arg8: memref<128x128xbf16, #tpu.memory_space<vmem>>, %arg9: memref<1x128xf32, #tpu.memory_space<vmem>>, %arg10: memref<1x128xf32, #tpu.memory_space<vmem>>, %arg11: memref<1x288x128xf32, #tpu.memory_space<vmem>>, %arg12: memref<328x128xf32, #tpu.memory_space<vmem>>) attributes {dimension_semantics = [#tpu.dimension_semantics<parallel>], iteration_bounds = array<i64: 2>, scalar_prefetch = 0 : i64, scratch_operands = 1 : i64, tpu.core_type = #tpu.core_type<tc>, window_params = [{transform_indices = @transform_0, window_bounds = array<i64: 1, 288, 128>}, {transform_indices = @transform_1, window_bounds = array<i64: 1, 288, 128>}, {pipeline_mode = #tpu.pipeline_mode<synchronous>, transform_indices = @transform_2, window_bounds = array<i64: 128, 128>}, {pipeline_mode = #tpu.pipeline_mode<synchronous>, transform_indices = @transform_3, window_bounds = array<i64: 1, 128>}, {pipeline_mode = #tpu.pipeline_mode<synchronous>, transform_indices = @transform_4, window_bounds = array<i64: 128, 128>}, {pipeline_mode = #tpu.pipeline_mode<synchronous>, transform_indices = @transform_5, window_bounds = array<i64: 1, 128>}, {pipeline_mode = #tpu.pipeline_mode<synchronous>, transform_indices = @transform_6, window_bounds = array<i64: 1, 128>}, {pipeline_mode = #tpu.pipeline_mode<synchronous>, transform_indices = @transform_7, window_bounds = array<i64: 128, 128>}, {pipeline_mode = #tpu.pipeline_mode<synchronous>, transform_indices = @transform_8, window_bounds = array<i64: 1, 128>}, {pipeline_mode = #tpu.pipeline_mode<synchronous>, transform_indices = @transform_9, window_bounds = array<i64: 1, 128>}, {transform_indices = @transform_10, window_bounds = array<i64: 1, 288, 128>}]} {
    %0 = tpu.iota {dimensions = array<i32: 0>} : vector<288x1xi32>
    %1 = arith.sitofp %0 : vector<288x1xi32> to vector<288x1xf32>
    %cst = arith.constant 1.800000e+01 : f32
    %2 = vector.broadcast %cst : f32 to vector<288x1xf32>
    %3 = arith.divf %1, %2 : vector<288x1xf32>
    %4 = arith.fptosi %3 : vector<288x1xf32> to vector<288x1xi32>
    %c18_i32 = arith.constant 18 : i32
    %5 = vector.broadcast %c18_i32 : i32 to vector<288x1xi32>
    %6 = arith.muli %4, %5 : vector<288x1xi32>
    %7 = arith.subi %0, %6 : vector<288x1xi32>
    %c16_i32 = arith.constant 16 : i32
    %8 = vector.broadcast %c16_i32 : i32 to vector<288x1xi32>
    %9 = arith.cmpi slt, %7, %8 : vector<288x1xi32>
    %c0 = arith.constant 0 : index
    %c0_0 = arith.constant 0 : index
    %c0_1 = arith.constant 0 : index
    %10 = vector.load %arg1[%c0, %c0_0, %c0_1] : memref<1x288x128xbf16, #tpu.memory_space<vmem>>, vector<1x288x128xbf16>
    %11 = vector.shape_cast %10 : vector<1x288x128xbf16> to vector<288x128xbf16>
    %c0_2 = arith.constant 0 : index
    %c0_3 = arith.constant 0 : index
    %12 = vector.load %arg3[%c0_2, %c0_3] : memref<128x128xbf16, #tpu.memory_space<vmem>>, vector<128x128xbf16>
    %cst_4 = arith.constant dense<0.000000e+00> : vector<288x128xf32>
    %13 = tpu.matmul %11, %12, %cst_4 {dimension_numbers = #tpu.dot_dimension_numbers<[1], [0], [0], [1], [0, 0, 1, 1], [], []>} : vector<288x128xbf16>, vector<128x128xbf16>, vector<288x128xf32> -> vector<288x128xf32>
    %c0_5 = arith.constant 0 : index
    %c0_6 = arith.constant 0 : index
    %14 = vector.load %arg4[%c0_5, %c0_6] : memref<1x128xf32, #tpu.memory_space<vmem>>, vector<1x128xf32>
    %15 = vector.broadcast %14 : vector<1x128xf32> to vector<288x128xf32>
    %16 = arith.addf %13, %15 : vector<288x128xf32>
    %c0_7 = arith.constant 0 : index
    %c0_8 = arith.constant 0 : index
    %c0_9 = arith.constant 0 : index
    %17 = vector.load %arg2[%c0_7, %c0_8, %c0_9] : memref<1x288x128xbf16, #tpu.memory_space<vmem>>, vector<1x288x128xbf16>
    %18 = vector.shape_cast %17 : vector<1x288x128xbf16> to vector<288x128xbf16>
    %19 = arith.extf %18 : vector<288x128xbf16> to vector<288x128xf32>
    %20 = arith.addf %19, %16 : vector<288x128xf32>
    %cst_10 = arith.constant 0.000000e+00 : f32
    %21 = vector.shape_cast %9 : vector<288x1xi1> to vector<288x1xi1>
    %22 = vector.broadcast %21 : vector<288x1xi1> to vector<288x128xi1>
    %23 = vector.broadcast %cst_10 : f32 to vector<288x128xf32>
    %24 = arith.select %22, %20, %23 : vector<288x128xi1>, vector<288x128xf32>
    %cst_11 = arith.constant 0.000000e+00 : f32
    %25 = vector.broadcast %cst_11 : f32 to vector<328x128xf32>
    %c0_12 = arith.constant 0 : index
    %c0_13 = arith.constant 0 : index
    %26 = vector.load %arg12[%c0_12, %c0_13] : memref<328x128xf32, #tpu.memory_space<vmem>>, vector<328x128xf32>
    tpu.vector_store %arg12[%c0_12, %c0_13], %25 {strides = array<i32>} : memref<328x128xf32, #tpu.memory_space<vmem>>, vector<328x128xf32>,
    %c19 = arith.constant 19 : index
    %c0_14 = arith.constant 0 : index
    %27 = vector.load %arg12[%c19, %c0_14] : memref<328x128xf32, #tpu.memory_space<vmem>>, vector<288x128xf32>
    tpu.vector_store %arg12[%c19, %c0_14], %24 {strides = array<i32>} : memref<328x128xf32, #tpu.memory_space<vmem>>, vector<288x128xf32>,
    %c0_15 = arith.constant 0 : index
    %c0_16 = arith.constant 0 : index
    %28 = vector.load %arg12[%c0_15, %c0_16] : memref<328x128xf32, #tpu.memory_space<vmem>>, vector<288x128xf32>
    %c1 = arith.constant 1 : index
    %c0_17 = arith.constant 0 : index
    %29 = vector.load %arg12[%c1, %c0_17] : memref<328x128xf32, #tpu.memory_space<vmem>>, vector<288x128xf32>
    %c8_i32 = arith.constant 8 : i32
    %30 = tpu.dynamic_rotate %29 by %c8_i32 dim 1 : vector<288x128xf32>, i32 -> vector<288x128xf32>
    %31 = arith.addf %28, %30 : vector<288x128xf32>
    %c2 = arith.constant 2 : index
    %c0_18 = arith.constant 0 : index
    %32 = vector.load %arg12[%c2, %c0_18] : memref<328x128xf32, #tpu.memory_space<vmem>>, vector<288x128xf32>
    %c16_i32_19 = arith.constant 16 : i32
    %33 = tpu.dynamic_rotate %32 by %c16_i32_19 dim 1 : vector<288x128xf32>, i32 -> vector<288x128xf32>
    %34 = arith.addf %31, %33 : vector<288x128xf32>
    %c18 = arith.constant 18 : index
    %c0_20 = arith.constant 0 : index
    %35 = vector.load %arg12[%c18, %c0_20] : memref<328x128xf32, #tpu.memory_space<vmem>>, vector<288x128xf32>
    %c24_i32 = arith.constant 24 : i32
    %36 = tpu.dynamic_rotate %35 by %c24_i32 dim 1 : vector<288x128xf32>, i32 -> vector<288x128xf32>
    %37 = arith.addf %34, %36 : vector<288x128xf32>
    %c19_21 = arith.constant 19 : index
    %c0_22 = arith.constant 0 : index
    %38 = vector.load %arg12[%c19_21, %c0_22] : memref<328x128xf32, #tpu.memory_space<vmem>>, vector<288x128xf32>
    %c32_i32 = arith.constant 32 : i32
    %39 = tpu.dynamic_rotate %38 by %c32_i32 dim 1 : vector<288x128xf32>, i32 -> vector<288x128xf32>
    %40 = arith.addf %37, %39 : vector<288x128xf32>
    %c20 = arith.constant 20 : index
    %c0_23 = arith.constant 0 : index
    %41 = vector.load %arg12[%c20, %c0_23] : memref<328x128xf32, #tpu.memory_space<vmem>>, vector<288x128xf32>
    %c40_i32 = arith.constant 40 : i32
    %42 = tpu.dynamic_rotate %41 by %c40_i32 dim 1 : vector<288x128xf32>, i32 -> vector<288x128xf32>
    %43 = arith.addf %40, %42 : vector<288x128xf32>
    %c36 = arith.constant 36 : index
    %c0_24 = arith.constant 0 : index
    %44 = vector.load %arg12[%c36, %c0_24] : memref<328x128xf32, #tpu.memory_space<vmem>>, vector<288x128xf32>
    %c48_i32 = arith.constant 48 : i32
    %45 = tpu.dynamic_rotate %44 by %c48_i32 dim 1 : vector<288x128xf32>, i32 -> vector<288x128xf32>
    %46 = arith.addf %43, %45 : vector<288x128xf32>
    %c37 = arith.constant 37 : index
    %c0_25 = arith.constant 0 : index
    %47 = vector.load %arg12[%c37, %c0_25] : memref<328x128xf32, #tpu.memory_space<vmem>>, vector<288x128xf32>
    %c56_i32 = arith.constant 56 : i32
    %48 = tpu.dynamic_rotate %47 by %c56_i32 dim 1 : vector<288x128xf32>, i32 -> vector<288x128xf32>
    %49 = arith.addf %46, %48 : vector<288x128xf32>
    %c38 = arith.constant 38 : index
    %c0_26 = arith.constant 0 : index
    %50 = vector.load %arg12[%c38, %c0_26] : memref<328x128xf32, #tpu.memory_space<vmem>>, vector<288x128xf32>
    %c64_i32 = arith.constant 64 : i32
    %51 = tpu.dynamic_rotate %50 by %c64_i32 dim 1 : vector<288x128xf32>, i32 -> vector<288x128xf32>
    %52 = arith.addf %49, %51 : vector<288x128xf32>
    %53 = arith.truncf %52 : vector<288x128xf32> to vector<288x128xbf16>
    %c0_27 = arith.constant 0 : index
    %c0_28 = arith.constant 0 : index
    %54 = vector.load %arg5[%c0_27, %c0_28] : memref<128x128xbf16, #tpu.memory_space<vmem>>, vector<128x128xbf16>
    %cst_29 = arith.constant dense<0.000000e+00> : vector<288x128xf32>
    %55 = tpu.matmul %53, %54, %cst_29 {dimension_numbers = #tpu.dot_dimension_numbers<[1], [0], [0], [1], [0, 0, 1, 1], [], []>} : vector<288x128xbf16>, vector<128x128xbf16>, vector<288x128xf32> -> vector<288x128xf32>
    %cst_30 = arith.constant 0.000000e+00 : f32
    %56 = vector.shape_cast %9 : vector<288x1xi1> to vector<288x1xi1>
    %57 = vector.broadcast %56 : vector<288x1xi1> to vector<288x128xi1>
    %58 = vector.broadcast %cst_30 : f32 to vector<288x128xf32>
    %59 = arith.select %57, %55, %58 : vector<288x128xi1>, vector<288x128xf32>
    %cst_31 = arith.constant dense<0.000000e+00> : vector<128xf32>
    %60 = vector.multi_reduction <add>, %59, %cst_31 [0] : vector<288x128xf32> to vector<128xf32>
    %61 = vector.shape_cast %60 : vector<128xf32> to vector<1x128xf32>
    %cst_32 = arith.constant 2.560000e+02 : f32
    %62 = vector.broadcast %cst_32 : f32 to vector<1x128xf32>
    %63 = arith.divf %61, %62 : vector<1x128xf32>
    %64 = vector.broadcast %63 : vector<1x128xf32> to vector<288x128xf32>
    %65 = arith.subf %55, %64 : vector<288x128xf32>
    %66 = arith.mulf %65, %65 : vector<288x128xf32>
    %cst_33 = arith.constant 0.000000e+00 : f32
    %67 = vector.shape_cast %9 : vector<288x1xi1> to vector<288x1xi1>
    %68 = vector.broadcast %67 : vector<288x1xi1> to vector<288x128xi1>
    %69 = vector.broadcast %cst_33 : f32 to vector<288x128xf32>
    %70 = arith.select %68, %66, %69 : vector<288x128xi1>, vector<288x128xf32>
    %cst_34 = arith.constant dense<0.000000e+00> : vector<128xf32>
    %71 = vector.multi_reduction <add>, %70, %cst_34 [0] : vector<288x128xf32> to vector<128xf32>
    %72 = vector.shape_cast %71 : vector<128xf32> to vector<1x128xf32>
    %cst_35 = arith.constant 2.550000e+02 : f32
    %73 = vector.broadcast %cst_35 : f32 to vector<1x128xf32>
    %74 = arith.divf %72, %73 : vector<1x128xf32>
    %c0_36 = arith.constant 0 : index
    %c0_37 = arith.constant 0 : index
    %75 = vector.load %arg6[%c0_36, %c0_37] : memref<1x128xf32, #tpu.memory_space<vmem>>, vector<1x128xf32>
    %76 = math.sqrt %74 : vector<1x128xf32>
    %cst_38 = arith.constant 1.000000e-03 : f32
    %77 = vector.broadcast %cst_38 : f32 to vector<1x128xf32>
    %78 = arith.addf %76, %77 : vector<1x128xf32>
    %79 = math.rsqrt %78 : vector<1x128xf32>
    %80 = arith.mulf %75, %79 : vector<1x128xf32>
    %81 = vector.broadcast %80 : vector<1x128xf32> to vector<288x128xf32>
    %82 = arith.mulf %65, %81 : vector<288x128xf32>
    %c0_39 = arith.constant 0 : index
    %c0_40 = arith.constant 0 : index
    %83 = vector.load %arg7[%c0_39, %c0_40] : memref<1x128xf32, #tpu.memory_space<vmem>>, vector<1x128xf32>
    %84 = vector.broadcast %83 : vector<1x128xf32> to vector<288x128xf32>
    %85 = arith.addf %82, %84 : vector<288x128xf32>
    %cst_41 = arith.constant 0.000000e+00 : f32
    %86 = vector.broadcast %cst_41 : f32 to vector<288x128xf32>
    %87 = arith.maximumf %85, %86 : vector<288x128xf32>
    %cst_42 = arith.constant 0.000000e+00 : f32
    %88 = vector.shape_cast %9 : vector<288x1xi1> to vector<288x1xi1>
    %89 = vector.broadcast %88 : vector<288x1xi1> to vector<288x128xi1>
    %90 = vector.broadcast %cst_42 : f32 to vector<288x128xf32>
    %91 = arith.select %89, %87, %90 : vector<288x128xi1>, vector<288x128xf32>
    %c19_43 = arith.constant 19 : index
    %c0_44 = arith.constant 0 : index
    %92 = vector.load %arg12[%c19_43, %c0_44] : memref<328x128xf32, #tpu.memory_space<vmem>>, vector<288x128xf32>
    tpu.vector_store %arg12[%c19_43, %c0_44], %91 {strides = array<i32>} : memref<328x128xf32, #tpu.memory_space<vmem>>, vector<288x128xf32>,
    %c0_45 = arith.constant 0 : index
    %c0_46 = arith.constant 0 : index
    %93 = vector.load %arg12[%c0_45, %c0_46] : memref<328x128xf32, #tpu.memory_space<vmem>>, vector<288x128xf32>
    %c1_47 = arith.constant 1 : index
    %c0_48 = arith.constant 0 : index
    %94 = vector.load %arg12[%c1_47, %c0_48] : memref<328x128xf32, #tpu.memory_space<vmem>>, vector<288x128xf32>
    %c4_i32 = arith.constant 4 : i32
    %95 = tpu.dynamic_rotate %94 by %c4_i32 dim 1 : vector<288x128xf32>, i32 -> vector<288x128xf32>
    %96 = arith.addf %93, %95 : vector<288x128xf32>
    %c2_49 = arith.constant 2 : index
    %c0_50 = arith.constant 0 : index
    %97 = vector.load %arg12[%c2_49, %c0_50] : memref<328x128xf32, #tpu.memory_space<vmem>>, vector<288x128xf32>
    %c8_i32_51 = arith.constant 8 : i32
    %98 = tpu.dynamic_rotate %97 by %c8_i32_51 dim 1 : vector<288x128xf32>, i32 -> vector<288x128xf32>
    %99 = arith.addf %96, %98 : vector<288x128xf32>
    %c18_52 = arith.constant 18 : index
    %c0_53 = arith.constant 0 : index
    %100 = vector.load %arg12[%c18_52, %c0_53] : memref<328x128xf32, #tpu.memory_space<vmem>>, vector<288x128xf32>
    %c12_i32 = arith.constant 12 : i32
    %101 = tpu.dynamic_rotate %100 by %c12_i32 dim 1 : vector<288x128xf32>, i32 -> vector<288x128xf32>
    %102 = arith.addf %99, %101 : vector<288x128xf32>
    %c19_54 = arith.constant 19 : index
    %c0_55 = arith.constant 0 : index
    %103 = vector.load %arg12[%c19_54, %c0_55] : memref<328x128xf32, #tpu.memory_space<vmem>>, vector<288x128xf32>
    %c16_i32_56 = arith.constant 16 : i32
    %104 = tpu.dynamic_rotate %103 by %c16_i32_56 dim 1 : vector<288x128xf32>, i32 -> vector<288x128xf32>
    %105 = arith.addf %102, %104 : vector<288x128xf32>
    %c20_57 = arith.constant 20 : index
    %c0_58 = arith.constant 0 : index
    %106 = vector.load %arg12[%c20_57, %c0_58] : memref<328x128xf32, #tpu.memory_space<vmem>>, vector<288x128xf32>
    %c20_i32 = arith.constant 20 : i32
    %107 = tpu.dynamic_rotate %106 by %c20_i32 dim 1 : vector<288x128xf32>, i32 -> vector<288x128xf32>
    %108 = arith.addf %105, %107 : vector<288x128xf32>
    %c36_59 = arith.constant 36 : index
    %c0_60 = arith.constant 0 : index
    %109 = vector.load %arg12[%c36_59, %c0_60] : memref<328x128xf32, #tpu.memory_space<vmem>>, vector<288x128xf32>
    %c24_i32_61 = arith.constant 24 : i32
    %110 = tpu.dynamic_rotate %109 by %c24_i32_61 dim 1 : vector<288x128xf32>, i32 -> vector<288x128xf32>
    %111 = arith.addf %108, %110 : vector<288x128xf32>
    %c37_62 = arith.constant 37 : index
    %c0_63 = arith.constant 0 : index
    %112 = vector.load %arg12[%c37_62, %c0_63] : memref<328x128xf32, #tpu.memory_space<vmem>>, vector<288x128xf32>
    %c28_i32 = arith.constant 28 : i32
    %113 = tpu.dynamic_rotate %112 by %c28_i32 dim 1 : vector<288x128xf32>, i32 -> vector<288x128xf32>
    %114 = arith.addf %111, %113 : vector<288x128xf32>
    %c38_64 = arith.constant 38 : index
    %c0_65 = arith.constant 0 : index
    %115 = vector.load %arg12[%c38_64, %c0_65] : memref<328x128xf32, #tpu.memory_space<vmem>>, vector<288x128xf32>
    %c32_i32_66 = arith.constant 32 : i32
    %116 = tpu.dynamic_rotate %115 by %c32_i32_66 dim 1 : vector<288x128xf32>, i32 -> vector<288x128xf32>
    %117 = arith.addf %114, %116 : vector<288x128xf32>
    %118 = arith.truncf %117 : vector<288x128xf32> to vector<288x128xbf16>
    %c0_67 = arith.constant 0 : index
    %c0_68 = arith.constant 0 : index
    %119 = vector.load %arg8[%c0_67, %c0_68] : memref<128x128xbf16, #tpu.memory_space<vmem>>, vector<128x128xbf16>
    %cst_69 = arith.constant dense<0.000000e+00> : vector<288x128xf32>
    %120 = tpu.matmul %118, %119, %cst_69 {dimension_numbers = #tpu.dot_dimension_numbers<[1], [0], [0], [1], [0, 0, 1, 1], [], []>} : vector<288x128xbf16>, vector<128x128xbf16>, vector<288x128xf32> -> vector<288x128xf32>
    %cst_70 = arith.constant 0.000000e+00 : f32
    %121 = vector.shape_cast %9 : vector<288x1xi1> to vector<288x1xi1>
    %122 = vector.broadcast %121 : vector<288x1xi1> to vector<288x128xi1>
    %123 = vector.broadcast %cst_70 : f32 to vector<288x128xf32>
    %124 = arith.select %122, %120, %123 : vector<288x128xi1>, vector<288x128xf32>
    %cst_71 = arith.constant dense<0.000000e+00> : vector<128xf32>
    %125 = vector.multi_reduction <add>, %124, %cst_71 [0] : vector<288x128xf32> to vector<128xf32>
    %126 = vector.shape_cast %125 : vector<128xf32> to vector<1x128xf32>
    %cst_72 = arith.constant 2.560000e+02 : f32
    %127 = vector.broadcast %cst_72 : f32 to vector<1x128xf32>
    %128 = arith.divf %126, %127 : vector<1x128xf32>
    %129 = vector.broadcast %128 : vector<1x128xf32> to vector<288x128xf32>
    %130 = arith.subf %120, %129 : vector<288x128xf32>
    %131 = arith.mulf %130, %130 : vector<288x128xf32>
    %cst_73 = arith.constant 0.000000e+00 : f32
    %132 = vector.shape_cast %9 : vector<288x1xi1> to vector<288x1xi1>
    %133 = vector.broadcast %132 : vector<288x1xi1> to vector<288x128xi1>
    %134 = vector.broadcast %cst_73 : f32 to vector<288x128xf32>
    %135 = arith.select %133, %131, %134 : vector<288x128xi1>, vector<288x128xf32>
    %cst_74 = arith.constant dense<0.000000e+00> : vector<128xf32>
    %136 = vector.multi_reduction <add>, %135, %cst_74 [0] : vector<288x128xf32> to vector<128xf32>
    %137 = vector.shape_cast %136 : vector<128xf32> to vector<1x128xf32>
    %cst_75 = arith.constant 2.550000e+02 : f32
    %138 = vector.broadcast %cst_75 : f32 to vector<1x128xf32>
    %139 = arith.divf %137, %138 : vector<1x128xf32>
    %c0_76 = arith.constant 0 : index
    %c0_77 = arith.constant 0 : index
    %140 = vector.load %arg9[%c0_76, %c0_77] : memref<1x128xf32, #tpu.memory_space<vmem>>, vector<1x128xf32>
    %141 = math.sqrt %139 : vector<1x128xf32>
    %cst_78 = arith.constant 1.000000e-03 : f32
    %142 = vector.broadcast %cst_78 : f32 to vector<1x128xf32>
    %143 = arith.addf %141, %142 : vector<1x128xf32>
    %144 = math.rsqrt %143 : vector<1x128xf32>
    %145 = arith.mulf %140, %144 : vector<1x128xf32>
    %146 = vector.broadcast %145 : vector<1x128xf32> to vector<288x128xf32>
    %147 = arith.mulf %130, %146 : vector<288x128xf32>
    %c0_79 = arith.constant 0 : index
    %c0_80 = arith.constant 0 : index
    %148 = vector.load %arg10[%c0_79, %c0_80] : memref<1x128xf32, #tpu.memory_space<vmem>>, vector<1x128xf32>
    %149 = vector.broadcast %148 : vector<1x128xf32> to vector<288x128xf32>
    %150 = arith.addf %147, %149 : vector<288x128xf32>
    %cst_81 = arith.constant 0.000000e+00 : f32
    %151 = vector.broadcast %cst_81 : f32 to vector<288x128xf32>
    %152 = arith.maximumf %150, %151 : vector<288x128xf32>
    %cst_82 = arith.constant 0.000000e+00 : f32
    %153 = vector.shape_cast %9 : vector<288x1xi1> to vector<288x1xi1>
    %154 = vector.broadcast %153 : vector<288x1xi1> to vector<288x128xi1>
    %155 = vector.broadcast %cst_82 : f32 to vector<288x128xf32>
    %156 = arith.select %154, %152, %155 : vector<288x128xi1>, vector<288x128xf32>
    %157 = vector.shape_cast %156 : vector<288x128xf32> to vector<1x288x128xf32>
    %c0_83 = arith.constant 0 : index
    %c0_84 = arith.constant 0 : index
    %c0_85 = arith.constant 0 : index
    %158 = vector.load %arg11[%c0_83, %c0_84, %c0_85] : memref<1x288x128xf32, #tpu.memory_space<vmem>>, vector<1x288x128xf32>
    tpu.vector_store %arg11[%c0_83, %c0_84, %c0_85], %157 {strides = array<i32>} : memref<1x288x128xf32, #tpu.memory_space<vmem>>, vector<1x288x128xf32>,
    return
  }
  func.func @transform_0(%arg0: i32) -> (i32, i32, i32) {
    %c0_i32 = arith.constant 0 : i32
    %c0_i32_0 = arith.constant 0 : i32
    %c0_i32_1 = arith.constant 0 : i32
    return %arg0, %c0_i32, %c0_i32_0 : i32, i32, i32
  }
  func.func @transform_1(%arg0: i32) -> (i32, i32, i32) {
    %c0_i32 = arith.constant 0 : i32
    %c0_i32_0 = arith.constant 0 : i32
    %c0_i32_1 = arith.constant 0 : i32
    return %arg0, %c0_i32, %c0_i32_0 : i32, i32, i32
  }
  func.func @transform_2(%arg0: i32) -> (i32, i32) {
    %c0_i32 = arith.constant 0 : i32
    %c0_i32_0 = arith.constant 0 : i32
    %c0_i32_1 = arith.constant 0 : i32
    return %c0_i32, %c0_i32_0 : i32, i32
  }
  func.func @transform_3(%arg0: i32) -> (i32, i32) {
    %c0_i32 = arith.constant 0 : i32
    %c0_i32_0 = arith.constant 0 : i32
    %c0_i32_1 = arith.constant 0 : i32
    return %c0_i32, %c0_i32_0 : i32, i32
  }
  func.func @transform_4(%arg0: i32) -> (i32, i32) {
    %c0_i32 = arith.constant 0 : i32
    %c0_i32_0 = arith.constant 0 : i32
    %c0_i32_1 = arith.constant 0 : i32
    return %c0_i32, %c0_i32_0 : i32, i32
  }
  func.func @transform_5(%arg0: i32) -> (i32, i32) {
    %c0_i32 = arith.constant 0 : i32
    %c0_i32_0 = arith.constant 0 : i32
    %c0_i32_1 = arith.constant 0 : i32
    return %c0_i32, %c0_i32_0 : i32, i32
  }
  func.func @transform_6(%arg0: i32) -> (i32, i32) {
    %c0_i32 = arith.constant 0 : i32
    %c0_i32_0 = arith.constant 0 : i32
    %c0_i32_1 = arith.constant 0 : i32
    return %c0_i32, %c0_i32_0 : i32, i32
  }
  func.func @transform_7(%arg0: i32) -> (i32, i32) {
    %c0_i32 = arith.constant 0 : i32
    %c0_i32_0 = arith.constant 0 : i32
    %c0_i32_1 = arith.constant 0 : i32
    return %c0_i32, %c0_i32_0 : i32, i32
  }
  func.func @transform_8(%arg0: i32) -> (i32, i32) {
    %c0_i32 = arith.constant 0 : i32
    %c0_i32_0 = arith.constant 0 : i32
    %c0_i32_1 = arith.constant 0 : i32
    return %c0_i32, %c0_i32_0 : i32, i32
  }
  func.func @transform_9(%arg0: i32) -> (i32, i32) {
    %c0_i32 = arith.constant 0 : i32
    %c0_i32_0 = arith.constant 0 : i32
    %c0_i32_1 = arith.constant 0 : i32
    return %c0_i32, %c0_i32_0 : i32, i32
  }
  func.func @transform_10(%arg0: i32) -> (i32, i32, i32) {
    %c0_i32 = arith.constant 0 : i32
    %c0_i32_0 = arith.constant 0 : i32
    %c0_i32_1 = arith.constant 0 : i32
    return %arg0, %c0_i32, %c0_i32_0 : i32, i32, i32
  }
}

</mosaic_0001>

<bundles_post_ra>
// kernel: upsampling_forward.1
= control target key start
LH: loop header
LB: loop body
LE: loop exit
PB: predicated region body
PF: predicated region fallthrough
CT: control target
= control target key end

     0   :  { %s5507_s13 = smov 0   ;;  %s9535_s0 = inlined_call_operand.vmem [shape: bf16[2,288,128], index: 0, kind: input, shape index: {}]   ;;  %s9536_s1 = inlined_call_operand.vmem [shape: bf16[2,288,128], index: 1, kind: input, shape index: {}]   ;;  %s9537_s2 = inlined_call_operand.vmem [shape: bf16[128,128], index: 2, kind: input, shape index: {}]   ;;  %s9538_s3 = inlined_call_operand.vmem [shape: f32[1,128], index: 3, kind: input, shape index: {}]   ;;  %s9539_s4 = inlined_call_operand.vmem [shape: bf16[128,128], index: 4, kind: input, shape index: {}]   ;;  %s9540_s5 = inlined_call_operand.vmem [shape: f32[1,128], index: 5, kind: input, shape index: {}]   ;;  %s9541_s6 = inlined_call_operand.vmem [shape: f32[1,128], index: 6, kind: input, shape index: {}]   ;;  %s9542_s7 = inlined_call_operand.vmem [shape: bf16[128,128], index: 7, kind: input, shape index: {}]   ;;  %s9543_s8 = inlined_call_operand.vmem [shape: f32[1,128], index: 8, kind: input, shape index: {}]   ;;  %s9544_s9 = inlined_call_operand.vmem [shape: f32[1,128], index: 9, kind: input, shape index: {}]   ;;  %s9545_s10 = inlined_call_operand.vmem [shape: f32[2,288,128], index: 10, kind: output, shape index: {}]  }
   0x1 LB: > { %s4807_s14 = sadd.s32 4294967295, %s5434_s13   ;;  %p4811_p0 = scmp.ge.s32.totalorder %s5434_s13, 1  ;;  %s5434_s13 = sphi %s5507_s13, %s20_s13  }
   0x2   : > { %p322_p1 = scmp.lt.s32.totalorder %s5434_s13, 3 }
   0x4   : > { %p323_p2 = pnand %p4811_p0, %p322_p1 }
   0x6   : > { %326 = sbr.rel (%p323_p2) target bundleno = 2566 (0xa06), region = 60 }
   0xb   : > { %v5010_v0 = vld [vmem:[%s9537_s2 + $0x38] sm:$0xff]  ;;  %v5009_v1 = vld [vmem:[%s9537_s2 + $0x30] sm:$0xff]  ;;  %v5008_v2 = vld [vmem:[%s9537_s2 + $0x28] sm:$0xff]  ;;  %p365_p3 = scmp.lt.s32.totalorder %s4807_s14, 1  ;;  %v5436_v17 = vmov 0.0   ;;  %v5437_v19 = vmov 18.0   ;;  %v380_v27 = vlaneseq }
   0xc   : > { %852 = vmatpush.bf16.msra.mxu0 %v5010_v0  ;;  %5116 = vmatpush.bf16.msra.mxu3 %v5010_v0  ;;  %v5007_v3 = vld [vmem:[%s9537_s2 + $0x20] sm:$0xff]  ;;  %v5006_v4 = vld [vmem:[%s9537_s2 + $0x18] sm:$0xff]  ;;  %v5005_v5 = vld [vmem:[%s9537_s2 + $0x10] sm:$0xff]  ;;  %1167 = vst [vmem:[#allocation2] sm:$0xff] %v5436_v17  ;;  %5399 = vrcp.f32 %v5437_v19  ;;  %s5438_s17 = smov 8   ;;  %s5439_s18 = smov 16  }
   0xd   : > { %s10625_s14 = smov (!%p365_p3, %s4807_s14), 1  ;;  %v5004_v6 = vld [vmem:[%s9537_s2 + $0x8] sm:$0xff]  ;;  %v5003_v7 = vld [vmem:[%s9537_s2] sm:$0xff]  ;;  %1168 = vst [vmem:[#allocation2 + $0x8] sm:$0xff] %v5436_v17  ;;  %v5583_v29 = vshrl.u32 %v380_v27, 7  ;;  %v9764_v19 = vmov 0 }
   0xe   : > { %s5140_s29 = smul.u32 144, %s10625_s14  ;;  %1169 = vst [vmem:[#allocation2 + $0x10] sm:$0xff] %v5436_v17  ;;  %s5440_s24 = smov 32  }
   0xf   : > { %1170 = vst [vmem:[#allocation2 + $0x18] sm:$0xff] %v5436_v17  ;;  %v417_v34 = vcvt.s32.f32 %v5583_v29  ;;  %v5596_v36 = vadd.s32 224, %v5583_v29  ;;  %v5600_v37 = vadd.s32 8, %v5583_v29  ;;  %v5615_v45 = vadd.s32 232, %v5583_v29  ;;  %s5441_s25 = smov 24   ;;  %s5442_s26 = smov 40  }
  0x10   : > { %853 = vmatpush.bf16.msra.mxu0 %v5009_v1  ;;  %5117 = vmatpush.bf16.msra.mxu3 %v5009_v1  ;;  %s5547_s16 = scalar_lea.vmem %s9535_s0, %s5140_s29  ;;  %1171 = vst [vmem:[#allocation2 + $0x20] sm:$0xff] %v5436_v17  ;;  %v5621_v48 = vadd.s32 16, %v5583_v29  ;;  %s5633_s21 = scalar_lea.vmem %s9536_s1, %s5140_s29  ;;  %v5637_v58 = vadd.s32 240, %v5583_v29  ;;  %v5642_v0 = vadd.s32 24, %v5583_v29  ;;  %v5647_v1 = vld [vmem:[%s9538_s3] ss:$0 sm:$0xff] }
  0x11   : > { %v4985_v8 = vld [vmem:[%s5547_s16] sm:$0xff]  ;;  %v4999_v9 = vld [vmem:[%s5547_s16 + $0x70] sm:$0xff]  ;;  %v4986_v10 = vld [vmem:[%s5547_s16 + $0x8] sm:$0xff]  ;;  %1172 = vst [vmem:[#allocation2 + $0x28] sm:$0xff] %v5436_v17  ;;  %v445_v39 = vcvt.s32.f32 %v5596_v36  ;;  %v418_v40 = vcvt.s32.f32 %v5600_v37  ;;  %v446_v51 = vcvt.s32.f32 %v5615_v45  ;;  %s5443_s29 = smov 48   ;;  %s5444_s30 = smov 56  }
  0x12   : > { %v5000_v11 = vld [vmem:[%s5547_s16 + $0x78] sm:$0xff]  ;;  %v4987_v12 = vld [vmem:[%s5547_s16 + $0x10] sm:$0xff]  ;;  %v5001_v13 = vld [vmem:[%s5547_s16 + $0x80] sm:$0xff]  ;;  %1173 = vst [vmem:[#allocation2 + $0x30] sm:$0xff] %v5436_v17  ;;  %v5400_v20 = vpop.eup %5399  ;;  %v419_v55 = vcvt.s32.f32 %v5621_v48  ;;  %s5445_s11 = smov 64   ;;  %s5449_s23 = smov 12  }
  0x13   : > { %v4988_v14 = vld [vmem:[%s5547_s16 + $0x18] sm:$0xff]  ;;  %v5002_v15 = vld [vmem:[%s5547_s16 + $0x88] sm:$0xff]  ;;  %v4989_v16 = vld [vmem:[%s5547_s16 + $0x20] sm:$0xff]  ;;  %1174 = vst [vmem:[#allocation2 + $0x38] sm:$0xff] %v5436_v17  ;;  %v454_v24 = vmul.f32 18.0, %v5400_v20  ;;  %vm458_vm0 = vweird.f32 %v5400_v20 }
  0x14   : > { %854 = vmatpush.bf16.msra.mxu0 %v5008_v2  ;;  %5118 = vmatpush.bf16.msra.mxu3 %v5008_v2  ;;  %v4990_v18 = vld [vmem:[%s5547_s16 + $0x28] sm:$0xff]  ;;  %1175 = vst [vmem:[#allocation2 + $0x40] sm:$0xff] %v5436_v17  ;;  %v4991_v26 = vld [vmem:[%s5547_s16 + $0x30] sm:$0xff]  ;;  %v4992_v41 = vld [vmem:[%s5547_s16 + $0x38] sm:$0xff] }
  0x15   : > { %v1280_v21 = vld [vmem:[#allocation2 + $0x1] sm:$0xff]  ;;  %v1281_v22 = vld [vmem:[#allocation2 + $0x9] sm:$0xff]  ;;  %1176 = vst [vmem:[#allocation2 + $0x48] sm:$0xff] %v5436_v17  ;;  %v455_v25 = vsub.f32 1.0, %v454_v24 }
  0x16   : > { %v5346_v23 = vpack.i.bf16 %v1281_v22, %v1280_v21  ;;  %1177 = vst [vmem:[#allocation2 + $0x50] sm:$0xff] %v5436_v17  ;;  %v1424_v30 = vld [vmem:[#allocation2 + $0x2] sm:$0xff]  ;;  %v1425_v31 = vld [vmem:[#allocation2 + $0xa] sm:$0xff] }
  0x17   : > { %1178 = vst [vmem:[#allocation2 + $0x58] sm:$0xff] %v5436_v17  ;;  %v456_v28 = vmul.f32 %v5400_v20, %v455_v25  ;;  %v5351_v33 = vpack.i.bf16 %v1425_v31, %v1424_v30  ;;  %v5028_v62 = vld [vmem:[%s5633_s21] sm:$0xff]  }
  0x18   : > { %855 = vmatpush.bf16.msra.mxu0 %v5007_v3  ;;  %5119 = vmatpush.bf16.msra.mxu3 %v5007_v3  ;;  %1179 = vst [vmem:[#allocation2 + $0x60] sm:$0xff] %v5436_v17 }
  0x19   : > { %5347 = vrot.lane.b32.xlu0 %v5346_v23, %s5438_s17  ;;  %1180 = vst [vmem:[#allocation2 + $0x68] sm:$0xff] %v5436_v17  ;;  %v457_v32 = vadd.f32 %v5400_v20, %v456_v28  ;;  %5352 = vrot.lane.b32.xlu2 %v5351_v33, %s5439_s18 }
  0x1a   : > { %1181 = vst [vmem:[#allocation2 + $0x70] sm:$0xff] %v5436_v17 }
  0x1b   : > { %1182 = vst [vmem:[#allocation2 + $0x78] sm:$0xff] %v5436_v17  ;;  %v5592_v35 = vsel %vm458_vm0, %v5400_v20, %v457_v32  ;;  %v5663_v20 = vadd.s32 32, %v5583_v29 }
  0x1c   : > { %856 = vmatpush.bf16.msra.mxu0 %v5006_v4  ;;  %5120 = vmatpush.bf16.msra.mxu3 %v5006_v4  ;;  %1183 = vst [vmem:[#allocation2 + $0x80] sm:$0xff] %v5436_v17  ;;  %v460_v38 = vmul.f32 %v5592_v35, %v417_v34  ;;  %v488_v44 = vmul.f32 %v5592_v35, %v445_v39  ;;  %v5030_v39 = vunpack.c.h.bf16 %v5028_v62 }
  0x1d   : > { %1184 = vst [vmem:[#allocation2 + $0x88] sm:$0xff] %v5436_v17  ;;  %v461_v46 = vmul.f32 %v5592_v35, %v418_v40  ;;  %v489_v57 = vmul.f32 %v5592_v35, %v446_v51  ;;  %v462_v61 = vmul.f32 %v5592_v35, %v419_v55  ;;  %v421_v34 = vcvt.s32.f32 %v5663_v20 }
  0x1e   : > { %1185 = vst [vmem:[#allocation2 + $0x90] sm:$0xff] %v5436_v17  ;;  %v5143_v42 = vceil.f32 %v460_v38  ;;  %v5144_v43 = vfloor.f32 %v460_v38  ;;  %vm5142_vm1 = vcmp.lt.s32.totalorder %v460_v38, 0  ;;  %v5283_v49 = vceil.f32 %v488_v44 }
  0x1f   : > { %1186 = vst [vmem:[#allocation2 + $0x98] sm:$0xff] %v5436_v17  ;;  %v5284_v50 = vfloor.f32 %v488_v44  ;;  %vm5282_vm2 = vcmp.lt.s32.totalorder %v488_v44, 0  ;;  %v5148_v53 = vceil.f32 %v461_v46  ;;  %v5149_v54 = vfloor.f32 %v461_v46 }
  0x20   : > { %857 = vmatpush.bf16.msra.mxu0 %v5005_v5  ;;  %5121 = vmatpush.bf16.msra.mxu3 %v5005_v5  ;;  %1187 = vst [vmem:[#allocation2 + $0xa0] sm:$0xff] %v5436_v17  ;;  %v5145_v47 = vsel %vm5142_vm1, %v5143_v42, %v5144_v43  ;;  %vm5147_vm3 = vcmp.lt.s32.totalorder %v461_v46, 0  ;;  %v5288_v3 = vceil.f32 %v489_v57  ;;  %v5289_v4 = vfloor.f32 %v489_v57 }
  0x21   : > { %1188 = vst [vmem:[#allocation2 + $0xa8] sm:$0xff] %v5436_v17  ;;  %v5146_v52 = vcvt.f32.s32 %v5145_v47  ;;  %v5285_v56 = vsel %vm5282_vm2, %v5283_v49, %v5284_v50  ;;  %v5150_v60 = vsel %vm5147_vm3, %v5148_v53, %v5149_v54  ;;  %v447_v5 = vcvt.s32.f32 %v5637_v58 }
  0x22   : > { %1189 = vst [vmem:[#allocation2 + $0xb0] sm:$0xff] %v5436_v17  ;;  %v5286_v63 = vcvt.f32.s32 %v5285_v56  ;;  %v5151_v2 = vcvt.f32.s32 %v5150_v60  ;;  %vm5287_vm4 = vcmp.lt.s32.totalorder %v489_v57, 0  ;;  %vm5152_vm5 = vcmp.lt.s32.totalorder %v462_v61, 0  ;;  %v5697_v57 = vld [vmem:[%s5633_s21 + $0x8] sm:$0xff]  }
  0x23   : > { %1190 = vst [vmem:[#allocation2 + $0xb8] sm:$0xff] %v5436_v17  ;;  %v532_v59 = vmul.u32 18, %v5146_v52  ;;  %v5686_v50 = vadd.s32 256, %v5583_v29  ;;  %v9770_v51 = vmov 0  ;;  %v464_v53 = vmul.f32 %v5592_v35, %v421_v34 }
  0x24   : > { %858 = vmatpush.bf16.msra.mxu0 %v5004_v6  ;;  %5122 = vmatpush.bf16.msra.mxu3 %v5004_v6  ;;  %1191 = vst [vmem:[#allocation2 + $0xc0] sm:$0xff] %v5436_v17  ;;  %v5700_v60 = vadd.s32 40, %v5583_v29 }
  0x25   : > { %1192 = vst [vmem:[#allocation2 + $0xc8] sm:$0xff] %v5436_v17  ;;  %v568_v6 = vsub.s32 %v5583_v29, %v532_v59  ;;  %vm5162_vm13 = vcmp.lt.s32.totalorder %v464_v53, 0 }
  0x26   : > { %1193 = vst [vmem:[#allocation2 + $0xd0] sm:$0xff] %v5436_v17 }
  0x27   : > { %1194 = vst [vmem:[#allocation2 + $0xd8] sm:$0xff] %v5436_v17  ;;  %vm5658_vm6 = vcmp.lt.s32.totalorder %v568_v6, 16 }
  0x28   : > { %859 = vmatpush.bf16.msra.mxu0 %v5003_v7  ;;  %5123 = vmatpush.bf16.msra.mxu3 %v5003_v7  ;;  %1195 = vst [vmem:[#allocation2 + $0xe0] sm:$0xff] %v5436_v17  ;;  %v5029_v7 = vunpack.c.l.bf16 %v5028_v62  ;;  %v9765_v19 = vsel %vm5658_vm6, 4294967295, %v9764_v19 }
  0x29   : > { %1196 = vst [vmem:[#allocation2 + $0xe8] sm:$0xff] %v5436_v17 }
  0x2a   : > { %1197 = vst [vmem:[#allocation2 + $0xf0] sm:$0xff] %v5436_v17 }
  0x2b   : > { %860 = vmatmul.bf16.vlgmr.msra.gmra.mxu0 %v4985_v8  ;;  %930 = vmatmul.bf16.vlgmr.msra.gmra.mxu3 %v4999_v9  ;;  %1198 = vst [vmem:[#allocation2 + $0xf8] sm:$0xff] %v5436_v17  ;;  %v4993_v8 = vld [vmem:[%s5547_s16 + $0x40] sm:$0xff]  ;;  %v5153_v9 = vceil.f32 %v462_v61 }
  0x2c   : > { %1199 = vst [vmem:[#allocation2 + $0x100] sm:$0xff] %v5436_v17 }
  0x2d   : > { %1200 = vst [vmem:[#allocation2 + $0x108] sm:$0xff] %v5436_v17 }
  0x2e   : > { %1201 = vst [vmem:[#allocation2 + $0x110] sm:$0xff] %v5436_v17 }
  0x2f   : > { %1202 = vst [vmem:[#allocation2 + $0x118] sm:$0xff] %v5436_v17 }
  0x30   : > { %1203 = vst [vmem:[#allocation2 + $0x120] sm:$0xff] %v5436_v17 }
  0x31   : > { %1204 = vst [vmem:[#allocation2 + $0x128] sm:$0xff] %v5436_v17 }
  0x32   : > { %1205 = vst [vmem:[#allocation2 + $0x130] sm:$0xff] %v5436_v17 }
  0x33   : > { %1206 = vst [vmem:[#allocation2 + $0x138] sm:$0xff] %v5436_v17 }
  0x34   : > { %1207 = vst [vmem:[#allocation2 + $0x140] sm:$0xff] %v5436_v17  ;;  %v5290_v17 = vsel %vm5287_vm4, %v5288_v3, %v5289_v4 }
  0x35   : > { %9766 = vst [vmem:[#allocation3_spill] sm:$0xff] %v9765_v19 }
  0x3b   : > { %865 = vmatmul.bf16.gmra.mxu0 %v4986_v10  ;;  %935 = vmatmul.bf16.gmra.mxu3 %v5000_v11  ;;  %v5154_v10 = vfloor.f32 %v462_v61  ;;  %v420_v11 = vcvt.s32.f32 %v5642_v0 }
  0x3d   : > { %v5155_v22 = vsel %vm5152_vm5, %v5153_v9, %v5154_v10  ;;  %v463_v23 = vmul.f32 %v5592_v35, %v420_v11  ;;  %v5033_v9 = vunpack.c.l.bf16 %v5697_v57 }
  0x3e   : > { %v5156_v33 = vcvt.f32.s32 %v5155_v22 }
  0x3f   : > { %v5158_v40 = vceil.f32 %v463_v23  ;;  %vm5157_vm9 = vcmp.lt.s32.totalorder %v463_v23, 0 }
  0x40   : > { %v534_v52 = vmul.u32 18, %v5156_v33 }
  0x4b   : > { %870 = vmatmul.bf16.gmra.mxu0 %v4987_v12  ;;  %940 = vmatmul.bf16.gmra.mxu3 %v5001_v13  ;;  %v560_v13 = vmul.u32 18, %v5286_v63 }
  0x4d   : > { %v596_v24 = vsub.s32 %v5596_v36, %v560_v13  ;;  %v5676_v36 = vadd.s32 248, %v5583_v29  ;;  %v5163_v13 = vceil.f32 %v464_v53 }
  0x4f   : > { %vm5679_vm8 = vcmp.lt.s32.totalorder %v596_v24, 16  ;;  %v448_v44 = vcvt.s32.f32 %v5676_v36 }
  0x51   : > { %v491_v54 = vmul.f32 %v5592_v35, %v448_v44 }
  0x53   : > { %v5299_v6 = vfloor.f32 %v491_v54  ;;  %vm5297_vm11 = vcmp.lt.s32.totalorder %v491_v54, 0 }
  0x5b   : > { %875 = vmatmul.bf16.gmra.mxu0 %v4988_v14  ;;  %945 = vmatmul.bf16.gmra.mxu3 %v5002_v15  ;;  %v5655_v15 = vld [vmem:[%s5633_s21 + $0x70] sm:$0xff]  }
  0x5c   : > { %v5085_v25 = vunpack.c.l.bf16 %v5655_v15  ;;  %v5086_v62 = vunpack.c.h.bf16 %v5655_v15  ;;  %v422_v15 = vcvt.s32.f32 %v5700_v60 }
  0x5e   : > { %v465_v33 = vmul.f32 %v5592_v35, %v422_v15 }
  0x60   : > { %vm5167_vm1 = vcmp.lt.s32.totalorder %v465_v33, 0 }
  0x6b   : > { %880 = vmatmul.bf16.gmra.mxu0 %v4989_v16  ;;  %v533_v16 = vmul.u32 18, %v5151_v2 }
  0x6d   : > { %v569_v28 = vsub.s32 %v5600_v37, %v533_v16  ;;  %v9767_v37 = vmov 0  ;;  %v9773_v16 = vmov 0 }
  0x6e   : > { %v9768_v37 = vsel %vm5679_vm8, 4294967295, %v9767_v37 }
  0x6f   : > { %9769 = vst [vmem:[#allocation4_spill] sm:$0xff] %v9768_v37  ;;  %vm5688_vm10 = vcmp.lt.s32.totalorder %v569_v28, 16  ;;  %v5107_v37 = vld [vmem:[%s5633_s21 + $0x48] sm:$0xff]  }
  0x70   : > { %v9771_v51 = vsel %vm5688_vm10, 4294967295, %v9770_v51 }
  0x71   : > { %9772 = vst [vmem:[#allocation5_spill] sm:$0xff] %v9771_v51 }
  0x7b   : > { %885 = vmatmul.bf16.gmra.mxu0 %v4990_v18  ;;  %v490_v18 = vmul.f32 %v5592_v35, %v447_v5  ;;  %v5298_v5 = vceil.f32 %v491_v54  ;;  %v5169_v54 = vfloor.f32 %v465_v33 }
  0x7d   : > { %v5293_v30 = vceil.f32 %v490_v18  ;;  %v5294_v31 = vfloor.f32 %v490_v18  ;;  %vm5292_vm7 = vcmp.lt.s32.totalorder %v490_v18, 0 }
  0x7f   : > { %v5295_v49 = vsel %vm5292_vm7, %v5293_v30, %v5294_v31 }
  0x80   : > { %v5296_v63 = vcvt.f32.s32 %v5295_v49 }
  0x82   : > { %v562_v18 = vmul.u32 18, %v5296_v63  ;;  %v9782_v63 = vmov 0 }
  0x84   : > { %v598_v34 = vsub.s32 %v5637_v58, %v562_v18 }
  0x86   : > { %vm5758_vm0 = vcmp.lt.s32.totalorder %v598_v34, 16 }
  0x8b   : > { %890 = vmatmul.bf16.gmra.mxu0 %v4991_v26  ;;  %v5291_v26 = vcvt.f32.s32 %v5290_v17 }
  0x8d   : > { %v561_v43 = vmul.u32 18, %v5291_v26  ;;  %v5732_v26 = vld [vmem:[%s5633_s21 + $0x78] sm:$0xff]  }
  0x8f   : > { %v597_v61 = vsub.s32 %v5615_v45, %v561_v43 }
  0x91   : > { %vm5718_vm12 = vcmp.lt.s32.totalorder %v597_v61, 16 }
  0x92   : > { %v9774_v16 = vsel %vm5718_vm12, 4294967295, %v9773_v16 }
  0x93   : > { %9775 = vst [vmem:[#allocation6_spill] sm:$0xff] %v9774_v16  ;;  %v6181_v16 = vadd.s32 168, %v5583_v29 }
  0x9b   : > { %895 = vmatmul.bf16.gmra.mxu0 %v4992_v41  ;;  %v5159_v41 = vfloor.f32 %v463_v23  ;;  %v5300_v23 = vsel %vm5297_vm11, %v5298_v5, %v5299_v6 }
  0x9d   : > { %v5160_v59 = vsel %vm5157_vm9, %v5158_v40, %v5159_v41  ;;  %v5089_v41 = vunpack.c.l.bf16 %v5732_v26 }
  0x9e   : > { %v5161_v10 = vcvt.f32.s32 %v5160_v59 }
  0xa0   : > { %v535_v28 = vmul.u32 18, %v5161_v10 }
  0xa2   : > { %v571_v58 = vsub.s32 %v5642_v0, %v535_v28 }
  0xa4   : > { %vm5767_vm2 = vcmp.lt.s32.totalorder %v571_v58, 16 }
  0xa5   : > { %v9783_v63 = vsel %vm5767_vm2, 4294967295, %v9782_v63 }
  0xa6   : > { %9784 = vst [vmem:[#allocation9_spill] sm:$0xff] %v9783_v63 }
  0xa8   : > { %v861_v12 = vpop.f32.mrf.mxu0 }
  0xa9   : > { %v862_v14 = vadd.f32 %v5647_v1, %v861_v12  ;;  %v4994_v12 = vld [vmem:[%s5547_s16 + $0x48] sm:$0xff] }
  0xab   : > { %v1023_v21 = vadd.f32 %v5029_v7, %v862_v14  ;;  %900 = vmatmul.bf16.gmra.mxu0 %v4993_v8  ;;  %v449_v7 = vcvt.s32.f32 %v5686_v50  ;;  %v570_v8 = vsub.s32 %v5621_v48, %v534_v52  ;;  %v5164_v14 = vfloor.f32 %v464_v53 }
  0xac   : > { %v5723_v48 = vadd.s32 48, %v5583_v29  ;;  %v5034_v52 = vunpack.c.h.bf16 %v5697_v57  ;;  %v5168_v53 = vceil.f32 %v465_v33  ;;  %v5765_v57 = vadd.s32 56, %v5583_v29 }
  0xad   : > { %v5670_v27 = vsel %vm5658_vm6, %v1023_v21, 0.0  ;;  %v492_v24 = vmul.f32 %v5592_v35, %v449_v7  ;;  %vm5727_vm14 = vcmp.lt.s32.totalorder %v570_v8, 16  ;;  %v5777_v7 = vld [vmem:[%s5633_s21 + $0x10] sm:$0xff]  }
  0xae   : > { %1208 = vst [vmem:[#allocation2 + $0x13] sm:$0xff] %v5670_v27  ;;  %v931_v32 = vpop.f32.mrf.mxu3  ;;  %v5170_v6 = vsel %vm5167_vm1, %v5168_v53, %v5169_v54  ;;  %v424_v15 = vcvt.s32.f32 %v5765_v57 }
  0xaf   : > { %v932_v38 = vadd.f32 %v5647_v1, %v931_v32  ;;  %v5165_v32 = vsel %vm5162_vm13, %v5163_v13, %v5164_v14  ;;  %v5303_v43 = vceil.f32 %v492_v24  ;;  %v5304_v44 = vfloor.f32 %v492_v24 }
  0xb0   : > { %v863_v42 = vpop.f32.mrf.mxu0  ;;  %vm5302_vm15 = vcmp.lt.s32.totalorder %v492_v24, 0  ;;  %v5090_v14 = vunpack.c.h.bf16 %v5732_v26  ;;  %v9785_v26 = vmov 0  ;;  %v467_v34 = vmul.f32 %v5592_v35, %v424_v15 }
  0xb1   : > { %v1051_v46 = vadd.f32 %v5085_v25, %v932_v38  ;;  %v864_v47 = vadd.f32 %v5647_v1, %v863_v42  ;;  %v9776_v25 = vmov 0  ;;  %v5301_v38 = vcvt.f32.s32 %v5300_v23 }
  0xb2   : > { %v9777_v25 = vsel %vm5727_vm14, 4294967295, %v9776_v25  ;;  %v5178_v53 = vceil.f32 %v467_v34  ;;  %v5179_v54 = vfloor.f32 %v467_v34  ;;  %vm5177_vm7 = vcmp.lt.s32.totalorder %v467_v34, 0 }
  0xb3   : > { %v1159_v55 = vsel %vm5679_vm8, %v1051_v46, 0.0  ;;  %v1024_v56 = vadd.f32 %v5030_v39, %v864_v47  ;;  %9778 = vst [vmem:[#allocation7_spill] sm:$0xff] %v9777_v25  ;;  %v423_v39 = vcvt.s32.f32 %v5723_v48  ;;  %v5166_v47 = vcvt.f32.s32 %v5165_v32 }
  0xb4   : > { %1236 = vst [vmem:[#allocation2 + $0xf3] sm:$0xff] %v1159_v55  ;;  %1770 = vrot.lane.b32.xlu2 %v1159_v55, %s5440_s24  ;;  %v9779_v55 = vmov 0  ;;  %v6314_v25 = vadd.s32 208, %v5583_v29 }
  0xb5   : > { %v5707_v2 = vsel %vm5688_vm10, %v1024_v56, 0.0  ;;  %v1426_v3 = vld [vmem:[#allocation2 + $0x12] sm:$0xff]  ;;  %v9780_v55 = vsel %vm5758_vm0, 4294967295, %v9779_v55  ;;  %v563_v56 = vmul.u32 18, %v5301_v38  ;;  %v466_v0 = vmul.f32 %v5592_v35, %v423_v39  ;;  %v5809_v39 = vld [vmem:[%s5633_s21 + $0x80] sm:$0xff]  }
  0xb6   : > { %v1282_v4 = vld [vmem:[#allocation2 + $0x11] sm:$0xff]  ;;  %1209 = vst [vmem:[#allocation2 + $0x1b] sm:$0xff] %v5707_v2  ;;  %v933_v45 = vpop.f32.mrf.mxu3  ;;  %1570 = vrot.lane.b32.xlu1 %v1426_v3, %s5441_s25  ;;  %v9788_v38 = vmov 0 }
  0xb7   : > { %1320 = vrot.lane.b32.xlu0 %v1282_v4, %s5438_s17  ;;  %v934_v11 = vadd.f32 %v5647_v1, %v933_v45  ;;  %9781 = vst [vmem:[#allocation8_spill] sm:$0xff] %v9780_v55  ;;  %v599_v45 = vsub.s32 %v5676_v36, %v563_v56  ;;  %v5173_v8 = vceil.f32 %v466_v0  ;;  %vm5172_vm3 = vcmp.lt.s32.totalorder %v466_v0, 0 }
  0xb8   : > { %v866_v17 = vpop.f32.mrf.mxu0  ;;  %v5038_v56 = vunpack.c.h.bf16 %v5777_v7 }
  0xb9   : > { %v1052_v21 = vadd.f32 %v5086_v62, %v934_v11  ;;  %v867_v22 = vadd.f32 %v5647_v1, %v866_v17  ;;  %v5305_v62 = vsel %vm5302_vm15, %v5303_v43, %v5304_v44  ;;  %v5171_v17 = vcvt.f32.s32 %v5170_v6 }
  0xba   : > { %v5306_v10 = vcvt.f32.s32 %v5305_v62  ;;  %vm5795_vm4 = vcmp.lt.s32.totalorder %v599_v45, 16  ;;  %v9791_v62 = vmov 0  ;;  %v5838_v6 = vadd.s32 72, %v5583_v29 }
  0xbb   : > { %v5736_v30 = vsel %vm5718_vm12, %v1052_v21, 0.0  ;;  %v1025_v31 = vadd.f32 %v5033_v9, %v867_v22  ;;  %905 = vmatmul.bf16.gmra.mxu0 %v4994_v12  ;;  %v5174_v9 = vfloor.f32 %v466_v0  ;;  %v5037_v21 = vunpack.c.l.bf16 %v5777_v7  ;;  %v4995_v22 = vld [vmem:[%s5547_s16 + $0x50] sm:$0xff] }
  0xbc   : > { %1237 = vst [vmem:[#allocation2 + $0xfb] sm:$0xff] %v5736_v30  ;;  %v9786_v26 = vsel %vm5795_vm4, 4294967295, %v9785_v26  ;;  %v9794_v7 = vmov 0  ;;  %v5845_v45 = vadd.s32 264, %v5583_v29 }
  0xbd   : > { %v5744_v40 = vsel %vm5727_vm14, %v1025_v31, 0.0  ;;  %v5747_v42 = vld [vmem:[#allocation2 + $0x1a] sm:$0xff]  ;;  %9787 = vst [vmem:[#allocation10_spill] sm:$0xff] %v9786_v26  ;;  %v5175_v28 = vsel %vm5172_vm3, %v5173_v8, %v5174_v9  ;;  %v564_v31 = vmul.u32 18, %v5306_v10  ;;  %v5848_v8 = vadd.s32 272, %v5583_v29 }
  0xbe   : > { %1210 = vst [vmem:[#allocation2 + $0x23] sm:$0xff] %v5744_v40  ;;  %v936_v46 = vpop.f32.mrf.mxu3  ;;  %1714 = vrot.lane.b32.xlu1 %v5670_v27, %s5440_s24  ;;  %1572 = vrot.lane.b32.xlu2 %v5747_v42, %s5441_s25  ;;  %v1283_v12 = vld [vmem:[#allocation2 + $0x19] sm:$0xff]  ;;  %v5176_v44 = vcvt.f32.s32 %v5175_v28 }
  0xbf   : > { %1464 = vrot.lane.b32.xlu0 %v1426_v3, %s5439_s18  ;;  %v937_v49 = vadd.f32 %v5647_v1, %v936_v46  ;;  %v536_v3 = vmul.u32 18, %v5166_v47  ;;  %v600_v46 = vsub.s32 %v5686_v50, %v564_v31  ;;  %v9797_v31 = vmov 0 }
  0xc0   : > { %v868_v27 = vpop.f32.mrf.mxu0  ;;  %v538_v0 = vmul.u32 18, %v5176_v44 }
  0xc1   : > { %v1053_v59 = vadd.f32 %v5089_v41, %v937_v49  ;;  %v869_v61 = vadd.f32 %v5647_v1, %v868_v27  ;;  %v572_v36 = vsub.s32 %v5663_v20, %v536_v3  ;;  %v5800_v20 = vadd.s32 64, %v5583_v29 }
  0xc2   : > { %vm5831_vm9 = vcmp.lt.s32.totalorder %v600_v46, 16  ;;  %v574_v10 = vsub.s32 %v5723_v48, %v538_v0  ;;  %v426_v48 = vcvt.s32.f32 %v5838_v6  ;;  %v5884_v0 = vadd.s32 80, %v5583_v29 }
  0xc3   : > { %v5773_v4 = vsel %vm5758_vm0, %v1053_v59, 0.0  ;;  %v1026_v5 = vadd.f32 %v5034_v52, %v869_v61  ;;  %v1311_v13 = vld [vmem:[#allocation2 + $0xf9] sm:$0xff]  ;;  %vm5804_vm5 = vcmp.lt.s32.totalorder %v572_v36, 16  ;;  %v425_v58 = vcvt.s32.f32 %v5800_v20 }
  0xc4   : > { %1238 = vst [vmem:[#allocation2 + $0x103] sm:$0xff] %v5773_v4  ;;  %v9789_v38 = vsel %vm5804_vm5, 4294967295, %v9788_v38  ;;  %v1455_v49 = vld [vmem:[#allocation2 + $0xfa] sm:$0xff]  ;;  %v5093_v52 = vunpack.c.l.bf16 %v5809_v39  ;;  %v9792_v62 = vsel %vm5831_vm9, 4294967295, %v9791_v62  ;;  %v450_v36 = vcvt.s32.f32 %v5845_v45 }
  0xc5   : > { %v5782_v11 = vsel %vm5767_vm2, %v1026_v5, 0.0  ;;  %9790 = vst [vmem:[#allocation11_spill] sm:$0xff] %v9789_v38  ;;  %v5180_v5 = vsel %vm5177_vm7, %v5178_v53, %v5179_v54  ;;  %vm5871_vm15 = vcmp.lt.s32.totalorder %v574_v10, 16  ;;  %v5893_v10 = vld [vmem:[%s5633_s21 + $0x88] sm:$0xff]   ;;  %v5109_v38 = vld [vmem:[%s5633_s21 + $0x58] sm:$0xff]  }
  0xc6   : > { %1211 = vst [vmem:[#allocation2 + $0x2b] sm:$0xff] %v5782_v11  ;;  %1322 = vrot.lane.b32.xlu1 %v1283_v12, %s5438_s17  ;;  %v938_v18 = vpop.f32.mrf.mxu3  ;;  %1716 = vrot.lane.b32.xlu2 %v5707_v2, %s5440_s24  ;;  %v537_v2 = vmul.u32 18, %v5171_v17  ;;  %v9798_v31 = vsel %vm5871_vm15, 4294967295, %v9797_v31 }
  0xc7   : > { %1378 = vrot.lane.b32.xlu0 %v1311_v13, %s5438_s17  ;;  %v939_v23 = vadd.f32 %v5647_v1, %v938_v18  ;;  %9793 = vst [vmem:[#allocation12_spill] sm:$0xff] %v9792_v62  ;;  %v5856_v13 = vld [vmem:[%s5633_s21 + $0x18] sm:$0xff]   ;;  %v6150_v62 = vadd.s32 160, %v5583_v29 }
  0xc8   : > { %v871_v24 = vpop.f32.mrf.mxu0  ;;  %v573_v50 = vsub.s32 %v5700_v60, %v537_v2  ;;  %v1822_v18 = vld [vmem:[#allocation2 + $0x14] sm:$0xff]  ;;  %9799 = vst [vmem:[#allocation14_spill] sm:$0xff] %v9798_v31 }
  0xc9   : > { %v872_v32 = vadd.f32 %v5647_v1, %v871_v24  ;;  %v1054_v33 = vadd.f32 %v5090_v14, %v939_v23  ;;  %v5181_v14 = vcvt.f32.s32 %v5180_v5  ;;  %v1428_v23 = vld [vmem:[#allocation2 + $0x22] sm:$0xff]  ;;  %v493_v24 = vmul.f32 %v5592_v35, %v450_v36 }
  0xca   : > { %vm5840_vm11 = vcmp.lt.s32.totalorder %v573_v50, 16 }
  0xcb   : > { %v1027_v41 = vadd.f32 %v5037_v21, %v872_v32  ;;  %910 = vmatmul.bf16.gmra.mxu0 %v4995_v22  ;;  %v5813_v43 = vsel %vm5795_vm4, %v1054_v33, 0.0  ;;  %v9795_v7 = vsel %vm5840_vm11, 4294967295, %v9794_v7  ;;  %v451_v22 = vcvt.s32.f32 %v5848_v8  ;;  %v4996_v33 = vld [vmem:[%s5547_s16 + $0x58] sm:$0xff] }
  0xcc   : > { %1239 = vst [vmem:[#allocation2 + $0x10b] sm:$0xff] %v5813_v43  ;;  %v5041_v32 = vunpack.c.l.bf16 %v5856_v13  ;;  %vm5307_vm1 = vcmp.lt.s32.totalorder %v493_v24, 0  ;;  %v5309_v44 = vfloor.f32 %v493_v24 }
  0xcd   : > { %v5820_v47 = vsel %vm5804_vm5, %v1027_v41, 0.0  ;;  %9796 = vst [vmem:[#allocation13_spill] sm:$0xff] %v9795_v7  ;;  %v494_v34 = vmul.f32 %v5592_v35, %v451_v22  ;;  %v539_v41 = vmul.u32 18, %v5181_v14  ;;  %v1823_v14 = vld [vmem:[#allocation2 + $0x1c] sm:$0xff]  ;;  %v427_v22 = vcvt.s32.f32 %v5884_v0 }
  0xce   : > { %1212 = vst [vmem:[#allocation2 + $0x33] sm:$0xff] %v5820_v47  ;;  %1466 = vrot.lane.b32.xlu1 %v5747_v42, %s5439_s18  ;;  %v941_v27 = vpop.f32.mrf.mxu3  ;;  %1522 = vrot.lane.b32.xlu2 %v1455_v49, %s5439_s18  ;;  %v468_v42 = vmul.f32 %v5592_v35, %v425_v58  ;;  %v6287_v7 = vadd.s32 200, %v5583_v29 }
  0xcf   : > { %1628 = vrot.lane.b32.xlu0 %v1455_v49, %s5441_s25  ;;  %v942_v59 = vadd.f32 %v5647_v1, %v941_v27  ;;  %v469_v49 = vmul.f32 %v5592_v35, %v426_v48  ;;  %vm5312_vm3 = vcmp.lt.s32.totalorder %v494_v34, 0  ;;  %v5313_v50 = vceil.f32 %v494_v34 }
  0xd0   : > { %v873_v61 = vpop.f32.mrf.mxu0  ;;  %v5183_v15 = vceil.f32 %v468_v42  ;;  %v5184_v21 = vfloor.f32 %v468_v42  ;;  %vm5182_vm13 = vcmp.lt.s32.totalorder %v468_v42, 0  ;;  %v5042_v42 = vunpack.c.h.bf16 %v5856_v13 }
  0xd1   : > { %v874_v3 = vadd.f32 %v5647_v1, %v873_v61  ;;  %v1055_v60 = vadd.f32 %v5093_v52, %v942_v59  ;;  %v5094_v52 = vunpack.c.h.bf16 %v5809_v39  ;;  %v5314_v59 = vfloor.f32 %v494_v34 }
  0xd2   : > { %v5185_v58 = vsel %vm5182_vm13, %v5183_v15, %v5184_v21  ;;  %v575_v61 = vsub.s32 %v5765_v57, %v539_v41  ;;  %v5188_v57 = vceil.f32 %v469_v49  ;;  %v5189_v21 = vfloor.f32 %v469_v49 }
  0xd3   : > { %v1028_v9 = vadd.f32 %v5038_v56, %v874_v3  ;;  %v5853_v12 = vsel %vm5831_vm9, %v1055_v60, 0.0  ;;  %v1284_v3 = vld [vmem:[#allocation2 + $0x21] sm:$0xff]  ;;  %v5186_v60 = vcvt.f32.s32 %v5185_v58  ;;  %vm5187_vm7 = vcmp.lt.s32.totalorder %v469_v49, 0 }
  0xd4   : > { %1240 = vst [vmem:[#allocation2 + $0x113] sm:$0xff] %v5853_v12  ;;  %v470_v58 = vmul.f32 %v5592_v35, %v427_v22  ;;  %v5920_v49 = vadd.s32 88, %v5583_v29  ;;  %v1313_v22 = vld [vmem:[#allocation2 + $0x109] sm:$0xff] }
  0xd5   : > { %v5862_v17 = vsel %vm5840_vm11, %v1028_v9, 0.0  ;;  %v5315_v9 = vsel %vm5312_vm3, %v5313_v50, %v5314_v59 }
  0xd6   : > { %1213 = vst [vmem:[#allocation2 + $0x3b] sm:$0xff] %v5862_v17  ;;  %1858 = vrot.lane.b32.xlu1 %v1822_v18, %s5442_s26  ;;  %v943_v28 = vpop.f32.mrf.mxu3  ;;  %1468 = vrot.lane.b32.xlu2 %v1428_v23, %s5439_s18  ;;  %v5316_v13 = vcvt.f32.s32 %v5315_v9  ;;  %v5097_v18 = vunpack.c.l.bf16 %v5893_v10 }
  0xd7   : > { %1772 = vrot.lane.b32.xlu0 %v5736_v30, %s5440_s24  ;;  %v5308_v30 = vceil.f32 %v493_v24  ;;  %v944_v54 = vadd.f32 %v5647_v1, %v943_v28 }
  0xd8   : > { %v876_v2 = vpop.f32.mrf.mxu0 }
  0xd9   : > { %v877_v46 = vadd.f32 %v5647_v1, %v876_v2  ;;  %v5310_v53 = vsel %vm5307_vm1, %v5308_v30, %v5309_v44  ;;  %v1056_v15 = vadd.f32 %v5094_v52, %v944_v54  ;;  %vm5908_vm1 = vcmp.lt.s32.totalorder %v575_v61, 16  ;;  %v5102_v52 = vld [vmem:[%s5633_s21 + $0x20] sm:$0xff]  }
  0xda   : > { %v5311_v56 = vcvt.f32.s32 %v5310_v53  ;;  %v9803_v2 = vmov 0  ;;  %v9806_v53 = vmov 0  ;;  %v5045_v61 = vunpack.c.l.bf16 %v5102_v52 }
  0xdb   : > { %v1029_v27 = vadd.f32 %v5041_v32, %v877_v46  ;;  %915 = vmatmul.bf16.gmra.mxu0 %v4996_v33  ;;  %v9800_v33 = vmov 0  ;;  %v9804_v2 = vsel %vm5908_vm1, 4294967295, %v9803_v2  ;;  %v5190_v46 = vsel %vm5187_vm7, %v5188_v57, %v5189_v21  ;;  %v1456_v21 = vld [vmem:[#allocation2 + $0x102] sm:$0xff] }
  0xdc   : > { %v565_v5 = vmul.u32 18, %v5311_v56  ;;  %9805 = vst [vmem:[#allocation16_spill] sm:$0xff] %v9804_v2  ;;  %v1285_v56 = vld [vmem:[#allocation2 + $0x29] sm:$0xff]  ;;  %v5191_v59 = vcvt.f32.s32 %v5190_v46  ;;  %vm5192_vm7 = vcmp.lt.s32.totalorder %v470_v58, 0  ;;  %v6260_v2 = vadd.s32 192, %v5583_v29 }
  0xdd   : > { %v5890_v39 = vsel %vm5871_vm15, %v1029_v27, 0.0 }
  0xde   : > { %1214 = vst [vmem:[#allocation2 + $0x43] sm:$0xff] %v5890_v39  ;;  %1324 = vrot.lane.b32.xlu1 %v1284_v3, %s5438_s17  ;;  %v946_v36 = vpop.f32.mrf.mxu3  ;;  %1860 = vrot.lane.b32.xlu2 %v1823_v14, %s5442_s26  ;;  %v601_v48 = vsub.s32 %v5845_v45, %v565_v5  ;;  %v540_v45 = vmul.u32 18, %v5186_v60  ;;  %v5193_v3 = vceil.f32 %v470_v58  ;;  %v5194_v60 = vfloor.f32 %v470_v58 }
  0xdf   : > { %1574 = vrot.lane.b32.xlu0 %v1428_v23, %s5441_s25  ;;  %v947_v24 = vadd.f32 %v5647_v1, %v946_v36  ;;  %v566_v23 = vmul.u32 18, %v5316_v13  ;;  %v428_v5 = vcvt.s32.f32 %v5920_v49  ;;  %v5951_v36 = vadd.s32 96, %v5583_v29 }
  0xe0   : > { %v878_v28 = vpop.f32.mrf.mxu0  ;;  %vm5904_vm13 = vcmp.lt.s32.totalorder %v601_v48, 16  ;;  %v576_v27 = vsub.s32 %v5800_v20, %v540_v45  ;;  %v541_v20 = vmul.u32 18, %v5191_v59  ;;  %v1429_v59 = vld [vmem:[#allocation2 + $0x2a] sm:$0xff] }
  0xe1   : > { %v879_v32 = vadd.f32 %v5647_v1, %v878_v28  ;;  %v9801_v33 = vsel %vm5904_vm13, 4294967295, %v9800_v33  ;;  %v1057_v34 = vadd.f32 %v5097_v18, %v947_v24  ;;  %v5914_v41 = vsel %vm5904_vm13, %v1056_v15, 0.0 }
  0xe2   : > { %9802 = vst [vmem:[#allocation15_spill] sm:$0xff] %v9801_v33  ;;  %v602_v30 = vsub.s32 %v5848_v8, %v566_v23  ;;  %v1312_v8 = vld [vmem:[#allocation2 + $0x101] sm:$0xff]  ;;  %v5195_v15 = vsel %vm5192_vm7, %v5193_v3, %v5194_v60  ;;  %v471_v13 = vmul.f32 %v5592_v35, %v428_v5  ;;  %v577_v48 = vsub.s32 %v5838_v6, %v541_v20 }
  0xe3   : > { %v1030_v44 = vadd.f32 %v5042_v42, %v879_v32  ;;  %1241 = vst [vmem:[#allocation2 + $0x11b] sm:$0xff] %v5914_v41  ;;  %v4997_v42 = vld [vmem:[%s5547_s16 + $0x60] sm:$0xff]  ;;  %v5196_v24 = vcvt.f32.s32 %v5195_v15  ;;  %v5046_v28 = vunpack.c.h.bf16 %v5102_v52  ;;  %v5969_v6 = vadd.s32 104, %v5583_v29 }
  0xe4   : > { %vm5923_vm3 = vcmp.lt.s32.totalorder %v602_v30, 16  ;;  %v5198_v23 = vceil.f32 %v471_v13  ;;  %v5199_v32 = vfloor.f32 %v471_v13  ;;  %vm5197_vm7 = vcmp.lt.s32.totalorder %v471_v13, 0 }
  0xe5   : > { %v9807_v53 = vsel %vm5923_vm3, 4294967295, %v9806_v53  ;;  %v5929_v54 = vsel %vm5908_vm1, %v1030_v44, 0.0  ;;  %v5933_v50 = vsel %vm5923_vm3, %v1057_v34, 0.0  ;;  %vm5945_vm3 = vcmp.lt.s32.totalorder %v576_v27, 16  ;;  %v5103_v27 = vld [vmem:[%s5633_s21 + $0x28] sm:$0xff]  }
  0xe6   : > { %9808 = vst [vmem:[#allocation17_spill] sm:$0xff] %v9807_v53  ;;  %1380 = vrot.lane.b32.xlu1 %v1312_v8, %s5438_s17  ;;  %1326 = vrot.lane.b32.xlu2 %v1285_v56, %s5438_s17  ;;  %v429_v34 = vcvt.s32.f32 %v5951_v36  ;;  %vm5964_vm13 = vcmp.lt.s32.totalorder %v577_v48, 16  ;;  %v9812_v44 = vmov 0  ;;  %v542_v46 = vmul.u32 18, %v5196_v24 }
  0xe7   : > { %1215 = vst [vmem:[#allocation2 + $0x4b] sm:$0xff] %v5929_v54  ;;  %1718 = vrot.lane.b32.xlu0 %v5744_v40, %s5440_s24  ;;  %v9809_v40 = vmov 0  ;;  %v9813_v44 = vsel %vm5964_vm13, 4294967295, %v9812_v44  ;;  %v5200_v52 = vsel %vm5197_vm7, %v5198_v23, %v5199_v32  ;;  %v430_v60 = vcvt.s32.f32 %v5969_v6 }
  0xe8   : > { %1242 = vst [vmem:[#allocation2 + $0x123] sm:$0xff] %v5933_v50  ;;  %v881_v9 = vpop.f32.mrf.mxu0  ;;  %v9810_v40 = vsel %vm5945_vm3, 4294967295, %v9809_v40  ;;  %v472_v8 = vmul.f32 %v5592_v35, %v429_v34  ;;  %v5201_v3 = vcvt.f32.s32 %v5200_v52  ;;  %v5049_v5 = vunpack.c.l.bf16 %v5103_v27 }
  0xe9   : > { %v882_v14 = vadd.f32 %v5647_v1, %v881_v9  ;;  %9811 = vst [vmem:[#allocation18_spill] sm:$0xff] %v9810_v40  ;;  %v4998_v9 = vld [vmem:[%s5547_s16 + $0x68] sm:$0xff]  ;;  %v9815_v15 = vmov 0  ;;  %v473_v13 = vmul.f32 %v5592_v35, %v430_v60  ;;  %v5104_v60 = vld [vmem:[%s5633_s21 + $0x30] sm:$0xff]  }
  0xea   : > { %9814 = vst [vmem:[#allocation19_spill] sm:$0xff] %v9813_v44  ;;  %v5204_v20 = vfloor.f32 %v472_v8  ;;  %vm5202_vm7 = vcmp.lt.s32.totalorder %v472_v8, 0 }
  0xeb   : > { %v1031_v57 = vadd.f32 %v5045_v61, %v882_v14  ;;  %920 = vmatmul.bf16.gmra.mxu0 %v4997_v42  ;;  %v578_v61 = vsub.s32 %v5884_v0, %v542_v46  ;;  %v5982_v42 = vld [vmem:[#allocation2 + $0x10a] sm:$0xff]  ;;  %v5203_v14 = vceil.f32 %v472_v8  ;;  %v543_v0 = vmul.u32 18, %v5201_v3 }
  0xec   : > { %v5208_v34 = vceil.f32 %v473_v13  ;;  %v9818_v8 = vmov 0 }
  0xed   : > { %v5955_v18 = vsel %vm5945_vm3, %v1031_v57, 0.0  ;;  %vm5989_vm9 = vcmp.lt.s32.totalorder %v578_v61, 16  ;;  %v5205_v48 = vsel %vm5202_vm7, %v5203_v14, %v5204_v20  ;;  %v579_v23 = vsub.s32 %v5920_v49, %v543_v0 }
  0xee   : > { %1216 = vst [vmem:[#allocation2 + $0x53] sm:$0xff] %v5955_v18  ;;  %1630 = vrot.lane.b32.xlu1 %v1456_v21, %s5441_s25  ;;  %1382 = vrot.lane.b32.xlu2 %v1313_v22, %s5438_s17  ;;  %v9816_v15 = vsel %vm5989_vm9, 4294967295, %v9815_v15  ;;  %v5995_v22 = vadd.s32 112, %v5583_v29  ;;  %v5206_v32 = vcvt.f32.s32 %v5205_v48  ;;  %vm5207_vm7 = vcmp.lt.s32.totalorder %v473_v13, 0 }
  0xef   : > { %1524 = vrot.lane.b32.xlu0 %v1456_v21, %s5439_s18  ;;  %9817 = vst [vmem:[#allocation20_spill] sm:$0xff] %v9816_v15  ;;  %vm6009_vm4 = vcmp.lt.s32.totalorder %v579_v23, 16  ;;  %v6014_v61 = vadd.s32 120, %v5583_v29  ;;  %v5053_v0 = vunpack.c.l.bf16 %v5104_v60  ;;  %v5108_v15 = vld [vmem:[%s5633_s21 + $0x50] sm:$0xff]  }
  0xf0   : > { %v883_v45 = vpop.f32.mrf.mxu0  ;;  %v431_v46 = vcvt.s32.f32 %v5995_v22  ;;  %v9819_v8 = vsel %vm6009_vm4, 4294967295, %v9818_v8 }
  0xf1   : > { %v884_v30 = vadd.f32 %v5647_v1, %v883_v45  ;;  %v5209_v45 = vfloor.f32 %v473_v13  ;;  %9820 = vst [vmem:[#allocation21_spill] sm:$0xff] %v9819_v8  ;;  %v6234_v8 = vadd.s32 184, %v5583_v29 }
  0xf3   : > { %v1032_v58 = vadd.f32 %v5046_v28, %v884_v30  ;;  %v1824_v28 = vld [vmem:[#allocation2 + $0x24] sm:$0xff]  ;;  %v5050_v30 = vunpack.c.h.bf16 %v5103_v27  ;;  %v5210_v49 = vsel %vm5207_vm7, %v5208_v34, %v5209_v45  ;;  %v474_v27 = vmul.f32 %v5592_v35, %v431_v46 }
  0xf4   : > { %v5211_v14 = vcvt.f32.s32 %v5210_v49  ;;  %v1430_v49 = vld [vmem:[#allocation2 + $0x32] sm:$0xff] }
  0xf5   : > { %v5975_v56 = vsel %vm5964_vm13, %v1032_v58, 0.0  ;;  %v5213_v13 = vceil.f32 %v474_v27  ;;  %vm5212_vm7 = vcmp.lt.s32.totalorder %v474_v27, 0  ;;  %v1434_v19 = vld [vmem:[#allocation2 + $0x52] sm:$0xff] }
  0xf6   : > { %1217 = vst [vmem:[#allocation2 + $0x5b] sm:$0xff] %v5975_v56  ;;  %1774 = vrot.lane.b32.xlu1 %v5773_v4, %s5440_s24  ;;  %1632 = vrot.lane.b32.xlu2 %v5982_v42, %s5441_s25  ;;  %v545_v23 = vmul.u32 18, %v5211_v14 }
  0xf7   : > { %1470 = vrot.lane.b32.xlu0 %v1429_v59, %s5439_s18 }
  0xf8   : > { %v886_v57 = vpop.f32.mrf.mxu0 }
  0xf9   : > { %v887_v4 = vadd.f32 %v5647_v1, %v886_v57  ;;  %v1286_v57 = vld [vmem:[#allocation2 + $0x31] sm:$0xff] }
  0xfb   : > { %v1033_v21 = vadd.f32 %v5049_v5, %v887_v4  ;;  %925 = vmatmul.bf16.gmra.mxu0 %v4998_v9  ;;  %v1314_v5 = vld [vmem:[#allocation2 + $0x111] sm:$0xff]  ;;  %v6022_v9 = vpop.permute.xlu2 %5352  ;;  %v432_v4 = vcvt.s32.f32 %v6014_v61 }
  0xfd   : > { %v5999_v24 = vsel %vm5989_vm9, %v1033_v21, 0.0  ;;  %v5214_v21 = vfloor.f32 %v474_v27 }
  0xfe   : > { %1218 = vst [vmem:[#allocation2 + $0x63] sm:$0xff] %v5999_v24  ;;  %1576 = vrot.lane.b32.xlu1 %v1429_v59, %s5441_s25  ;;  %1776 = vrot.lane.b32.xlu2 %v5813_v43, %s5440_s24  ;;  %v544_v59 = vmul.u32 18, %v5206_v32  ;;  %v9821_v32 = vmov 0 }
  0xff   : > { %1862 = vrot.lane.b32.xlu0 %v1824_v28, %s5442_s26  ;;  %v5215_v45 = vsel %vm5212_vm7, %v5213_v13, %v5214_v21  ;;  %v9825_v21 = vmov 0 }
 0x100   : > { %v888_v58 = vpop.f32.mrf.mxu0  ;;  %v580_v20 = vsub.s32 %v5951_v36, %v544_v59  ;;  %v416_v36 = vadd.s32 280, %v5583_v29  ;;  %v581_v59 = vsub.s32 %v5969_v6, %v545_v23 }
 0x101   : > { %v889_v52 = vadd.f32 %v5647_v1, %v888_v58 }
 0x102   : > { %vm6032_vm0 = vcmp.lt.s32.totalorder %v580_v20, 16  ;;  %v452_v46 = vcvt.s32.f32 %v416_v36  ;;  %v5054_v20 = vunpack.c.h.bf16 %v5104_v60  ;;  %vm6059_vm8 = vcmp.lt.s32.totalorder %v581_v59, 16 }
 0x103   : > { %v1034_v3 = vadd.f32 %v5050_v30, %v889_v52  ;;  %v9822_v32 = vsel %vm6032_vm0, 4294967295, %v9821_v32  ;;  %v6039_v30 = vadd.s32 128, %v5583_v29  ;;  %v6045_v52 = vld [vmem:[#allocation2 + $0x112] sm:$0xff]  ;;  %v9826_v21 = vsel %vm6059_vm8, 4294967295, %v9825_v21 }
 0x104   : > { %9823 = vst [vmem:[#allocation22_spill] sm:$0xff] %v9822_v32  ;;  %v495_v14 = vmul.f32 %v5592_v35, %v452_v46 }
 0x105   : > { %v6020_v43 = vsel %vm6009_vm4, %v1034_v3, 0.0  ;;  %v5216_v3 = vcvt.f32.s32 %v5215_v45  ;;  %v433_v6 = vcvt.s32.f32 %v6039_v30  ;;  %9827 = vst [vmem:[#allocation24_spill] sm:$0xff] %v9826_v21  ;;  %v1432_v21 = vld [vmem:[#allocation2 + $0x42] sm:$0xff] }
 0x106   : > { %1219 = vst [vmem:[#allocation2 + $0x6b] sm:$0xff] %v6020_v43  ;;  %1720 = vrot.lane.b32.xlu1 %v5782_v11, %s5440_s24  ;;  %1328 = vrot.lane.b32.xlu2 %v1286_v57, %s5438_s17  ;;  %v475_v11 = vmul.f32 %v5592_v35, %v432_v4  ;;  %vm5317_vm12 = vcmp.lt.s32.totalorder %v495_v14, 0 }
 0x107   : > { %1384 = vrot.lane.b32.xlu0 %v1314_v5, %s5438_s17  ;;  %v476_v45 = vmul.f32 %v5592_v35, %v433_v6 }
 0x108   : > { %v891_v48 = vpop.f32.mrf.mxu0  ;;  %v5218_v27 = vceil.f32 %v475_v11  ;;  %v5219_v5 = vfloor.f32 %v475_v11  ;;  %vm5217_vm7 = vcmp.lt.s32.totalorder %v475_v11, 0  ;;  %v6066_v11 = vadd.s32 136, %v5583_v29 }
 0x109   : > { %v892_v28 = vadd.f32 %v5647_v1, %v891_v48  ;;  %v546_v48 = vmul.u32 18, %v5216_v3  ;;  %v5223_v6 = vceil.f32 %v476_v45 }
 0x10a   : > { %v5220_v60 = vsel %vm5217_vm7, %v5218_v27, %v5219_v5 }
 0x10b   : > { %v1035_v34 = vadd.f32 %v5053_v0, %v892_v28  ;;  %v5319_v0 = vfloor.f32 %v495_v14  ;;  %v5105_v28 = vld [vmem:[%s5633_s21 + $0x38] sm:$0xff]   ;;  %v582_v3 = vsub.s32 %v5995_v22, %v546_v48  ;;  %v5221_v27 = vcvt.f32.s32 %v5220_v60 }
 0x10c   : > { %v9828_v22 = vmov 0 }
 0x10d   : > { %v6043_v58 = vsel %vm6032_vm0, %v1035_v34, 0.0 }
 0x10e   : > { %1220 = vst [vmem:[#allocation2 + $0x73] sm:$0xff] %v6043_v58  ;;  %1526 = vrot.lane.b32.xlu1 %v5982_v42, %s5439_s18  ;;  %1578 = vrot.lane.b32.xlu2 %v1430_v49, %s5441_s25  ;;  %v6055_v57 = vpop.permute.xlu2 %1770  ;;  %v5318_v42 = vceil.f32 %v495_v14  ;;  %v5057_v14 = vunpack.c.l.bf16 %v5105_v28 }
 0x10f   : > { %1634 = vrot.lane.b32.xlu0 %v6045_v52, %s5441_s25  ;;  %9824 = vst [vmem:[#allocation23_spill] sm:$0xff] %v6055_v57 }
 0x110   : > { %v893_v4 = vpop.f32.mrf.mxu0  ;;  %v5320_v23 = vsel %vm5317_vm12, %v5318_v42, %v5319_v0  ;;  %v5224_v42 = vfloor.f32 %v476_v45  ;;  %v434_v0 = vcvt.s32.f32 %v6066_v11  ;;  %vm5222_vm12 = vcmp.lt.s32.totalorder %v476_v45, 0 }
 0x111   : > { %v894_v13 = vadd.f32 %v5647_v1, %v893_v4  ;;  %v5321_v46 = vcvt.f32.s32 %v5320_v23  ;;  %v948_v4 = vpop.f32.mrf.mxu3 }
 0x112   : > { %v949_v5 = vadd.f32 %v5647_v1, %v948_v4  ;;  %v5225_v60 = vsel %vm5222_vm12, %v5223_v6, %v5224_v42  ;;  %v477_v45 = vmul.f32 %v5592_v35, %v434_v0  ;;  %v1825_v4 = vld [vmem:[#allocation2 + $0x2c] sm:$0xff] }
 0x113   : > { %v1036_v34 = vadd.f32 %v5054_v20, %v894_v13  ;;  %v567_v59 = vmul.u32 18, %v5321_v46  ;;  %v5098_v20 = vunpack.c.h.bf16 %v5893_v10  ;;  %v9831_v10 = vmov 0 }
 0x114   : > { %v6100_v46 = vadd.s32 144, %v5583_v29  ;;  %v5229_v6 = vfloor.f32 %v477_v45  ;;  %vm5227_vm12 = vcmp.lt.s32.totalorder %v477_v45, 0 }
 0x115   : > { %v6070_v53 = vsel %vm6059_vm8, %v1036_v34, 0.0  ;;  %v603_v13 = vsub.s32 %v416_v36, %v567_v59  ;;  %vm6089_vm8 = vcmp.lt.s32.totalorder %v582_v3, 16  ;;  %v1287_v3 = vld [vmem:[#allocation2 + $0x39] sm:$0xff] }
 0x116   : > { %1221 = vst [vmem:[#allocation2 + $0x7b] sm:$0xff] %v6070_v53  ;;  %1472 = vrot.lane.b32.xlu1 %v1430_v49, %s5439_s18  ;;  %1722 = vrot.lane.b32.xlu2 %v5820_v47, %s5440_s24  ;;  %v1058_v49 = vadd.f32 %v5098_v20, %v949_v5  ;;  %v9832_v10 = vsel %vm6089_vm8, 4294967295, %v9831_v10  ;;  %v547_v47 = vmul.u32 18, %v5221_v27  ;;  %v5226_v27 = vcvt.f32.s32 %v5225_v60  ;;  %v5106_v60 = vld [vmem:[%s5633_s21 + $0x40] sm:$0xff]  }
 0x117   : > { %1778 = vrot.lane.b32.xlu0 %v5853_v12, %s5440_s24  ;;  %vm6085_vm7 = vcmp.lt.s32.totalorder %v603_v13, 16  ;;  %9833 = vst [vmem:[#allocation26_spill] sm:$0xff] %v9832_v10  ;;  %v5058_v5 = vunpack.c.h.bf16 %v5105_v28  ;;  %v5228_v20 = vceil.f32 %v477_v45  ;;  %v435_v42 = vcvt.s32.f32 %v6100_v46  ;;  %v6113_v13 = vpop.permute.xlu0 %5347 }
 0x118   : > { %v896_v23 = vpop.f32.mrf.mxu0  ;;  %v6083_v34 = vpop.permute.xlu2 %1572  ;;  %v9829_v22 = vsel %vm6085_vm7, 4294967295, %v9828_v22  ;;  %v6095_v48 = vsel %vm6085_vm7, %v1058_v49, 0.0  ;;  %v548_v28 = vmul.u32 18, %v5226_v27  ;;  %v6208_v10 = vadd.s32 176, %v5583_v29 }
 0x119   : > { %v897_v12 = vadd.f32 %v5647_v1, %v896_v23  ;;  %9830 = vst [vmem:[#allocation25_spill] sm:$0xff] %v9829_v22 }
 0x11a   : > { %1243 = vst [vmem:[#allocation2 + $0x12b] sm:$0xff] %v6095_v48 }
 0x11b   : > { %v1037_v36 = vadd.f32 %v5057_v14, %v897_v12  ;;  %v583_v14 = vsub.s32 %v6014_v61, %v547_v47  ;;  %v9834_v61 = vmov 0  ;;  %v5230_v47 = vsel %vm5227_vm12, %v5228_v20, %v5229_v6 }
 0x11c   : > { %v5231_v27 = vcvt.f32.s32 %v5230_v47 }
 0x11d   : > { %v6104_v59 = vsel %vm6089_vm8, %v1037_v36, 0.0  ;;  %vm6118_vm7 = vcmp.lt.s32.totalorder %v583_v14, 16  ;;  %v6124_v36 = vadd.s32 152, %v5583_v29  ;;  %v584_v14 = vsub.s32 %v6039_v30, %v548_v28 }
 0x11e   : > { %1222 = vst [vmem:[#allocation2 + $0x83] sm:$0xff] %v6104_v59  ;;  %1864 = vrot.lane.b32.xlu1 %v1825_v4, %s5442_s26  ;;  %1528 = vrot.lane.b32.xlu2 %v6045_v52, %s5439_s18  ;;  %v9835_v61 = vsel %vm6118_vm7, 4294967295, %v9834_v61  ;;  %v478_v52 = vmul.f32 %v5592_v35, %v435_v42  ;;  %v1315_v4 = vld [vmem:[#allocation2 + $0x119] sm:$0xff]  ;;  %v9838_v30 = vmov 0  ;;  %v549_v28 = vmul.u32 18, %v5231_v27 }
 0x11f   : > { %1330 = vrot.lane.b32.xlu0 %v1287_v3, %s5438_s17  ;;  %9836 = vst [vmem:[#allocation27_spill] sm:$0xff] %v9835_v61  ;;  %v1431_v3 = vld [vmem:[#allocation2 + $0x3a] sm:$0xff]  ;;  %v436_v42 = vcvt.s32.f32 %v6124_v36 }
 0x120   : > { %v898_v0 = vpop.f32.mrf.mxu0  ;;  %v6116_v49 = vpop.permute.xlu2 %1716  ;;  %v5233_v20 = vceil.f32 %v478_v52  ;;  %v5234_v6 = vfloor.f32 %v478_v52  ;;  %vm5232_vm12 = vcmp.lt.s32.totalorder %v478_v52, 0  ;;  %v1826_v27 = vld [vmem:[#allocation2 + $0x34] sm:$0xff] }
 0x121   : > { %v899_v23 = vadd.f32 %v5647_v1, %v898_v0  ;;  %v479_v33 = vmul.f32 %v5592_v35, %v436_v42 }
 0x123   : > { %v1038_v12 = vadd.f32 %v5058_v5, %v899_v23  ;;  %v5061_v5 = vunpack.c.l.bf16 %v5106_v60  ;;  %v5239_v42 = vfloor.f32 %v479_v33 }
 0x125   : > { %v6129_v45 = vsel %vm6118_vm7, %v1038_v12, 0.0  ;;  %vm6144_vm7 = vcmp.lt.s32.totalorder %v584_v14, 16  ;;  %v585_v14 = vsub.s32 %v6066_v11, %v549_v28 }
 0x126   : > { %1223 = vst [vmem:[#allocation2 + $0x8b] sm:$0xff] %v6129_v45  ;;  %1386 = vrot.lane.b32.xlu1 %v1315_v4, %s5438_s17  ;;  %1474 = vrot.lane.b32.xlu2 %v1431_v3, %s5439_s18  ;;  %v9839_v30 = vsel %vm6144_vm7, 4294967295, %v9838_v30 }
 0x127   : > { %1580 = vrot.lane.b32.xlu0 %v1431_v3, %s5441_s25  ;;  %9840 = vst [vmem:[#allocation29_spill] sm:$0xff] %v9839_v30  ;;  %v5235_v3 = vsel %vm5232_vm12, %v5233_v20, %v5234_v6  ;;  %v5062_v20 = vunpack.c.h.bf16 %v5106_v60  ;;  %v5238_v6 = vceil.f32 %v479_v33  ;;  %vm5237_vm12 = vcmp.lt.s32.totalorder %v479_v33, 0 }
 0x128   : > { %v901_v0 = vpop.f32.mrf.mxu0  ;;  %v6137_v23 = vpop.permute.xlu1 %1570 }
 0x129   : > { %v902_v12 = vadd.f32 %v5647_v1, %v901_v0  ;;  %v6140_v22 = vpop.permute.xlu0 %1320  ;;  %v6142_v4 = vpop.permute.xlu2 %1522  ;;  %v1459_v1 = vld [vmem:[#allocation2 + $0x11a] sm:$0xff]  ;;  %v437_v0 = vcvt.s32.f32 %v6150_v62  ;;  %v5240_v55 = vsel %vm5237_vm12, %v5238_v6, %v5239_v42  ;;  %v5065_v6 = vunpack.c.l.bf16 %v5107_v37 }
 0x12a   : > { %9837 = vst [vmem:[#allocation28_spill] sm:$0xff] %v6142_v4 }
 0x12b   : > { %v1039_v47 = vadd.f32 %v5061_v5, %v902_v12  ;;  %v5236_v5 = vcvt.f32.s32 %v5235_v3  ;;  %v9841_v3 = vmov 0  ;;  %v480_v33 = vmul.f32 %v5592_v35, %v437_v0 }
 0x12d   : > { %v6154_v52 = vsel %vm6144_vm7, %v1039_v47, 0.0  ;;  %vm6175_vm7 = vcmp.lt.s32.totalorder %v585_v14, 16  ;;  %v5243_v42 = vceil.f32 %v480_v33  ;;  %v5244_v0 = vfloor.f32 %v480_v33 }
 0x12e   : > { %1224 = vst [vmem:[#allocation2 + $0x93] sm:$0xff] %v6154_v52  ;;  %1636 = vrot.lane.b32.xlu1 %v1459_v1, %s5441_s25  ;;  %1866 = vrot.lane.b32.xlu2 %v1826_v27, %s5442_s26  ;;  %v9842_v3 = vsel %vm6175_vm7, 4294967295, %v9841_v3  ;;  %v550_v27 = vmul.u32 18, %v5236_v5  ;;  %v1568_v5 = vld [vmem:[#allocation2 + $0x122] sm:$0xff]  ;;  %vm5242_vm12 = vcmp.lt.s32.totalorder %v480_v33, 0 }
 0x12f   : > { %1724 = vrot.lane.b32.xlu0 %v5862_v17, %s5440_s24  ;;  %v6168_v17 = vld [vmem:[%s9538_s3] ss:$0 sm:$0xff]  ;;  %9843 = vst [vmem:[#allocation30_spill] sm:$0xff] %v9842_v3 }
 0x130   : > { %v903_v12 = vpop.f32.mrf.mxu0  ;;  %v6163_v47 = vpop.permute.xlu1 %1714  ;;  %v586_v14 = vsub.s32 %v6100_v46, %v550_v27  ;;  %v9845_v46 = vmov 0 }
 0x131   : > { %v904_v11 = vadd.f32 %v6168_v17, %v903_v12  ;;  %v6171_v28 = vpop.permute.xlu0 %1464  ;;  %v6173_v60 = vpop.permute.xlu2 %1468 }
 0x133   : > { %v1040_v26 = vadd.f32 %v5062_v20, %v904_v11  ;;  %v5241_v20 = vcvt.f32.s32 %v5240_v55  ;;  %v438_v11 = vcvt.s32.f32 %v6181_v16 }
 0x135   : > { %v6186_v12 = vsel %vm6175_vm7, %v1040_v26, 0.0  ;;  %vm6202_vm7 = vcmp.lt.s32.totalorder %v586_v14, 16  ;;  %v551_v55 = vmul.u32 18, %v5241_v20  ;;  %v481_v61 = vmul.f32 %v5592_v35, %v438_v11 }
 0x136   : > { %1225 = vst [vmem:[#allocation2 + $0x9b] sm:$0xff] %v6186_v12  ;;  %1780 = vrot.lane.b32.xlu1 %v5914_v41, %s5440_s24  ;;  %1638 = vrot.lane.b32.xlu2 %v1568_v5, %s5441_s25  ;;  %v9846_v46 = vsel %vm6202_vm7, 4294967295, %v9845_v46  ;;  %v5245_v5 = vsel %vm5242_vm12, %v5243_v42, %v5244_v0  ;;  %v5066_v20 = vunpack.c.h.bf16 %v5107_v37  ;;  %v439_v0 = vcvt.s32.f32 %v6208_v10 }
 0x137   : > { %1530 = vrot.lane.b32.xlu0 %v1459_v1, %s5439_s18  ;;  %9847 = vst [vmem:[#allocation32_spill] sm:$0xff] %v9846_v46  ;;  %v5246_v14 = vcvt.f32.s32 %v5245_v5  ;;  %v5249_v42 = vfloor.f32 %v481_v61  ;;  %vm5247_vm12 = vcmp.lt.s32.totalorder %v481_v61, 0  ;;  %v9849_v37 = vmov 0 }
 0x138   : > { %v906_v26 = vpop.f32.mrf.mxu0  ;;  %v6195_v3 = vpop.permute.xlu1 %1322  ;;  %v482_v5 = vmul.f32 %v5592_v35, %v439_v0 }
 0x139   : > { %v907_v30 = vadd.f32 %v6168_v17, %v906_v26  ;;  %v6198_v41 = vpop.permute.xlu0 %1378  ;;  %v6200_v1 = vpop.permute.xlu2 %1860  ;;  %v1288_v26 = vld [vmem:[#allocation2 + $0x41] sm:$0xff] }
 0x13a   : > { %9844 = vst [vmem:[#allocation31_spill] sm:$0xff] %v6198_v41  ;;  %v5254_v0 = vfloor.f32 %v482_v5 }
 0x13b   : > { %v1041_v27 = vadd.f32 %v5065_v6, %v907_v30  ;;  %v587_v30 = vsub.s32 %v6124_v36, %v551_v55  ;;  %v5248_v6 = vceil.f32 %v481_v61 }
 0x13d   : > { %v6212_v33 = vsel %vm6202_vm7, %v1041_v27, 0.0  ;;  %vm6228_vm7 = vcmp.lt.s32.totalorder %v587_v30, 16  ;;  %v5250_v55 = vsel %vm5247_vm12, %v5248_v6, %v5249_v42  ;;  %v5069_v6 = vunpack.c.l.bf16 %v5108_v15 }
 0x13e   : > { %1226 = vst [vmem:[#allocation2 + $0xa3] sm:$0xff] %v6212_v33  ;;  %1332 = vrot.lane.b32.xlu1 %v1288_v26, %s5438_s17  ;;  %1782 = vrot.lane.b32.xlu2 %v5933_v50, %s5440_s24  ;;  %v9850_v37 = vsel %vm6228_vm7, 4294967295, %v9849_v37  ;;  %v552_v50 = vmul.u32 18, %v5246_v14  ;;  %v1289_v14 = vld [vmem:[#allocation2 + $0x49] sm:$0xff]  ;;  %v5253_v42 = vceil.f32 %v482_v5  ;;  %vm5252_vm12 = vcmp.lt.s32.totalorder %v482_v5, 0 }
 0x13f   : > { %1476 = vrot.lane.b32.xlu0 %v1432_v21, %s5439_s18  ;;  %9851 = vst [vmem:[#allocation34_spill] sm:$0xff] %v9850_v37 }
 0x140   : > { %v908_v11 = vpop.f32.mrf.mxu0  ;;  %v6221_v27 = vpop.permute.xlu1 %1466  ;;  %v588_v30 = vsub.s32 %v6150_v62, %v552_v50  ;;  %v9854_v62 = vmov 0 }
 0x141   : > { %v909_v26 = vadd.f32 %v6168_v17, %v908_v11  ;;  %v6224_v46 = vpop.permute.xlu0 %1628  ;;  %v6226_v32 = vpop.permute.xlu2 %1326  ;;  %v1569_v11 = vld [vmem:[#allocation2 + $0x12a] sm:$0xff] }
 0x142   : > { %9848 = vst [vmem:[#allocation33_spill] sm:$0xff] %v6224_v46 }
 0x143   : > { %v1042_v36 = vadd.f32 %v5066_v20, %v909_v26  ;;  %v5251_v20 = vcvt.f32.s32 %v5250_v55  ;;  %v440_v26 = vcvt.s32.f32 %v6234_v8 }
 0x145   : > { %v6239_v61 = vsel %vm6228_vm7, %v1042_v36, 0.0  ;;  %vm6254_vm7 = vcmp.lt.s32.totalorder %v588_v30, 16  ;;  %v553_v50 = vmul.u32 18, %v5251_v20  ;;  %v483_v40 = vmul.f32 %v5592_v35, %v440_v26  ;;  %v1433_v30 = vld [vmem:[#allocation2 + $0x4a] sm:$0xff] }
 0x146   : > { %1227 = vst [vmem:[#allocation2 + $0xab] sm:$0xff] %v6239_v61  ;;  %1582 = vrot.lane.b32.xlu1 %v1432_v21, %s5441_s25  ;;  %1334 = vrot.lane.b32.xlu2 %v1289_v14, %s5438_s17  ;;  %v9855_v62 = vsel %vm6254_vm7, 4294967295, %v9854_v62  ;;  %v5255_v14 = vsel %vm5252_vm12, %v5253_v42, %v5254_v0  ;;  %v441_v26 = vcvt.s32.f32 %v6260_v2 }
 0x147   : > { %1640 = vrot.lane.b32.xlu0 %v1569_v11, %s5441_s25  ;;  %9856 = vst [vmem:[#allocation37_spill] sm:$0xff] %v9855_v62  ;;  %v5256_v20 = vcvt.f32.s32 %v5255_v14  ;;  %v5258_v42 = vceil.f32 %v483_v40  ;;  %v5259_v0 = vfloor.f32 %v483_v40  ;;  %vm5257_vm12 = vcmp.lt.s32.totalorder %v483_v40, 0 }
 0x148   : > { %v911_v36 = vpop.f32.mrf.mxu0  ;;  %v6247_v37 = vpop.permute.xlu1 %1858  ;;  %v484_v31 = vmul.f32 %v5592_v35, %v441_v26  ;;  %v442_v26 = vcvt.s32.f32 %v6287_v7 }
 0x149   : > { %v912_v44 = vadd.f32 %v6168_v17, %v911_v36  ;;  %v6250_v21 = vpop.permute.xlu0 %1772  ;;  %v6252_v11 = vpop.permute.xlu2 %1382  ;;  %v5260_v14 = vsel %vm5257_vm12, %v5258_v42, %v5259_v0 }
 0x14a   : > { %9852 = vst [vmem:[#allocation35_spill] sm:$0xff] %v6250_v21  ;;  %v5263_v42 = vceil.f32 %v484_v31  ;;  %v5264_v0 = vfloor.f32 %v484_v31  ;;  %vm5262_vm12 = vcmp.lt.s32.totalorder %v484_v31, 0  ;;  %v485_v63 = vmul.f32 %v5592_v35, %v442_v26 }
 0x14b   : > { %9853 = vst [vmem:[#allocation36_spill] sm:$0xff] %v6252_v11  ;;  %v1043_v55 = vadd.f32 %v5069_v6, %v912_v44  ;;  %v589_v44 = vsub.s32 %v6181_v16, %v553_v50  ;;  %v5070_v6 = vunpack.c.h.bf16 %v5108_v15  ;;  %v9858_v16 = vmov 0  ;;  %v5110_v11 = vld [vmem:[%s5633_s21 + $0x60] sm:$0xff]  }
 0x14c   : > { %v554_v15 = vmul.u32 18, %v5256_v20  ;;  %v5261_v20 = vcvt.f32.s32 %v5260_v14  ;;  %v5265_v14 = vsel %vm5262_vm12, %v5263_v42, %v5264_v0  ;;  %v5269_v42 = vfloor.f32 %v485_v63 }
 0x14d   : > { %v6264_v5 = vsel %vm6254_vm7, %v1043_v55, 0.0  ;;  %vm6281_vm7 = vcmp.lt.s32.totalorder %v589_v44, 16  ;;  %v443_v0 = vcvt.s32.f32 %v6314_v25  ;;  %vm5267_vm12 = vcmp.lt.s32.totalorder %v485_v63, 0 }
 0x14e   : > { %1228 = vst [vmem:[#allocation2 + $0xb3] sm:$0xff] %v6264_v5  ;;  %1726 = vrot.lane.b32.xlu1 %v5890_v39, %s5440_s24  ;;  %1584 = vrot.lane.b32.xlu2 %v1433_v30, %s5441_s25  ;;  %v9859_v16 = vsel %vm6281_vm7, 4294967295, %v9858_v16  ;;  %v590_v44 = vsub.s32 %v6208_v10, %v554_v15  ;;  %v9863_v10 = vmov 0  ;;  %v555_v15 = vmul.u32 18, %v5261_v20 }
 0x14f   : > { %1784 = vrot.lane.b32.xlu0 %v6095_v48, %s5440_s24  ;;  %9860 = vst [vmem:[#allocation39_spill] sm:$0xff] %v9859_v16  ;;  %v5074_v20 = vunpack.c.h.bf16 %v5109_v38 }
 0x150   : > { %v913_v36 = vpop.f32.mrf.mxu0  ;;  %v6274_v55 = vpop.permute.xlu1 %1324 }
 0x151   : > { %v914_v39 = vadd.f32 %v6168_v17, %v913_v36  ;;  %v6277_v62 = vpop.permute.xlu0 %1574  ;;  %v6279_v48 = vpop.permute.xlu2 %1632  ;;  %v1290_v36 = vld [vmem:[#allocation2 + $0x51] sm:$0xff] }
 0x152   : > { %9857 = vst [vmem:[#allocation38_spill] sm:$0xff] %v6279_v48 }
 0x153   : > { %v1044_v50 = vadd.f32 %v5070_v6, %v914_v39  ;;  %v5073_v6 = vunpack.c.l.bf16 %v5109_v38 }
 0x155   : > { %v6292_v40 = vsel %vm6281_vm7, %v1044_v50, 0.0  ;;  %vm6308_vm7 = vcmp.lt.s32.totalorder %v590_v44, 16  ;;  %v5266_v44 = vcvt.f32.s32 %v5265_v14  ;;  %v486_v14 = vmul.f32 %v5592_v35, %v443_v0  ;;  %v1446_v21 = vld [vmem:[#allocation2 + $0xb2] sm:$0xff] }
 0x156   : > { %1229 = vst [vmem:[#allocation2 + $0xbb] sm:$0xff] %v6292_v40  ;;  %1478 = vrot.lane.b32.xlu1 %v1433_v30, %s5439_s18  ;;  %1728 = vrot.lane.b32.xlu2 %v5929_v54, %s5440_s24  ;;  %v9864_v10 = vsel %vm6308_vm7, 4294967295, %v9863_v10 }
 0x157   : > { %1336 = vrot.lane.b32.xlu0 %v1290_v36, %s5438_s17  ;;  %9865 = vst [vmem:[#allocation42_spill] sm:$0xff] %v9864_v10 }
 0x158   : > { %v916_v39 = vpop.f32.mrf.mxu0  ;;  %v6301_v50 = vpop.permute.xlu1 %1380 }
 0x159   : > { %9861 = vst [vmem:[#allocation40_spill] sm:$0xff] %v6301_v50  ;;  %v917_v16 = vadd.f32 %v6168_v17, %v916_v39  ;;  %v6304_v30 = vpop.permute.xlu0 %1718  ;;  %v6306_v36 = vpop.permute.xlu2 %1776  ;;  %v1291_v39 = vld [vmem:[#allocation2 + $0x59] sm:$0xff]  ;;  %v6339_v50 = vadd.s32 216, %v5583_v29  ;;  %v5273_v29 = vceil.f32 %v486_v14 }
 0x15a   : > { %9862 = vst [vmem:[#allocation41_spill] sm:$0xff] %v6306_v36 }
 0x15b   : > { %v1045_v54 = vadd.f32 %v5073_v6, %v917_v16  ;;  %v591_v16 = vsub.s32 %v6234_v8, %v555_v15  ;;  %v5268_v6 = vceil.f32 %v485_v63  ;;  %v9868_v8 = vmov 0 }
 0x15d   : > { %v6318_v31 = vsel %vm6308_vm7, %v1045_v54, 0.0  ;;  %vm6333_vm7 = vcmp.lt.s32.totalorder %v591_v16, 16  ;;  %v5270_v15 = vsel %vm5267_vm12, %v5268_v6, %v5269_v42  ;;  %v1292_v16 = vld [vmem:[#allocation2 + $0x61] sm:$0xff]  ;;  %v5274_v6 = vfloor.f32 %v486_v14  ;;  %v1303_v41 = vld [vmem:[#allocation2 + $0xb9] sm:$0xff] }
 0x15e   : > { %1230 = vst [vmem:[#allocation2 + $0xc3] sm:$0xff] %v6318_v31  ;;  %1338 = vrot.lane.b32.xlu1 %v1291_v39, %s5438_s17  ;;  %1480 = vrot.lane.b32.xlu2 %v1434_v19, %s5439_s18  ;;  %v9869_v8 = vsel %vm6333_vm7, 4294967295, %v9868_v8  ;;  %v444_v42 = vcvt.s32.f32 %v6339_v50  ;;  %vm5272_vm12 = vcmp.lt.s32.totalorder %v486_v14, 0 }
 0x15f   : > { %1586 = vrot.lane.b32.xlu0 %v1434_v19, %s5441_s25  ;;  %9870 = vst [vmem:[#allocation45_spill] sm:$0xff] %v9869_v8  ;;  %v556_v19 = vmul.u32 18, %v5266_v44  ;;  %v5271_v44 = vcvt.f32.s32 %v5270_v15 }
 0x160   : > { %v918_v26 = vpop.f32.mrf.mxu0  ;;  %v6326_v54 = vpop.permute.xlu1 %1630  ;;  %v487_v36 = vmul.f32 %v5592_v35, %v444_v42 }
 0x161   : > { %9866 = vst [vmem:[#allocation43_spill] sm:$0xff] %v6326_v54  ;;  %v919_v10 = vadd.f32 %v6168_v17, %v918_v26  ;;  %v6329_v39 = vpop.permute.xlu0 %1524  ;;  %v6331_v51 = vpop.permute.xlu2 %1328  ;;  %v1435_v26 = vld [vmem:[#allocation2 + $0x5a] sm:$0xff] }
 0x162   : > { %9867 = vst [vmem:[#allocation44_spill] sm:$0xff] %v6329_v39  ;;  %v5279_v35 = vfloor.f32 %v487_v36 }
 0x163   : > { %v1046_v38 = vadd.f32 %v5074_v20, %v919_v10  ;;  %v592_v10 = vsub.s32 %v6260_v2, %v556_v19  ;;  %v5077_v20 = vunpack.c.l.bf16 %v5110_v11  ;;  %v9872_v2 = vmov 0 }
 0x164   : > { %v557_v19 = vmul.u32 18, %v5271_v44  ;;  %v5078_v44 = vunpack.c.h.bf16 %v5110_v11 }
 0x165   : > { %v6344_v63 = vsel %vm6333_vm7, %v1046_v38, 0.0  ;;  %vm6360_vm7 = vcmp.lt.s32.totalorder %v592_v10, 16  ;;  %v1436_v10 = vld [vmem:[#allocation2 + $0x62] sm:$0xff] }
 0x166   : > { %1231 = vst [vmem:[#allocation2 + $0xcb] sm:$0xff] %v6344_v63  ;;  %1588 = vrot.lane.b32.xlu1 %v1435_v26, %s5441_s25  ;;  %1340 = vrot.lane.b32.xlu2 %v1292_v16, %s5438_s17  ;;  %v9873_v2 = vsel %vm6360_vm7, 4294967295, %v9872_v2  ;;  %v5275_v16 = vsel %vm5272_vm12, %v5273_v29, %v5274_v6  ;;  %v593_v14 = vsub.s32 %v6287_v7, %v557_v19  ;;  %vm5277_vm12 = vcmp.lt.s32.totalorder %v487_v36, 0  ;;  %v1304_v46 = vld [vmem:[#allocation2 + $0xc1] sm:$0xff] }
 0x167   : > { %1730 = vrot.lane.b32.xlu0 %v5955_v18, %s5440_s24  ;;  %9874 = vst [vmem:[#allocation47_spill] sm:$0xff] %v9873_v2  ;;  %v9875_v7 = vmov 0 }
 0x168   : > { %v921_v0 = vpop.f32.mrf.mxu0  ;;  %v6353_v38 = vpop.permute.xlu1 %1774 }
 0x169   : > { %9871 = vst [vmem:[#allocation46_spill] sm:$0xff] %v6353_v38  ;;  %v922_v8 = vadd.f32 %v6168_v17, %v921_v0  ;;  %v6356_v39 = vpop.permute.xlu0 %1470  ;;  %v6358_v18 = vpop.permute.xlu2 %1578  ;;  %v5276_v0 = vcvt.f32.s32 %v5275_v16  ;;  %v1293_v16 = vld [vmem:[#allocation2 + $0x69] sm:$0xff] }
 0x16b   : > { %v1047_v15 = vadd.f32 %v5077_v20, %v922_v8  ;;  %v5278_v8 = vceil.f32 %v487_v36  ;;  %v558_v11 = vmul.u32 18, %v5276_v0 }
 0x16d   : > { %v6367_v48 = vsel %vm6360_vm7, %v1047_v15, 0.0  ;;  %vm6382_vm7 = vcmp.lt.s32.totalorder %v593_v14, 16  ;;  %v5280_v19 = vsel %vm5277_vm12, %v5278_v8, %v5279_v35  ;;  %v594_v36 = vsub.s32 %v6314_v25, %v558_v11  ;;  %v5111_v14 = vld [vmem:[%s5633_s21 + $0x68] sm:$0xff]  }
 0x16e   : > { %1232 = vst [vmem:[#allocation2 + $0xd3] sm:$0xff] %v6367_v48  ;;  %1732 = vrot.lane.b32.xlu1 %v5975_v56, %s5440_s24  ;;  %1590 = vrot.lane.b32.xlu2 %v1436_v10, %s5441_s25  ;;  %v9876_v7 = vsel %vm6382_vm7, 4294967295, %v9875_v7  ;;  %v5081_v2 = vunpack.c.l.bf16 %v5111_v14 }
 0x16f   : > { %1482 = vrot.lane.b32.xlu0 %v1435_v26, %s5439_s18  ;;  %9877 = vst [vmem:[#allocation48_spill] sm:$0xff] %v9876_v7  ;;  %vm6404_vm12 = vcmp.lt.s32.totalorder %v594_v36, 16  ;;  %v5082_v36 = vunpack.c.h.bf16 %v5111_v14  ;;  %v1438_v14 = vld [vmem:[#allocation2 + $0x72] sm:$0xff]  ;;  %v1440_v7 = vld [vmem:[#allocation2 + $0x82] sm:$0xff] }
 0x170   : > { %v923_v20 = vpop.f32.mrf.mxu0  ;;  %v6375_v29 = vpop.permute.xlu1 %1576 }
 0x171   : > { %v924_v6 = vadd.f32 %v6168_v17, %v923_v20  ;;  %v6378_v42 = vpop.permute.xlu0 %1862  ;;  %v6380_v56 = vpop.permute.xlu2 %1722  ;;  %v5281_v20 = vcvt.f32.s32 %v5280_v19  ;;  %v1437_v19 = vld [vmem:[#allocation2 + $0x6a] sm:$0xff] }
 0x173   : > { %v1048_v26 = vadd.f32 %v5078_v44, %v924_v6  ;;  %v559_v25 = vmul.u32 18, %v5281_v20 }
 0x175   : > { %v6388_v15 = vsel %vm6382_vm7, %v1048_v26, 0.0 }
 0x176   : > { %1233 = vst [vmem:[#allocation2 + $0xdb] sm:$0xff] %v6388_v15  ;;  %1484 = vrot.lane.b32.xlu1 %v1436_v10, %s5439_s18  ;;  %1734 = vrot.lane.b32.xlu2 %v5999_v24, %s5440_s24  ;;  %v9880_v10 = vmov 0  ;;  %v1294_v24 = vld [vmem:[#allocation2 + $0x71] sm:$0xff] }
 0x177   : > { %1342 = vrot.lane.b32.xlu0 %v1293_v16, %s5438_s17  ;;  %v9881_v10 = vsel %vm6404_vm12, 4294967295, %v9880_v10  ;;  %v595_v16 = vsub.s32 %v6339_v50, %v559_v25 }
 0x178   : > { %v926_v0 = vpop.f32.mrf.mxu0  ;;  %v6397_v44 = vpop.permute.xlu1 %1720  ;;  %9882 = vst [vmem:[#allocation51_spill] sm:$0xff] %v9881_v10  ;;  %v9886_v10 = vmov 0 }
 0x179   : > { %v927_v8 = vadd.f32 %v6168_v17, %v926_v0  ;;  %v6400_v35 = vpop.permute.xlu0 %1384  ;;  %v6402_v6 = vpop.permute.xlu2 %1528 }
 0x17a   : > { %9878 = vst [vmem:[#allocation49_spill] sm:$0xff] %v6400_v35 }
 0x17b   : > { %9879 = vst [vmem:[#allocation50_spill] sm:$0xff] %v6402_v6  ;;  %v1049_v11 = vadd.f32 %v5081_v2, %v927_v8 }
 0x17d   : > { %v6410_v26 = vsel %vm6404_vm12, %v1049_v11, 0.0  ;;  %vm6424_vm12 = vcmp.lt.s32.totalorder %v595_v16, 16 }
 0x17e   : > { %1234 = vst [vmem:[#allocation2 + $0xe3] sm:$0xff] %v6410_v26  ;;  %1344 = vrot.lane.b32.xlu1 %v1294_v24, %s5438_s17  ;;  %1486 = vrot.lane.b32.xlu2 %v1437_v19, %s5439_s18  ;;  %v9887_v10 = vsel %vm6424_vm12, 4294967295, %v9886_v10 }
 0x17f   : > { %1592 = vrot.lane.b32.xlu0 %v1437_v19, %s5441_s25  ;;  %9888 = vst [vmem:[#allocation55_spill] sm:$0xff] %v9887_v10  ;;  %v1297_v10 = vld [vmem:[#allocation2 + $0x89] sm:$0xff] }
 0x180   : > { %v928_v0 = vpop.f32.mrf.mxu0  ;;  %v6417_v20 = vpop.permute.xlu1 %1526 }
 0x181   : > { %9883 = vst [vmem:[#allocation52_spill] sm:$0xff] %v6417_v20  ;;  %v929_v2 = vadd.f32 %v6168_v17, %v928_v0  ;;  %v6420_v8 = vpop.permute.xlu0 %1634  ;;  %v6422_v11 = vpop.permute.xlu2 %1474  ;;  %v1295_v17 = vld [vmem:[#allocation2 + $0x79] sm:$0xff] }
 0x182   : > { %9884 = vst [vmem:[#allocation53_spill] sm:$0xff] %v6420_v8  ;;  %v1443_v8 = vld [vmem:[#allocation2 + $0x9a] sm:$0xff] }
 0x183   : > { %9885 = vst [vmem:[#allocation54_spill] sm:$0xff] %v6422_v11  ;;  %v1050_v24 = vadd.f32 %v5082_v36, %v929_v2  ;;  %v1439_v36 = vld [vmem:[#allocation2 + $0x7a] sm:$0xff]  ;;  %v6827_v11 = vld [vmem:[#allocation2 + $0x12c] sm:$0xff] }
 0x184   : > { %9983 = vst [vmem:[#allocation150_spill] sm:$0xff] %v6827_v11 }
 0x185   : > { %v6430_v50 = vsel %vm6424_vm12, %v1050_v24, 0.0  ;;  %v1296_v24 = vld [vmem:[#allocation2 + $0x81] sm:$0xff] }
 0x186   : > { %1235 = vst [vmem:[#allocation2 + $0xeb] sm:$0xff] %v6430_v50  ;;  %1594 = vrot.lane.b32.xlu1 %v1438_v14, %s5441_s25  ;;  %1346 = vrot.lane.b32.xlu2 %v1295_v17, %s5438_s17 }
 0x187   : > { %1736 = vrot.lane.b32.xlu0 %v6020_v43, %s5440_s24 }
 0x188   : > { %v6437_v25 = vpop.permute.xlu1 %1472 }
 0x189   : > { %9889 = vst [vmem:[#allocation56_spill] sm:$0xff] %v6437_v25  ;;  %v6439_v19 = vpop.permute.xlu0 %1778  ;;  %v6441_v16 = vpop.permute.xlu2 %1866  ;;  %v5416_v25 = vld [vmem:[#allocation2 + $0x34] sm:$0xff] }
 0x18a   : > { %9890 = vst [vmem:[#allocation57_spill] sm:$0xff] %v6439_v19 }
 0x18e   : > { %1738 = vrot.lane.b32.xlu1 %v6043_v58, %s5440_s24  ;;  %1596 = vrot.lane.b32.xlu2 %v1439_v36, %s5441_s25 }
 0x18f   : > { %1488 = vrot.lane.b32.xlu0 %v1438_v14, %s5439_s18 }
 0x190   : > { %v6447_v0 = vpop.permute.xlu1 %1864 }
 0x191   : > { %v6449_v43 = vpop.permute.xlu0 %1330  ;;  %v6451_v2 = vpop.permute.xlu2 %1638 }
 0x192   : > { %9891 = vst [vmem:[#allocation58_spill] sm:$0xff] %v6451_v2 }
 0x196   : > { %1490 = vrot.lane.b32.xlu1 %v1439_v36, %s5439_s18  ;;  %1740 = vrot.lane.b32.xlu2 %v6070_v53, %s5440_s24  ;;  %v1441_v53 = vld [vmem:[#allocation2 + $0x8a] sm:$0xff] }
 0x197   : > { %1348 = vrot.lane.b32.xlu0 %v1296_v24, %s5438_s17 }
 0x198   : > { %v6457_v58 = vpop.permute.xlu1 %1386 }
 0x199   : > { %9892 = vst [vmem:[#allocation59_spill] sm:$0xff] %v6457_v58  ;;  %v6459_v14 = vpop.permute.xlu0 %1580  ;;  %v6461_v17 = vpop.permute.xlu2 %1782  ;;  %v1442_v58 = vld [vmem:[#allocation2 + $0x92] sm:$0xff] }
 0x19a   : > { %9893 = vst [vmem:[#allocation60_spill] sm:$0xff] %v6461_v17  ;;  %v1298_v17 = vld [vmem:[#allocation2 + $0x91] sm:$0xff] }
 0x19e   : > { %1350 = vrot.lane.b32.xlu1 %v1297_v10, %s5438_s17  ;;  %1492 = vrot.lane.b32.xlu2 %v1440_v7, %s5439_s18 }
 0x19f   : > { %1598 = vrot.lane.b32.xlu0 %v1440_v7, %s5441_s25 }
 0x1a0   : > { %v6466_v36 = vpop.permute.xlu1 %1636 }
 0x1a1   : > { %9894 = vst [vmem:[#allocation61_spill] sm:$0xff] %v6466_v36  ;;  %v6468_v24 = vpop.permute.xlu0 %1724  ;;  %v6470_v2 = vpop.permute.xlu2 %1334 }
 0x1a2   : > { %9895 = vst [vmem:[#allocation62_spill] sm:$0xff] %v6470_v2  ;;  %v6791_v2 = vld [vmem:[#allocation2 + $0xfc] sm:$0xff] }
 0x1a6   : > { %1600 = vrot.lane.b32.xlu1 %v1441_v53, %s5441_s25  ;;  %1352 = vrot.lane.b32.xlu2 %v1298_v17, %s5438_s17  ;;  %v1299_v17 = vld [vmem:[#allocation2 + $0x99] sm:$0xff] }
 0x1a7   : > { %1742 = vrot.lane.b32.xlu0 %v6104_v59, %s5440_s24 }
 0x1a8   : > { %v6476_v10 = vpop.permute.xlu1 %1780 }
 0x1a9   : > { %9896 = vst [vmem:[#allocation63_spill] sm:$0xff] %v6476_v10  ;;  %v6478_v6 = vpop.permute.xlu0 %1530  ;;  %v6480_v7 = vpop.permute.xlu2 %1584  ;;  %v1300_v10 = vld [vmem:[#allocation2 + $0xa1] sm:$0xff] }
 0x1aa   : > { %9897 = vst [vmem:[#allocation64_spill] sm:$0xff] %v6478_v6 }
 0x1ab   : > { %9898 = vst [vmem:[#allocation65_spill] sm:$0xff] %v6480_v7  ;;  %v6825_v7 = vld [vmem:[#allocation2 + $0x11c] sm:$0xff] }
 0x1ac   : > { %9982 = vst [vmem:[#allocation149_spill] sm:$0xff] %v6825_v7 }
 0x1ae   : > { %1744 = vrot.lane.b32.xlu1 %v6129_v45, %s5440_s24  ;;  %1602 = vrot.lane.b32.xlu2 %v1442_v58, %s5441_s25 }
 0x1af   : > { %1494 = vrot.lane.b32.xlu0 %v1441_v53, %s5439_s18 }
 0x1b0   : > { %v6486_v35 = vpop.permute.xlu1 %1332 }
 0x1b1   : > { %9899 = vst [vmem:[#allocation66_spill] sm:$0xff] %v6486_v35  ;;  %v6488_v59 = vpop.permute.xlu0 %1476  ;;  %v6490_v19 = vpop.permute.xlu2 %1728  ;;  %v6797_v35 = vld [vmem:[#allocation2 + $0x10c] sm:$0xff] }
 0x1b2   : > { %9900 = vst [vmem:[#allocation67_spill] sm:$0xff] %v6488_v59  ;;  %v6789_v59 = vld [vmem:[#allocation2 + $0xec] sm:$0xff] }
 0x1b3   : > { %9901 = vst [vmem:[#allocation68_spill] sm:$0xff] %v6490_v19  ;;  %v6809_v19 = vld [vmem:[#allocation2 + $0x114] sm:$0xff] }
 0x1b4   : > { %9977 = vst [vmem:[#allocation144_spill] sm:$0xff] %v6809_v19 }
 0x1b6   : > { %1496 = vrot.lane.b32.xlu1 %v1442_v58, %s5439_s18  ;;  %1746 = vrot.lane.b32.xlu2 %v6154_v52, %s5440_s24  ;;  %v1444_v52 = vld [vmem:[#allocation2 + $0xa2] sm:$0xff] }
 0x1b7   : > { %1354 = vrot.lane.b32.xlu0 %v1299_v17, %s5438_s17 }
 0x1b8   : > { %v6496_v45 = vpop.permute.xlu1 %1582 }
 0x1b9   : > { %9902 = vst [vmem:[#allocation69_spill] sm:$0xff] %v6496_v45  ;;  %v6498_v53 = vpop.permute.xlu0 %1640  ;;  %v6500_v6 = vpop.permute.xlu2 %1480  ;;  %v6815_v45 = vld [vmem:[#allocation2 + $0x124] sm:$0xff] }
 0x1ba   : > { %9903 = vst [vmem:[#allocation70_spill] sm:$0xff] %v6498_v53  ;;  %v1301_v53 = vld [vmem:[#allocation2 + $0xa9] sm:$0xff] }
 0x1bb   : > { %9904 = vst [vmem:[#allocation71_spill] sm:$0xff] %v6500_v6  ;;  %v6743_v6 = vld [vmem:[#allocation2 + $0xc4] sm:$0xff] }
 0x1bc   : > { %9978 = vst [vmem:[#allocation145_spill] sm:$0xff] %v6815_v45 }
 0x1be   : > { %1356 = vrot.lane.b32.xlu1 %v1300_v10, %s5438_s17  ;;  %1498 = vrot.lane.b32.xlu2 %v1443_v8, %s5439_s18 }
 0x1bf   : > { %1604 = vrot.lane.b32.xlu0 %v1443_v8, %s5441_s25 }
 0x1c0   : > { %v6505_v58 = vpop.permute.xlu1 %1726 }
 0x1c1   : > { %9905 = vst [vmem:[#allocation72_spill] sm:$0xff] %v6505_v58  ;;  %v6507_v17 = vpop.permute.xlu0 %1784  ;;  %v6509_v36 = vpop.permute.xlu2 %1340  ;;  %v6807_v58 = vld [vmem:[#allocation2 + $0x104] sm:$0xff] }
 0x1c2   : > { %9906 = vst [vmem:[#allocation73_spill] sm:$0xff] %v6507_v17  ;;  %v1445_v17 = vld [vmem:[#allocation2 + $0xaa] sm:$0xff] }
 0x1c3   : > { %9907 = vst [vmem:[#allocation74_spill] sm:$0xff] %v6509_v36 }
 0x1c6   : > { %1606 = vrot.lane.b32.xlu1 %v1444_v52, %s5441_s25  ;;  %1358 = vrot.lane.b32.xlu2 %v1301_v53, %s5438_s17  ;;  %v1302_v53 = vld [vmem:[#allocation2 + $0xb1] sm:$0xff] }
 0x1c7   : > { %1748 = vrot.lane.b32.xlu0 %v6186_v12, %s5440_s24 }
 0x1c8   : > { %v6515_v10 = vpop.permute.xlu1 %1478 }
 0x1c9   : > { %9908 = vst [vmem:[#allocation75_spill] sm:$0xff] %v6515_v10  ;;  %v6517_v20 = vpop.permute.xlu0 %1336  ;;  %v6519_v8 = vpop.permute.xlu2 %1590  ;;  %v6779_v10 = vld [vmem:[#allocation2 + $0xf4] sm:$0xff] }
 0x1ca   : > { %9909 = vst [vmem:[#allocation76_spill] sm:$0xff] %v6517_v20  ;;  %v6753_v20 = vld [vmem:[#allocation2 + $0xbc] sm:$0xff] }
 0x1cb   : > { %9910 = vst [vmem:[#allocation77_spill] sm:$0xff] %v6519_v8  ;;  %v6725_v8 = vld [vmem:[#allocation2 + $0xac] sm:$0xff] }
 0x1ce   : > { %1750 = vrot.lane.b32.xlu1 %v6212_v33, %s5440_s24  ;;  %1608 = vrot.lane.b32.xlu2 %v1445_v17, %s5441_s25 }
 0x1cf   : > { %1500 = vrot.lane.b32.xlu0 %v1444_v52, %s5439_s18 }
 0x1d0   : > { %v6525_v38 = vpop.permute.xlu1 %1338 }
 0x1d1   : > { %9911 = vst [vmem:[#allocation78_spill] sm:$0xff] %v6525_v38  ;;  %v6527_v12 = vpop.permute.xlu0 %1586  ;;  %v6529_v54 = vpop.permute.xlu2 %1734  ;;  %v6737_v38 = vld [vmem:[#allocation2 + $0xb4] sm:$0xff] }
 0x1d2   : > { %9912 = vst [vmem:[#allocation79_spill] sm:$0xff] %v6527_v12  ;;  %v6773_v12 = vld [vmem:[#allocation2 + $0xe4] sm:$0xff] }
 0x1d3   : > { %9913 = vst [vmem:[#allocation80_spill] sm:$0xff] %v6529_v54 }
 0x1d6   : > { %1502 = vrot.lane.b32.xlu1 %v1445_v17, %s5439_s18  ;;  %1752 = vrot.lane.b32.xlu2 %v6239_v61, %s5440_s24  ;;  %v1447_v61 = vld [vmem:[#allocation2 + $0xba] sm:$0xff] }
 0x1d7   : > { %1360 = vrot.lane.b32.xlu0 %v1302_v53, %s5438_s17 }
 0x1d8   : > { %v6535_v33 = vpop.permute.xlu1 %1588 }
 0x1d9   : > { %9914 = vst [vmem:[#allocation81_spill] sm:$0xff] %v6535_v33  ;;  %v6537_v52 = vpop.permute.xlu0 %1730  ;;  %v6539_v4 = vpop.permute.xlu2 %1486  ;;  %v6771_v33 = vld [vmem:[#allocation2 + $0xd4] sm:$0xff] }
 0x1da   : > { %9915 = vst [vmem:[#allocation82_spill] sm:$0xff] %v6537_v52  ;;  %v6761_v52 = vld [vmem:[#allocation2 + $0xdc] sm:$0xff] }
 0x1db   : > { %9916 = vst [vmem:[#allocation83_spill] sm:$0xff] %v6539_v4 }
 0x1de   : > { %1362 = vrot.lane.b32.xlu1 %v1303_v41, %s5438_s17  ;;  %1504 = vrot.lane.b32.xlu2 %v1446_v21, %s5439_s18 }
 0x1df   : > { %1610 = vrot.lane.b32.xlu0 %v1446_v21, %s5441_s25 }
 0x1e0   : > { %v6544_v17 = vpop.permute.xlu1 %1732 }
 0x1e1   : > { %9917 = vst [vmem:[#allocation84_spill] sm:$0xff] %v6544_v17  ;;  %v6546_v53 = vpop.permute.xlu0 %1482  ;;  %v6548_v57 = vpop.permute.xlu2 %1346  ;;  %v6755_v17 = vld [vmem:[#allocation2 + $0xcc] sm:$0xff] }
 0x1e2   : > { %9918 = vst [vmem:[#allocation85_spill] sm:$0xff] %v6546_v53  ;;  %v6735_v53 = vld [vmem:[#allocation2 + $0xa4] sm:$0xff] }
 0x1e3   : > { %9919 = vst [vmem:[#allocation86_spill] sm:$0xff] %v6548_v57  ;;  %v1448_v57 = vld [vmem:[#allocation2 + $0xc2] sm:$0xff] }
 0x1e6   : > { %1612 = vrot.lane.b32.xlu1 %v1447_v61, %s5441_s25  ;;  %1364 = vrot.lane.b32.xlu2 %v1304_v46, %s5438_s17  ;;  %v1305_v46 = vld [vmem:[#allocation2 + $0xc9] sm:$0xff] }
 0x1e7   : > { %1754 = vrot.lane.b32.xlu0 %v6264_v5, %s5440_s24 }
 0x1e8   : > { %v6554_v41 = vpop.permute.xlu1 %1484 }
 0x1e9   : > { %9920 = vst [vmem:[#allocation87_spill] sm:$0xff] %v6554_v41  ;;  %v6556_v36 = vpop.permute.xlu0 %1342  ;;  %v6558_v21 = vpop.permute.xlu2 %1596  ;;  %v1306_v41 = vld [vmem:[#allocation2 + $0xd1] sm:$0xff] }
 0x1ea   : > { %9921 = vst [vmem:[#allocation88_spill] sm:$0xff] %v6556_v36  ;;  %v6707_v36 = vld [vmem:[#allocation2 + $0x94] sm:$0xff] }
 0x1eb   : > { %9922 = vst [vmem:[#allocation89_spill] sm:$0xff] %v6558_v21 }
 0x1ee   : > { %1756 = vrot.lane.b32.xlu1 %v6292_v40, %s5440_s24  ;;  %1614 = vrot.lane.b32.xlu2 %v1448_v57, %s5441_s25 }
 0x1ef   : > { %1506 = vrot.lane.b32.xlu0 %v1447_v61, %s5439_s18 }
 0x1f0   : > { %v6564_v4 = vpop.permute.xlu1 %1344 }
 0x1f1   : > { %9923 = vst [vmem:[#allocation90_spill] sm:$0xff] %v6564_v4  ;;  %v6566_v5 = vpop.permute.xlu0 %1592  ;;  %v6568_v54 = vpop.permute.xlu2 %1740  ;;  %v1449_v4 = vld [vmem:[#allocation2 + $0xca] sm:$0xff] }
 0x1f2   : > { %9924 = vst [vmem:[#allocation91_spill] sm:$0xff] %v6566_v5  ;;  %v6719_v5 = vld [vmem:[#allocation2 + $0x9c] sm:$0xff] }
 0x1f3   : > { %9925 = vst [vmem:[#allocation92_spill] sm:$0xff] %v6568_v54 }
 0x1f6   : > { %1508 = vrot.lane.b32.xlu1 %v1448_v57, %s5439_s18  ;;  %1758 = vrot.lane.b32.xlu2 %v6318_v31, %s5440_s24  ;;  %v1450_v31 = vld [vmem:[#allocation2 + $0xd2] sm:$0xff] }
 0x1f7   : > { %1366 = vrot.lane.b32.xlu0 %v1305_v46, %s5438_s17 }
 0x1f8   : > { %v6574_v40 = vpop.permute.xlu1 %1594 }
 0x1f9   : > { %9926 = vst [vmem:[#allocation93_spill] sm:$0xff] %v6574_v40  ;;  %v6576_v61 = vpop.permute.xlu0 %1736  ;;  %v6578_v21 = vpop.permute.xlu2 %1492 }
 0x1fa   : > { %9927 = vst [vmem:[#allocation94_spill] sm:$0xff] %v6576_v61  ;;  %v6717_v61 = vld [vmem:[#allocation2 + $0x8c] sm:$0xff] }
 0x1fb   : > { %9928 = vst [vmem:[#allocation95_spill] sm:$0xff] %v6578_v21  ;;  %v1307_v21 = vld [vmem:[#allocation2 + $0xd9] sm:$0xff] }
 0x1fe   : > { %1368 = vrot.lane.b32.xlu1 %v1306_v41, %s5438_s17  ;;  %1510 = vrot.lane.b32.xlu2 %v1449_v4, %s5439_s18 }
 0x1ff   : > { %1616 = vrot.lane.b32.xlu0 %v1449_v4, %s5441_s25 }
 0x200   : > { %v6583_v57 = vpop.permute.xlu1 %1738 }
 0x201   : > { %9929 = vst [vmem:[#allocation96_spill] sm:$0xff] %v6583_v57  ;;  %v6585_v46 = vpop.permute.xlu0 %1488  ;;  %v6587_v54 = vpop.permute.xlu2 %1352 }
 0x202   : > { %9930 = vst [vmem:[#allocation97_spill] sm:$0xff] %v6585_v46 }
 0x203   : > { %9931 = vst [vmem:[#allocation98_spill] sm:$0xff] %v6587_v54  ;;  %v1451_v54 = vld [vmem:[#allocation2 + $0xda] sm:$0xff] }
 0x206   : > { %1618 = vrot.lane.b32.xlu1 %v1450_v31, %s5441_s25  ;;  %1370 = vrot.lane.b32.xlu2 %v1307_v21, %s5438_s17  ;;  %v1308_v21 = vld [vmem:[#allocation2 + $0xe1] sm:$0xff] }
 0x207   : > { %1760 = vrot.lane.b32.xlu0 %v6344_v63, %s5440_s24 }
 0x208   : > { %v6593_v41 = vpop.permute.xlu1 %1490 }
 0x209   : > { %9932 = vst [vmem:[#allocation99_spill] sm:$0xff] %v6593_v41  ;;  %v6595_v40 = vpop.permute.xlu0 %1348  ;;  %v6597_v4 = vpop.permute.xlu2 %1602  ;;  %v6701_v41 = vld [vmem:[#allocation2 + $0x84] sm:$0xff] }
 0x20a   : > { %9933 = vst [vmem:[#allocation100_spill] sm:$0xff] %v6595_v40  ;;  %v1309_v40 = vld [vmem:[#allocation2 + $0xe9] sm:$0xff] }
 0x20b   : > { %9934 = vst [vmem:[#allocation101_spill] sm:$0xff] %v6597_v4 }
 0x20e   : > { %1762 = vrot.lane.b32.xlu1 %v6367_v48, %s5440_s24  ;;  %1620 = vrot.lane.b32.xlu2 %v1451_v54, %s5441_s25 }
 0x20f   : > { %1512 = vrot.lane.b32.xlu0 %v1450_v31, %s5439_s18 }
 0x210   : > { %v6603_v46 = vpop.permute.xlu1 %1350 }
 0x211   : > { %9935 = vst [vmem:[#allocation102_spill] sm:$0xff] %v6603_v46  ;;  %v6605_v63 = vpop.permute.xlu0 %1598  ;;  %v6607_v57 = vpop.permute.xlu2 %1746  ;;  %v1452_v46 = vld [vmem:[#allocation2 + $0xe2] sm:$0xff] }
 0x212   : > { %9936 = vst [vmem:[#allocation103_spill] sm:$0xff] %v6605_v63  ;;  %v6699_v63 = vld [vmem:[#allocation2 + $0x74] sm:$0xff] }
 0x213   : > { %9937 = vst [vmem:[#allocation104_spill] sm:$0xff] %v6607_v57 }
 0x216   : > { %1514 = vrot.lane.b32.xlu1 %v1451_v54, %s5439_s18  ;;  %1764 = vrot.lane.b32.xlu2 %v6388_v15, %s5440_s24  ;;  %v1454_v15 = vld [vmem:[#allocation2 + $0xf2] sm:$0xff] }
 0x217   : > { %1372 = vrot.lane.b32.xlu0 %v1308_v21, %s5438_s17 }
 0x218   : > { %v6613_v48 = vpop.permute.xlu1 %1600 }
 0x219   : > { %9938 = vst [vmem:[#allocation105_spill] sm:$0xff] %v6613_v48  ;;  %v6615_v31 = vpop.permute.xlu0 %1742  ;;  %v6617_v4 = vpop.permute.xlu2 %1498  ;;  %v6689_v48 = vld [vmem:[#allocation2 + $0x7c] sm:$0xff] }
 0x21a   : > { %9939 = vst [vmem:[#allocation106_spill] sm:$0xff] %v6615_v31 }
 0x21b   : > { %9940 = vst [vmem:[#allocation107_spill] sm:$0xff] %v6617_v4  ;;  %v1310_v4 = vld [vmem:[#allocation2 + $0xf1] sm:$0xff] }
 0x21e   : > { %1374 = vrot.lane.b32.xlu1 %v1309_v40, %s5438_s17  ;;  %1516 = vrot.lane.b32.xlu2 %v1452_v46, %s5439_s18 }
 0x21f   : > { %1622 = vrot.lane.b32.xlu0 %v1452_v46, %s5441_s25 }
 0x220   : > { %v6622_v54 = vpop.permute.xlu1 %1744 }
 0x221   : > { %9941 = vst [vmem:[#allocation108_spill] sm:$0xff] %v6622_v54  ;;  %v6624_v21 = vpop.permute.xlu0 %1494  ;;  %v6626_v57 = vpop.permute.xlu2 %1358  ;;  %v1453_v54 = vld [vmem:[#allocation2 + $0xea] sm:$0xff] }
 0x222   : > { %9942 = vst [vmem:[#allocation109_spill] sm:$0xff] %v6624_v21 }
 0x223   : > { %9943 = vst [vmem:[#allocation110_spill] sm:$0xff] %v6626_v57 }
 0x226   : > { %1520 = vrot.lane.b32.xlu1 %v1454_v15, %s5439_s18  ;;  %1376 = vrot.lane.b32.xlu2 %v1310_v4, %s5438_s17  ;;  %v6647_v4 = vld [vmem:[#allocation2 + $0x3c] sm:$0xff] }
 0x227   : > { %1766 = vrot.lane.b32.xlu0 %v6410_v26, %s5440_s24 }
 0x228   : > { %v6632_v40 = vpop.permute.xlu1 %1496 }
 0x229   : > { %9944 = vst [vmem:[#allocation111_spill] sm:$0xff] %v6632_v40  ;;  %v6634_v31 = vpop.permute.xlu0 %1354  ;;  %v6636_v46 = vpop.permute.xlu2 %1608  ;;  %v6665_v40 = vld [vmem:[#allocation2 + $0x54] sm:$0xff] }
 0x22a   : > { %9945 = vst [vmem:[#allocation112_spill] sm:$0xff] %v6634_v31 }
 0x22b   : > { %9946 = vst [vmem:[#allocation113_spill] sm:$0xff] %v6636_v46  ;;  %v6653_v46 = vld [vmem:[#allocation2 + $0x4c] sm:$0xff] }
 0x22e   : > { %1624 = vrot.lane.b32.xlu1 %v1453_v54, %s5441_s25  ;;  %1626 = vrot.lane.b32.xlu2 %v1454_v15, %s5441_s25 }
 0x22f   : > { %1518 = vrot.lane.b32.xlu0 %v1453_v54, %s5439_s18 }
 0x230   : > { %v6641_v57 = vpop.permute.xlu1 %1356 }
 0x231   : > { %9947 = vst [vmem:[#allocation114_spill] sm:$0xff] %v6641_v57  ;;  %v6643_v21 = vpop.permute.xlu0 %1604  ;;  %v6645_v26 = vpop.permute.xlu2 %1752 }
 0x232   : > { %9948 = vst [vmem:[#allocation115_spill] sm:$0xff] %v6643_v21  ;;  %v6683_v21 = vld [vmem:[#allocation2 + $0x6c] sm:$0xff] }
 0x233   : > { %9949 = vst [vmem:[#allocation116_spill] sm:$0xff] %v6645_v26  ;;  %v6663_v26 = vld [vmem:[#allocation2 + $0x44] sm:$0xff] }
 0x236   : > { %1768 = vrot.lane.b32.xlu1 %v6430_v50, %s5440_s24  ;;  %1872 = vrot.lane.b32.xlu2 %v6653_v46, %s5442_s26  ;;  %v6671_v50 = vld [vmem:[#allocation2 + $0x64] sm:$0xff] }
 0x237   : > { %1868 = vrot.lane.b32.xlu0 %v6647_v4, %s5442_s26 }
 0x238   : > { %v6657_v54 = vpop.permute.xlu1 %1606 }
 0x239   : > { %9950 = vst [vmem:[#allocation117_spill] sm:$0xff] %v6657_v54  ;;  %v6659_v15 = vpop.permute.xlu0 %1748  ;;  %v6661_v57 = vpop.permute.xlu2 %1504 }
 0x23a   : > { %9951 = vst [vmem:[#allocation118_spill] sm:$0xff] %v6659_v15  ;;  %v6681_v15 = vld [vmem:[#allocation2 + $0x5c] sm:$0xff] }
 0x23b   : > { %9952 = vst [vmem:[#allocation119_spill] sm:$0xff] %v6661_v57 }
 0x23e   : > { %1870 = vrot.lane.b32.xlu1 %v6663_v26, %s5442_s26  ;;  %1878 = vrot.lane.b32.xlu2 %v6671_v50, %s5442_s26 }
 0x23f   : > { %1874 = vrot.lane.b32.xlu0 %v6665_v40, %s5442_s26 }
 0x240   : > { %v6675_v54 = vpop.permute.xlu1 %1750 }
 0x241   : > { %9953 = vst [vmem:[#allocation120_spill] sm:$0xff] %v6675_v54  ;;  %v6677_v31 = vpop.permute.xlu0 %1500  ;;  %v6679_v57 = vpop.permute.xlu2 %1364 }
 0x242   : > { %9954 = vst [vmem:[#allocation121_spill] sm:$0xff] %v6677_v31 }
 0x243   : > { %9955 = vst [vmem:[#allocation122_spill] sm:$0xff] %v6679_v57 }
 0x246   : > { %1876 = vrot.lane.b32.xlu1 %v6681_v15, %s5442_s26  ;;  %1884 = vrot.lane.b32.xlu2 %v6689_v48, %s5442_s26 }
 0x247   : > { %1880 = vrot.lane.b32.xlu0 %v6683_v21, %s5442_s26 }
 0x248   : > { %v6693_v54 = vpop.permute.xlu1 %1502 }
 0x249   : > { %9956 = vst [vmem:[#allocation123_spill] sm:$0xff] %v6693_v54  ;;  %v6695_v31 = vpop.permute.xlu0 %1360  ;;  %v6697_v57 = vpop.permute.xlu2 %1614 }
 0x24a   : > { %9957 = vst [vmem:[#allocation124_spill] sm:$0xff] %v6695_v31 }
 0x24b   : > { %9958 = vst [vmem:[#allocation125_spill] sm:$0xff] %v6697_v57 }
 0x24e   : > { %1882 = vrot.lane.b32.xlu1 %v6699_v63, %s5442_s26  ;;  %1890 = vrot.lane.b32.xlu2 %v6707_v36, %s5442_s26 }
 0x24f   : > { %1886 = vrot.lane.b32.xlu0 %v6701_v41, %s5442_s26 }
 0x250   : > { %v6711_v54 = vpop.permute.xlu1 %1362 }
 0x251   : > { %9959 = vst [vmem:[#allocation126_spill] sm:$0xff] %v6711_v54  ;;  %v6713_v31 = vpop.permute.xlu0 %1610  ;;  %v6715_v57 = vpop.permute.xlu2 %1758 }
 0x252   : > { %9960 = vst [vmem:[#allocation127_spill] sm:$0xff] %v6713_v31 }
 0x253   : > { %9961 = vst [vmem:[#allocation128_spill] sm:$0xff] %v6715_v57 }
 0x256   : > { %1888 = vrot.lane.b32.xlu1 %v6717_v61, %s5442_s26  ;;  %1896 = vrot.lane.b32.xlu2 %v6725_v8, %s5442_s26 }
 0x257   : > { %1892 = vrot.lane.b32.xlu0 %v6719_v5, %s5442_s26 }
 0x258   : > { %v6729_v54 = vpop.permute.xlu1 %1612 }
 0x259   : > { %9962 = vst [vmem:[#allocation129_spill] sm:$0xff] %v6729_v54  ;;  %v6731_v31 = vpop.permute.xlu0 %1754  ;;  %v6733_v57 = vpop.permute.xlu2 %1510 }
 0x25a   : > { %9963 = vst [vmem:[#allocation130_spill] sm:$0xff] %v6731_v31 }
 0x25b   : > { %9964 = vst [vmem:[#allocation131_spill] sm:$0xff] %v6733_v57 }
 0x25e   : > { %1894 = vrot.lane.b32.xlu1 %v6735_v53, %s5442_s26  ;;  %1902 = vrot.lane.b32.xlu2 %v6743_v6, %s5442_s26 }
 0x25f   : > { %1898 = vrot.lane.b32.xlu0 %v6737_v38, %s5442_s26 }
 0x260   : > { %v6747_v54 = vpop.permute.xlu1 %1756 }
 0x261   : > { %9965 = vst [vmem:[#allocation132_spill] sm:$0xff] %v6747_v54  ;;  %v6749_v31 = vpop.permute.xlu0 %1506  ;;  %v6751_v57 = vpop.permute.xlu2 %1370 }
 0x262   : > { %9966 = vst [vmem:[#allocation133_spill] sm:$0xff] %v6749_v31 }
 0x263   : > { %9967 = vst [vmem:[#allocation134_spill] sm:$0xff] %v6751_v57 }
 0x266   : > { %1900 = vrot.lane.b32.xlu1 %v6753_v20, %s5442_s26  ;;  %1908 = vrot.lane.b32.xlu2 %v6761_v52, %s5442_s26 }
 0x267   : > { %1904 = vrot.lane.b32.xlu0 %v6755_v17, %s5442_s26 }
 0x268   : > { %v6765_v54 = vpop.permute.xlu1 %1508 }
 0x269   : > { %9968 = vst [vmem:[#allocation135_spill] sm:$0xff] %v6765_v54  ;;  %v6767_v31 = vpop.permute.xlu0 %1366  ;;  %v6769_v57 = vpop.permute.xlu2 %1620 }
 0x26a   : > { %9969 = vst [vmem:[#allocation136_spill] sm:$0xff] %v6767_v31 }
 0x26b   : > { %9970 = vst [vmem:[#allocation137_spill] sm:$0xff] %v6769_v57 }
 0x26e   : > { %1906 = vrot.lane.b32.xlu1 %v6771_v33, %s5442_s26  ;;  %1914 = vrot.lane.b32.xlu2 %v6779_v10, %s5442_s26 }
 0x26f   : > { %1910 = vrot.lane.b32.xlu0 %v6773_v12, %s5442_s26 }
 0x270   : > { %v6783_v54 = vpop.permute.xlu1 %1368 }
 0x271   : > { %9971 = vst [vmem:[#allocation138_spill] sm:$0xff] %v6783_v54  ;;  %v6785_v31 = vpop.permute.xlu0 %1616  ;;  %v6787_v57 = vpop.permute.xlu2 %1764 }
 0x272   : > { %9972 = vst [vmem:[#allocation139_spill] sm:$0xff] %v6785_v31 }
 0x273   : > { %9973 = vst [vmem:[#allocation140_spill] sm:$0xff] %v6787_v57 }
 0x276   : > { %1912 = vrot.lane.b32.xlu1 %v6789_v59, %s5442_s26  ;;  %1920 = vrot.lane.b32.xlu2 %v6797_v35, %s5442_s26 }
 0x277   : > { %1916 = vrot.lane.b32.xlu0 %v6791_v2, %s5442_s26 }
 0x278   : > { %v6801_v54 = vpop.permute.xlu1 %1618 }
 0x279   : > { %9974 = vst [vmem:[#allocation141_spill] sm:$0xff] %v6801_v54  ;;  %v6803_v31 = vpop.permute.xlu0 %1760  ;;  %v6805_v57 = vpop.permute.xlu2 %1516 }
 0x27a   : > { %9975 = vst [vmem:[#allocation142_spill] sm:$0xff] %v6803_v31 }
 0x27b   : > { %9976 = vst [vmem:[#allocation143_spill] sm:$0xff] %v6805_v57 }
 0x27e   : > { %1918 = vrot.lane.b32.xlu1 %v6807_v58, %s5442_s26  ;;  %1926 = vrot.lane.b32.xlu2 %v6815_v45, %s5442_s26 }
 0x27f   : > { %1922 = vrot.lane.b32.xlu0 %v6809_v19, %s5442_s26  ;;  %v5414_v19 = vld [vmem:[#allocation2 + $0x2c] sm:$0xff] }
 0x280   : > { %v6819_v54 = vpop.permute.xlu1 %1762 }
 0x281   : > { %9979 = vst [vmem:[#allocation146_spill] sm:$0xff] %v6819_v54  ;;  %v6821_v31 = vpop.permute.xlu0 %1512  ;;  %v6823_v57 = vpop.permute.xlu2 %1376 }
 0x282   : > { %9980 = vst [vmem:[#allocation147_spill] sm:$0xff] %v6821_v31 }
 0x283   : > { %9981 = vst [vmem:[#allocation148_spill] sm:$0xff] %v6823_v57  ;;  %v5415_v57 = vld [vmem:[#allocation2 + $0x24] sm:$0xff] }
 0x286   : > { %1924 = vrot.lane.b32.xlu1 %v6825_v7, %s5442_s26  ;;  %1970 = vrot.lane.b32.xlu2 %v5414_v19, %s5443_s29 }
 0x287   : > { %1928 = vrot.lane.b32.xlu0 %v6827_v11, %s5442_s26  ;;  %s5451_s26 = smov 28  }
 0x288   : > { %v6834_v45 = vpop.permute.xlu1 %1514 }
 0x289   : > { %9984 = vst [vmem:[#allocation151_spill] sm:$0xff] %v6834_v45  ;;  %v6836_v54 = vpop.permute.xlu0 %1372  ;;  %v6838_v31 = vpop.permute.xlu2 %1626  ;;  %v2078_v45 = vld [vmem:[#allocation2 + $0x35] sm:$0xff] }
 0x28a   : > { %9985 = vst [vmem:[#allocation152_spill] sm:$0xff] %v6836_v54 }
 0x28b   : > { %9986 = vst [vmem:[#allocation153_spill] sm:$0xff] %v6838_v31  ;;  %v2223_v31 = vld [vmem:[#allocation2 + $0x3e] sm:$0xff] }
 0x28e   : > { %1968 = vrot.lane.b32.xlu1 %v5415_v57, %s5443_s29  ;;  %1976 = vrot.lane.b32.xlu2 %v6663_v26, %s5443_s29 }
 0x28f   : > { %1972 = vrot.lane.b32.xlu0 %v5416_v25, %s5443_s29 }
 0x290   : > { %v6844_v11 = vpop.permute.xlu1 %1374 }
 0x291   : > { %9987 = vst [vmem:[#allocation154_spill] sm:$0xff] %v6844_v11  ;;  %v6846_v7 = vpop.permute.xlu0 %1622  ;;  %v6848_v19 = vpop.permute.xlu2 %1872  ;;  %v2225_v11 = vld [vmem:[#allocation2 + $0x4e] sm:$0xff] }
 0x292   : > { %9988 = vst [vmem:[#allocation155_spill] sm:$0xff] %v6846_v7  ;;  %v2221_v7 = vld [vmem:[#allocation2 + $0x2e] sm:$0xff] }
 0x296   : > { %1974 = vrot.lane.b32.xlu1 %v6647_v4, %s5443_s29  ;;  %1982 = vrot.lane.b32.xlu2 %v6681_v15, %s5443_s29 }
 0x297   : > { %1978 = vrot.lane.b32.xlu0 %v6653_v46, %s5443_s29 }
 0x298   : > { %v6856_v57 = vpop.permute.xlu1 %1520 }
 0x299   : > { %9989 = vst [vmem:[#allocation156_spill] sm:$0xff] %v6856_v57  ;;  %v6858_v25 = vpop.permute.xlu0 %1766  ;;  %v6860_v26 = vpop.permute.xlu2 %1878  ;;  %v2222_v57 = vld [vmem:[#allocation2 + $0x36] sm:$0xff] }
 0x29a   : > { %9990 = vst [vmem:[#allocation157_spill] sm:$0xff] %v6858_v25  ;;  %v2220_v25 = vld [vmem:[#allocation2 + $0x26] sm:$0xff] }
 0x29b   : > { %9991 = vst [vmem:[#allocation158_spill] sm:$0xff] %v6860_v26 }
 0x29e   : > { %1980 = vrot.lane.b32.xlu1 %v6665_v40, %s5443_s29  ;;  %1988 = vrot.lane.b32.xlu2 %v6699_v63, %s5443_s29 }
 0x29f   : > { %1984 = vrot.lane.b32.xlu0 %v6671_v50, %s5443_s29 }
 0x2a0   : > { %v6868_v4 = vpop.permute.xlu1 %1624 }
 0x2a1   : > { %9992 = vst [vmem:[#allocation159_spill] sm:$0xff] %v6868_v4  ;;  %v6870_v46 = vpop.permute.xlu0 %1518  ;;  %v6872_v15 = vpop.permute.xlu2 %1884  ;;  %v2077_v4 = vld [vmem:[#allocation2 + $0x2d] sm:$0xff] }
 0x2a2   : > { %9993 = vst [vmem:[#allocation160_spill] sm:$0xff] %v6870_v46  ;;  %v2079_v46 = vld [vmem:[#allocation2 + $0x3d] sm:$0xff] }
 0x2a3   : > { %9994 = vst [vmem:[#allocation161_spill] sm:$0xff] %v6872_v15 }
 0x2a6   : > { %1986 = vrot.lane.b32.xlu1 %v6683_v21, %s5443_s29  ;;  %1994 = vrot.lane.b32.xlu2 %v6717_v61, %s5443_s29 }
 0x2a7   : > { %1990 = vrot.lane.b32.xlu0 %v6689_v48, %s5443_s29 }
 0x2a8   : > { %v6880_v40 = vpop.permute.xlu1 %1768 }
 0x2a9   : > { %9995 = vst [vmem:[#allocation162_spill] sm:$0xff] %v6880_v40  ;;  %v6882_v50 = vpop.permute.xlu0 %1868  ;;  %v6884_v63 = vpop.permute.xlu2 %1890  ;;  %v2076_v40 = vld [vmem:[#allocation2 + $0x25] sm:$0xff] }
 0x2aa   : > { %9996 = vst [vmem:[#allocation163_spill] sm:$0xff] %v6884_v63  ;;  %v2233_v63 = vld [vmem:[#allocation2 + $0x8e] sm:$0xff] }
 0x2ae   : > { %1992 = vrot.lane.b32.xlu1 %v6701_v41, %s5443_s29  ;;  %2114 = vrot.lane.b32.xlu2 %v2077_v4, %s5444_s30 }
 0x2af   : > { %1996 = vrot.lane.b32.xlu0 %v6707_v36, %s5443_s29 }
 0x2b0   : > { %v6891_v48 = vpop.permute.xlu1 %1870 }
 0x2b1   : > { %v6893_v21 = vpop.permute.xlu0 %1874  ;;  %v6895_v61 = vpop.permute.xlu2 %1896 }
 0x2b2   : > { %9997 = vst [vmem:[#allocation164_spill] sm:$0xff] %v6895_v61  ;;  %v2081_v61 = vld [vmem:[#allocation2 + $0x4d] sm:$0xff] }
 0x2b6   : > { %2112 = vrot.lane.b32.xlu1 %v2076_v40, %s5444_s30  ;;  %1998 = vrot.lane.b32.xlu2 %v6719_v5, %s5443_s29 }
 0x2b7   : > { %2256 = vrot.lane.b32.xlu0 %v2220_v25, %s5445_s11 }
 0x2b8   : > { %v6901_v36 = vpop.permute.xlu1 %1876 }
 0x2b9   : > { %v6903_v41 = vpop.permute.xlu0 %1880  ;;  %v6905_v4 = vpop.permute.xlu2 %1902 }
 0x2ba   : > { %9998 = vst [vmem:[#allocation165_spill] sm:$0xff] %v6903_v41 }
 0x2bb   : > { %9999 = vst [vmem:[#allocation166_spill] sm:$0xff] %v6905_v4  ;;  %v2080_v4 = vld [vmem:[#allocation2 + $0x45] sm:$0xff] }
 0x2be   : > { %2258 = vrot.lane.b32.xlu1 %v2221_v7, %s5445_s11  ;;  %2260 = vrot.lane.b32.xlu2 %v2222_v57, %s5445_s11 }
 0x2bf   : > { %2116 = vrot.lane.b32.xlu0 %v2078_v45, %s5444_s30 }
 0x2c0   : > { %v6910_v40 = vpop.permute.xlu1 %1882 }
 0x2c1   : > { %10000 = vst [vmem:[#allocation167_spill] sm:$0xff] %v6910_v40  ;;  %v6912_v25 = vpop.permute.xlu0 %1886  ;;  %v6914_v5 = vpop.permute.xlu2 %1908  ;;  %v5417_v40 = vld [vmem:[#allocation2] sm:$0xff] }
 0x2c2   : > { %10001 = vst [vmem:[#allocation168_spill] sm:$0xff] %v6912_v25  ;;  %v5011_v25 = vld [vmem:[%s9539_s4] sm:$0xff] }
 0x2c3   : > { %10002 = vst [vmem:[#allocation169_spill] sm:$0xff] %v6914_v5  ;;  %v2224_v5 = vld [vmem:[#allocation2 + $0x46] sm:$0xff] }
 0x2c6   : > { %2118 = vrot.lane.b32.xlu1 %v2079_v46, %s5444_s30  ;;  %2002 = vrot.lane.b32.xlu2 %v6725_v8, %s5443_s29 }
 0x2c7   : > { %2262 = vrot.lane.b32.xlu0 %v2223_v31, %s5445_s11 }
 0x2c8   : > { %v6920_v7 = vpop.permute.xlu1 %1888 }
 0x2c9   : > { %10003 = vst [vmem:[#allocation170_spill] sm:$0xff] %v6920_v7  ;;  %v6922_v45 = vpop.permute.xlu0 %1892  ;;  %v6924_v57 = vpop.permute.xlu2 %1914 }
 0x2ca   : > { %10004 = vst [vmem:[#allocation171_spill] sm:$0xff] %v6922_v45  ;;  %v2089_v45 = vld [vmem:[#allocation2 + $0x8d] sm:$0xff] }
 0x2cb   : > { %10005 = vst [vmem:[#allocation172_spill] sm:$0xff] %v6924_v57  ;;  %v2082_v57 = vld [vmem:[#allocation2 + $0x55] sm:$0xff] }
 0x2ce   : > { %2000 = vrot.lane.b32.xlu1 %v6735_v53, %s5443_s29  ;;  %2264 = vrot.lane.b32.xlu2 %v2224_v5, %s5445_s11 }
 0x2cf   : > { %2120 = vrot.lane.b32.xlu0 %v2080_v4, %s5444_s30 }
 0x2d0   : > { %v6930_v46 = vpop.permute.xlu1 %1894 }
 0x2d1   : > { %10006 = vst [vmem:[#allocation173_spill] sm:$0xff] %v6930_v46  ;;  %v6932_v31 = vpop.permute.xlu0 %1898  ;;  %v6934_v8 = vpop.permute.xlu2 %1920  ;;  %v2083_v46 = vld [vmem:[#allocation2 + $0x5d] sm:$0xff] }
 0x2d2   : > { %10007 = vst [vmem:[#allocation174_spill] sm:$0xff] %v6932_v31  ;;  %v2226_v31 = vld [vmem:[#allocation2 + $0x56] sm:$0xff] }
 0x2d3   : > { %10008 = vst [vmem:[#allocation175_spill] sm:$0xff] %v6934_v8  ;;  %v2227_v8 = vld [vmem:[#allocation2 + $0x5e] sm:$0xff] }
 0x2d6   : > { %2122 = vrot.lane.b32.xlu1 %v2081_v61, %s5444_s30  ;;  %2124 = vrot.lane.b32.xlu2 %v2082_v57, %s5444_s30 }
 0x2d7   : > { %2266 = vrot.lane.b32.xlu0 %v2225_v11, %s5445_s11 }
 0x2d8   : > { %v6939_v53 = vpop.permute.xlu1 %1900 }
 0x2d9   : > { %10009 = vst [vmem:[#allocation176_spill] sm:$0xff] %v6939_v53  ;;  %v6941_v4 = vpop.permute.xlu0 %1904  ;;  %v6943_v5 = vpop.permute.xlu2 %1926 }
 0x2da   : > { %10010 = vst [vmem:[#allocation177_spill] sm:$0xff] %v6941_v4  ;;  %v2228_v4 = vld [vmem:[#allocation2 + $0x66] sm:$0xff] }
 0x2db   : > { %10011 = vst [vmem:[#allocation178_spill] sm:$0xff] %v6943_v5  ;;  %v2085_v5 = vld [vmem:[#allocation2 + $0x6d] sm:$0xff] }
 0x2de   : > { %2004 = vrot.lane.b32.xlu1 %v6737_v38, %s5443_s29  ;;  %2270 = vrot.lane.b32.xlu2 %v2227_v8, %s5445_s11 }
 0x2df   : > { %2126 = vrot.lane.b32.xlu0 %v2083_v46, %s5444_s30 }
 0x2e0   : > { %v6949_v61 = vpop.permute.xlu1 %1906 }
 0x2e1   : > { %10012 = vst [vmem:[#allocation179_spill] sm:$0xff] %v6949_v61  ;;  %v6951_v11 = vpop.permute.xlu0 %1910  ;;  %v6953_v57 = vpop.permute.xlu2 %1970  ;;  %v2084_v61 = vld [vmem:[#allocation2 + $0x65] sm:$0xff] }
 0x2e2   : > { %10013 = vst [vmem:[#allocation180_spill] sm:$0xff] %v6951_v11  ;;  %v2229_v11 = vld [vmem:[#allocation2 + $0x6e] sm:$0xff] }
 0x2e6   : > { %2268 = vrot.lane.b32.xlu1 %v2226_v31, %s5445_s11  ;;  %2130 = vrot.lane.b32.xlu2 %v2085_v5, %s5444_s30 }
 0x2e7   : > { %2006 = vrot.lane.b32.xlu0 %v6753_v20, %s5443_s29 }
 0x2e8   : > { %v6959_v38 = vpop.permute.xlu1 %1912 }
 0x2e9   : > { %10014 = vst [vmem:[#allocation181_spill] sm:$0xff] %v6959_v38  ;;  %v6961_v46 = vpop.permute.xlu0 %1916  ;;  %v6963_v8 = vpop.permute.xlu2 %1976  ;;  %v5018_v38 = vld [vmem:[%s9539_s4 + $0x38] sm:$0xff] }
 0x2ea   : > { %10015 = vst [vmem:[#allocation182_spill] sm:$0xff] %v6961_v46  ;;  %2446 = vmatpush.bf16.msra.mxu1 %v5018_v38  ;;  %5124 = vmatpush.bf16.msrb.mxu3 %v5018_v38  ;;  %v2230_v38 = vld [vmem:[#allocation2 + $0x76] sm:$0xff] }
 0x2ee   : > { %2128 = vrot.lane.b32.xlu1 %v2084_v61, %s5444_s30  ;;  %2008 = vrot.lane.b32.xlu2 %v6743_v6, %s5443_s29 }
 0x2ef   : > { %2272 = vrot.lane.b32.xlu0 %v2228_v4, %s5445_s11  ;;  %v2087_v4 = vld [vmem:[#allocation2 + $0x7d] sm:$0xff] }
 0x2f0   : > { %v6969_v31 = vpop.permute.xlu1 %1918 }
 0x2f1   : > { %10016 = vst [vmem:[#allocation183_spill] sm:$0xff] %v6969_v31  ;;  %v6971_v20 = vpop.permute.xlu0 %1922  ;;  %v6973_v5 = vpop.permute.xlu2 %1982  ;;  %v5017_v31 = vld [vmem:[%s9539_s4 + $0x30] sm:$0xff] }
 0x2f2   : > { %10017 = vst [vmem:[#allocation184_spill] sm:$0xff] %v6971_v20  ;;  %2447 = vmatpush.bf16.msra.mxu1 %v5017_v31  ;;  %5125 = vmatpush.bf16.msrb.mxu3 %v5017_v31  ;;  %v5015_v31 = vld [vmem:[%s9539_s4 + $0x20] sm:$0xff] }
 0x2f6   : > { %2274 = vrot.lane.b32.xlu1 %v2229_v11, %s5445_s11  ;;  %2134 = vrot.lane.b32.xlu2 %v2087_v4, %s5444_s30  ;;  %v5016_v11 = vld [vmem:[%s9539_s4 + $0x28] sm:$0xff] }
 0x2f7   : > { %2010 = vrot.lane.b32.xlu0 %v6755_v17, %s5443_s29  ;;  %v2086_v17 = vld [vmem:[#allocation2 + $0x75] sm:$0xff]  ;;  %2448 = vmatpush.bf16.msra.mxu1 %v5016_v11 }
 0x2f8   : > { %v6982_v6 = vpop.permute.xlu1 %1924  ;;  %5126 = vmatpush.bf16.msrb.mxu3 %v5016_v11  ;;  %v2232_v11 = vld [vmem:[#allocation2 + $0x86] sm:$0xff] }
 0x2f9   : > { %10018 = vst [vmem:[#allocation185_spill] sm:$0xff] %v6982_v6  ;;  %v6984_v61 = vpop.permute.xlu0 %1928  ;;  %v6986_v20 = vpop.permute.xlu2 %1988 }
 0x2fa   : > { %10019 = vst [vmem:[#allocation186_spill] sm:$0xff] %v6984_v61 }
 0x2fb   : > { %10020 = vst [vmem:[#allocation187_spill] sm:$0xff] %v6986_v20  ;;  %2449 = vmatpush.bf16.msra.mxu1 %v5015_v31 }
 0x2fc   : > { %5127 = vmatpush.bf16.msrb.mxu3 %v5015_v31  ;;  %v5013_v31 = vld [vmem:[%s9539_s4 + $0x10] sm:$0xff] }
 0x2fe   : > { %2132 = vrot.lane.b32.xlu1 %v2086_v17, %s5444_s30  ;;  %2012 = vrot.lane.b32.xlu2 %v6771_v33, %s5443_s29  ;;  %v5014_v17 = vld [vmem:[%s9539_s4 + $0x18] sm:$0xff]  ;;  %v2088_v33 = vld [vmem:[#allocation2 + $0x85] sm:$0xff] }
 0x2ff   : > { %2276 = vrot.lane.b32.xlu0 %v2230_v38, %s5445_s11  ;;  %v2231_v38 = vld [vmem:[#allocation2 + $0x7e] sm:$0xff]  ;;  %2450 = vmatpush.bf16.msra.mxu1 %v5014_v17 }
 0x300   : > { %v6998_v4 = vpop.permute.xlu1 %1968  ;;  %5128 = vmatpush.bf16.msrb.mxu3 %v5014_v17  ;;  %v2090_v17 = vld [vmem:[#allocation2 + $0x95] sm:$0xff] }
 0x301   : > { %v7000_v61 = vpop.permute.xlu0 %1972  ;;  %v7002_v6 = vpop.permute.xlu2 %1994 }
 0x302   : > { %10021 = vst [vmem:[#allocation188_spill] sm:$0xff] %v7002_v6  ;;  %v5350_v6 = vunpack.i.h.bf16 %v6113_v13 }
 0x303   : > { %2451 = vmatpush.bf16.msra.mxu1 %v5013_v31 }
 0x304   : > { %5129 = vmatpush.bf16.msrb.mxu3 %v5013_v31  ;;  %v2091_v31 = vld [vmem:[#allocation2 + $0x9d] sm:$0xff]  ;;  %v1389_v20 = vadd.f32 %v5417_v40, %v5350_v6 }
 0x306   : > { %2278 = vrot.lane.b32.xlu1 %v2231_v38, %s5445_s11  ;;  %2280 = vrot.lane.b32.xlu2 %v2232_v11, %s5445_s11  ;;  %v5012_v38 = vld [vmem:[%s9539_s4 + $0x8] sm:$0xff] }
 0x307   : > { %2136 = vrot.lane.b32.xlu0 %v2088_v33, %s5444_s30  ;;  %2452 = vmatpush.bf16.msra.mxu1 %v5012_v38 }
 0x308   : > { %v7013_v53 = vpop.permute.xlu1 %1974  ;;  %5130 = vmatpush.bf16.msrb.mxu3 %v5012_v38 }
 0x309   : > { %v7015_v46 = vpop.permute.xlu0 %1978  ;;  %v7017_v54 = vpop.permute.xlu2 %2114 }
 0x30b   : > { %2453 = vmatpush.bf16.msra.mxu1 %v5011_v25 }
 0x30c   : > { %5131 = vmatpush.bf16.msrb.mxu3 %v5011_v25  ;;  %v5354_v25 = vunpack.i.l.bf16 %v6022_v9 }
 0x30e   : > { %2138 = vrot.lane.b32.xlu1 %v2089_v45, %s5444_s30  ;;  %2140 = vrot.lane.b32.xlu2 %v2090_v17, %s5444_s30  ;;  %v5349_v17 = vunpack.i.l.bf16 %v6113_v13 }
 0x30f   : > { %2282 = vrot.lane.b32.xlu0 %v2233_v63, %s5445_s11  ;;  %v2235_v63 = vld [vmem:[#allocation2 + $0x9e] sm:$0xff] }
 0x310   : > { %v7028_v33 = vpop.permute.xlu1 %1980  ;;  %v1388_v15 = vadd.f32 %v5417_v40, %v5349_v17 }
 0x311   : > { %v7030_v11 = vpop.permute.xlu0 %1984  ;;  %v7032_v7 = vpop.permute.xlu2 %1998 }
 0x312   : > { %10022 = vst [vmem:[#allocation189_spill] sm:$0xff] %v7032_v7  ;;  %v1532_v41 = vadd.f32 %v5354_v25, %v1388_v15 }
 0x316   : > { %2014 = vrot.lane.b32.xlu1 %v6761_v52, %s5443_s29  ;;  %2286 = vrot.lane.b32.xlu2 %v2235_v63, %s5445_s11  ;;  %v2234_v52 = vld [vmem:[#allocation2 + $0x96] sm:$0xff]  ;;  %v5355_v63 = vunpack.i.h.bf16 %v6022_v9  ;;  %v2237_v9 = vld [vmem:[#allocation2 + $0xae] sm:$0xff] }
 0x317   : > { %2142 = vrot.lane.b32.xlu0 %v2091_v31, %s5444_s30  ;;  %v2092_v31 = vld [vmem:[#allocation2 + $0xa5] sm:$0xff] }
 0x318   : > { %v7041_v45 = vpop.permute.xlu1 %1986  ;;  %v1533_v17 = vadd.f32 %v5355_v63, %v1389_v20 }
 0x319   : > { %10023 = vst [vmem:[#allocation190_spill] sm:$0xff] %v7041_v45  ;;  %v7044_v38 = vpop.permute.xlu0 %1990  ;;  %v7046_v7 = vpop.permute.xlu2 %2260  ;;  %v1642_v45 = vadd.f32 %v6137_v23, %v1532_v41 }
 0x31a   : > { %10024 = vst [vmem:[#allocation191_spill] sm:$0xff] %v7044_v38 }
 0x31b   : > { %v1786_v40 = vadd.f32 %v6163_v47, %v1642_v45 }
 0x31d   : > { %v1930_v20 = vadd.f32 %v6247_v37, %v1786_v40 }
 0x31e   : > { %2284 = vrot.lane.b32.xlu1 %v2234_v52, %s5445_s11  ;;  %2144 = vrot.lane.b32.xlu2 %v2092_v31, %s5444_s30  ;;  %v2093_v52 = vld [vmem:[#allocation2 + $0xad] sm:$0xff] }
 0x31f   : > { %2016 = vrot.lane.b32.xlu0 %v6773_v12, %s5443_s29  ;;  %v1643_v12 = vadd.f32 %v6083_v34, %v1533_v17  ;;  %v2236_v34 = vld [vmem:[#allocation2 + $0xa6] sm:$0xff]  ;;  %v1247_v17 = vld [vmem:[#allocation2 + $0x18] sm:$0xff] }
 0x320   : > { %v7055_v38 = vpop.permute.xlu1 %1992  ;;  %v1391_v47 = vadd.f32 %v6195_v3, %v1247_v17  ;;  %v2096_v17 = vld [vmem:[#allocation2 + $0xc5] sm:$0xff] }
 0x321   : > { %v7057_v13 = vpop.permute.xlu0 %1996  ;;  %v7059_v26 = vpop.permute.xlu2 %2002  ;;  %v1787_v6 = vadd.f32 %v6116_v49, %v1643_v12  ;;  %v2095_v49 = vld [vmem:[#allocation2 + $0xbd] sm:$0xff] }
 0x323   : > { %v1931_v41 = vadd.f32 %v6200_v1, %v1787_v6  ;;  %v1246_v1 = vld [vmem:[#allocation2 + $0x10] sm:$0xff] }
 0x325   : > { %v2041_v31 = vadd.f32 %v6953_v57, %v1931_v41  ;;  %v1535_v57 = vadd.f32 %v6221_v27, %v1391_v47  ;;  %v2238_v41 = vld [vmem:[#allocation2 + $0xb6] sm:$0xff] }
 0x326   : > { %2018 = vrot.lane.b32.xlu1 %v6789_v59, %s5443_s29  ;;  %2290 = vrot.lane.b32.xlu2 %v2237_v9, %s5445_s11  ;;  %v2040_v59 = vadd.f32 %v6998_v4, %v1930_v20  ;;  %v1390_v4 = vadd.f32 %v6140_v22, %v1246_v1  ;;  %v2094_v20 = vld [vmem:[#allocation2 + $0xb5] sm:$0xff] }
 0x327   : > { %2146 = vrot.lane.b32.xlu0 %v2093_v52, %s5444_s30  ;;  %v2185_v37 = vadd.f32 %v7017_v54, %v2041_v31 }
 0x328   : > { %v2113_v15 = vpop.permute.xlu1 %2112 }
 0x329   : > { %v2257_v25 = vpop.permute.xlu0 %2256  ;;  %v7070_v23 = vpop.permute.xlu2 %2264  ;;  %v2184_v63 = vadd.f32 %v2113_v15, %v2040_v59  ;;  %v1645_v15 = vadd.f32 %v6375_v29, %v1535_v57 }
 0x32b   : > { %v2328_v52 = vadd.f32 %v2257_v25, %v2184_v63  ;;  %v1789_v6 = vadd.f32 %v6397_v44, %v1645_v15 }
 0x32d   : > { %v1933_v27 = vadd.f32 %v6447_v0, %v1789_v6  ;;  %v2240_v0 = vld [vmem:[#allocation2 + $0xc6] sm:$0xff] }
 0x32e   : > { %2288 = vrot.lane.b32.xlu1 %v2236_v34, %s5445_s11  ;;  %2150 = vrot.lane.b32.xlu2 %v2095_v49, %s5444_s30  ;;  %v2239_v34 = vld [vmem:[#allocation2 + $0xbe] sm:$0xff] }
 0x32f   : > { %2020 = vrot.lane.b32.xlu0 %v6779_v10, %s5443_s29  ;;  %v1534_v10 = vadd.f32 %v6171_v28, %v1390_v4  ;;  %v1248_v49 = vld [vmem:[#allocation2 + $0x20] sm:$0xff] }
 0x330   : > { %v2259_v45 = vpop.permute.xlu1 %2258  ;;  %v2104_v6 = vld [vmem:[#allocation2 + $0x105] sm:$0xff] }
 0x331   : > { %v2329_v9 = vadd.f32 %v2259_v45, %v2185_v37  ;;  %v2117_v12 = vpop.permute.xlu0 %2116  ;;  %v7083_v40 = vpop.permute.xlu2 %2124  ;;  %v1644_v54 = vadd.f32 %v6277_v62, %v1534_v10  ;;  %v2043_v62 = vadd.f32 %v7013_v53, %v1933_v27 }
 0x333   : > { %v2364_v3 = vpack.c.bf16 %v2329_v9, %v2328_v52  ;;  %v1788_v22 = vadd.f32 %v6304_v30, %v1644_v54  ;;  %v1249_v30 = vld [vmem:[#allocation2 + $0x28] sm:$0xff] }
 0x334   : > { %v2097_v9 = vld [vmem:[#allocation2 + $0xcd] sm:$0xff] }
 0x335   : > { %2454 = vmatmul.bf16.vlgmr.msra.gmra.mxu1 %v2364_v3  ;;  %v1932_v29 = vadd.f32 %v6378_v42, %v1788_v22  ;;  %v1393_v42 = vadd.f32 %v6226_v32, %v1249_v30 }
 0x336   : > { %2148 = vrot.lane.b32.xlu1 %v2094_v20, %s5444_s30  ;;  %2022 = vrot.lane.b32.xlu2 %v6791_v2, %s5443_s29  ;;  %v1392_v2 = vadd.f32 %v6274_v55, %v1248_v49  ;;  %v1251_v20 = vld [vmem:[#allocation2 + $0x38] sm:$0xff]  ;;  %v10030_v49 = vld [vmem:[#allocation72_spill] sm:$0xff] }
 0x337   : > { %2292 = vrot.lane.b32.xlu0 %v2238_v41, %s5445_s11  ;;  %v2042_v59 = vadd.f32 %v7000_v61, %v1932_v29  ;;  %v1537_v61 = vadd.f32 %v6356_v39, %v1393_v42  ;;  %v10026_v29 = vld [vmem:[#allocation54_spill] sm:$0xff] }
 0x338   : > { %v2119_v28 = vpop.permute.xlu1 %2118  ;;  %v1536_v4 = vadd.f32 %v6173_v60, %v1392_v2 }
 0x339   : > { %v2263_v44 = vpop.permute.xlu0 %2262  ;;  %v7097_v25 = vpop.permute.xlu2 %2270  ;;  %v2187_v31 = vadd.f32 %v2119_v28, %v2043_v62  ;;  %v2186_v63 = vadd.f32 %v2117_v12, %v2042_v59  ;;  %v1647_v57 = vadd.f32 %v6459_v14, %v1537_v61  ;;  %v2241_v12 = vld [vmem:[#allocation2 + $0xce] sm:$0xff]  ;;  %v10027_v59 = vld [vmem:[#allocation65_spill] sm:$0xff] }
 0x33a   : > { %v1646_v32 = vadd.f32 %v6358_v18, %v1536_v4  ;;  %v10025_v28 = vld [vmem:[#allocation56_spill] sm:$0xff] }
 0x33b   : > { %v2331_v53 = vadd.f32 %v2263_v44, %v2187_v31  ;;  %v2330_v1 = vadd.f32 %v7046_v7, %v2186_v63  ;;  %v1791_v55 = vadd.f32 %v6468_v24, %v1647_v57  ;;  %v10028_v31 = vld [vmem:[#allocation69_spill] sm:$0xff] }
 0x33c   : > { %v1790_v39 = vadd.f32 %v6380_v56, %v1646_v32  ;;  %v2248_v56 = vld [vmem:[#allocation2 + $0x106] sm:$0xff]  ;;  %v2098_v32 = vld [vmem:[#allocation2 + $0xd5] sm:$0xff] }
 0x33d   : > { %v2365_v52 = vpack.c.bf16 %v2331_v53, %v2330_v1  ;;  %v1935_v7 = vadd.f32 %v6882_v50, %v1791_v55  ;;  %v1250_v50 = vld [vmem:[#allocation2 + $0x30] sm:$0xff] }
 0x33e   : > { %2294 = vrot.lane.b32.xlu1 %v2239_v34, %s5445_s11  ;;  %2296 = vrot.lane.b32.xlu2 %v2240_v0, %s5445_s11  ;;  %v1934_v14 = vadd.f32 %v6441_v16, %v1790_v39  ;;  %v2105_v34 = vld [vmem:[#allocation2 + $0x10d] sm:$0xff]  ;;  %v2242_v55 = vld [vmem:[#allocation2 + $0xd6] sm:$0xff] }
 0x33f   : > { %2152 = vrot.lane.b32.xlu0 %v2096_v17, %s5444_s30  ;;  %v2045_v18 = vadd.f32 %v7015_v46, %v1935_v7  ;;  %v2249_v17 = vld [vmem:[#allocation2 + $0x10e] sm:$0xff] }
 0x340   : > { %v7105_v47 = vpop.permute.xlu1 %2000  ;;  %v2044_v15 = vadd.f32 %v6963_v8, %v1934_v14  ;;  %v1394_v8 = vadd.f32 %v6331_v51, %v1250_v50  ;;  %v2099_v51 = vld [vmem:[#allocation2 + $0xdd] sm:$0xff]  ;;  %v10032_v39 = vld [vmem:[#allocation144_spill] sm:$0xff]  ;;  %v1253_v7 = vld [vmem:[#allocation2 + $0x48] sm:$0xff] }
 0x341   : > { %v2121_v37 = vpop.permute.xlu0 %2120  ;;  %v7109_v45 = vpop.permute.xlu2 %2130  ;;  %v2243_v50 = vld [vmem:[#allocation2 + $0xde] sm:$0xff] }
 0x342   : > { %v2188_v54 = vadd.f32 %v2121_v37, %v2044_v15 }
 0x344   : > { %v2332_v22 = vadd.f32 %v7070_v23, %v2188_v54  ;;  %v10029_v23 = vld [vmem:[#allocation68_spill] sm:$0xff] }
 0x345   : > { %2459 = vmatmul.bf16.gmra.mxu1 %v2365_v52 }
 0x346   : > { %2154 = vrot.lane.b32.xlu1 %v2097_v9, %s5444_s30  ;;  %2026 = vrot.lane.b32.xlu2 %v6797_v35, %s5443_s29  ;;  %v1395_v35 = vadd.f32 %v6449_v43, %v1251_v20  ;;  %v1252_v9 = vld [vmem:[#allocation2 + $0x40] sm:$0xff]  ;;  %v10036_v20 = vld [vmem:[#allocation79_spill] sm:$0xff] }
 0x347   : > { %2298 = vrot.lane.b32.xlu0 %v2241_v12, %s5445_s11 }
 0x348   : > { %v2123_v60 = vpop.permute.xlu1 %2122  ;;  %v1539_v62 = vadd.f32 %v10026_v29, %v1395_v35  ;;  %v10037_v35 = vld [vmem:[#allocation81_spill] sm:$0xff] }
 0x349   : > { %v2267_v24 = vpop.permute.xlu0 %2266  ;;  %v7123_v10 = vpop.permute.xlu2 %2008  ;;  %v2189_v3 = vadd.f32 %v2123_v60, %v2045_v18  ;;  %v10033_v60 = vld [vmem:[#allocation62_spill] sm:$0xff] }
 0x34a   : > { %v1649_v43 = vadd.f32 %v10027_v59, %v1539_v62 }
 0x34b   : > { %v2333_v16 = vadd.f32 %v2267_v24, %v2189_v3  ;;  %v10034_v24 = vld [vmem:[#allocation67_spill] sm:$0xff] }
 0x34c   : > { %v1793_v30 = vadd.f32 %v10029_v23, %v1649_v43  ;;  %v10035_v3 = vld [vmem:[#allocation75_spill] sm:$0xff] }
 0x34d   : > { %v2366_v44 = vpack.c.bf16 %v2333_v16, %v2332_v22 }
 0x34e   : > { %2024 = vrot.lane.b32.xlu1 %v6807_v58, %s5443_s29  ;;  %2312 = vrot.lane.b32.xlu2 %v2248_v56, %s5445_s11  ;;  %v1538_v58 = vadd.f32 %v10025_v28, %v1394_v8  ;;  %v1937_v2 = vadd.f32 %v6848_v19, %v1793_v30  ;;  %v10031_v19 = vld [vmem:[#allocation66_spill] sm:$0xff]  ;;  %v10038_v8 = vld [vmem:[#allocation149_spill] sm:$0xff]  ;;  %v10040_v28 = vld [vmem:[#allocation84_spill] sm:$0xff] }
 0x34f   : > { %2168 = vrot.lane.b32.xlu0 %v2104_v6, %s5444_s30 }
 0x350   : > { %v7131_v46 = vpop.permute.xlu1 %2004  ;;  %v1648_v63 = vadd.f32 %v10028_v31, %v1538_v58  ;;  %v2047_v1 = vadd.f32 %v6973_v5, %v1937_v2  ;;  %v1255_v2 = vld [vmem:[#allocation2 + $0x58] sm:$0xff] }
 0x351   : > { %v2127_v41 = vpop.permute.xlu0 %2126  ;;  %v7135_v27 = vpop.permute.xlu2 %2134 }
 0x352   : > { %v1792_v0 = vadd.f32 %v10030_v49, %v1648_v63  ;;  %v2191_v52 = vadd.f32 %v2127_v41, %v2047_v1  ;;  %v2107_v41 = vld [vmem:[#allocation2 + $0x11d] sm:$0xff] }
 0x353   : > { %v10041_v63 = vld [vmem:[#allocation190_spill] sm:$0xff] }
 0x354   : > { %v1936_v53 = vadd.f32 %v6891_v48, %v1792_v0  ;;  %v1396_v48 = vadd.f32 %v10031_v19, %v1252_v9  ;;  %v2106_v0 = vld [vmem:[#allocation2 + $0x115] sm:$0xff] }
 0x355   : > { %2464 = vmatmul.bf16.gmra.mxu1 %v2366_v44 }
 0x356   : > { %2170 = vrot.lane.b32.xlu1 %v2105_v34, %s5444_s30  ;;  %2158 = vrot.lane.b32.xlu2 %v2099_v51, %s5444_s30  ;;  %v2046_v4 = vadd.f32 %v7028_v33, %v1936_v53  ;;  %v1397_v33 = vadd.f32 %v10033_v60, %v1253_v7  ;;  %v1540_v15 = vadd.f32 %v10034_v24, %v1396_v48  ;;  %v10042_v51 = vld [vmem:[#allocation76_spill] sm:$0xff]  ;;  %v10043_v53 = vld [vmem:[#allocation71_spill] sm:$0xff]  ;;  %v10046_v48 = vld [vmem:[#allocation77_spill] sm:$0xff] }
 0x357   : > { %2314 = vrot.lane.b32.xlu0 %v2249_v17, %s5445_s11  ;;  %v1254_v17 = vld [vmem:[#allocation2 + $0x50] sm:$0xff]  ;;  %v10049_v24 = vld [vmem:[#allocation94_spill] sm:$0xff] }
 0x358   : > { %v2269_v42 = vpop.permute.xlu1 %2268  ;;  %v2190_v57 = vadd.f32 %v7083_v40, %v2046_v4  ;;  %v2335_v40 = vadd.f32 %v7097_v25, %v2191_v52  ;;  %v1541_v54 = vadd.f32 %v10035_v3, %v1397_v33  ;;  %v1650_v56 = vadd.f32 %v10036_v20, %v1540_v15  ;;  %v10039_v25 = vld [vmem:[#allocation82_spill] sm:$0xff]  ;;  %v2101_v60 = vld [vmem:[#allocation2 + $0xed] sm:$0xff]  ;;  %v10051_v20 = vld [vmem:[#allocation165_spill] sm:$0xff] }
 0x359   : > { %v7148_v61 = vpop.permute.xlu0 %2006  ;;  %v7150_v37 = vpop.permute.xlu2 %2012  ;;  %v1398_v23 = vadd.f32 %v10042_v51, %v1254_v17  ;;  %v10044_v4 = vld [vmem:[#allocation78_spill] sm:$0xff]  ;;  %v2245_v33 = vld [vmem:[#allocation2 + $0xee] sm:$0xff] }
 0x35a   : > { %v2334_v12 = vadd.f32 %v2269_v42, %v2190_v57  ;;  %v1651_v16 = vadd.f32 %v10037_v35, %v1541_v54  ;;  %v1794_v22 = vadd.f32 %v10039_v25, %v1650_v56  ;;  %v2250_v42 = vld [vmem:[#allocation2 + $0x116] sm:$0xff]  ;;  %v1399_v57 = vadd.f32 %v10044_v4, %v1255_v2  ;;  %v10050_v54 = vld [vmem:[#allocation158_spill] sm:$0xff]  ;;  %v10053_v25 = vld [vmem:[#allocation187_spill] sm:$0xff] }
 0x35b   : > { %v1542_v1 = vadd.f32 %v10043_v53, %v1398_v23  ;;  %v1256_v23 = vld [vmem:[#allocation2 + $0x60] sm:$0xff]  ;;  %v10059_v2 = vld [vmem:[#allocation89_spill] sm:$0xff]  ;;  %v10060_v4 = vld [vmem:[#allocation92_spill] sm:$0xff] }
 0x35c   : > { %v2367_v6 = vpack.c.bf16 %v2335_v40, %v2334_v12  ;;  %v1795_v58 = vadd.f32 %v10040_v28, %v1651_v16  ;;  %v1938_v62 = vadd.f32 %v6893_v21, %v1794_v22  ;;  %v2100_v21 = vld [vmem:[#allocation2 + $0xe5] sm:$0xff]  ;;  %v10048_v40 = vld [vmem:[#allocation80_spill] sm:$0xff] }
 0x35d   : > { %v1652_v12 = vadd.f32 %v10046_v48, %v1542_v1  ;;  %v1257_v16 = vld [vmem:[#allocation2 + $0x68] sm:$0xff]  ;;  %v10063_v48 = vld [vmem:[#allocation96_spill] sm:$0xff] }
 0x35e   : > { %2156 = vrot.lane.b32.xlu1 %v2098_v32, %s5444_s30  ;;  %2028 = vrot.lane.b32.xlu2 %v10032_v39, %s5443_s29  ;;  %v1939_v44 = vadd.f32 %v6901_v36, %v1795_v58  ;;  %v2048_v31 = vadd.f32 %v7030_v11, %v1938_v62  ;;  %v10047_v39 = vld [vmem:[#allocation91_spill] sm:$0xff] }
 0x35f   : > { %2300 = vrot.lane.b32.xlu0 %v2242_v55, %s5445_s11  ;;  %v10045_v55 = vld [vmem:[#allocation85_spill] sm:$0xff]  ;;  %v10054_v28 = vld [vmem:[#allocation191_spill] sm:$0xff] }
 0x360   : > { %v2129_v5 = vpop.permute.xlu1 %2128  ;;  %v2049_v34 = vadd.f32 %v10041_v63, %v1939_v44  ;;  %v1543_v9 = vadd.f32 %v10045_v55, %v1399_v57  ;;  %v2244_v44 = vld [vmem:[#allocation2 + $0xe6] sm:$0xff] }
 0x361   : > { %v2273_v14 = vpop.permute.xlu0 %2272  ;;  %v7162_v18 = vpop.permute.xlu2 %2280  ;;  %v2192_v49 = vadd.f32 %v2129_v5, %v2048_v31  ;;  %v2251_v5 = vld [vmem:[#allocation2 + $0x11e] sm:$0xff] }
 0x362   : > { %v2193_v30 = vadd.f32 %v7109_v45, %v2049_v34  ;;  %v1653_v7 = vadd.f32 %v10047_v39, %v1543_v9  ;;  %v10055_v31 = vld [vmem:[#allocation145_spill] sm:$0xff]  ;;  %v2108_v63 = vld [vmem:[#allocation2 + $0x125] sm:$0xff]  ;;  %v2109_v9 = vld [vmem:[#allocation2 + $0x12d] sm:$0xff] }
 0x363   : > { %v2336_v52 = vadd.f32 %v2273_v14, %v2192_v49  ;;  %v1796_v14 = vadd.f32 %v10048_v40, %v1652_v12  ;;  %v10056_v34 = vld [vmem:[#allocation83_spill] sm:$0xff]  ;;  %v10057_v49 = vld [vmem:[#allocation74_spill] sm:$0xff]  ;;  %v10064_v39 = vld [vmem:[#allocation161_spill] sm:$0xff] }
 0x364   : > { %v1797_v15 = vadd.f32 %v10049_v24, %v1653_v7  ;;  %v10066_v40 = vld [vmem:[#allocation188_spill] sm:$0xff] }
 0x365   : > { %2469 = vmatmul.bf16.gmra.mxu1 %v2367_v6  ;;  %v1940_v6 = vadd.f32 %v10050_v54, %v1796_v14 }
 0x366   : > { %2302 = vrot.lane.b32.xlu1 %v2243_v50, %s5445_s11  ;;  %2174 = vrot.lane.b32.xlu2 %v2107_v41, %s5444_s30  ;;  %v1941_v56 = vadd.f32 %v10051_v20, %v1797_v15  ;;  %v2102_v20 = vld [vmem:[#allocation2 + $0xf5] sm:$0xff] }
 0x367   : > { %2030 = vrot.lane.b32.xlu0 %v10038_v8, %s5443_s29  ;;  %v10052_v8 = vld [vmem:[#allocation88_spill] sm:$0xff]  ;;  %v2050_v22 = vadd.f32 %v10053_v25, %v1940_v6  ;;  %v2252_v6 = vld [vmem:[#allocation2 + $0x126] sm:$0xff] }
 0x368   : > { %v2275_v29 = vpop.permute.xlu1 %2274  ;;  %v1401_v41 = vadd.f32 %v10052_v8, %v1257_v16  ;;  %v2051_v58 = vadd.f32 %v10054_v28, %v1941_v56  ;;  %v2246_v16 = vld [vmem:[#allocation2 + $0xf6] sm:$0xff]  ;;  %v10067_v28 = vld [vmem:[#allocation86_spill] sm:$0xff] }
 0x369   : > { %v7176_v59 = vpop.permute.xlu0 %2010  ;;  %v7178_v43 = vpop.permute.xlu2 %2140  ;;  %v2337_v36 = vadd.f32 %v2275_v29, %v2193_v30  ;;  %v1258_v25 = vld [vmem:[#allocation2 + $0x70] sm:$0xff] }
 0x36a   : > { %v2195_v29 = vadd.f32 %v7135_v27, %v2051_v58  ;;  %v1545_v17 = vadd.f32 %v10056_v34, %v1401_v41  ;;  %v10058_v27 = vld [vmem:[#allocation87_spill] sm:$0xff]  ;;  %v1259_v41 = vld [vmem:[#allocation2 + $0x78] sm:$0xff] }
 0x36b   : > { %v2368_v19 = vpack.c.bf16 %v2337_v36, %v2336_v52  ;;  %v10061_v52 = vld [vmem:[#allocation93_spill] sm:$0xff]  ;;  %v1403_v58 = vadd.f32 %v10067_v28, %v1259_v41  ;;  %v1261_v41 = vld [vmem:[#allocation2 + $0x88] sm:$0xff] }
 0x36c   : > { %v10079_v28 = vld [vmem:[#allocation95_spill] sm:$0xff] }
 0x36e   : > { %2172 = vrot.lane.b32.xlu1 %v2106_v0, %s5444_s30  ;;  %2160 = vrot.lane.b32.xlu2 %v2100_v21, %s5444_s30  ;;  %v1400_v0 = vadd.f32 %v10057_v49, %v1256_v23  ;;  %v10071_v23 = vld [vmem:[#allocation103_spill] sm:$0xff]  ;;  %v10072_v49 = vld [vmem:[#allocation105_spill] sm:$0xff] }
 0x36f   : > { %2316 = vrot.lane.b32.xlu0 %v2250_v42, %s5445_s11 }
 0x370   : > { %v2133_v11 = vpop.permute.xlu1 %2132  ;;  %v1544_v36 = vadd.f32 %v10058_v27, %v1400_v0  ;;  %v2111_v27 = vld [vmem:[#allocation2 + $0x13d] sm:$0xff] }
 0x371   : > { %v2277_v32 = vpop.permute.xlu0 %2276  ;;  %v7189_v45 = vpop.permute.xlu2 %2286  ;;  %v2194_v62 = vadd.f32 %v2133_v11, %v2050_v22  ;;  %v1655_v11 = vadd.f32 %v10059_v2, %v1545_v17  ;;  %v10073_v2 = vld [vmem:[#allocation106_spill] sm:$0xff] }
 0x372   : > { %v1654_v55 = vadd.f32 %v10061_v52, %v1544_v36  ;;  %v1966_v36 = vld [vmem:[#allocation2 + $0x134] sm:$0xff] }
 0x373   : > { %v2338_v42 = vadd.f32 %v2277_v32, %v2194_v62  ;;  %v1799_v57 = vadd.f32 %v10060_v4, %v1655_v11  ;;  %v2253_v32 = vld [vmem:[#allocation2 + $0x12e] sm:$0xff]  ;;  %v2254_v52 = vld [vmem:[#allocation2 + $0x136] sm:$0xff] }
 0x374   : > { %v1798_v12 = vadd.f32 %v10063_v48, %v1654_v55  ;;  %v2255_v55 = vld [vmem:[#allocation2 + $0x13e] sm:$0xff] }
 0x375   : > { %2474 = vmatmul.bf16.gmra.mxu1 %v2368_v19  ;;  %v10062_v19 = vld [vmem:[#allocation150_spill] sm:$0xff]  ;;  %v1943_v7 = vadd.f32 %v10064_v39, %v1799_v57 }
 0x376   : > { %2318 = vrot.lane.b32.xlu1 %v2251_v5, %s5445_s11  ;;  %2306 = vrot.lane.b32.xlu2 %v2245_v33, %s5445_s11  ;;  %v1967_v57 = vld [vmem:[#allocation2 + $0x13c] sm:$0xff] }
 0x377   : > { %2162 = vrot.lane.b32.xlu0 %v2101_v60, %s5444_s30  ;;  %v10065_v60 = vld [vmem:[#allocation167_spill] sm:$0xff]  ;;  %v2053_v14 = vadd.f32 %v10066_v40, %v1943_v7  ;;  %v10077_v40 = vld [vmem:[#allocation189_spill] sm:$0xff] }
 0x378   : > { %v2279_v3 = vpop.permute.xlu1 %2278  ;;  %v1942_v33 = vadd.f32 %v10065_v60, %v1798_v12  ;;  %v10076_v12 = vld [vmem:[#allocation170_spill] sm:$0xff]  ;;  %v5356_v60 = vpack.i.bf16 %v1967_v57, %v1966_v36 }
 0x379   : > { %v2137_v35 = vpop.permute.xlu0 %2136  ;;  %v7201_v50 = vpop.permute.xlu2 %2144  ;;  %v2339_v51 = vadd.f32 %v2279_v3, %v2195_v29 }
 0x37a   : > { %v2052_v15 = vadd.f32 %v7055_v38, %v1942_v33  ;;  %v10068_v38 = vld [vmem:[#allocation90_spill] sm:$0xff]  ;;  %v5366_v33 = vpack.i.bf16 %v2255_v55, %v2254_v52 }
 0x37b   : > { %v2369_v53 = vpack.c.bf16 %v2339_v51, %v2338_v42  ;;  %v1402_v29 = vadd.f32 %v10068_v38, %v1258_v25  ;;  %v2103_v51 = vld [vmem:[#allocation2 + $0xfd] sm:$0xff] }
 0x37c   : > { %v2196_v54 = vadd.f32 %v2137_v35, %v2052_v15  ;;  %v2247_v42 = vld [vmem:[#allocation2 + $0xfe] sm:$0xff] }
 0x37d   : > { %v10080_v38 = vld [vmem:[#allocation102_spill] sm:$0xff] }
 0x37e   : > { %2304 = vrot.lane.b32.xlu1 %v2244_v44, %s5445_s11  ;;  %2176 = vrot.lane.b32.xlu2 %v2108_v63, %s5444_s30  ;;  %v2340_v62 = vadd.f32 %v7162_v18, %v2196_v54  ;;  %v10069_v44 = vld [vmem:[#allocation97_spill] sm:$0xff]  ;;  %v10070_v63 = vld [vmem:[#allocation99_spill] sm:$0xff]  ;;  %v10078_v54 = vld [vmem:[#allocation100_spill] sm:$0xff] }
 0x37f   : > { %2032 = vrot.lane.b32.xlu0 %v10055_v31, %s5443_s29  ;;  %v1546_v31 = vadd.f32 %v10069_v44, %v1402_v29  ;;  %v1547_v34 = vadd.f32 %v10070_v63, %v1403_v58  ;;  %v1405_v29 = vadd.f32 %v10080_v38, %v1261_v41  ;;  %v10082_v63 = vld [vmem:[#allocation101_spill] sm:$0xff]  ;;  %v10096_v38 = vld [vmem:[#allocation120_spill] sm:$0xff] }
 0x380   : > { %v2139_v30 = vpop.permute.xlu1 %2138 }
 0x381   : > { %v2283_v21 = vpop.permute.xlu0 %2282  ;;  %v7215_v1 = vpop.permute.xlu2 %2290  ;;  %v2197_v3 = vadd.f32 %v2139_v30, %v2053_v14  ;;  %v1656_v30 = vadd.f32 %v10071_v23, %v1546_v31  ;;  %v1657_v0 = vadd.f32 %v10072_v49, %v1547_v34  ;;  %v10081_v31 = vld [vmem:[#allocation109_spill] sm:$0xff] }
 0x383   : > { %v2341_v8 = vadd.f32 %v2283_v21, %v2197_v3  ;;  %v2110_v21 = vld [vmem:[#allocation2 + $0x135] sm:$0xff]  ;;  %v1800_v11 = vadd.f32 %v10073_v2, %v1656_v30  ;;  %v1260_v3 = vld [vmem:[#allocation2 + $0x80] sm:$0xff] }
 0x384   : > { %v5361_v18 = vpack.i.bf16 %v2111_v27, %v2110_v21  ;;  %v10085_v30 = vld [vmem:[#allocation118_spill] sm:$0xff]  ;;  %v10087_v27 = vld [vmem:[#allocation171_spill] sm:$0xff] }
 0x385   : > { %2479 = vmatmul.bf16.gmra.mxu1 %v2369_v53  ;;  %v2370_v17 = vpack.c.bf16 %v2341_v8, %v2340_v62  ;;  %v10074_v53 = vld [vmem:[#allocation108_spill] sm:$0xff] }
 0x386   : > { %2034 = vrot.lane.b32.xlu1 %v10062_v19, %s5443_s29  ;;  %2322 = vrot.lane.b32.xlu2 %v2253_v32, %s5445_s11  ;;  %v1801_v4 = vadd.f32 %v10074_v53, %v1657_v0  ;;  %v10075_v32 = vld [vmem:[#allocation168_spill] sm:$0xff] }
 0x387   : > { %2178 = vrot.lane.b32.xlu0 %v2109_v9, %s5444_s30  ;;  %v1944_v48 = vadd.f32 %v10075_v32, %v1800_v11  ;;  %v1263_v11 = vld [vmem:[#allocation2 + $0x98] sm:$0xff] }
 0x388   : > { %v7225_v5 = vpop.permute.xlu1 %2014  ;;  %v1945_v39 = vadd.f32 %v10076_v12, %v1801_v4  ;;  %v10088_v4 = vld [vmem:[#allocation112_spill] sm:$0xff] }
 0x389   : > { %v2143_v24 = vpop.permute.xlu0 %2142  ;;  %v7230_v56 = vpop.permute.xlu2 %2150  ;;  %v2054_v15 = vadd.f32 %v7057_v13, %v1944_v48  ;;  %v1407_v57 = vadd.f32 %v10088_v4, %v1263_v11  ;;  %v1262_v48 = vld [vmem:[#allocation2 + $0x90] sm:$0xff]  ;;  %v1265_v4 = vld [vmem:[#allocation2 + $0xa8] sm:$0xff] }
 0x38a   : > { %v2055_v14 = vadd.f32 %v10077_v40, %v1945_v39  ;;  %v10089_v39 = vld [vmem:[#allocation98_spill] sm:$0xff] }
 0x38e   : > { %2320 = vrot.lane.b32.xlu1 %v2252_v6, %s5445_s11  ;;  %2308 = vrot.lane.b32.xlu2 %v2246_v16, %s5445_s11  ;;  %v1404_v6 = vadd.f32 %v10078_v54, %v1260_v3  ;;  %v2199_v16 = vadd.f32 %v2143_v24, %v2055_v14  ;;  %v10091_v3 = vld [vmem:[#allocation111_spill] sm:$0xff] }
 0x38f   : > { %2164 = vrot.lane.b32.xlu0 %v2102_v20, %s5444_s30  ;;  %v2198_v20 = vadd.f32 %v7178_v43, %v2054_v15  ;;  %v1549_v43 = vadd.f32 %v10081_v31, %v1405_v29  ;;  %v1272_v15 = vld [vmem:[#allocation2 + $0xe0] sm:$0xff]  ;;  %v1273_v31 = vld [vmem:[#allocation2 + $0xe8] sm:$0xff] }
 0x390   : > { %v2285_v22 = vpop.permute.xlu1 %2284  ;;  %v1548_v58 = vadd.f32 %v10079_v28, %v1404_v6  ;;  %v2343_v13 = vadd.f32 %v7189_v45, %v2199_v16  ;;  %v10092_v6 = vld [vmem:[#allocation152_spill] sm:$0xff] }
 0x391   : > { %v7237_v35 = vpop.permute.xlu0 %2016  ;;  %v7248_v9 = vpop.permute.xlu2 %2022  ;;  %v2342_v8 = vadd.f32 %v2285_v22, %v2198_v20  ;;  %v10084_v22 = vld [vmem:[#allocation104_spill] sm:$0xff]  ;;  %v1416_v20 = vadd.f32 %v10092_v6, %v1272_v15 }
 0x392   : > { %v1658_v34 = vadd.f32 %v10082_v63, %v1548_v58  ;;  %v10095_v28 = vld [vmem:[#allocation116_spill] sm:$0xff] }
 0x393   : > { %v2371_v24 = vpack.c.bf16 %v2343_v13, %v2342_v8  ;;  %v10094_v8 = vld [vmem:[#allocation117_spill] sm:$0xff]  ;;  %v10097_v13 = vld [vmem:[#allocation143_spill] sm:$0xff] }
 0x394   : > { %v1802_v23 = vadd.f32 %v10084_v22, %v1658_v34  ;;  %v10099_v34 = vld [vmem:[#allocation164_spill] sm:$0xff] }
 0x395   : > { %2484 = vmatmul.bf16.gmra.mxu1 %v2370_v17  ;;  %v10083_v17 = vld [vmem:[#allocation115_spill] sm:$0xff] }
 0x396   : > { %2166 = vrot.lane.b32.xlu1 %v2103_v51, %s5444_s30  ;;  %5362 = vrot.lane.b32.xlu2 %v5361_v18, %s5444_s30  ;;  %v1659_v51 = vadd.f32 %v10083_v17, %v1549_v43 }
 0x397   : > { %2310 = vrot.lane.b32.xlu0 %v2247_v42, %s5445_s11  ;;  %v10086_v42 = vld [vmem:[#allocation163_spill] sm:$0xff] }
 0x398   : > { %v7250_v19 = vpop.permute.xlu1 %2018  ;;  %v1803_v49 = vadd.f32 %v10085_v30, %v1659_v51  ;;  %v1946_v21 = vadd.f32 %v10086_v42, %v1802_v23  ;;  %v10100_v51 = vld [vmem:[#allocation173_spill] sm:$0xff] }
 0x399   : > { %v2147_v7 = vpop.permute.xlu0 %2146  ;;  %v7266_v44 = vpop.permute.xlu2 %2296 }
 0x39a   : > { %v1947_v36 = vadd.f32 %v10087_v27, %v1803_v49  ;;  %v2056_v2 = vadd.f32 %v7105_v47, %v1946_v21  ;;  %v10101_v49 = vld [vmem:[#allocation153_spill] sm:$0xff]  ;;  %v10102_v21 = vld [vmem:[#allocation160_spill] sm:$0xff] }
 0x39c   : > { %v2057_v18 = vadd.f32 %v7059_v26, %v1947_v36  ;;  %v2200_v52 = vadd.f32 %v7201_v50, %v2056_v2 }
 0x39e   : > { %5357 = vrot.lane.b32.xlu1 %v5356_v60, %s5443_s29  ;;  %v2201_v55 = vadd.f32 %v2147_v7, %v2057_v18  ;;  %v1406_v60 = vadd.f32 %v10089_v39, %v1262_v48  ;;  %v10093_v7 = vld [vmem:[#allocation113_spill] sm:$0xff]  ;;  %v10105_v39 = vld [vmem:[#allocation23_spill] sm:$0xff]  ;;  %s5448_s29 = smov 4  }
 0x39f   : > { %5367 = vrot.lane.b32.xlu0 %v5366_v33, %s5445_s11  ;;  %v10090_v33 = vld [vmem:[#allocation107_spill] sm:$0xff] }
 0x3a0   : > { %v2289_v25 = vpop.permute.xlu1 %2288  ;;  %v1551_v40 = vadd.f32 %v10090_v33, %v1407_v57  ;;  %v2345_v26 = vadd.f32 %v7215_v1, %v2201_v55  ;;  %v1550_v54 = vadd.f32 %v10091_v3, %v1406_v60  ;;  %v1560_v1 = vadd.f32 %v10097_v13, %v1416_v20  ;;  %v10103_v57 = vld [vmem:[#allocation110_spill] sm:$0xff]  ;;  %v10109_v20 = vld [vmem:[#allocation121_spill] sm:$0xff]  ;;  %v10113_v13 = vld [vmem:[#allocation132_spill] sm:$0xff] }
 0x3a1   : > { %v7263_v62 = vpop.permute.xlu0 %2020  ;;  %v2027_v53 = vpop.permute.xlu2 %2026  ;;  %v2344_v32 = vadd.f32 %v2289_v25, %v2200_v52  ;;  %v1409_v52 = vadd.f32 %v10103_v57, %v1265_v4  ;;  %v1264_v55 = vld [vmem:[#allocation2 + $0xa0] sm:$0xff] }
 0x3a2   : > { %v1661_v16 = vadd.f32 %v10093_v7, %v1551_v40  ;;  %v1660_v41 = vadd.f32 %v10094_v8, %v1550_v54  ;;  %v1670_v42 = vadd.f32 %v10101_v49, %v1560_v1  ;;  %v10106_v40 = vld [vmem:[#allocation114_spill] sm:$0xff] }
 0x3a3   : > { %v2372_v50 = vpack.c.bf16 %v2345_v26, %v2344_v32  ;;  %v10104_v32 = vld [vmem:[#allocation33_spill] sm:$0xff]  ;;  %v1408_v26 = vadd.f32 %v10106_v40, %v1264_v55 }
 0x3a4   : > { %v1805_v58 = vadd.f32 %v10095_v28, %v1661_v16  ;;  %v1804_v29 = vadd.f32 %v10096_v38, %v1660_v41  ;;  %v1814_v60 = vadd.f32 %v10105_v39, %v1670_v42  ;;  %v10110_v16 = vld [vmem:[#allocation129_spill] sm:$0xff]  ;;  %v10111_v41 = vld [vmem:[#allocation35_spill] sm:$0xff]  ;;  %v10117_v42 = vld [vmem:[#allocation174_spill] sm:$0xff] }
 0x3a5   : > { %2489 = vmatmul.bf16.gmra.mxu1 %v2371_v24  ;;  %v10098_v24 = vld [vmem:[#allocation154_spill] sm:$0xff]  ;;  %v10112_v38 = vld [vmem:[#allocation127_spill] sm:$0xff]  ;;  %v1267_v40 = vld [vmem:[#allocation2 + $0xb8] sm:$0xff] }
 0x3a6   : > { %v1417_v63 = vadd.f32 %v10098_v24, %v1273_v31  ;;  %v1949_v17 = vadd.f32 %v10099_v34, %v1805_v58  ;;  %v1948_v22 = vadd.f32 %v10100_v51, %v1804_v29  ;;  %v10114_v31 = vld [vmem:[#allocation182_spill] sm:$0xff]  ;;  %v10116_v34 = vld [vmem:[#allocation176_spill] sm:$0xff] }
 0x3a8   : > { %v2149_v0 = vpop.permute.xlu1 %2148  ;;  %v1561_v27 = vadd.f32 %v10102_v21, %v1417_v63  ;;  %v2058_v36 = vadd.f32 %v7131_v46, %v1948_v22  ;;  %v2059_v18 = vadd.f32 %v7148_v61, %v1949_v17  ;;  %v10107_v46 = vld [vmem:[#allocation123_spill] sm:$0xff]  ;;  %v10108_v61 = vld [vmem:[#allocation172_spill] sm:$0xff]  ;;  %v10115_v63 = vld [vmem:[#allocation130_spill] sm:$0xff] }
 0x3a9   : > { %v2293_v45 = vpop.permute.xlu0 %2292  ;;  %v2313_v25 = vpop.permute.xlu2 %2312  ;;  %v1553_v54 = vadd.f32 %v10107_v46, %v1409_v52  ;;  %v1958_v6 = vadd.f32 %v10108_v61, %v1814_v60  ;;  %v10120_v46 = vld [vmem:[#allocation126_spill] sm:$0xff] }
 0x3aa   : > { %v2203_v2 = vadd.f32 %v7230_v56, %v2059_v18  ;;  %v2202_v11 = vadd.f32 %v2149_v0, %v2058_v36  ;;  %v1671_v48 = vadd.f32 %v10104_v32, %v1561_v27  ;;  %v1266_v32 = vld [vmem:[#allocation2 + $0xb0] sm:$0xff] }
 0x3ab   : > { %v1663_v8 = vadd.f32 %v10110_v16, %v1553_v54  ;;  %v1411_v54 = vadd.f32 %v10120_v46, %v1267_v40  ;;  %v10136_v40 = vld [vmem:[#allocation46_spill] sm:$0xff] }
 0x3ac   : > { %v2346_v56 = vadd.f32 %v2293_v45, %v2202_v11  ;;  %v1815_v28 = vadd.f32 %v10111_v41, %v1671_v48  ;;  %v10118_v48 = vld [vmem:[#allocation124_spill] sm:$0xff] }
 0x3ad   : > { %v1807_v1 = vadd.f32 %v10113_v13, %v1663_v8  ;;  %v1410_v39 = vadd.f32 %v10118_v48, %v1266_v32  ;;  %v10124_v8 = vld [vmem:[#allocation148_spill] sm:$0xff] }
 0x3ae   : > { %v1959_v24 = vadd.f32 %v10114_v31, %v1815_v28  ;;  %v1275_v28 = vld [vmem:[#allocation2 + $0xf8] sm:$0xff] }
 0x3af   : > { %v1951_v17 = vadd.f32 %v10116_v34, %v1807_v1  ;;  %v10128_v1 = vld [vmem:[#allocation156_spill] sm:$0xff]  ;;  %v10130_v34 = vld [vmem:[#allocation177_spill] sm:$0xff] }
 0x3b0   : > { %v2295_v12 = vpop.permute.xlu1 %2294  ;;  %v2069_v51 = vadd.f32 %v2027_v53, %v1959_v24 }
 0x3b1   : > { %v7281_v14 = vpop.permute.xlu0 %2152  ;;  %v2347_v33 = vadd.f32 %v2295_v12, %v2203_v2  ;;  %v7307_v15 = vpop.permute.xlu2 %2158  ;;  %v2061_v27 = vadd.f32 %v7176_v59, %v1951_v17 }
 0x3b2   : > { %v7284_v47 = vpop.f32.mrf.mxu1 }
 0x3b3   : > { %v2373_v58 = vpack.c.bf16 %v2347_v33, %v2346_v56 }
 0x3b5   : > { %2494 = vmatmul.bf16.gmra.mxu1 %v2372_v50  ;;  %v1552_v50 = vadd.f32 %v10109_v20, %v1408_v26  ;;  %v10119_v26 = vld [vmem:[#allocation119_spill] sm:$0xff] }
 0x3b7   : > { %v1662_v29 = vadd.f32 %v10112_v38, %v1552_v50  ;;  %v10126_v38 = vld [vmem:[#allocation128_spill] sm:$0xff] }
 0x3b8   : > { %v2155_v43 = vpop.permute.xlu1 %2154 }
 0x3b9   : > { %v2299_v23 = vpop.permute.xlu0 %2298  ;;  %v1806_v45 = vadd.f32 %v10115_v63, %v1662_v29  ;;  %v2029_v2 = vpop.permute.xlu2 %2028  ;;  %v2205_v57 = vadd.f32 %v2155_v43, %v2061_v27  ;;  %v10129_v63 = vld [vmem:[#allocation166_spill] sm:$0xff] }
 0x3ba   : > { %v7296_v30 = vpop.f32.mrf.mxu1 }
 0x3bb   : > { %v1950_v21 = vadd.f32 %v10117_v42, %v1806_v45  ;;  %v2349_v33 = vadd.f32 %v2299_v23, %v2205_v57  ;;  %v10123_v23 = vld [vmem:[#allocation139_spill] sm:$0xff]  ;;  %v10133_v57 = vld [vmem:[#allocation38_spill] sm:$0xff] }
 0x3bd   : > { %v2060_v4 = vadd.f32 %v7123_v10, %v1950_v21  ;;  %v10132_v21 = vld [vmem:[#allocation43_spill] sm:$0xff] }
 0x3bf   : > { %v2204_v53 = vadd.f32 %v7281_v14, %v2060_v4  ;;  %v10122_v14 = vld [vmem:[#allocation125_spill] sm:$0xff]  ;;  %v1269_v4 = vld [vmem:[#allocation2 + $0xc8] sm:$0xff] }
 0x3c0   : > { %v2025_v3 = vpop.permute.xlu1 %2024 }
 0x3c1   : > { %v2169_v0 = vpop.permute.xlu0 %2168  ;;  %v2068_v12 = vadd.f32 %v2025_v3, %v1958_v6  ;;  %v1554_v3 = vadd.f32 %v10119_v26, %v1410_v39  ;;  %v2348_v10 = vadd.f32 %v7266_v44, %v2204_v53  ;;  %v2175_v20 = vpop.permute.xlu2 %2174  ;;  %v10127_v44 = vld [vmem:[#allocation142_spill] sm:$0xff] }
 0x3c2   : > { %v7312_v7 = vpop.f32.mrf.mxu1 }
 0x3c3   : > { %v2212_v22 = vadd.f32 %v2169_v0, %v2068_v12  ;;  %v2374_v56 = vpack.c.bf16 %v2349_v33, %v2348_v10  ;;  %v1274_v0 = vld [vmem:[#allocation2 + $0xf0] sm:$0xff]  ;;  %v1664_v50 = vadd.f32 %v10122_v14, %v1554_v3  ;;  %v10125_v12 = vld [vmem:[#allocation31_spill] sm:$0xff]  ;;  %v1268_v14 = vld [vmem:[#allocation2 + $0xc0] sm:$0xff] }
 0x3c4   : > { %v1418_v41 = vadd.f32 %v10124_v8, %v1274_v0 }
 0x3c5   : > { %2499 = vmatmul.bf16.gmra.mxu1 %v2373_v58  ;;  %v2356_v52 = vadd.f32 %v2313_v25, %v2212_v22  ;;  %v10121_v25 = vld [vmem:[#allocation133_spill] sm:$0xff]  ;;  %v1419_v58 = vadd.f32 %v10125_v12, %v1275_v28  ;;  %v1808_v29 = vadd.f32 %v10126_v38, %v1664_v50 }
 0x3c6   : > { %v1555_v6 = vadd.f32 %v10121_v25, %v1411_v54  ;;  %v1562_v31 = vadd.f32 %v10128_v1, %v1418_v41  ;;  %v10137_v54 = vld [vmem:[#allocation131_spill] sm:$0xff]  ;;  %v10142_v12 = vld [vmem:[#allocation137_spill] sm:$0xff] }
 0x3c7   : > { %v1952_v45 = vadd.f32 %v10129_v63, %v1808_v29  ;;  %v10141_v41 = vld [vmem:[#allocation135_spill] sm:$0xff]  ;;  %v10143_v29 = vld [vmem:[#allocation140_spill] sm:$0xff]  ;;  %v10145_v63 = vld [vmem:[#allocation146_spill] sm:$0xff] }
 0x3c8   : > { %v2171_v49 = vpop.permute.xlu1 %2170  ;;  %v1665_v16 = vadd.f32 %v10123_v23, %v1555_v6  ;;  %v1672_v27 = vadd.f32 %v10132_v21, %v1562_v31  ;;  %v10147_v21 = vld [vmem:[#allocation179_spill] sm:$0xff] }
 0x3c9   : > { %v2213_v36 = vadd.f32 %v2171_v49, %v2069_v51  ;;  %v2315_v18 = vpop.permute.xlu0 %2314  ;;  %v10131_v49 = vld [vmem:[#allocation28_spill] sm:$0xff]  ;;  %v2161_v53 = vpop.permute.xlu2 %2160 }
 0x3ca   : > { %v7323_v11 = vpop.f32.mrf.mxu1  ;;  %v1809_v13 = vadd.f32 %v10127_v44, %v1665_v16  ;;  %v1563_v42 = vadd.f32 %v10131_v49, %v1419_v58  ;;  %v1816_v26 = vadd.f32 %v10136_v40, %v1672_v27  ;;  %v10150_v40 = vld [vmem:[#allocation52_spill] sm:$0xff] }
 0x3cb   : > { %v2357_v55 = vadd.f32 %v2315_v18, %v2213_v36  ;;  %v2062_v36 = vadd.f32 %v7150_v37, %v1952_v45  ;;  %v10138_v37 = vld [vmem:[#allocation175_spill] sm:$0xff] }
 0x3cc   : > { %v1953_v17 = vadd.f32 %v10130_v34, %v1809_v13  ;;  %v10144_v13 = vld [vmem:[#allocation141_spill] sm:$0xff] }
 0x3cd   : > { %v2378_v60 = vpack.c.bf16 %v2357_v55, %v2356_v52  ;;  %v1673_v52 = vadd.f32 %v10133_v57, %v1563_v42  ;;  %v10134_v55 = vld [vmem:[#allocation136_spill] sm:$0xff]  ;;  %v10146_v34 = vld [vmem:[#allocation169_spill] sm:$0xff] }
 0x3ce   : > { %v2063_v18 = vadd.f32 %v7225_v5, %v1953_v17  ;;  %v1413_v32 = vadd.f32 %v10134_v55, %v1269_v4  ;;  %v10139_v5 = vld [vmem:[#allocation183_spill] sm:$0xff] }
 0x3cf   : > { %2524 = vmatmul.bf16.vlgmr.msrb.gmra.mxu3 %v2378_v60  ;;  %v10135_v60 = vld [vmem:[#allocation41_spill] sm:$0xff]  ;;  %v1960_v6 = vadd.f32 %v10139_v5, %v1816_v26 }
 0x3d0   : > { %v2157_v59 = vpop.permute.xlu1 %2156  ;;  %v2207_v48 = vadd.f32 %v7307_v15, %v2063_v18  ;;  %v1817_v33 = vadd.f32 %v10135_v60, %v1673_v52  ;;  %v1557_v10 = vadd.f32 %v10137_v54, %v1413_v32  ;;  %v10140_v15 = vld [vmem:[#allocation122_spill] sm:$0xff]  ;;  %v10148_v52 = vld [vmem:[#allocation36_spill] sm:$0xff] }
 0x3d1   : > { %v2301_v61 = vpop.permute.xlu0 %2300  ;;  %v2206_v39 = vadd.f32 %v2157_v59, %v2062_v36  ;;  %v1412_v59 = vadd.f32 %v10140_v15, %v1268_v14  ;;  %v2070_v23 = vadd.f32 %v2029_v2, %v1960_v6  ;;  %v2307_v31 = vpop.permute.xlu2 %2306  ;;  %v10149_v60 = vld [vmem:[#allocation40_spill] sm:$0xff]  ;;  %v10155_v15 = vld [vmem:[#allocation57_spill] sm:$0xff] }
 0x3d2   : > { %v7331_v43 = vpop.f32.mrf.mxu1  ;;  %v1961_v25 = vadd.f32 %v10138_v37, %v1817_v33  ;;  %v1667_v58 = vadd.f32 %v10142_v12, %v1557_v10  ;;  %v10151_v37 = vld [vmem:[#allocation44_spill] sm:$0xff] }
 0x3d3   : > { %v1556_v28 = vadd.f32 %v10141_v41, %v1412_v59  ;;  %v10157_v41 = vld [vmem:[#allocation184_spill] sm:$0xff] }
 0x3d4   : > { %v1811_v44 = vadd.f32 %v10143_v29, %v1667_v58 }
 0x3d5   : > { %2504 = vmatmul.bf16.gmra.mxu1 %v2374_v56  ;;  %v2350_v56 = vadd.f32 %v2301_v61, %v2206_v39  ;;  %v1666_v1 = vadd.f32 %v10144_v13, %v1556_v28 }
 0x3d6   : > { %v1955_v17 = vadd.f32 %v10146_v34, %v1811_v44  ;;  %v10158_v44 = vld [vmem:[#allocation138_spill] sm:$0xff] }
 0x3d7   : > { %v1810_v45 = vadd.f32 %v10145_v63, %v1666_v1 }
 0x3d8   : > { %v2303_v24 = vpop.permute.xlu1 %2302  ;;  %v2065_v36 = vadd.f32 %v7250_v19, %v1955_v17 }
 0x3d9   : > { %v2031_v51 = vpop.permute.xlu0 %2030  ;;  %v2351_v3 = vadd.f32 %v2303_v24, %v2207_v48  ;;  %v1954_v27 = vadd.f32 %v10147_v21, %v1810_v45  ;;  %v1276_v48 = vld [vmem:[#allocation2 + $0x100] sm:$0xff]  ;;  %v2177_v10 = vpop.permute.xlu2 %2176  ;;  %v10160_v45 = vld [vmem:[#allocation147_spill] sm:$0xff] }
 0x3da   : > { %v7343_v22 = vpop.f32.mrf.mxu1  ;;  %v2071_v16 = vadd.f32 %v2031_v51, %v1961_v25  ;;  %v1420_v33 = vadd.f32 %v10149_v60, %v1276_v48  ;;  %v10152_v25 = vld [vmem:[#allocation61_spill] sm:$0xff] }
 0x3db   : > { %v2375_v8 = vpack.c.bf16 %v2351_v3, %v2350_v56  ;;  %v2064_v4 = vadd.f32 %v7237_v35, %v1954_v27  ;;  %v10153_v56 = vld [vmem:[#allocation53_spill] sm:$0xff] }
 0x3dc   : > { %v2215_v61 = vadd.f32 %v2175_v20, %v2071_v16  ;;  %v1277_v20 = vld [vmem:[#allocation2 + $0x108] sm:$0xff]  ;;  %v1564_v35 = vadd.f32 %v10151_v37, %v1420_v33  ;;  %v10166_v33 = vld [vmem:[#allocation180_spill] sm:$0xff]  ;;  %v10168_v37 = vld [vmem:[#allocation49_spill] sm:$0xff] }
 0x3dd   : > { %v1421_v55 = vadd.f32 %v10148_v52, %v1277_v20  ;;  %v2208_v32 = vadd.f32 %v2161_v53, %v2064_v4  ;;  %v10154_v53 = vld [vmem:[#allocation63_spill] sm:$0xff] }
 0x3df   : > { %v1565_v26 = vadd.f32 %v10150_v40, %v1421_v55 }
 0x3e0   : > { %v2173_v46 = vpop.permute.xlu1 %2172 }
 0x3e1   : > { %v2317_v0 = vpop.permute.xlu0 %2316  ;;  %v2214_v38 = vadd.f32 %v2173_v46, %v2070_v23  ;;  %v1675_v5 = vadd.f32 %v10152_v25, %v1565_v26  ;;  %v10156_v23 = vld [vmem:[#allocation185_spill] sm:$0xff] }
 0x3e2   : > { %v7357_v50 = vpop.f32.mrf.mxu1 }
 0x3e3   : > { %v2358_v2 = vadd.f32 %v2317_v0, %v2214_v38  ;;  %v1674_v0 = vadd.f32 %v10153_v56, %v1564_v35  ;;  %v1819_v14 = vadd.f32 %v10154_v53, %v1675_v5  ;;  %v1270_v38 = vld [vmem:[#allocation2 + $0xd0] sm:$0xff]  ;;  %v1279_v5 = vld [vmem:[#allocation2 + $0x118] sm:$0xff] }
 0x3e4   : > { %v1414_v13 = vadd.f32 %v10158_v44, %v1270_v38  ;;  %v10173_v44 = vld [vmem:[#allocation70_spill] sm:$0xff] }
 0x3e5   : > { %2509 = vmatmul.bf16.gmra.mxu1 %v2375_v8  ;;  %v1818_v59 = vadd.f32 %v10155_v15, %v1674_v0  ;;  %v1963_v16 = vadd.f32 %v10156_v23, %v1819_v14  ;;  %v10169_v0 = vld [vmem:[#allocation59_spill] sm:$0xff]  ;;  %v10170_v23 = vld [vmem:[#allocation50_spill] sm:$0xff] }
 0x3e6   : > { %v1558_v34 = vadd.f32 %v10160_v45, %v1414_v13  ;;  %v1423_v53 = vadd.f32 %v10169_v0, %v1279_v5  ;;  %v10176_v45 = vld [vmem:[#allocation178_spill] sm:$0xff] }
 0x3e7   : > { %v1962_v28 = vadd.f32 %v10157_v41, %v1818_v59 }
 0x3e8   : > { %v2319_v24 = vpop.permute.xlu1 %2318 }
 0x3e9   : > { %v2359_v51 = vadd.f32 %v2319_v24, %v2215_v61  ;;  %v2163_v49 = vpop.permute.xlu0 %2162  ;;  %v1271_v61 = vld [vmem:[#allocation2 + $0xd8] sm:$0xff]  ;;  %v10159_v24 = vld [vmem:[#allocation134_spill] sm:$0xff] }
 0x3ea   : > { %v7366_v42 = vpop.f32.mrf.mxu1  ;;  %v2209_v57 = vadd.f32 %v2163_v49, %v2065_v36  ;;  %v1415_v63 = vadd.f32 %v10159_v24, %v1271_v61  ;;  %v10162_v49 = vld [vmem:[#allocation155_spill] sm:$0xff] }
 0x3eb   : > { %v2379_v18 = vpack.c.bf16 %v2359_v51, %v2358_v2  ;;  %v10161_v2 = vld [vmem:[#allocation151_spill] sm:$0xff]  ;;  %v1668_v21 = vadd.f32 %v10162_v49, %v1558_v34 }
 0x3ec   : > { %v2353_v3 = vadd.f32 %v2307_v31, %v2209_v57  ;;  %v2323_v31 = vpop.permute.xlu2 %2322  ;;  %v1559_v51 = vadd.f32 %v10161_v2, %v1415_v63  ;;  %v10164_v57 = vld [vmem:[#allocation159_spill] sm:$0xff] }
 0x3ed   : > { %2529 = vmatmul.bf16.gmra.mxu3 %v2379_v18  ;;  %v10163_v18 = vld [vmem:[#allocation157_spill] sm:$0xff] }
 0x3ee   : > { %v1812_v4 = vadd.f32 %v10163_v18, %v1668_v21  ;;  %v1669_v20 = vadd.f32 %v10164_v57, %v1559_v51 }
 0x3f0   : > { %v2305_v39 = vpop.permute.xlu1 %2304  ;;  %v1956_v40 = vadd.f32 %v10166_v33, %v1812_v4 }
 0x3f1   : > { %v2352_v46 = vadd.f32 %v2305_v39, %v2208_v32  ;;  %v2033_v54 = vpop.permute.xlu0 %2032  ;;  %v10165_v39 = vld [vmem:[#allocation162_spill] sm:$0xff] }
 0x3f2   : > { %v7374_v19 = vpop.f32.mrf.mxu1  ;;  %v2072_v1 = vadd.f32 %v2033_v54, %v1962_v28  ;;  %v1813_v60 = vadd.f32 %v10165_v39, %v1669_v20 }
 0x3f3   : > { %v2376_v6 = vpack.c.bf16 %v2353_v3, %v2352_v46  ;;  %v1278_v3 = vld [vmem:[#allocation2 + $0x110] sm:$0xff]  ;;  %v10167_v46 = vld [vmem:[#allocation181_spill] sm:$0xff] }
 0x3f4   : > { %v2216_v27 = vadd.f32 %v2177_v10, %v2072_v1  ;;  %v1957_v54 = vadd.f32 %v10167_v46, %v1813_v60  ;;  %v2066_v10 = vadd.f32 %v7263_v62, %v1956_v40  ;;  %v1422_v35 = vadd.f32 %v10168_v37, %v1278_v3  ;;  %v2309_v25 = vpop.permute.xlu2 %2308 }
 0x3f5   : > { %2514 = vmatmul.bf16.gmra.mxu1 %v2376_v6 }
 0x3f6   : > { %v2067_v6 = vadd.f32 %v7248_v9, %v1957_v54  ;;  %v10174_v9 = vld [vmem:[#allocation60_spill] sm:$0xff] }
 0x3f8   : > { %v2035_v8 = vpop.permute.xlu1 %2034 }
 0x3f9   : > { %v2073_v12 = vadd.f32 %v2035_v8, %v1963_v16  ;;  %v2179_v58 = vpop.permute.xlu0 %2178  ;;  %v1566_v16 = vadd.f32 %v10170_v23, %v1422_v35  ;;  %v10171_v8 = vld [vmem:[#allocation64_spill] sm:$0xff] }
 0x3fa   : > { %v7383_v29 = vpop.f32.mrf.mxu1  ;;  %v1567_v41 = vadd.f32 %v10171_v8, %v1423_v53  ;;  %v2545_v53 = vsel %vm5658_vm6, %v7284_v47, 0.0 }
 0x3fb   : > { %v2217_v17 = vadd.f32 %v2179_v58, %v2073_v12  ;;  %v10172_v58 = vld [vmem:[#allocation58_spill] sm:$0xff] }
 0x3fc   : > { %v1676_v38 = vadd.f32 %v10172_v58, %v1566_v16  ;;  %v1677_v13 = vadd.f32 %v10173_v44, %v1567_v41  ;;  %v5363_v63 = vpop.permute.xlu2 %5362  ;;  %v2548_v16 = vsel %vm5767_vm2, %v7323_v11, 0.0  ;;  %v2550_v44 = vsel %vm5840_vm11, %v7343_v22, 0.0 }
 0x3fd   : > { %v2361_v32 = vadd.f32 %v2323_v31, %v2217_v17  ;;  %v10175_v31 = vld [vmem:[#allocation73_spill] sm:$0xff]  ;;  %v10177_v17 = vld [vmem:[#allocation186_spill] sm:$0xff] }
 0x3fe   : > { %v1820_v61 = vadd.f32 %v10174_v9, %v1676_v38  ;;  %v1821_v24 = vadd.f32 %v10175_v31, %v1677_v13 }
 0x400   : > { %v2321_v36 = vpop.permute.xlu1 %2320  ;;  %v1964_v34 = vadd.f32 %v10176_v45, %v1820_v61  ;;  %v1965_v2 = vadd.f32 %v10177_v17, %v1821_v24  ;;  %v2551_v61 = vsel %vm5871_vm15, %v7357_v50, 0.0  ;;  %v2553_v17 = vsel %vm5945_vm3, %v7374_v19, 0.0 }
 0x401   : > { %v2360_v52 = vadd.f32 %v2321_v36, %v2216_v27  ;;  %v2165_v55 = vpop.permute.xlu0 %2164  ;;  %v5365_v27 = vunpack.i.h.bf16 %v5363_v63  ;;  %v5364_v36 = vunpack.i.l.bf16 %v5363_v63  ;;  %v2552_v63 = vsel %vm5908_vm1, %v7366_v42, 0.0 }
 0x402   : > { %v7392_v48 = vpop.f32.mrf.mxu1  ;;  %v2210_v56 = vadd.f32 %v2165_v55, %v2066_v10 }
 0x403   : > { %v2380_v26 = vpack.c.bf16 %v2361_v32, %v2360_v52 }
 0x404   : > { %v2354_v62 = vadd.f32 %v2309_v25, %v2210_v56  ;;  %v2546_v56 = vsel %vm5688_vm10, %v7296_v30, 0.0 }
 0x405   : > { %2534 = vmatmul.bf16.gmra.mxu3 %v2380_v26 }
 0x408   : > { %v2167_v14 = vpop.permute.xlu1 %2166 }
 0x409   : > { %v2211_v15 = vadd.f32 %v2167_v14, %v2067_v6  ;;  %v2311_v59 = vpop.permute.xlu0 %2310 }
 0x40a   : > { %v7403_v28 = vpop.f32.mrf.mxu1 }
 0x40b   : > { %v2355_v12 = vadd.f32 %v2311_v59, %v2211_v15  ;;  %v2547_v15 = vsel %vm5727_vm14, %v7312_v7, 0.0  ;;  %v2581_v59 = vadd.f32 %v2546_v56, %v2545_v53 }
 0x40d   : > { %v2377_v1 = vpack.c.bf16 %v2355_v12, %v2354_v62  ;;  %v2582_v8 = vadd.f32 %v2581_v59, %v2547_v15  ;;  %v2549_v62 = vsel %vm5804_vm5, %v7331_v43, 0.0  ;;  %v10196_v15 = vld [vmem:[#allocation26_spill] sm:$0xff] }
 0x40f   : > { %2519 = vmatmul.bf16.gmra.mxu1 %v2377_v1  ;;  %v2583_v12 = vadd.f32 %v2582_v8, %v2548_v16 }
 0x410   : > { %v5358_v51 = vpop.permute.xlu1 %5357 }
 0x411   : > { %v5360_v49 = vunpack.i.h.bf16 %v5358_v51  ;;  %v5359_v21 = vunpack.i.l.bf16 %v5358_v51  ;;  %v5368_v18 = vpop.permute.xlu0 %5367  ;;  %v2584_v13 = vadd.f32 %v2583_v12, %v2549_v62  ;;  %v10188_v51 = vld [vmem:[#allocation19_spill] sm:$0xff] }
 0x412   : > { %v7411_v4 = vpop.f32.mrf.mxu1  ;;  %v5370_v52 = vunpack.i.h.bf16 %v5368_v18  ;;  %v5369_v55 = vunpack.i.l.bf16 %v5368_v18  ;;  %v2555_v18 = vsel %vm5989_vm9, %v7392_v48, 0.0  ;;  %v10199_v12 = vld [vmem:[#allocation27_spill] sm:$0xff] }
 0x413   : > { %v2074_v57 = vadd.f32 %v5359_v21, %v1964_v34  ;;  %v2075_v20 = vadd.f32 %v5360_v49, %v1965_v2  ;;  %v2585_v31 = vadd.f32 %v2584_v13, %v2550_v44  ;;  %v10187_v34 = vld [vmem:[#allocation18_spill] sm:$0xff]  ;;  %v2554_v49 = vsel %vm5964_vm13, %v7383_v29, 0.0 }
 0x415   : > { %v2218_v32 = vadd.f32 %v5364_v36, %v2074_v57  ;;  %v2219_v39 = vadd.f32 %v5365_v27, %v2075_v20  ;;  %v2586_v45 = vadd.f32 %v2585_v31, %v2551_v61  ;;  %v10190_v36 = vld [vmem:[#allocation20_spill] sm:$0xff]  ;;  %v10201_v61 = vld [vmem:[#allocation29_spill] sm:$0xff] }
 0x417   : > { %v2362_v60 = vadd.f32 %v5369_v55, %v2218_v32  ;;  %v2363_v33 = vadd.f32 %v5370_v52, %v2219_v39  ;;  %v2587_v2 = vadd.f32 %v2586_v45, %v2552_v63  ;;  %v10192_v52 = vld [vmem:[#allocation21_spill] sm:$0xff]  ;;  %v2556_v55 = vsel %vm6009_vm4, %v7403_v28, 0.0  ;;  %v10193_v39 = vld [vmem:[#allocation22_spill] sm:$0xff] }
 0x418   : > { %vm10200_vm4 = vnez %v10199_v12  ;;  %v10203_v45 = vld [vmem:[#allocation30_spill] sm:$0xff] }
 0x419   : > { %v2381_v40 = vpack.c.bf16 %v2363_v33, %v2362_v60  ;;  %v2588_v21 = vadd.f32 %v2587_v2, %v2553_v17  ;;  %v2557_v60 = vsel %vm6032_vm0, %v7411_v4, 0.0  ;;  %vm10202_vm0 = vnez %v10201_v61 }
 0x41a   : > { %v7413_v26 = vpop.f32.mrf.mxu1 }
 0x41b   : > { %2539 = vmatmul.bf16.gmra.mxu3 %v2381_v40  ;;  %v2589_v57 = vadd.f32 %v2588_v21, %v2554_v49  ;;  %v10194_v40 = vld [vmem:[#allocation24_spill] sm:$0xff] }
 0x41c   : > { %vm10195_vm13 = vnez %v10194_v40  ;;  %v10205_v49 = vld [vmem:[#allocation32_spill] sm:$0xff] }
 0x41d   : > { %v2590_v32 = vadd.f32 %v2589_v57, %v2555_v18  ;;  %v2558_v56 = vsel %vm10195_vm13, %v7413_v26, 0.0  ;;  %vm10204_vm13 = vnez %v10203_v45  ;;  %v10207_v57 = vld [vmem:[#allocation34_spill] sm:$0xff] }
 0x41e   : > { %vm10208_vm9 = vnez %v10207_v57 }
 0x41f   : > { %v2591_v33 = vadd.f32 %v2590_v32, %v2556_v55 }
 0x421   : > { %v2592_v53 = vadd.f32 %v2591_v33, %v2557_v60 }
 0x422   : > { %v7415_v3 = vpop.f32.mrf.mxu1 }
 0x423   : > { %v2559_v59 = vsel %vm6089_vm8, %v7415_v3, 0.0  ;;  %v2593_v16 = vadd.f32 %v2592_v53, %v2558_v56  ;;  %vm10206_vm8 = vnez %v10205_v49  ;;  %v10210_v56 = vld [vmem:[#allocation37_spill] sm:$0xff] }
 0x425   : > { %v2594_v13 = vadd.f32 %v2593_v16, %v2559_v59  ;;  %v10212_v16 = vld [vmem:[#allocation39_spill] sm:$0xff] }
 0x42a   : > { %v7417_v46 = vpop.f32.mrf.mxu1 }
 0x42b   : > { %v2560_v44 = vsel %vm10200_vm4, %v7417_v46, 0.0 }
 0x42c   : > { %v2595_v63 = vadd.f32 %v2594_v13, %v2560_v44 }
 0x432   : > { %v7419_v54 = vpop.f32.mrf.mxu1 }
 0x433   : > { %v2561_v31 = vsel %vm10202_vm0, %v7419_v54, 0.0  ;;  %vm10211_vm0 = vnez %v10210_v56 }
 0x434   : > { %v2596_v2 = vadd.f32 %v2595_v63, %v2561_v31  ;;  %v10214_v31 = vld [vmem:[#allocation42_spill] sm:$0xff] }
 0x43a   : > { %v7421_v10 = vpop.f32.mrf.mxu1 }
 0x43b   : > { %v2562_v17 = vsel %vm10204_vm13, %v7421_v10, 0.0  ;;  %vm10213_vm13 = vnez %v10212_v16 }
 0x43c   : > { %v2597_v18 = vadd.f32 %v2596_v2, %v2562_v17  ;;  %v10216_v2 = vld [vmem:[#allocation45_spill] sm:$0xff] }
 0x442   : > { %v7423_v37 = vpop.f32.mrf.mxu1 }
 0x443   : > { %v2563_v21 = vsel %vm10206_vm8, %v7423_v37, 0.0  ;;  %vm10215_vm8 = vnez %v10214_v31 }
 0x444   : > { %v2598_v32 = vadd.f32 %v2597_v18, %v2563_v21 }
 0x44a   : > { %v7425_v35 = vpop.f32.mrf.mxu1 }
 0x44b   : > { %v2564_v55 = vsel %vm10208_vm9, %v7425_v35, 0.0  ;;  %vm10217_vm9 = vnez %v10216_v2 }
 0x44c   : > { %v2599_v59 = vadd.f32 %v2598_v32, %v2564_v55  ;;  %v10219_v55 = vld [vmem:[#allocation47_spill] sm:$0xff] }
 0x452   : > { %v7427_v25 = vpop.f32.mrf.mxu1  ;;  %v7451_v1 = vpop.f32.mrf.mxu3 }
 0x453   : > { %10184 = vst [vmem:[#allocation56_spill] sm:$0xff] %v7451_v1  ;;  %v2565_v53 = vsel %vm10211_vm0, %v7427_v25, 0.0  ;;  %vm10220_vm0 = vnez %v10219_v55 }
 0x454   : > { %v2600_v13 = vadd.f32 %v2599_v59, %v2565_v53 }
 0x45a   : > { %v7429_v5 = vpop.f32.mrf.mxu1  ;;  %v7470_v20 = vpop.f32.mrf.mxu3 }
 0x45b   : > { %10191 = vst [vmem:[#allocation65_spill] sm:$0xff] %v7470_v20  ;;  %v2566_v44 = vsel %vm10213_vm13, %v7429_v5, 0.0 }
 0x45c   : > { %v2601_v17 = vadd.f32 %v2600_v13, %v2566_v44  ;;  %v10222_v44 = vld [vmem:[#allocation51_spill] sm:$0xff] }
 0x462   : > { %v7446_v58 = vpop.f32.mrf.mxu1 }
 0x463   : > { %v2567_v63 = vsel %vm10215_vm8, %v7446_v58, 0.0  ;;  %vm10223_vm8 = vnez %v10222_v44 }
 0x464   : > { %v2602_v18 = vadd.f32 %v2601_v17, %v2567_v63 }
 0x46a   : > { %v7465_v27 = vpop.f32.mrf.mxu1 }
 0x46b   : > { %10189 = vst [vmem:[#allocation54_spill] sm:$0xff] %v7465_v27  ;;  %v2568_v21 = vsel %vm10217_vm9, %v7465_v27, 0.0 }
 0x46c   : > { %v2603_v16 = vadd.f32 %v2602_v18, %v2568_v21  ;;  %v10226_v21 = vld [vmem:[#allocation4_spill] sm:$0xff] }
 0x470   : > { %v7484_v8 = vpop.f32.mrf.mxu3 }
 0x471   : > { %10197 = vst [vmem:[#allocation69_spill] sm:$0xff] %v7484_v8 }
 0x472   : > { %v7486_v62 = vpop.f32.mrf.mxu1 }
 0x473   : > { %10198 = vst [vmem:[#allocation68_spill] sm:$0xff] %v7486_v62  ;;  %v2569_v32 = vsel %vm10220_vm0, %v7486_v62, 0.0  ;;  %vm10227_vm0 = vnez %v10226_v21  ;;  %v10234_v21 = vld [vmem:[#allocation12_spill] sm:$0xff] }
 0x474   : > { %v2604_v31 = vadd.f32 %v2603_v16, %v2569_v32  ;;  %v2573_v18 = vsel %vm10227_vm0, %v7451_v1, 0.0  ;;  %v10228_v16 = vld [vmem:[#allocation6_spill] sm:$0xff]  ;;  %vm10235_vm0 = vnez %v10234_v21  ;;  %v5446_v1 = vmov 256.0  }
 0x475   : > { %5401 = vrcp.f32 %v5446_v1 }
 0x478   : > { %v7503_v60 = vpop.f32.mrf.mxu3 }
 0x479   : > { %10209 = vst [vmem:[#allocation72_spill] sm:$0xff] %v7503_v60 }
 0x47a   : > { %v7505_v33 = vpop.f32.mrf.mxu1 }
 0x47b   : > { %v2570_v59 = vsel %vm6382_vm7, %v7505_v33, 0.0  ;;  %vm10229_vm7 = vnez %v10228_v16  ;;  %v10236_v16 = vld [vmem:[#allocation15_spill] sm:$0xff] }
 0x47c   : > { %v2605_v2 = vadd.f32 %v2604_v31, %v2570_v59  ;;  %v2574_v32 = vsel %vm10229_vm7, %v7470_v20, 0.0  ;;  %v10230_v31 = vld [vmem:[#allocation8_spill] sm:$0xff]  ;;  %vm10237_vm7 = vnez %v10236_v16 }
 0x488   : > { %v7519_v57 = vpop.f32.mrf.mxu3 }
 0x489   : > { %10218 = vst [vmem:[#allocation66_spill] sm:$0xff] %v7519_v57 }
 0x48c   : > { %v7521_v56 = vpop.f32.mrf.mxu1 }
 0x48d   : > { %v2571_v13 = vsel %vm10223_vm8, %v7521_v56, 0.0  ;;  %vm10231_vm8 = vnez %v10230_v31  ;;  %v10238_v31 = vld [vmem:[#allocation17_spill] sm:$0xff] }
 0x48e   : > { %v2606_v63 = vadd.f32 %v2605_v2, %v2571_v13  ;;  %v2575_v2 = vsel %vm10231_vm8, %v7484_v8, 0.0  ;;  %v10232_v13 = vld [vmem:[#allocation10_spill] sm:$0xff]  ;;  %vm10239_vm8 = vnez %v10238_v31 }
 0x490   : > { %v2537_v55 = vpop.f32.mrf.mxu3 }
 0x494   : > { %v7532_v17 = vpop.f32.mrf.mxu1 }
 0x495   : > { %10224 = vst [vmem:[#allocation144_spill] sm:$0xff] %v7532_v17  ;;  %v2572_v49 = vsel %vm6424_vm12, %v7532_v17, 0.0  ;;  %vm10233_vm12 = vnez %v10232_v13 }
 0x496   : > { %v2607_v62 = vadd.f32 %v2606_v63, %v2572_v49  ;;  %v2576_v27 = vsel %vm10233_vm12, %v7503_v60, 0.0 }
 0x498   : > { %v2608_v53 = vadd.f32 %v2607_v62, %v2573_v18  ;;  %v2577_v62 = vsel %vm10235_vm0, %v7519_v57, 0.0 }
 0x49a   : > { %v2609_v44 = vadd.f32 %v2608_v53, %v2574_v32  ;;  %v2578_v53 = vsel %vm10237_vm7, %v2537_v55, 0.0 }
 0x49c   : > { %v2610_v59 = vadd.f32 %v2609_v44, %v2575_v2  ;;  %v5402_v2 = vpop.eup %5401 }
 0x49d   : > { %v2623_v57 = vmul.f32 256.0, %v5402_v2  ;;  %vm2627_vm7 = vweird.f32 %v5402_v2 }
 0x49e   : > { %v2540_v49 = vpop.f32.mrf.mxu3  ;;  %v2611_v63 = vadd.f32 %v2610_v59, %v2576_v27  ;;  %v10240_v27 = vld [vmem:[#allocation25_spill] sm:$0xff] }
 0x49f   : > { %v2579_v44 = vsel %vm10239_vm8, %v2540_v49, 0.0  ;;  %vm10241_vm12 = vnez %v10240_v27  ;;  %v2624_v1 = vsub.f32 1.0, %v2623_v57 }
 0x4a0   : > { %v2612_v18 = vadd.f32 %v2611_v63, %v2577_v62 }
 0x4a1   : > { %v2625_v20 = vmul.f32 %v5402_v2, %v2624_v1 }
 0x4a2   : > { %v2613_v32 = vadd.f32 %v2612_v18, %v2578_v53 }
 0x4a3   : > { %v2626_v53 = vadd.f32 %v5402_v2, %v2625_v20 }
 0x4a4   : > { %v2614_v8 = vadd.f32 %v2613_v32, %v2579_v44 }
 0x4a5   : > { %v7561_v17 = vsel %vm2627_vm7, %v5402_v2, %v2626_v53  ;;  %vm10245_vm7 = vnez %v10188_v51 }
 0x4a6   : > { %v7556_v13 = vpop.f32.mrf.mxu3  ;;  %10242 = vst [vmem:[#allocation62_spill] sm:$0xff] %v7561_v17 }
 0x4a7   : > { %v2580_v59 = vsel %vm10241_vm12, %v7556_v13, 0.0 }
 0x4a8   : > { %v2615_v21 = vadd.f32 %v2614_v8, %v2580_v59 }
 0x4aa   : > { %v2616_v63 = vrot.slane %v2615_v21, 4 }
 0x4ac   : > { %v2617_v62 = vadd.f32 %v2616_v63, %v2615_v21 }
 0x4ae   : > { %v2618_v60 = vrot.slane %v2617_v62, 2 }
 0x4b0   : > { %v2619_v16 = vadd.f32 %v2618_v60, %v2617_v62 }
 0x4b2   : > { %v2620_v18 = vrot.slane %v2619_v16, 1 }
 0x4b4   : > { %v2621_v31 = vadd.f32 %v2620_v18, %v2619_v16 }
 0x4b6   : > { %v7564_v32 = vmul.f32 %v7561_v17, %v2621_v31 }
 0x4b8   : > { %v7567_v44 = vsub.f32 %v2537_v55, %v7564_v32  ;;  %v7570_v8 = vsub.f32 %v2540_v49, %v7564_v32  ;;  %v7574_v57 = vsub.f32 %v7284_v47, %v7564_v32  ;;  %v7578_v20 = vsub.f32 %v7296_v30, %v7564_v32 }
 0x4b9   : > { %v7582_v60 = vsub.f32 %v7312_v7, %v7564_v32  ;;  %v7590_v16 = vsub.f32 %v7323_v11, %v7564_v32  ;;  %v7594_v47 = vsub.f32 %v7331_v43, %v7564_v32  ;;  %v7604_v49 = vsub.f32 %v7343_v22, %v7564_v32 }
 0x4ba   : > { %10243 = vst [vmem:[#allocation67_spill] sm:$0xff] %v7567_v44  ;;  %v2666_v21 = vmul.f32 %v7574_v57, %v7574_v57  ;;  %v2667_v55 = vmul.f32 %v7578_v20, %v7578_v20  ;;  %v7610_v43 = vsub.f32 %v7357_v50, %v7564_v32  ;;  %v7618_v1 = vsub.f32 %v7366_v42, %v7564_v32 }
 0x4bb   : > { %10244 = vst [vmem:[#allocation75_spill] sm:$0xff] %v7570_v8  ;;  %v2668_v30 = vmul.f32 %v7582_v60, %v7582_v60  ;;  %v2669_v11 = vmul.f32 %v7590_v16, %v7590_v16  ;;  %v2670_v59 = vmul.f32 %v7594_v47, %v7594_v47  ;;  %v2671_v22 = vmul.f32 %v7604_v49, %v7604_v49 }
 0x4bc   : > { %v2702_v7 = vsel %vm5658_vm6, %v2666_v21, 0.0  ;;  %v2703_v31 = vsel %vm5688_vm10, %v2667_v55, 0.0  ;;  %v7626_v50 = vsub.f32 %v7374_v19, %v7564_v32  ;;  %v2672_v21 = vmul.f32 %v7610_v43, %v7610_v43 }
 0x4bd   : > { %v2738_v2 = vadd.f32 %v2703_v31, %v2702_v7  ;;  %v2704_v63 = vsel %vm5727_vm14, %v2668_v30, 0.0  ;;  %v2705_v18 = vsel %vm5767_vm2, %v2669_v11, 0.0  ;;  %v2706_v55 = vsel %vm5804_vm5, %v2670_v59, 0.0 }
 0x4be   : > { %v7634_v42 = vsub.f32 %v7383_v29, %v7564_v32  ;;  %v2673_v7 = vmul.f32 %v7618_v1, %v7618_v1  ;;  %v2707_v31 = vsel %vm5840_vm11, %v2671_v22, 0.0  ;;  %v7642_v19 = vsub.f32 %v7392_v48, %v7564_v32 }
 0x4bf   : > { %v2739_v62 = vadd.f32 %v2738_v2, %v2704_v63  ;;  %v2674_v2 = vmul.f32 %v7626_v50, %v7626_v50  ;;  %v2708_v59 = vsel %vm5871_vm15, %v2672_v21, 0.0  ;;  %v7650_v29 = vsub.f32 %v7403_v28, %v7564_v32 }
 0x4c0   : > { %v2709_v22 = vsel %vm5908_vm1, %v2673_v7, 0.0  ;;  %v7658_v48 = vsub.f32 %v7411_v4, %v7564_v32  ;;  %v7666_v28 = vsub.f32 %v7413_v26, %v7564_v32  ;;  %v7674_v4 = vsub.f32 %v7415_v3, %v7564_v32 }
 0x4c1   : > { %v2740_v53 = vadd.f32 %v2739_v62, %v2705_v18  ;;  %v2675_v62 = vmul.f32 %v7634_v42, %v7634_v42  ;;  %v2710_v21 = vsel %vm5945_vm3, %v2674_v2, 0.0  ;;  %vm10246_vm3 = vnez %v10190_v36 }
 0x4c2   : > { %v7682_v26 = vsub.f32 %v7417_v46, %v7564_v32  ;;  %v7690_v3 = vsub.f32 %v7419_v54, %v7564_v32  ;;  %v7698_v46 = vsub.f32 %v7421_v10, %v7564_v32  ;;  %v7706_v54 = vsub.f32 %v7423_v37, %v7564_v32 }
 0x4c3   : > { %v2741_v30 = vadd.f32 %v2740_v53, %v2706_v55  ;;  %v2676_v53 = vmul.f32 %v7642_v19, %v7642_v19  ;;  %v2711_v7 = vsel %vm10245_vm7, %v2675_v62, 0.0  ;;  %vm10247_vm7 = vnez %v10192_v52 }
 0x4c4   : > { %v7714_v10 = vsub.f32 %v7425_v35, %v7564_v32  ;;  %v7722_v37 = vsub.f32 %v7427_v25, %v7564_v32  ;;  %v7730_v35 = vsub.f32 %v7429_v5, %v7564_v32  ;;  %v7738_v25 = vsub.f32 %v7446_v58, %v7564_v32  ;;  %v10255_v5 = vld [vmem:[#allocation54_spill] sm:$0xff]  ;;  %v10258_v58 = vld [vmem:[#allocation68_spill] sm:$0xff] }
 0x4c5   : > { %v2742_v11 = vadd.f32 %v2741_v30, %v2707_v31  ;;  %v2677_v30 = vmul.f32 %v7650_v29, %v7650_v29  ;;  %v2712_v2 = vsel %vm10246_vm3, %v2676_v53, 0.0  ;;  %vm10248_vm3 = vnez %v10193_v39 }
 0x4c6   : > { %v2688_v17 = vmul.f32 %v7738_v25, %v7738_v25 }
 0x4c7   : > { %v2743_v63 = vadd.f32 %v2742_v11, %v2708_v59  ;;  %v2678_v11 = vmul.f32 %v7658_v48, %v7658_v48  ;;  %v2713_v62 = vsel %vm10247_vm7, %v2677_v30, 0.0  ;;  %vm10249_vm7 = vnez %v10194_v40 }
 0x4c9   : > { %v2744_v18 = vadd.f32 %v2743_v63, %v2709_v22  ;;  %v2679_v63 = vmul.f32 %v7666_v28, %v7666_v28  ;;  %v2714_v53 = vsel %vm10248_vm3, %v2678_v11, 0.0  ;;  %vm10250_vm3 = vnez %v10196_v15 }
 0x4cb   : > { %v2745_v55 = vadd.f32 %v2744_v18, %v2710_v21  ;;  %v2680_v18 = vmul.f32 %v7674_v4, %v7674_v4  ;;  %v2715_v30 = vsel %vm10249_vm7, %v2679_v63, 0.0 }
 0x4cd   : > { %v2746_v31 = vadd.f32 %v2745_v55, %v2711_v7  ;;  %v2681_v55 = vmul.f32 %v7682_v26, %v7682_v26  ;;  %v2716_v11 = vsel %vm10250_vm3, %v2680_v18, 0.0  ;;  %vm10251_vm3 = vnez %v10201_v61 }
 0x4cf   : > { %v2747_v59 = vadd.f32 %v2746_v31, %v2712_v2  ;;  %v2682_v31 = vmul.f32 %v7690_v3, %v7690_v3  ;;  %v2717_v63 = vsel %vm10200_vm4, %v2681_v55, 0.0  ;;  %vm10252_vm4 = vnez %v10203_v45 }
 0x4d1   : > { %v2748_v22 = vadd.f32 %v2747_v59, %v2713_v62  ;;  %v2683_v59 = vmul.f32 %v7698_v46, %v7698_v46  ;;  %v2718_v18 = vsel %vm10251_vm3, %v2682_v31, 0.0  ;;  %v10253_v31 = vld [vmem:[#allocation32_spill] sm:$0xff] }
 0x4d2   : > { %vm10254_vm3 = vnez %v10253_v31 }
 0x4d3   : > { %v2749_v21 = vadd.f32 %v2748_v22, %v2714_v53  ;;  %v2684_v22 = vmul.f32 %v7706_v54, %v7706_v54  ;;  %v2719_v55 = vsel %vm10252_vm4, %v2683_v59, 0.0  ;;  %v10256_v59 = vld [vmem:[#allocation34_spill] sm:$0xff] }
 0x4d4   : > { %vm10257_vm4 = vnez %v10256_v59 }
 0x4d5   : > { %v2750_v7 = vadd.f32 %v2749_v21, %v2715_v30  ;;  %v2685_v21 = vmul.f32 %v7714_v10, %v7714_v10 }
 0x4d7   : > { %v2751_v2 = vadd.f32 %v2750_v7, %v2716_v11  ;;  %v2686_v7 = vmul.f32 %v7722_v37, %v7722_v37  ;;  %v2720_v11 = vsel %vm10254_vm3, %v2684_v22, 0.0  ;;  %v10259_v22 = vld [vmem:[#allocation37_spill] sm:$0xff] }
 0x4d8   : > { %vm10260_vm3 = vnez %v10259_v22 }
 0x4d9   : > { %v2752_v62 = vadd.f32 %v2751_v2, %v2717_v63  ;;  %v7746_v63 = vsub.f32 %v10255_v5, %v7564_v32  ;;  %v7762_v5 = vsub.f32 %v7505_v33, %v7564_v32  ;;  %v10264_v33 = vld [vmem:[#allocation144_spill] sm:$0xff] }
 0x4da   : > { %v7778_v31 = vsub.f32 %v10264_v33, %v7564_v32  ;;  %v10271_v33 = vld [vmem:[#allocation65_spill] sm:$0xff] }
 0x4db   : > { %v2753_v53 = vadd.f32 %v2752_v62, %v2718_v18  ;;  %v2687_v62 = vmul.f32 %v7730_v35, %v7730_v35  ;;  %v2721_v18 = vsel %vm10257_vm4, %v2685_v21, 0.0  ;;  %v2689_v59 = vmul.f32 %v7746_v63, %v7746_v63 }
 0x4dc   : > { %10265 = vst [vmem:[#allocation79_spill] sm:$0xff] %v7778_v31  ;;  %v2691_v21 = vmul.f32 %v7762_v5, %v7762_v5  ;;  %v7794_v61 = vsub.f32 %v10271_v33, %v7564_v32  ;;  %v10279_v33 = vld [vmem:[#allocation72_spill] sm:$0xff] }
 0x4dd   : > { %v2754_v30 = vadd.f32 %v2753_v53, %v2719_v55  ;;  %v7754_v55 = vsub.f32 %v10258_v58, %v7564_v32  ;;  %v7770_v58 = vsub.f32 %v7521_v56, %v7564_v32  ;;  %v10267_v56 = vld [vmem:[#allocation56_spill] sm:$0xff]  ;;  %v7810_v15 = vsub.f32 %v10279_v33, %v7564_v32 }
 0x4de   : > { %v7786_v45 = vsub.f32 %v10267_v56, %v7564_v32  ;;  %10272 = vst [vmem:[#allocation149_spill] sm:$0xff] %v7794_v61  ;;  %v10275_v56 = vld [vmem:[#allocation69_spill] sm:$0xff]  ;;  %v5447_v33 = vmov 255.0  }
 0x4df   : > { %v2755_v2 = vadd.f32 %v2754_v30, %v2720_v11  ;;  %v2722_v30 = vsel %vm10260_vm3, %v2686_v7, 0.0  ;;  %v2690_v22 = vmul.f32 %v7754_v55, %v7754_v55  ;;  %v10262_v7 = vld [vmem:[#allocation42_spill] sm:$0xff]  ;;  %v7802_v12 = vsub.f32 %v10275_v56, %v7564_v32  ;;  %10280 = vst [vmem:[#allocation84_spill] sm:$0xff] %v7810_v15 }
 0x4e0   : > { %vm10263_vm3 = vnez %v10262_v7  ;;  %10268 = vst [vmem:[#allocation81_spill] sm:$0xff] %v7786_v45  ;;  %v2692_v7 = vmul.f32 %v7770_v58, %v7770_v58  ;;  %v10283_v56 = vld [vmem:[#allocation66_spill] sm:$0xff]  ;;  %5403 = vrcp.f32 %v5447_v33 }
 0x4e1   : > { %v2756_v53 = vadd.f32 %v2755_v2, %v2721_v18  ;;  %v2723_v2 = vsel %vm10213_vm13, %v2687_v62, 0.0  ;;  %v2693_v62 = vmul.f32 %v7778_v31, %v7778_v31  ;;  %10276 = vst [vmem:[#allocation82_spill] sm:$0xff] %v7802_v12  ;;  %v7818_v31 = vsub.f32 %v10283_v56, %v7564_v32  ;;  %v10289_v56 = vld [vmem:[#allocation8_spill] sm:$0xff] }
 0x4e3   : > { %v2757_v11 = vadd.f32 %v2756_v53, %v2722_v30  ;;  %v2724_v53 = vsel %vm10263_vm3, %v2688_v17, 0.0  ;;  %v10269_v17 = vld [vmem:[#allocation47_spill] sm:$0xff]  ;;  %10284 = vst [vmem:[#allocation190_spill] sm:$0xff] %v7818_v31 }
 0x4e4   : > { %vm10270_vm3 = vnez %v10269_v17  ;;  %v2694_v17 = vmul.f32 %v7786_v45, %v7786_v45  ;;  %v10287_v45 = vld [vmem:[#allocation6_spill] sm:$0xff] }
 0x4e5   : > { %v2758_v18 = vadd.f32 %v2757_v11, %v2723_v2  ;;  %v2725_v11 = vsel %vm10217_vm9, %v2689_v59, 0.0  ;;  %v10273_v59 = vld [vmem:[#allocation48_spill] sm:$0xff]  ;;  %vm10288_vm13 = vnez %v10287_v45 }
 0x4e6   : > { %vm10274_vm9 = vnez %v10273_v59  ;;  %v2695_v59 = vmul.f32 %v7794_v61, %v7794_v61  ;;  %v2697_v61 = vmul.f32 %v7810_v15, %v7810_v15  ;;  %v5404_v45 = vpop.eup %5403 }
 0x4e7   : > { %v2759_v30 = vadd.f32 %v2758_v18, %v2724_v53  ;;  %v2726_v18 = vsel %vm10270_vm3, %v2690_v22, 0.0  ;;  %v10277_v22 = vld [vmem:[#allocation51_spill] sm:$0xff] }
 0x4e8   : > { %vm10278_vm3 = vnez %v10277_v22  ;;  %v2696_v22 = vmul.f32 %v7802_v12, %v7802_v12 }
 0x4e9   : > { %v2760_v2 = vadd.f32 %v2759_v30, %v2725_v11  ;;  %v2727_v30 = vsel %vm10274_vm9, %v2691_v21, 0.0  ;;  %v10281_v21 = vld [vmem:[#allocation55_spill] sm:$0xff] }
 0x4ea   : > { %vm10282_vm9 = vnez %v10281_v21 }
 0x4eb   : > { %v2761_v53 = vadd.f32 %v2760_v2, %v2726_v18  ;;  %v2728_v2 = vsel %vm10278_vm3, %v2692_v7, 0.0  ;;  %v10285_v7 = vld [vmem:[#allocation4_spill] sm:$0xff] }
 0x4ec   : > { %vm10286_vm3 = vnez %v10285_v7 }
 0x4ed   : > { %v2762_v11 = vadd.f32 %v2761_v53, %v2727_v30  ;;  %v2729_v53 = vsel %vm10282_vm9, %v2693_v62, 0.0  ;;  %v2731_v62 = vsel %vm10288_vm13, %v2695_v59, 0.0  ;;  %vm10290_vm9 = vnez %v10289_v56 }
 0x4ee   : > { %v2732_v21 = vsel %vm10290_vm9, %v2696_v22, 0.0 }
 0x4ef   : > { %v2763_v18 = vadd.f32 %v2762_v11, %v2728_v2  ;;  %v2730_v11 = vsel %vm10286_vm3, %v2694_v17, 0.0  ;;  %v7834_v17 = vsub.f32 %v7556_v13, %v7564_v32  ;;  %v10294_v13 = vld [vmem:[#allocation15_spill] sm:$0xff] }
 0x4f0   : > { %vm10295_vm9 = vnez %v10294_v13 }
 0x4f1   : > { %v2764_v30 = vadd.f32 %v2763_v18, %v2729_v53  ;;  %v2698_v53 = vmul.f32 %v7818_v31, %v7818_v31 }
 0x4f3   : > { %v2765_v2 = vadd.f32 %v2764_v30, %v2730_v11  ;;  %v2699_v30 = vmul.f32 %v7567_v44, %v7567_v44  ;;  %v10291_v11 = vld [vmem:[#allocation10_spill] sm:$0xff]  ;;  %v2734_v56 = vsel %vm10235_vm0, %v2698_v53, 0.0  ;;  %v10296_v44 = vld [vmem:[#allocation17_spill] sm:$0xff]  ;;  %vm2784_vm0 = vweird.f32 %v5404_v45 }
 0x4f4   : > { %vm10292_vm3 = vnez %v10291_v11 }
 0x4f5   : > { %v2766_v18 = vadd.f32 %v2765_v2, %v2731_v62  ;;  %v2733_v33 = vsel %vm10292_vm3, %v2697_v61, 0.0  ;;  %v2700_v2 = vmul.f32 %v7570_v8, %v7570_v8  ;;  %v2735_v32 = vsel %vm10295_vm9, %v2699_v30, 0.0 }
 0x4f7   : > { %v2767_v12 = vadd.f32 %v2766_v18, %v2732_v21  ;;  %v2701_v21 = vmul.f32 %v7834_v17, %v7834_v17  ;;  %v2780_v18 = vmul.f32 255.0, %v5404_v45  ;;  %v2736_v61 = vsel %vm10239_vm8, %v2700_v2, 0.0 }
 0x4f9   : > { %v2768_v59 = vadd.f32 %v2767_v12, %v2733_v33  ;;  %v2737_v12 = vsel %vm10241_vm12, %v2701_v21, 0.0  ;;  %v2781_v33 = vsub.f32 1.0, %v2780_v18 }
 0x4fb   : > { %v2769_v22 = vadd.f32 %v2768_v59, %v2734_v56  ;;  %v2782_v53 = vmul.f32 %v5404_v45, %v2781_v33 }
 0x4fd   : > { %v2770_v7 = vadd.f32 %v2769_v22, %v2735_v32  ;;  %v2783_v31 = vadd.f32 %v5404_v45, %v2782_v53 }
 0x4ff   : > { %v2771_v11 = vadd.f32 %v2770_v7, %v2736_v61  ;;  %v7852_v30 = vsel %vm2784_vm0, %v5404_v45, %v2783_v31  ;;  %v3036_v45 = vld [vmem:[#allocation2 + $0x9] sm:$0xff] }
 0x500   : > { %10297 = vst [vmem:[#allocation76_spill] sm:$0xff] %v7852_v30 }
 0x501   : > { %v2772_v8 = vadd.f32 %v2771_v11, %v2737_v12 }
 0x503   : > { %v2773_v62 = vrot.slane %v2772_v8, 4 }
 0x505   : > { %v2774_v56 = vadd.f32 %v2773_v62, %v2772_v8 }
 0x507   : > { %v2775_v59 = vrot.slane %v2774_v56, 2 }
 0x509   : > { %v2776_v15 = vadd.f32 %v2775_v59, %v2774_v56  ;;  %v3035_v56 = vld [vmem:[#allocation2 + $0x1] sm:$0xff] }
 0x50a   : > { %v3179_v59 = vld [vmem:[#allocation2 + $0x2] sm:$0xff] }
 0x50b   : > { %v2777_v13 = vrot.slane %v2776_v15, 1 }
 0x50d   : > { %v2778_v22 = vadd.f32 %v2777_v13, %v2776_v15  ;;  %v5371_v15 = vpack.i.bf16 %v3036_v45, %v3035_v56 }
 0x50f   : > { %v2786_v32 = vmul.f32 %v7852_v30, %v2778_v22  ;;  %5372 = vrot.lane.b32.xlu1 %v5371_v15, %s5448_s29  ;;  %v3180_v22 = vld [vmem:[#allocation2 + $0xa] sm:$0xff]  ;;  %v10328_v30 = vld [vmem:[#allocation45_spill] sm:$0xff] }
 0x511   : > { %5405 = vrsqrt.f32 %v2786_v32  ;;  %vm2795_vm8 = vcmp.eq.f32.partialorder %v2786_v32, inf  ;;  %v2798_v8 = vand.u32 2147483648, %v2786_v32  ;;  %vm2797_vm9 = vcmp.eq.f32.partialorder %v2786_v32, 0.0 }
 0x517   : > { %v5406_v7 = vpop.eup %5405 }
 0x518   : > { %v2789_v2 = vmul.f32 %v5406_v7, %v2786_v32 }
 0x51a   : > { %v2790_v61 = vmul.f32 %v5406_v7, %v2789_v2 }
 0x51c   : > { %v2791_v21 = vmul.f32 0.5, %v2790_v61 }
 0x51e   : > { %v2792_v18 = vsub.f32 1.5, %v2791_v21 }
 0x520   : > { %v2793_v11 = vmul.f32 %v5406_v7, %v2792_v18  ;;  %v5376_v7 = vpack.i.bf16 %v3180_v22, %v3179_v59 }
 0x522   : > { %v2794_v12 = vmul.f32 %v2793_v11, %v2786_v32  ;;  %5377 = vrot.lane.b32.xlu0 %v5376_v7, %s5438_s17 }
 0x524   : > { %v2796_v62 = vsel %vm2795_vm8, %v2786_v32, %v2794_v12  ;;  %v2787_v32 = vld [vmem:[%s9540_s5] sm:$0x1] }
 0x525   : > { %v2799_v33 = vsel %vm2797_vm9, %v2798_v8, %v2796_v62  ;;  %v7863_v8 = vld [vmem:[%s9541_s6] ss:$0 sm:$0xff] }
 0x526   : > { %v2800_v53 = vadd.f32 0.001, %v2799_v33 }
 0x528   : > { %5407 = vrsqrt.f32 %v2800_v53  ;;  %vm2807_vm0 = vweird.f32 %v2800_v53 }
 0x52e   : > { %v5408_v31 = vpop.eup %5407 }
 0x52f   : > { %v2802_v13 = vmul.f32 %v5408_v31, %v2800_v53  ;;  %vm2808_vm8 = vweird.f32 %v5408_v31 }
 0x530   : > { %vm2809_vm9 = vmor %vm2807_vm0, %vm2808_vm8  ;;  %vm10298_vm8 = vnez %v10187_v34  ;;  %vm10299_vm0 = vnez %v10188_v51 }
 0x531   : > { %v2803_v2 = vmul.f32 %v5408_v31, %v2802_v13 }
 0x533   : > { %v2804_v61 = vmul.f32 0.5, %v2803_v2 }
 0x535   : > { %v2805_v21 = vsub.f32 1.5, %v2804_v61 }
 0x537   : > { %v2806_v18 = vmul.f32 %v5408_v31, %v2805_v21 }
 0x539   : > { %v2810_v11 = vsel %vm2809_vm9, %v5408_v31, %v2806_v18  ;;  %vm10300_vm9 = vnez %v10190_v36 }
 0x53a   : > { %v2811_v12 = vmul.f32 %v2810_v11, %v2787_v32 }
 0x53c   : > { %v7865_v62 = vperm.slane %v2811_v12, 0 }
 0x53e   : > { %v2850_v33 = vmul.f32 %v7865_v62, %v7834_v17  ;;  %v2815_v53 = vmul.f32 %v7865_v62, %v7574_v57  ;;  %v2816_v31 = vmul.f32 %v7865_v62, %v7578_v20  ;;  %v2817_v13 = vmul.f32 %v7865_v62, %v7582_v60 }
 0x53f   : > { %v2818_v59 = vmul.f32 %v7865_v62, %v7590_v16  ;;  %v2819_v17 = vmul.f32 %v7865_v62, %v7594_v47  ;;  %v2820_v22 = vmul.f32 %v7865_v62, %v7604_v49  ;;  %v2821_v2 = vmul.f32 %v7865_v62, %v7610_v43 }
 0x540   : > { %v2890_v56 = vadd.f32 %v7863_v8, %v2850_v33  ;;  %v2855_v57 = vadd.f32 %v7863_v8, %v2815_v53  ;;  %v2856_v7 = vadd.f32 %v7863_v8, %v2816_v31  ;;  %v2857_v20 = vadd.f32 %v7863_v8, %v2817_v13 }
 0x541   : > { %v2822_v60 = vmul.f32 %v7865_v62, %v7618_v1  ;;  %v2858_v16 = vadd.f32 %v7863_v8, %v2818_v59  ;;  %v2823_v47 = vmul.f32 %v7865_v62, %v7626_v50  ;;  %v2859_v61 = vadd.f32 %v7863_v8, %v2819_v17 }
 0x542   : > { %v2926_v45 = vmax.f32 %v2890_v56, 0.0  ;;  %v2824_v49 = vmul.f32 %v7865_v62, %v7634_v42  ;;  %v2825_v43 = vmul.f32 %v7865_v62, %v7642_v19  ;;  %v2860_v21 = vadd.f32 %v7863_v8, %v2820_v22 }
 0x543   : > { %v2861_v32 = vadd.f32 %v7863_v8, %v2821_v2  ;;  %v2891_v18 = vmax.f32 %v2855_v57, 0.0  ;;  %v2892_v11 = vmax.f32 %v2856_v7, 0.0  ;;  %v2893_v1 = vmax.f32 %v2857_v20, 0.0 }
 0x544   : > { %v2962_v15 = vsel %vm10241_vm12, %v2926_v45, 0.0  ;;  %v2826_v12 = vmul.f32 %v7865_v62, %v7650_v29  ;;  %v2862_v50 = vadd.f32 %v7863_v8, %v2822_v60  ;;  %v2894_v33 = vmax.f32 %v2858_v16, 0.0 }
 0x545   : > { %2998 = vst [vmem:[#allocation2 + $0x12b] sm:$0xff] %v2962_v15  ;;  %v2827_v56 = vmul.f32 %v7865_v62, %v7658_v48  ;;  %v2828_v42 = vmul.f32 %v7865_v62, %v7666_v28  ;;  %v2863_v19 = vadd.f32 %v7863_v8, %v2823_v47  ;;  %v2895_v45 = vmax.f32 %v2859_v61, 0.0 }
 0x546   : > { %v2829_v15 = vmul.f32 %v7865_v62, %v7674_v4  ;;  %v2864_v53 = vadd.f32 %v7863_v8, %v2824_v49  ;;  %v2865_v31 = vadd.f32 %v7863_v8, %v2825_v43  ;;  %v2896_v29 = vmax.f32 %v2860_v21, 0.0 }
 0x547   : > { %v2897_v13 = vmax.f32 %v2861_v32, 0.0  ;;  %v7915_v59 = vsel %vm5688_vm10, %v2892_v11, 0.0  ;;  %v7919_v48 = vsel %vm5727_vm14, %v2893_v1, 0.0  ;;  %v7923_v28 = vsel %vm5658_vm6, %v2891_v18, 0.0 }
 0x548   : > { %v2830_v4 = vmul.f32 %v7865_v62, %v7682_v26  ;;  %v2866_v17 = vadd.f32 %v7863_v8, %v2826_v12  ;;  %v2898_v22 = vmax.f32 %v2862_v50, 0.0  ;;  %2964 = vst [vmem:[#allocation2 + $0x1b] sm:$0xff] %v7915_v59  ;;  %v7931_v2 = vsel %vm5767_vm2, %v2894_v33, 0.0 }
 0x549   : > { %v2831_v57 = vmul.f32 %v7865_v62, %v7690_v3  ;;  %v2867_v7 = vadd.f32 %v7863_v8, %v2827_v56  ;;  %v2899_v20 = vmax.f32 %v2863_v19, 0.0  ;;  %2965 = vst [vmem:[#allocation2 + $0x23] sm:$0xff] %v7919_v48  ;;  %v7939_v26 = vsel %vm5804_vm5, %v2895_v45, 0.0 }
 0x54a   : > { %v2832_v60 = vmul.f32 %v7865_v62, %v7698_v46  ;;  %v2868_v16 = vadd.f32 %v7863_v8, %v2828_v42  ;;  %v2900_v47 = vmax.f32 %v2864_v53, 0.0  ;;  %v7946_v61 = vsel %vm5840_vm11, %v2896_v29, 0.0  ;;  %2963 = vst [vmem:[#allocation2 + $0x13] sm:$0xff] %v7923_v28 }
 0x54b   : > { %v2833_v3 = vmul.f32 %v7865_v62, %v7706_v54  ;;  %v2869_v49 = vadd.f32 %v7863_v8, %v2829_v15  ;;  %v2901_v43 = vmax.f32 %v2865_v31, 0.0  ;;  %v7954_v21 = vsel %vm5871_vm15, %v2897_v13, 0.0  ;;  %2966 = vst [vmem:[#allocation2 + $0x2b] sm:$0xff] %v7931_v2 }
 0x54c   : > { %v2834_v46 = vmul.f32 %v7865_v62, %v7714_v10  ;;  %v2870_v32 = vadd.f32 %v7863_v8, %v2830_v4  ;;  %v2902_v18 = vmax.f32 %v2866_v17, 0.0  ;;  %v7962_v11 = vsel %vm5908_vm1, %v2898_v22, 0.0  ;;  %2967 = vst [vmem:[#allocation2 + $0x33] sm:$0xff] %v7939_v26 }
 0x54d   : > { %v2835_v54 = vmul.f32 %v7865_v62, %v7722_v37  ;;  %v2871_v1 = vadd.f32 %v7863_v8, %v2831_v57  ;;  %v2903_v12 = vmax.f32 %v2867_v7, 0.0  ;;  %v7970_v50 = vsel %vm10298_vm8, %v2899_v20, 0.0  ;;  %2968 = vst [vmem:[#allocation2 + $0x3b] sm:$0xff] %v7946_v61 }
 0x54e   : > { %v2836_v10 = vmul.f32 %v7865_v62, %v7730_v35  ;;  %v2872_v33 = vadd.f32 %v7863_v8, %v2832_v60  ;;  %v2904_v56 = vmax.f32 %v2868_v16, 0.0  ;;  %v7978_v42 = vsel %vm10299_vm0, %v2900_v47, 0.0  ;;  %2969 = vst [vmem:[#allocation2 + $0x43] sm:$0xff] %v7954_v21 }
 0x54f   : > { %v2837_v37 = vmul.f32 %v7865_v62, %v7738_v25  ;;  %v2873_v19 = vadd.f32 %v7863_v8, %v2833_v3  ;;  %v2905_v45 = vmax.f32 %v2869_v49, 0.0  ;;  %v2937_v15 = vsel %vm10300_vm9, %v2901_v43, 0.0  ;;  %2970 = vst [vmem:[#allocation2 + $0x4b] sm:$0xff] %v7962_v11  ;;  %v10303_v49 = vld [vmem:[#allocation26_spill] sm:$0xff]  ;;  %v10305_v43 = vld [vmem:[#allocation79_spill] sm:$0xff] }
 0x550   : > { %v2838_v35 = vmul.f32 %v7865_v62, %v7746_v63  ;;  %v2874_v53 = vadd.f32 %v7863_v8, %v2834_v46  ;;  %v2906_v31 = vmax.f32 %v2870_v32, 0.0  ;;  %v3039_v29 = vld [vmem:[#allocation2 + $0x21] sm:$0xff]  ;;  %vm10301_vm12 = vnez %v10192_v52  ;;  %2971 = vst [vmem:[#allocation2 + $0x53] sm:$0xff] %v7970_v50 }
 0x551   : > { %v2938_v13 = vsel %vm10301_vm12, %v2902_v18, 0.0  ;;  %v2839_v25 = vmul.f32 %v7865_v62, %v7754_v55  ;;  %v2875_v4 = vadd.f32 %v7863_v8, %v2835_v54  ;;  %v2907_v17 = vmax.f32 %v2871_v1, 0.0  ;;  %3079 = vrot.lane.b32.xlu1 %v3039_v29, %s5448_s29  ;;  %v3038_v22 = vld [vmem:[#allocation2 + $0x19] sm:$0xff]  ;;  %2972 = vst [vmem:[#allocation2 + $0x5b] sm:$0xff] %v7978_v42  ;;  %v3037_v57 = vld [vmem:[#allocation2 + $0x11] sm:$0xff]  ;;  %v10306_v54 = vld [vmem:[#allocation27_spill] sm:$0xff] }
 0x552   : > { %vm10302_vm9 = vnez %v10193_v39  ;;  %v2840_v7 = vmul.f32 %v7865_v62, %v7762_v5  ;;  %v2876_v20 = vadd.f32 %v7863_v8, %v2836_v10  ;;  %v2908_v60 = vmax.f32 %v2872_v33, 0.0  ;;  %3077 = vrot.lane.b32.xlu0 %v3038_v22, %s5448_s29  ;;  %2973 = vst [vmem:[#allocation2 + $0x63] sm:$0xff] %v2937_v15  ;;  %3075 = vrot.lane.b32.xlu2 %v3037_v57, %s5448_s29  ;;  %v10314_v29 = vld [vmem:[#allocation82_spill] sm:$0xff]  ;;  %v10317_v22 = vld [vmem:[#allocation84_spill] sm:$0xff] }
 0x553   : > { %v2939_v63 = vsel %vm10302_vm9, %v2903_v12, 0.0  ;;  %v2940_v55 = vsel %vm10249_vm7, %v2904_v56, 0.0  ;;  %v2841_v16 = vmul.f32 %v7865_v62, %v7770_v58  ;;  %v2877_v47 = vadd.f32 %v7863_v8, %v2837_v37  ;;  %2974 = vst [vmem:[#allocation2 + $0x6b] sm:$0xff] %v2938_v13  ;;  %v10308_v12 = vld [vmem:[#allocation81_spill] sm:$0xff] }
 0x554   : > { %v2909_v3 = vmax.f32 %v2873_v19, 0.0  ;;  %vm10304_vm9 = vnez %v10303_v49  ;;  %v2842_v46 = vmul.f32 %v7865_v62, %v10305_v43  ;;  %v2878_v32 = vadd.f32 %v7863_v8, %v2838_v35  ;;  %2975 = vst [vmem:[#allocation2 + $0x73] sm:$0xff] %v2939_v63  ;;  %v10309_v56 = vld [vmem:[#allocation29_spill] sm:$0xff]  ;;  %v10315_v63 = vld [vmem:[#allocation32_spill] sm:$0xff]  ;;  %v10319_v43 = vld [vmem:[#allocation190_spill] sm:$0xff] }
 0x555   : > { %v2941_v5 = vsel %vm10304_vm9, %v2905_v45, 0.0  ;;  %v2910_v18 = vmax.f32 %v2874_v53, 0.0  ;;  %vm10307_vm7 = vnez %v10306_v54  ;;  %v2843_v58 = vmul.f32 %v7865_v62, %v10308_v12  ;;  %2976 = vst [vmem:[#allocation2 + $0x7b] sm:$0xff] %v2940_v55  ;;  %v10311_v19 = vld [vmem:[#allocation149_spill] sm:$0xff]  ;;  %v10312_v53 = vld [vmem:[#allocation30_spill] sm:$0xff] }
 0x556   : > { %v2942_v1 = vsel %vm10307_vm7, %v2906_v31, 0.0  ;;  %v2879_v10 = vadd.f32 %v7863_v8, %v2839_v25  ;;  %v2911_v33 = vmax.f32 %v2875_v4, 0.0  ;;  %vm10310_vm12 = vnez %v10309_v56  ;;  %2977 = vst [vmem:[#allocation2 + $0x83] sm:$0xff] %v2941_v5  ;;  %v3042_v5 = vld [vmem:[#allocation2 + $0x39] sm:$0xff] }
 0x557   : > { %v2943_v37 = vsel %vm10310_vm12, %v2907_v17, 0.0  ;;  %v2844_v45 = vmul.f32 %v7865_v62, %v10311_v19  ;;  %v2880_v15 = vadd.f32 %v7863_v8, %v2840_v7  ;;  %v2912_v35 = vmax.f32 %v2876_v20, 0.0  ;;  %2978 = vst [vmem:[#allocation2 + $0x8b] sm:$0xff] %v2942_v1  ;;  %v10320_v19 = vld [vmem:[#allocation37_spill] sm:$0xff] }
 0x558   : > { %vm10313_vm9 = vnez %v10312_v53  ;;  %v2845_v13 = vmul.f32 %v7865_v62, %v10314_v29  ;;  %v2881_v25 = vadd.f32 %v7863_v8, %v2841_v16  ;;  %v2913_v4 = vmax.f32 %v2877_v47, 0.0  ;;  %2979 = vst [vmem:[#allocation2 + $0x93] sm:$0xff] %v2943_v37  ;;  %v3041_v1 = vld [vmem:[#allocation2 + $0x31] sm:$0xff] }
 0x559   : > { %v2944_v31 = vsel %vm10313_vm9, %v2908_v60, 0.0  ;;  %vm10316_vm7 = vnez %v10315_v63  ;;  %v2846_v57 = vmul.f32 %v7865_v62, %v10317_v22  ;;  %v2882_v7 = vadd.f32 %v7863_v8, %v2842_v46  ;;  %3085 = vrot.lane.b32.xlu1 %v3042_v5, %s5448_s29  ;;  %v3040_v46 = vld [vmem:[#allocation2 + $0x29] sm:$0xff]  ;;  %v10326_v5 = vld [vmem:[#allocation42_spill] sm:$0xff] }
 0x55a   : > { %v2945_v17 = vsel %vm10316_vm7, %v2909_v3, 0.0  ;;  %v2914_v20 = vmax.f32 %v2878_v32, 0.0  ;;  %v2946_v60 = vsel %vm10257_vm4, %v2910_v18, 0.0  ;;  %v2847_v12 = vmul.f32 %v7865_v62, %v10319_v43  ;;  %2980 = vst [vmem:[#allocation2 + $0x9b] sm:$0xff] %v2944_v31  ;;  %v10322_v32 = vld [vmem:[#allocation67_spill] sm:$0xff]  ;;  %3083 = vrot.lane.b32.xlu0 %v3041_v1, %s5448_s29  ;;  %3081 = vrot.lane.b32.xlu2 %v3040_v46, %s5448_s29 }
 0x55b   : > { %v2883_v16 = vadd.f32 %v7863_v8, %v2843_v58  ;;  %v2915_v47 = vmax.f32 %v2879_v10, 0.0  ;;  %vm10321_vm7 = vnez %v10320_v19  ;;  %v2848_v29 = vmul.f32 %v7865_v62, %v10322_v32  ;;  %v10323_v22 = vld [vmem:[#allocation39_spill] sm:$0xff]  ;;  %2981 = vst [vmem:[#allocation2 + $0xa3] sm:$0xff] %v2945_v17 }
 0x55c   : > { %v2947_v3 = vsel %vm10321_vm7, %v2911_v33, 0.0  ;;  %v2884_v18 = vadd.f32 %v7863_v8, %v2844_v45  ;;  %v2916_v37 = vmax.f32 %v2880_v15, 0.0  ;;  %vm10324_vm4 = vnez %v10323_v22  ;;  %v10325_v58 = vld [vmem:[#allocation75_spill] sm:$0xff]  ;;  %2982 = vst [vmem:[#allocation2 + $0xab] sm:$0xff] %v2946_v60 }
 0x55d   : > { %v2948_v43 = vsel %vm10324_vm4, %v2912_v35, 0.0  ;;  %v2849_v10 = vmul.f32 %v7865_v62, %v10325_v58  ;;  %v2885_v33 = vadd.f32 %v7863_v8, %v2845_v13  ;;  %v2917_v31 = vmax.f32 %v2881_v25, 0.0  ;;  %2983 = vst [vmem:[#allocation2 + $0xb3] sm:$0xff] %v2947_v3  ;;  %v10330_v46 = vld [vmem:[#allocation47_spill] sm:$0xff]  ;;  %v10332_v58 = vld [vmem:[#allocation48_spill] sm:$0xff] }
 0x55e   : > { %vm10327_vm7 = vnez %v10326_v5  ;;  %v2886_v45 = vadd.f32 %v7863_v8, %v2846_v57  ;;  %v2918_v15 = vmax.f32 %v2882_v7, 0.0  ;;  %vm10329_vm4 = vnez %v10328_v30  ;;  %2984 = vst [vmem:[#allocation2 + $0xbb] sm:$0xff] %v2948_v43  ;;  %v10334_v60 = vld [vmem:[#allocation51_spill] sm:$0xff] }
 0x55f   : > { %v2949_v32 = vsel %vm10327_vm7, %v2913_v4, 0.0  ;;  %v2950_v35 = vsel %vm10329_vm4, %v2914_v20, 0.0  ;;  %v2887_v17 = vadd.f32 %v7863_v8, %v2847_v12  ;;  %v2919_v1 = vmax.f32 %v2883_v16, 0.0  ;;  %v10336_v16 = vld [vmem:[#allocation55_spill] sm:$0xff]  ;;  %v8213_v19 = vld [vmem:[#allocation2 + $0x92] sm:$0xff] }
 0x560   : > { %vm10331_vm9 = vnez %v10330_v46  ;;  %v2888_v13 = vadd.f32 %v7863_v8, %v2848_v29  ;;  %v2920_v25 = vmax.f32 %v2884_v18, 0.0  ;;  %vm10333_vm7 = vnez %v10332_v58  ;;  %2985 = vst [vmem:[#allocation2 + $0xc3] sm:$0xff] %v2949_v32  ;;  %v10338_v29 = vld [vmem:[#allocation4_spill] sm:$0xff] }
 0x561   : > { %v2951_v62 = vsel %vm10331_vm9, %v2915_v47, 0.0  ;;  %v2952_v4 = vsel %vm10333_vm7, %v2916_v37, 0.0  ;;  %v2889_v57 = vadd.f32 %v7863_v8, %v2849_v10  ;;  %v2921_v7 = vmax.f32 %v2885_v33, 0.0  ;;  %2986 = vst [vmem:[#allocation2 + $0xcb] sm:$0xff] %v2950_v35  ;;  %v3045_v47 = vld [vmem:[#allocation2 + $0x51] sm:$0xff]  ;;  %v3044_v37 = vld [vmem:[#allocation2 + $0x49] sm:$0xff] }
 0x562   : > { %vm10335_vm4 = vnez %v10334_v60  ;;  %v2922_v12 = vmax.f32 %v2886_v45, 0.0  ;;  %vm10337_vm12 = vnez %v10336_v16  ;;  %2987 = vst [vmem:[#allocation2 + $0xd3] sm:$0xff] %v2951_v62  ;;  %v2923_v43 = vmax.f32 %v2887_v17, 0.0  ;;  %3091 = vrot.lane.b32.xlu1 %v3045_v47, %s5448_s29  ;;  %v3043_v8 = vld [vmem:[#allocation2 + $0x41] sm:$0xff]  ;;  %3089 = vrot.lane.b32.xlu0 %v3044_v37, %s5448_s29  ;;  %v10341_v45 = vld [vmem:[#allocation8_spill] sm:$0xff] }
 0x563   : > { %v2953_v20 = vsel %vm10335_vm4, %v2917_v31, 0.0  ;;  %v2954_v3 = vsel %vm10337_vm12, %v2918_v15, 0.0  ;;  %vm10339_vm9 = vnez %v10338_v29  ;;  %2988 = vst [vmem:[#allocation2 + $0xdb] sm:$0xff] %v2952_v4  ;;  %v2924_v10 = vmax.f32 %v2888_v13, 0.0  ;;  %3087 = vrot.lane.b32.xlu2 %v3043_v8, %s5448_s29  ;;  %v10346_v13 = vld [vmem:[#allocation15_spill] sm:$0xff]  ;;  %v3049_v47 = vld [vmem:[#allocation2 + $0x71] sm:$0xff] }
 0x564   : > { %v2955_v18 = vsel %vm10339_vm9, %v2919_v1, 0.0  ;;  %v2956_v31 = vsel %vm10288_vm13, %v2920_v25, 0.0  ;;  %2989 = vst [vmem:[#allocation2 + $0xe3] sm:$0xff] %v2953_v20  ;;  %v2925_v32 = vmax.f32 %v2889_v57, 0.0  ;;  %vm10342_vm12 = vnez %v10341_v45  ;;  %v10344_v1 = vld [vmem:[#allocation12_spill] sm:$0xff]  ;;  %v3046_v20 = vld [vmem:[#allocation2 + $0x59] sm:$0xff] }
 0x565   : > { %v2957_v15 = vsel %vm10342_vm12, %v2921_v7, 0.0  ;;  %2990 = vst [vmem:[#allocation2 + $0xeb] sm:$0xff] %v2954_v3  ;;  %v2958_v17 = vsel %vm10292_vm3, %v2922_v12, 0.0  ;;  %vm10345_vm9 = vnez %v10344_v1  ;;  %vm10347_vm13 = vnez %v10346_v13  ;;  %v3048_v57 = vld [vmem:[#allocation2 + $0x69] sm:$0xff]  ;;  %v3047_v7 = vld [vmem:[#allocation2 + $0x61] sm:$0xff]  ;;  %v3050_v3 = vld [vmem:[#allocation2 + $0x79] sm:$0xff] }
 0x566   : > { %2991 = vst [vmem:[#allocation2 + $0xf3] sm:$0xff] %v2955_v18  ;;  %v2959_v62 = vsel %vm10345_vm9, %v2923_v43, 0.0  ;;  %v2960_v25 = vsel %vm10347_vm13, %v2924_v10, 0.0  ;;  %vm10348_vm4 = vnez %v10296_v44  ;;  %v3051_v12 = vld [vmem:[#allocation2 + $0x81] sm:$0xff]  ;;  %v3054_v43 = vld [vmem:[#allocation2 + $0x99] sm:$0xff]  ;;  %v3053_v18 = vld [vmem:[#allocation2 + $0x91] sm:$0xff] }
 0x567   : > { %2992 = vst [vmem:[#allocation2 + $0xfb] sm:$0xff] %v2956_v31  ;;  %v2961_v4 = vsel %vm10348_vm4, %v2925_v32, 0.0  ;;  %v3052_v37 = vld [vmem:[#allocation2 + $0x89] sm:$0xff]  ;;  %v3057_v8 = vld [vmem:[#allocation2 + $0xb1] sm:$0xff]  ;;  %v3055_v31 = vld [vmem:[#allocation2 + $0xa1] sm:$0xff] }
 0x568   : > { %2993 = vst [vmem:[#allocation2 + $0x103] sm:$0xff] %v2957_v15  ;;  %v3056_v10 = vld [vmem:[#allocation2 + $0xa9] sm:$0xff]  ;;  %v3059_v15 = vld [vmem:[#allocation2 + $0xc1] sm:$0xff]  ;;  %v8171_v44 = vld [vmem:[#allocation2 + $0x72] sm:$0xff] }
 0x569   : > { %2994 = vst [vmem:[#allocation2 + $0x10b] sm:$0xff] %v2958_v17  ;;  %v3060_v32 = vld [vmem:[#allocation2 + $0xc9] sm:$0xff]  ;;  %v3058_v17 = vld [vmem:[#allocation2 + $0xb9] sm:$0xff] }
 0x56a   : > { %2995 = vst [vmem:[#allocation2 + $0x113] sm:$0xff] %v2959_v62  ;;  %3097 = vrot.lane.b32.xlu1 %v3048_v57, %s5448_s29  ;;  %3095 = vrot.lane.b32.xlu0 %v3047_v7, %s5448_s29  ;;  %v8175_v13 = vld [vmem:[#allocation2 + $0x82] sm:$0xff]  ;;  %v8189_v29 = vld [vmem:[#allocation2 + $0x8a] sm:$0xff]  ;;  %v8193_v16 = vld [vmem:[#allocation2 + $0x9a] sm:$0xff] }
 0x56b   : > { %2996 = vst [vmem:[#allocation2 + $0x11b] sm:$0xff] %v2960_v25  ;;  %3093 = vrot.lane.b32.xlu2 %v3046_v20, %s5448_s29  ;;  %v3063_v62 = vld [vmem:[#allocation2 + $0xe1] sm:$0xff]  ;;  %v3062_v25 = vld [vmem:[#allocation2 + $0xd9] sm:$0xff]  ;;  %v8229_v54 = vld [vmem:[#allocation2 + $0xca] sm:$0xff] }
 0x56c   : > { %2997 = vst [vmem:[#allocation2 + $0x123] sm:$0xff] %v2961_v4  ;;  %v3061_v4 = vld [vmem:[#allocation2 + $0xd1] sm:$0xff]  ;;  %v3064_v20 = vld [vmem:[#allocation2 + $0xe9] sm:$0xff]  ;;  %v8195_v60 = vld [vmem:[#allocation2 + $0x7a] sm:$0xff] }
 0x56d   : > { %v3065_v7 = vld [vmem:[#allocation2 + $0xf1] sm:$0xff]  ;;  %v8177_v1 = vld [vmem:[#allocation2 + $0x62] sm:$0xff]  ;;  %v8225_v56 = vld [vmem:[#allocation2 + $0xba] sm:$0xff] }
 0x56e   : > { %v3066_v57 = vld [vmem:[#allocation2 + $0xf9] sm:$0xff]  ;;  %v8207_v5 = vld [vmem:[#allocation2 + $0xa2] sm:$0xff]  ;;  %v8231_v49 = vld [vmem:[#allocation2 + $0xaa] sm:$0xff] }
 0x56f   : > { %v8211_v22 = vld [vmem:[#allocation2 + $0xb2] sm:$0xff]  ;;  %v3207_v51 = vld [vmem:[#allocation2 + $0xe2] sm:$0xff]  ;;  %v3208_v41 = vld [vmem:[#allocation2 + $0xea] sm:$0xff] }
 0x570   : > { %v8243_v36 = vld [vmem:[#allocation2 + $0xd2] sm:$0xff]  ;;  %v8247_v34 = vld [vmem:[#allocation2 + $0xc2] sm:$0xff]  ;;  %v3210_v23 = vld [vmem:[#allocation2 + $0xfa] sm:$0xff] }
 0x571   : > { %v3206_v14 = vld [vmem:[#allocation2 + $0xda] sm:$0xff] }
 0x572   : > { %3103 = vrot.lane.b32.xlu1 %v3051_v12, %s5448_s29  ;;  %3101 = vrot.lane.b32.xlu0 %v3050_v3, %s5448_s29  ;;  %v3069_v12 = vld [vmem:[#allocation2 + $0x111] sm:$0xff]  ;;  %v3068_v3 = vld [vmem:[#allocation2 + $0x109] sm:$0xff] }
 0x573   : > { %3099 = vrot.lane.b32.xlu2 %v3049_v47, %s5448_s29  ;;  %v3067_v47 = vld [vmem:[#allocation2 + $0x101] sm:$0xff] }
 0x57a   : > { %3109 = vrot.lane.b32.xlu1 %v3054_v43, %s5448_s29  ;;  %3107 = vrot.lane.b32.xlu0 %v3053_v18, %s5448_s29  ;;  %v8110_v43 = vld [vmem:[#allocation2 + $0x12] sm:$0xff]  ;;  %v8114_v18 = vld [vmem:[#allocation2 + $0x22] sm:$0xff] }
 0x57b   : > { %3105 = vrot.lane.b32.xlu2 %v3052_v37, %s5448_s29  ;;  %v3070_v37 = vld [vmem:[#allocation2 + $0x119] sm:$0xff] }
 0x582   : > { %3115 = vrot.lane.b32.xlu1 %v3057_v8, %s5448_s29  ;;  %3113 = vrot.lane.b32.xlu0 %v3056_v10, %s5448_s29  ;;  %v8121_v10 = vld [vmem:[#allocation2 + $0x2a] sm:$0xff] }
 0x583   : > { %3111 = vrot.lane.b32.xlu2 %v3055_v31, %s5448_s29  ;;  %v8125_v31 = vld [vmem:[#allocation2 + $0x3a] sm:$0xff] }
 0x58a   : > { %3121 = vrot.lane.b32.xlu1 %v3060_v32, %s5448_s29  ;;  %3119 = vrot.lane.b32.xlu0 %v3059_v15, %s5448_s29  ;;  %v8127_v32 = vld [vmem:[#allocation2 + $0x1a] sm:$0xff] }
 0x58b   : > { %3117 = vrot.lane.b32.xlu2 %v3058_v17, %s5448_s29  ;;  %v8135_v17 = vld [vmem:[#allocation2 + $0x42] sm:$0xff] }
 0x592   : > { %3127 = vrot.lane.b32.xlu1 %v3063_v62, %s5448_s29  ;;  %3125 = vrot.lane.b32.xlu0 %v3062_v25, %s5448_s29  ;;  %v8139_v62 = vld [vmem:[#allocation2 + $0x52] sm:$0xff] }
 0x593   : > { %3123 = vrot.lane.b32.xlu2 %v3061_v4, %s5448_s29  ;;  %v8141_v25 = vld [vmem:[#allocation2 + $0x32] sm:$0xff]  ;;  %v8143_v4 = vpop.permute.xlu1 %5372 }
 0x59a   : > { %3133 = vrot.lane.b32.xlu1 %v3066_v57, %s5448_s29  ;;  %3131 = vrot.lane.b32.xlu0 %v3065_v7, %s5448_s29  ;;  %v8149_v57 = vpop.permute.xlu0 %5377 }
 0x59b   : > { %3129 = vrot.lane.b32.xlu2 %v3064_v20, %s5448_s29  ;;  %v8153_v20 = vld [vmem:[#allocation2 + $0x5a] sm:$0xff] }
 0x5a2   : > { %3139 = vrot.lane.b32.xlu1 %v3069_v12, %s5448_s29  ;;  %3137 = vrot.lane.b32.xlu0 %v3068_v3, %s5448_s29  ;;  %v8157_v12 = vld [vmem:[#allocation2 + $0x6a] sm:$0xff] }
 0x5a3   : > { %3135 = vrot.lane.b32.xlu2 %v3067_v47, %s5448_s29  ;;  %v8159_v3 = vld [vmem:[#allocation2 + $0x4a] sm:$0xff] }
 0x5aa   : > { %3219 = vrot.lane.b32.xlu1 %v8110_v43, %s5438_s17  ;;  %3223 = vrot.lane.b32.xlu0 %v8114_v18, %s5438_s17 }
 0x5ab   : > { %3141 = vrot.lane.b32.xlu2 %v3070_v37, %s5448_s29 }
 0x5ac   : > { %v8119_v8 = vpop.permute.xlu2 %3075 }
 0x5b2   : > { %3225 = vrot.lane.b32.xlu1 %v8121_v10, %s5438_s17  ;;  %3229 = vrot.lane.b32.xlu0 %v8125_v31, %s5438_s17 }
 0x5b3   : > { %3221 = vrot.lane.b32.xlu2 %v8127_v32, %s5438_s17 }
 0x5b4   : > { %v8133_v15 = vpop.permute.xlu2 %3081 }
 0x5ba   : > { %3231 = vrot.lane.b32.xlu1 %v8135_v17, %s5438_s17  ;;  %3235 = vrot.lane.b32.xlu0 %v8139_v62, %s5438_s17 }
 0x5bb   : > { %3227 = vrot.lane.b32.xlu2 %v8141_v25, %s5438_s17 }
 0x5bd   : > { %v8151_v7 = vpop.permute.xlu2 %3087 }
 0x5c2   : > { %3237 = vrot.lane.b32.xlu1 %v8153_v20, %s5438_s17  ;;  %3241 = vrot.lane.b32.xlu0 %v8157_v12, %s5438_s17 }
 0x5c3   : > { %3233 = vrot.lane.b32.xlu2 %v8159_v3, %s5438_s17  ;;  %v8165_v47 = vpop.permute.xlu1 %3079 }
 0x5c4   : > { %v8167_v37 = vpop.permute.xlu0 %3077 }
 0x5c5   : > { %v8169_v27 = vpop.permute.xlu2 %3093 }
 0x5ca   : > { %3243 = vrot.lane.b32.xlu1 %v8171_v44, %s5438_s17  ;;  %3247 = vrot.lane.b32.xlu0 %v8175_v13, %s5438_s17 }
 0x5cb   : > { %3239 = vrot.lane.b32.xlu2 %v8177_v1, %s5438_s17  ;;  %v8183_v35 = vpop.permute.xlu1 %3085 }
 0x5cc   : > { %v8185_v45 = vpop.permute.xlu0 %3083 }
 0x5cd   : > { %v8187_v33 = vpop.permute.xlu2 %3099 }
 0x5d2   : > { %3249 = vrot.lane.b32.xlu1 %v8189_v29, %s5438_s17  ;;  %3253 = vrot.lane.b32.xlu0 %v8193_v16, %s5438_s17 }
 0x5d3   : > { %3245 = vrot.lane.b32.xlu2 %v8195_v60, %s5438_s17 }
 0x5d4   : > { %v8201_v58 = vpop.permute.xlu1 %3091  ;;  %v8203_v46 = vpop.permute.xlu0 %3089 }
 0x5d5   : > { %v8205_v30 = vpop.permute.xlu2 %3105 }
 0x5d6   : > { %10349 = vst [vmem:[#allocation71_spill] sm:$0xff] %v8205_v30 }
 0x5da   : > { %3255 = vrot.lane.b32.xlu1 %v8207_v5, %s5438_s17  ;;  %3259 = vrot.lane.b32.xlu0 %v8211_v22, %s5438_s17 }
 0x5db   : > { %3251 = vrot.lane.b32.xlu2 %v8213_v19, %s5438_s17 }
 0x5dc   : > { %v8219_v55 = vpop.permute.xlu1 %3097  ;;  %v8221_v63 = vpop.permute.xlu0 %3095 }
 0x5dd   : > { %v8223_v53 = vpop.permute.xlu2 %3111 }
 0x5de   : > { %10350 = vst [vmem:[#allocation78_spill] sm:$0xff] %v8223_v53  ;;  %v3213_v53 = vld [vmem:[#allocation2 + $0x112] sm:$0xff] }
 0x5e2   : > { %3261 = vrot.lane.b32.xlu1 %v8225_v56, %s5438_s17  ;;  %3265 = vrot.lane.b32.xlu0 %v8229_v54, %s5438_s17 }
 0x5e3   : > { %3257 = vrot.lane.b32.xlu2 %v8231_v49, %s5438_s17 }
 0x5e4   : > { %v8237_v40 = vpop.permute.xlu1 %3103  ;;  %v8239_v39 = vpop.permute.xlu0 %3101 }
 0x5e5   : > { %10351 = vst [vmem:[#allocation85_spill] sm:$0xff] %v8237_v40  ;;  %v8241_v52 = vpop.permute.xlu2 %3117 }
 0x5e6   : > { %10352 = vst [vmem:[#allocation77_spill] sm:$0xff] %v8241_v52  ;;  %v3211_v52 = vld [vmem:[#allocation2 + $0x102] sm:$0xff] }
 0x5ea   : > { %3267 = vrot.lane.b32.xlu1 %v8243_v36, %s5438_s17  ;;  %3271 = vrot.lane.b32.xlu0 %v3207_v51, %s5438_s17 }
 0x5eb   : > { %3263 = vrot.lane.b32.xlu2 %v8247_v34, %s5438_s17 }
 0x5ec   : > { %v8252_v24 = vpop.permute.xlu1 %3109  ;;  %v8254_v9 = vpop.permute.xlu0 %3107 }
 0x5ed   : > { %10353 = vst [vmem:[#allocation91_spill] sm:$0xff] %v8252_v24  ;;  %v8256_v38 = vpop.permute.xlu2 %3123 }
 0x5ee   : > { %10354 = vst [vmem:[#allocation80_spill] sm:$0xff] %v8254_v9  ;;  %v5375_v9 = vunpack.i.h.bf16 %v8143_v4 }
 0x5ef   : > { %10355 = vst [vmem:[#allocation94_spill] sm:$0xff] %v8256_v38  ;;  %v3209_v38 = vld [vmem:[#allocation2 + $0xf2] sm:$0xff] }
 0x5f2   : > { %3273 = vrot.lane.b32.xlu1 %v3208_v41, %s5438_s17  ;;  %3277 = vrot.lane.b32.xlu0 %v3210_v23, %s5438_s17 }
 0x5f3   : > { %3269 = vrot.lane.b32.xlu2 %v3206_v14, %s5438_s17 }
 0x5f4   : > { %v8261_v0 = vpop.permute.xlu1 %3115  ;;  %v8263_v51 = vpop.permute.xlu0 %3113 }
 0x5f5   : > { %10356 = vst [vmem:[#allocation158_spill] sm:$0xff] %v8261_v0  ;;  %v8265_v6 = vpop.permute.xlu2 %3129  ;;  %v3214_v0 = vld [vmem:[#allocation2 + $0x11a] sm:$0xff] }
 0x5f6   : > { %10357 = vst [vmem:[#allocation165_spill] sm:$0xff] %v8263_v51  ;;  %v3212_v51 = vld [vmem:[#allocation2 + $0x10a] sm:$0xff] }
 0x5f7   : > { %10358 = vst [vmem:[#allocation88_spill] sm:$0xff] %v8265_v6 }
 0x5fa   : > { %3279 = vrot.lane.b32.xlu1 %v3211_v52, %s5438_s17  ;;  %3283 = vrot.lane.b32.xlu0 %v3213_v53, %s5438_s17 }
 0x5fb   : > { %3275 = vrot.lane.b32.xlu2 %v3209_v38, %s5438_s17 }
 0x5fc   : > { %v8270_v41 = vpop.permute.xlu1 %3121  ;;  %v8272_v23 = vpop.permute.xlu0 %3119 }
 0x5fd   : > { %10359 = vst [vmem:[#allocation187_spill] sm:$0xff] %v8270_v41  ;;  %v8274_v14 = vpop.permute.xlu2 %3135 }
 0x5fe   : > { %10360 = vst [vmem:[#allocation191_spill] sm:$0xff] %v8272_v23 }
 0x5ff   : > { %10361 = vst [vmem:[#allocation145_spill] sm:$0xff] %v8274_v14  ;;  %v3577_v14 = vld [vmem:[#allocation2 + $0x14] sm:$0xff] }
 0x602   : > { %3285 = vrot.lane.b32.xlu1 %v3214_v0, %s5438_s17  ;;  %3327 = vrot.lane.b32.xlu0 %v8127_v32, %s5449_s23 }
 0x603   : > { %3281 = vrot.lane.b32.xlu2 %v3212_v51, %s5438_s17  ;;  %s5450_s17 = smov 20  }
 0x604   : > { %v8280_v52 = vpop.permute.xlu1 %3127  ;;  %v8282_v53 = vpop.permute.xlu0 %3125 }
 0x605   : > { %10362 = vst [vmem:[#allocation83_spill] sm:$0xff] %v8280_v52  ;;  %v8284_v38 = vpop.permute.xlu2 %3141 }
 0x606   : > { %10363 = vst [vmem:[#allocation74_spill] sm:$0xff] %v8282_v53  ;;  %v3832_v53 = vld [vmem:[#allocation2 + $0x2d] sm:$0xff] }
 0x607   : > { %10364 = vst [vmem:[#allocation87_spill] sm:$0xff] %v8284_v38  ;;  %v3579_v38 = vld [vmem:[#allocation2 + $0x24] sm:$0xff] }
 0x60a   : > { %3329 = vrot.lane.b32.xlu1 %v8114_v18, %s5449_s23  ;;  %3333 = vrot.lane.b32.xlu0 %v8141_v25, %s5449_s23 }
 0x60b   : > { %3325 = vrot.lane.b32.xlu2 %v8110_v43, %s5449_s23 }
 0x60c   : > { %v8292_v0 = vpop.permute.xlu1 %3133  ;;  %v8294_v32 = vpop.permute.xlu0 %3131 }
 0x60d   : > { %10365 = vst [vmem:[#allocation89_spill] sm:$0xff] %v8292_v0  ;;  %v8296_v51 = vpop.permute.xlu2 %3221  ;;  %v3580_v0 = vld [vmem:[#allocation2 + $0x2c] sm:$0xff] }
 0x60e   : > { %10366 = vst [vmem:[#allocation92_spill] sm:$0xff] %v8294_v32 }
 0x612   : > { %3335 = vrot.lane.b32.xlu1 %v8125_v31, %s5449_s23  ;;  %3339 = vrot.lane.b32.xlu0 %v8159_v3, %s5449_s23 }
 0x613   : > { %3331 = vrot.lane.b32.xlu2 %v8121_v10, %s5449_s23 }
 0x614   : > { %v8304_v18 = vpop.permute.xlu1 %3139  ;;  %v8306_v25 = vpop.permute.xlu0 %3137 }
 0x615   : > { %10367 = vst [vmem:[#allocation93_spill] sm:$0xff] %v8304_v18  ;;  %v8308_v43 = vpop.permute.xlu2 %3227  ;;  %v3578_v18 = vld [vmem:[#allocation2 + $0x1c] sm:$0xff] }
 0x616   : > { %10368 = vst [vmem:[#allocation150_spill] sm:$0xff] %v8306_v25  ;;  %v3831_v25 = vld [vmem:[#allocation2 + $0x25] sm:$0xff] }
 0x61a   : > { %3341 = vrot.lane.b32.xlu1 %v8139_v62, %s5449_s23  ;;  %3345 = vrot.lane.b32.xlu0 %v8177_v1, %s5449_s23 }
 0x61b   : > { %3337 = vrot.lane.b32.xlu2 %v8135_v17, %s5449_s23 }
 0x61c   : > { %v8316_v31 = vpop.permute.xlu1 %3219  ;;  %v8318_v3 = vpop.permute.xlu0 %3223 }
 0x61d   : > { %v8320_v10 = vpop.permute.xlu2 %3233 }
 0x622   : > { %3347 = vrot.lane.b32.xlu1 %v8157_v12, %s5449_s23  ;;  %3351 = vrot.lane.b32.xlu0 %v8195_v60, %s5449_s23 }
 0x623   : > { %3343 = vrot.lane.b32.xlu2 %v8153_v20, %s5449_s23 }
 0x624   : > { %v8328_v62 = vpop.permute.xlu1 %3225  ;;  %v8330_v1 = vpop.permute.xlu0 %3229 }
 0x625   : > { %v8332_v17 = vpop.permute.xlu2 %3239 }
 0x62a   : > { %3353 = vrot.lane.b32.xlu1 %v8175_v13, %s5449_s23  ;;  %3357 = vrot.lane.b32.xlu0 %v8213_v19, %s5449_s23 }
 0x62b   : > { %3349 = vrot.lane.b32.xlu2 %v8171_v44, %s5449_s23 }
 0x62c   : > { %v8340_v12 = vpop.permute.xlu1 %3231  ;;  %v8342_v60 = vpop.permute.xlu0 %3235 }
 0x62d   : > { %v8344_v20 = vpop.permute.xlu2 %3245 }
 0x62e   : > { %10369 = vst [vmem:[#allocation96_spill] sm:$0xff] %v8344_v20 }
 0x632   : > { %3359 = vrot.lane.b32.xlu1 %v8193_v16, %s5449_s23  ;;  %3363 = vrot.lane.b32.xlu0 %v8231_v49, %s5449_s23 }
 0x633   : > { %3355 = vrot.lane.b32.xlu2 %v8189_v29, %s5449_s23 }
 0x634   : > { %v8352_v13 = vpop.permute.xlu1 %3237  ;;  %v8354_v19 = vpop.permute.xlu0 %3241 }
 0x635   : > { %v8356_v44 = vpop.permute.xlu2 %3251 }
 0x636   : > { %10370 = vst [vmem:[#allocation161_spill] sm:$0xff] %v8356_v44  ;;  %v3838_v44 = vld [vmem:[#allocation2 + $0x5d] sm:$0xff] }
 0x63a   : > { %3365 = vrot.lane.b32.xlu1 %v8211_v22, %s5449_s23  ;;  %3369 = vrot.lane.b32.xlu0 %v8247_v34, %s5449_s23 }
 0x63b   : > { %3361 = vrot.lane.b32.xlu2 %v8207_v5, %s5449_s23 }
 0x63c   : > { %v8364_v16 = vpop.permute.xlu1 %3243  ;;  %v8366_v49 = vpop.permute.xlu0 %3247 }
 0x63d   : > { %10371 = vst [vmem:[#allocation167_spill] sm:$0xff] %v8366_v49  ;;  %v8368_v29 = vpop.permute.xlu2 %3257 }
 0x63e   : > { %10372 = vst [vmem:[#allocation188_spill] sm:$0xff] %v8368_v29 }
 0x642   : > { %3371 = vrot.lane.b32.xlu1 %v8229_v54, %s5449_s23  ;;  %3469 = vrot.lane.b32.xlu0 %v7923_v28, %s5439_s18 }
 0x643   : > { %3367 = vrot.lane.b32.xlu2 %v8225_v56, %s5449_s23 }
 0x644   : > { %v8376_v22 = vpop.permute.xlu1 %3249  ;;  %v8378_v34 = vpop.permute.xlu0 %3253 }
 0x645   : > { %10373 = vst [vmem:[#allocation86_spill] sm:$0xff] %v8376_v22  ;;  %v8380_v5 = vpop.permute.xlu2 %3263 }
 0x646   : > { %10374 = vst [vmem:[#allocation90_spill] sm:$0xff] %v8378_v34 }
 0x647   : > { %10375 = vst [vmem:[#allocation97_spill] sm:$0xff] %v8380_v5  ;;  %v3975_v5 = vld [vmem:[#allocation2 + $0x26] sm:$0xff] }
 0x64a   : > { %3471 = vrot.lane.b32.xlu1 %v7915_v59, %s5439_s18  ;;  %3615 = vrot.lane.b32.xlu0 %v3578_v18, %s5450_s17 }
 0x64b   : > { %3373 = vrot.lane.b32.xlu2 %v8243_v36, %s5449_s23 }
 0x64c   : > { %v8387_v28 = vpop.permute.xlu1 %3255  ;;  %v8389_v54 = vpop.permute.xlu0 %3259 }
 0x64d   : > { %10376 = vst [vmem:[#allocation99_spill] sm:$0xff] %v8387_v28  ;;  %v8391_v56 = vpop.permute.xlu2 %3269 }
 0x64e   : > { %10377 = vst [vmem:[#allocation103_spill] sm:$0xff] %v8389_v54 }
 0x64f   : > { %10378 = vst [vmem:[#allocation105_spill] sm:$0xff] %v8391_v56  ;;  %v3976_v56 = vld [vmem:[#allocation2 + $0x2e] sm:$0xff] }
 0x652   : > { %3723 = vrot.lane.b32.xlu1 %v3579_v38, %s5441_s25  ;;  %3867 = vrot.lane.b32.xlu0 %v3831_v25, %s5451_s26 }
 0x653   : > { %3613 = vrot.lane.b32.xlu2 %v3577_v14, %s5450_s17 }
 0x654   : > { %v8396_v59 = vpop.permute.xlu1 %3261  ;;  %v8398_v18 = vpop.permute.xlu0 %3265 }
 0x655   : > { %10379 = vst [vmem:[#allocation106_spill] sm:$0xff] %v8396_v59  ;;  %v8400_v36 = vpop.permute.xlu2 %3275  ;;  %v3835_v59 = vld [vmem:[#allocation2 + $0x45] sm:$0xff] }
 0x656   : > { %10380 = vst [vmem:[#allocation108_spill] sm:$0xff] %v8398_v18  ;;  %v3581_v18 = vld [vmem:[#allocation2 + $0x34] sm:$0xff] }
 0x657   : > { %10381 = vst [vmem:[#allocation168_spill] sm:$0xff] %v8400_v36 }
 0x65a   : > { %3869 = vrot.lane.b32.xlu1 %v3832_v53, %s5451_s26  ;;  %4013 = vrot.lane.b32.xlu0 %v3976_v56, %s5440_s24 }
 0x65b   : > { %3725 = vrot.lane.b32.xlu2 %v3580_v0, %s5441_s25 }
 0x65c   : > { %v8405_v32 = vpop.permute.xlu1 %3267  ;;  %v8407_v25 = vpop.permute.xlu0 %3271 }
 0x65d   : > { %10382 = vst [vmem:[#allocation170_spill] sm:$0xff] %v8405_v32  ;;  %v8409_v14 = vpop.permute.xlu2 %3281  ;;  %v3582_v32 = vld [vmem:[#allocation2 + $0x3c] sm:$0xff] }
 0x65e   : > { %10383 = vst [vmem:[#allocation189_spill] sm:$0xff] %v8407_v25 }
 0x65f   : > { %10384 = vst [vmem:[#allocation100_spill] sm:$0xff] %v8409_v14 }
 0x662   : > { %3473 = vrot.lane.b32.xlu1 %v7919_v48, %s5439_s18  ;;  %3617 = vrot.lane.b32.xlu0 %v3579_v38, %s5450_s17 }
 0x663   : > { %4011 = vrot.lane.b32.xlu2 %v3975_v5, %s5440_s24  ;;  %v3833_v5 = vld [vmem:[#allocation2 + $0x35] sm:$0xff] }
 0x664   : > { %v8415_v53 = vpop.permute.xlu1 %3273  ;;  %v8417_v36 = vpop.permute.xlu0 %3277 }
 0x665   : > { %10385 = vst [vmem:[#allocation95_spill] sm:$0xff] %v8415_v53  ;;  %v8419_v56 = vpop.permute.xlu2 %3325  ;;  %v3836_v53 = vld [vmem:[#allocation2 + $0x4d] sm:$0xff] }
 0x666   : > { %10386 = vst [vmem:[#allocation102_spill] sm:$0xff] %v8417_v36  ;;  %v3977_v36 = vld [vmem:[#allocation2 + $0x36] sm:$0xff] }
 0x66a   : > { %3619 = vrot.lane.b32.xlu1 %v3580_v0, %s5450_s17  ;;  %3729 = vrot.lane.b32.xlu0 %v3582_v32, %s5441_s25 }
 0x66b   : > { %3475 = vrot.lane.b32.xlu2 %v7931_v2, %s5439_s18 }
 0x66c   : > { %v8425_v48 = vpop.permute.xlu1 %3279  ;;  %v8427_v14 = vpop.permute.xlu0 %3283 }
 0x66d   : > { %10387 = vst [vmem:[#allocation109_spill] sm:$0xff] %v8425_v48  ;;  %v8429_v38 = vpop.permute.xlu2 %3331  ;;  %v3978_v48 = vld [vmem:[#allocation2 + $0x3e] sm:$0xff] }
 0x66e   : > { %10388 = vst [vmem:[#allocation101_spill] sm:$0xff] %v8427_v14  ;;  %v3834_v14 = vld [vmem:[#allocation2 + $0x3d] sm:$0xff] }
 0x672   : > { %3871 = vrot.lane.b32.xlu1 %v3833_v5, %s5451_s26  ;;  %4015 = vrot.lane.b32.xlu0 %v3977_v36, %s5440_s24 }
 0x673   : > { %3727 = vrot.lane.b32.xlu2 %v3581_v18, %s5441_s25 }
 0x674   : > { %v8434_v0 = vpop.permute.xlu1 %3285  ;;  %v8436_v23 = vpop.permute.xlu0 %3327 }
 0x675   : > { %10389 = vst [vmem:[#allocation115_spill] sm:$0xff] %v8434_v0  ;;  %v8438_v2 = vpop.permute.xlu2 %3337  ;;  %v3583_v0 = vld [vmem:[#allocation2 + $0x44] sm:$0xff] }
 0x67a   : > { %4017 = vrot.lane.b32.xlu1 %v3978_v48, %s5440_s24  ;;  %3479 = vrot.lane.b32.xlu0 %v7946_v61, %s5439_s18 }
 0x67b   : > { %3873 = vrot.lane.b32.xlu2 %v3834_v14, %s5451_s26  ;;  %v3584_v14 = vld [vmem:[#allocation2 + $0x4c] sm:$0xff] }
 0x67c   : > { %v8444_v5 = vpop.permute.xlu1 %3329  ;;  %v8446_v36 = vpop.permute.xlu0 %3333 }
 0x67d   : > { %v8448_v41 = vpop.permute.xlu2 %3343 }
 0x682   : > { %3621 = vrot.lane.b32.xlu1 %v3581_v18, %s5450_s17  ;;  %3731 = vrot.lane.b32.xlu0 %v3583_v0, %s5441_s25 }
 0x683   : > { %3477 = vrot.lane.b32.xlu2 %v7939_v26, %s5439_s18  ;;  %v3979_v26 = vld [vmem:[#allocation2 + $0x46] sm:$0xff] }
 0x684   : > { %v8454_v48 = vpop.permute.xlu1 %3335  ;;  %v8456_v25 = vpop.permute.xlu0 %3339 }
 0x685   : > { %v8458_v61 = vpop.permute.xlu2 %3349 }
 0x68a   : > { %3733 = vrot.lane.b32.xlu1 %v3584_v14, %s5441_s25  ;;  %3877 = vrot.lane.b32.xlu0 %v3836_v53, %s5451_s26  ;;  %v5026_v53 = vld [vmem:[%s9542_s7 + $0x38] sm:$0xff] }
 0x68b   : > { %3623 = vrot.lane.b32.xlu2 %v3582_v32, %s5450_s17  ;;  %4201 = vmatpush.bf16.msra.mxu2 %v5026_v53 }
 0x68c   : > { %v8463_v18 = vpop.permute.xlu1 %3341  ;;  %v8465_v52 = vpop.permute.xlu0 %3345  ;;  %5132 = vmatpush.bf16.msra.mxu3 %v5026_v53 }
 0x68d   : > { %v8467_v6 = vpop.permute.xlu2 %3355 }
 0x68e   : > { %10390 = vst [vmem:[#allocation104_spill] sm:$0xff] %v8467_v6 }
 0x692   : > { %4019 = vrot.lane.b32.xlu1 %v3979_v26, %s5440_s24  ;;  %3481 = vrot.lane.b32.xlu0 %v7954_v21, %s5439_s18  ;;  %v5025_v26 = vld [vmem:[%s9542_s7 + $0x30] sm:$0xff] }
 0x693   : > { %3875 = vrot.lane.b32.xlu2 %v3835_v59, %s5451_s26  ;;  %4202 = vmatpush.bf16.msra.mxu2 %v5025_v26  ;;  %v3980_v21 = vld [vmem:[#allocation2 + $0x4e] sm:$0xff] }
 0x694   : > { %v8476_v32 = vpop.permute.xlu1 %3347  ;;  %v8478_v54 = vpop.permute.xlu0 %3351  ;;  %5133 = vmatpush.bf16.msra.mxu3 %v5025_v26  ;;  %v5024_v59 = vld [vmem:[%s9542_s7 + $0x28] sm:$0xff]  ;;  %v3585_v26 = vld [vmem:[#allocation2 + $0x54] sm:$0xff] }
 0x695   : > { %v8480_v29 = vpop.permute.xlu2 %3361 }
 0x696   : > { %10391 = vst [vmem:[#allocation118_spill] sm:$0xff] %v8480_v29 }
 0x697   : > { %4203 = vmatpush.bf16.msra.mxu2 %v5024_v59 }
 0x698   : > { %5134 = vmatpush.bf16.msra.mxu3 %v5024_v59 }
 0x69a   : > { %3483 = vrot.lane.b32.xlu1 %v7962_v11, %s5439_s18  ;;  %3627 = vrot.lane.b32.xlu0 %v3584_v14, %s5450_s17  ;;  %v5023_v11 = vld [vmem:[%s9542_s7 + $0x20] sm:$0xff]  ;;  %v3837_v14 = vld [vmem:[#allocation2 + $0x55] sm:$0xff] }
 0x69b   : > { %4021 = vrot.lane.b32.xlu2 %v3980_v21, %s5440_s24  ;;  %4204 = vmatpush.bf16.msra.mxu2 %v5023_v11  ;;  %v5022_v21 = vld [vmem:[%s9542_s7 + $0x18] sm:$0xff] }
 0x69c   : > { %v8492_v28 = vpop.permute.xlu1 %3353  ;;  %v8494_v53 = vpop.permute.xlu0 %3357  ;;  %5135 = vmatpush.bf16.msra.mxu3 %v5023_v11  ;;  %v5021_v11 = vld [vmem:[%s9542_s7 + $0x10] sm:$0xff] }
 0x69d   : > { %10392 = vst [vmem:[#allocation163_spill] sm:$0xff] %v8492_v28  ;;  %v8496_v29 = vpop.permute.xlu2 %3367 }
 0x69e   : > { %10393 = vst [vmem:[#allocation171_spill] sm:$0xff] %v8494_v53  ;;  %v5418_v53 = vld [vmem:[#allocation2] sm:$0xff] }
 0x69f   : > { %10394 = vst [vmem:[#allocation112_spill] sm:$0xff] %v8496_v29  ;;  %4205 = vmatpush.bf16.msra.mxu2 %v5022_v21  ;;  %v3144_v49 = vadd.f32 %v5418_v53, %v5375_v9  ;;  %v3983_v9 = vld [vmem:[#allocation2 + $0x66] sm:$0xff] }
 0x6a0   : > { %5136 = vmatpush.bf16.msra.mxu3 %v5022_v21 }
 0x6a2   : > { %3735 = vrot.lane.b32.xlu1 %v3585_v26, %s5441_s25  ;;  %3879 = vrot.lane.b32.xlu0 %v3837_v14, %s5451_s26  ;;  %v3586_v14 = vld [vmem:[#allocation2 + $0x5c] sm:$0xff] }
 0x6a3   : > { %3625 = vrot.lane.b32.xlu2 %v3583_v0, %s5450_s17  ;;  %4206 = vmatpush.bf16.msra.mxu2 %v5021_v11  ;;  %v3982_v0 = vld [vmem:[#allocation2 + $0x5e] sm:$0xff] }
 0x6a4   : > { %v8507_v29 = vpop.permute.xlu1 %3359  ;;  %v8509_v59 = vpop.permute.xlu0 %3363  ;;  %5137 = vmatpush.bf16.msra.mxu3 %v5021_v11  ;;  %v3981_v11 = vld [vmem:[#allocation2 + $0x56] sm:$0xff] }
 0x6a5   : > { %10395 = vst [vmem:[#allocation98_spill] sm:$0xff] %v8507_v29  ;;  %v8511_v34 = vpop.permute.xlu2 %3373 }
 0x6a6   : > { %10396 = vst [vmem:[#allocation107_spill] sm:$0xff] %v8509_v59 }
 0x6a7   : > { %10397 = vst [vmem:[#allocation111_spill] sm:$0xff] %v8511_v34  ;;  %v5020_v34 = vld [vmem:[%s9542_s7 + $0x8] sm:$0xff] }
 0x6a8   : > { %4207 = vmatpush.bf16.msra.mxu2 %v5020_v34  ;;  %5138 = vmatpush.bf16.msra.mxu3 %v5020_v34 }
 0x6aa   : > { %3881 = vrot.lane.b32.xlu1 %v3838_v44, %s5451_s26  ;;  %4025 = vrot.lane.b32.xlu0 %v3982_v0, %s5440_s24  ;;  %v5019_v44 = vld [vmem:[%s9542_s7] sm:$0xff] }
 0x6ab   : > { %3737 = vrot.lane.b32.xlu2 %v3586_v14, %s5441_s25 }
 0x6ac   : > { %v8522_v21 = vpop.permute.xlu1 %3365  ;;  %v8524_v59 = vpop.permute.xlu0 %3369  ;;  %4208 = vmatpush.bf16.msra.mxu2 %v5019_v44  ;;  %5139 = vmatpush.bf16.msra.mxu3 %v5019_v44  ;;  %v5379_v44 = vunpack.i.l.bf16 %v8149_v57 }
 0x6ad   : > { %10398 = vst [vmem:[#allocation152_spill] sm:$0xff] %v8522_v21  ;;  %v3614_v24 = vpop.permute.xlu2 %3613 }
 0x6ae   : > { %10399 = vst [vmem:[#allocation113_spill] sm:$0xff] %v8524_v59  ;;  %v5374_v59 = vunpack.i.l.bf16 %v8143_v4 }
 0x6b0   : > { %v3143_v29 = vadd.f32 %v5418_v53, %v5374_v59 }
 0x6b2   : > { %3485 = vrot.lane.b32.xlu1 %v7970_v50, %s5439_s18  ;;  %3629 = vrot.lane.b32.xlu0 %v3585_v26, %s5450_s17  ;;  %v3588_v50 = vld [vmem:[#allocation2 + $0x6c] sm:$0xff]  ;;  %v5380_v26 = vunpack.i.h.bf16 %v8149_v57  ;;  %v3587_v57 = vld [vmem:[#allocation2 + $0x64] sm:$0xff] }
 0x6b3   : > { %4023 = vrot.lane.b32.xlu2 %v3981_v11, %s5440_s24 }
 0x6b4   : > { %v8533_v0 = vpop.permute.xlu1 %3371  ;;  %v3470_v21 = vpop.permute.xlu0 %3469  ;;  %v3288_v59 = vadd.f32 %v5380_v26, %v3144_v49  ;;  %v3984_v49 = vld [vmem:[#allocation2 + $0x6e] sm:$0xff] }
 0x6b5   : > { %10400 = vst [vmem:[#allocation117_spill] sm:$0xff] %v8533_v0  ;;  %v3726_v34 = vpop.permute.xlu2 %3725  ;;  %v3287_v0 = vadd.f32 %v5379_v44, %v3143_v29 }
 0x6b6   : > { %v3398_v30 = vadd.f32 %v8436_v23, %v3288_v59  ;;  %v3444_v23 = vld [vmem:[#allocation2 + $0x6b] sm:$0xff] }
 0x6b7   : > { %v3397_v4 = vadd.f32 %v8419_v56, %v3287_v0 }
 0x6b9   : > { %v3541_v6 = vadd.f32 %v3470_v21, %v3397_v4  ;;  %v3840_v21 = vld [vmem:[#allocation2 + $0x6d] sm:$0xff] }
 0x6ba   : > { %3631 = vrot.lane.b32.xlu1 %v3586_v14, %s5450_s17  ;;  %3741 = vrot.lane.b32.xlu0 %v3588_v50, %s5441_s25  ;;  %v3839_v14 = vld [vmem:[#allocation2 + $0x65] sm:$0xff] }
 0x6bb   : > { %3487 = vrot.lane.b32.xlu2 %v7978_v42, %s5439_s18  ;;  %v3685_v29 = vadd.f32 %v3614_v24, %v3541_v6 }
 0x6bc   : > { %v3472_v11 = vpop.permute.xlu1 %3471  ;;  %v3616_v22 = vpop.permute.xlu0 %3615 }
 0x6bd   : > { %v4012_v40 = vpop.permute.xlu2 %4011  ;;  %v3542_v53 = vadd.f32 %v3472_v11, %v3398_v30 }
 0x6bf   : > { %v3686_v20 = vadd.f32 %v3616_v22, %v3542_v53  ;;  %v3589_v22 = vld [vmem:[#allocation2 + $0x74] sm:$0xff] }
 0x6c1   : > { %v3796_v30 = vadd.f32 %v3726_v34, %v3686_v20  ;;  %v3001_v20 = vld [vmem:[#allocation2 + $0x10] sm:$0xff] }
 0x6c2   : > { %3883 = vrot.lane.b32.xlu1 %v3839_v14, %s5451_s26  ;;  %4027 = vrot.lane.b32.xlu0 %v3983_v9, %s5440_s24  ;;  %v3443_v9 = vld [vmem:[#allocation2 + $0x63] sm:$0xff]  ;;  %v3145_v34 = vadd.f32 %v8119_v8, %v3001_v20 }
 0x6c3   : > { %3739 = vrot.lane.b32.xlu2 %v3587_v57, %s5441_s25 }
 0x6c4   : > { %v3724_v42 = vpop.permute.xlu1 %3723  ;;  %v3868_v44 = vpop.permute.xlu0 %3867 }
 0x6c5   : > { %v3476_v28 = vpop.permute.xlu2 %3475  ;;  %v3795_v56 = vadd.f32 %v3724_v42, %v3685_v29 }
 0x6c7   : > { %v3939_v0 = vadd.f32 %v3868_v44, %v3795_v56  ;;  %v3590_v44 = vld [vmem:[#allocation2 + $0x7c] sm:$0xff] }
 0x6c8   : > { %v3002_v56 = vld [vmem:[#allocation2 + $0x18] sm:$0xff] }
 0x6c9   : > { %v4083_v24 = vadd.f32 %v4012_v40, %v3939_v0  ;;  %v3842_v40 = vld [vmem:[#allocation2 + $0x7d] sm:$0xff] }
 0x6ca   : > { %4029 = vrot.lane.b32.xlu1 %v3984_v49, %s5440_s24  ;;  %3491 = vrot.lane.b32.xlu0 %v3444_v23, %s5439_s18  ;;  %v3289_v49 = vadd.f32 %v8316_v31, %v3145_v34  ;;  %v3841_v31 = vld [vmem:[#allocation2 + $0x75] sm:$0xff] }
 0x6cb   : > { %3885 = vrot.lane.b32.xlu2 %v3840_v21, %s5451_s26 }
 0x6cc   : > { %v3870_v26 = vpop.permute.xlu1 %3869  ;;  %v4014_v4 = vpop.permute.xlu0 %4013  ;;  %v3399_v0 = vadd.f32 %v8444_v5, %v3289_v49 }
 0x6cd   : > { %v3940_v11 = vadd.f32 %v3870_v26, %v3796_v30  ;;  %v3728_v59 = vpop.permute.xlu2 %3727 }
 0x6cf   : > { %v4084_v6 = vadd.f32 %v4014_v4, %v3940_v11 }
 0x6d1   : > { %v4119_v14 = vpack.c.bf16 %v4084_v6, %v4083_v24  ;;  %v3985_v6 = vld [vmem:[#allocation2 + $0x76] sm:$0xff] }
 0x6d2   : > { %3633 = vrot.lane.b32.xlu1 %v3587_v57, %s5450_s17  ;;  %3743 = vrot.lane.b32.xlu0 %v3589_v22, %s5441_s25  ;;  %v3146_v57 = vadd.f32 %v8167_v37, %v3002_v56  ;;  %v3445_v37 = vld [vmem:[#allocation2 + $0x73] sm:$0xff] }
 0x6d3   : > { %3489 = vrot.lane.b32.xlu2 %v3443_v9, %s5439_s18  ;;  %4209 = vmatmul.bf16.vlgmr.msra.gmra.mxu2 %v4119_v14 }
 0x6d4   : > { %v3474_v53 = vpop.permute.xlu1 %3473  ;;  %v3618_v42 = vpop.permute.xlu0 %3617  ;;  %v3290_v21 = vadd.f32 %v8296_v51, %v3146_v57 }
 0x6d5   : > { %v3874_v29 = vpop.permute.xlu2 %3873  ;;  %v3543_v11 = vadd.f32 %v3474_v53, %v3399_v0 }
 0x6d6   : > { %v3400_v26 = vadd.f32 %v8429_v38, %v3290_v21  ;;  %v3446_v38 = vld [vmem:[#allocation2 + $0x7b] sm:$0xff]  ;;  %v3004_v21 = vld [vmem:[#allocation2 + $0x28] sm:$0xff] }
 0x6d7   : > { %v3687_v24 = vadd.f32 %v3618_v42, %v3543_v11  ;;  %v3148_v0 = vadd.f32 %v8133_v15, %v3004_v21  ;;  %v3594_v21 = vld [vmem:[#allocation2 + $0x9c] sm:$0xff] }
 0x6d8   : > { %v3544_v4 = vadd.f32 %v3476_v28, %v3400_v26  ;;  %v3986_v28 = vld [vmem:[#allocation2 + $0x7e] sm:$0xff] }
 0x6d9   : > { %v3797_v20 = vadd.f32 %v3728_v59, %v3687_v24  ;;  %v3591_v59 = vld [vmem:[#allocation2 + $0x84] sm:$0xff]  ;;  %v3292_v11 = vadd.f32 %v8328_v62, %v3148_v0  ;;  %v3592_v62 = vld [vmem:[#allocation2 + $0x8c] sm:$0xff] }
 0x6da   : > { %3745 = vrot.lane.b32.xlu1 %v3590_v44, %s5441_s25  ;;  %3889 = vrot.lane.b32.xlu0 %v3842_v40, %s5451_s26  ;;  %v3843_v26 = vld [vmem:[#allocation2 + $0x85] sm:$0xff] }
 0x6db   : > { %3635 = vrot.lane.b32.xlu2 %v3588_v50, %s5450_s17  ;;  %v3448_v0 = vld [vmem:[#allocation2 + $0x8b] sm:$0xff] }
 0x6dc   : > { %v3620_v23 = vpop.permute.xlu1 %3619  ;;  %v3730_v30 = vpop.permute.xlu0 %3729 }
 0x6dd   : > { %v3478_v8 = vpop.permute.xlu2 %3477  ;;  %v3688_v14 = vadd.f32 %v3620_v23, %v3544_v4 }
 0x6df   : > { %v3798_v9 = vadd.f32 %v3730_v30, %v3688_v14  ;;  %v3003_v30 = vld [vmem:[#allocation2 + $0x20] sm:$0xff] }
 0x6e1   : > { %v3942_v53 = vadd.f32 %v3874_v29, %v3798_v9 }
 0x6e2   : > { %4031 = vrot.lane.b32.xlu1 %v3985_v6, %s5440_s24  ;;  %3493 = vrot.lane.b32.xlu0 %v3445_v37, %s5439_s18  ;;  %v3402_v6 = vadd.f32 %v8454_v48, %v3292_v11 }
 0x6e3   : > { %3887 = vrot.lane.b32.xlu2 %v3841_v31, %s5451_s26 }
 0x6e4   : > { %v3872_v51 = vpop.permute.xlu1 %3871  ;;  %v4016_v50 = vpop.permute.xlu0 %4015 }
 0x6e5   : > { %v3624_v5 = vpop.permute.xlu2 %3623  ;;  %v3941_v34 = vadd.f32 %v3872_v51, %v3797_v20  ;;  %v3844_v51 = vld [vmem:[#allocation2 + $0x8d] sm:$0xff] }
 0x6e7   : > { %v4085_v56 = vadd.f32 %v4016_v50, %v3941_v34 }
 0x6ea   : > { %3495 = vrot.lane.b32.xlu1 %v3446_v38, %s5439_s18  ;;  %3639 = vrot.lane.b32.xlu0 %v3590_v44, %s5450_s17  ;;  %v3147_v44 = vadd.f32 %v8165_v47, %v3003_v30  ;;  %v3988_v47 = vld [vmem:[#allocation2 + $0x8e] sm:$0xff] }
 0x6eb   : > { %4033 = vrot.lane.b32.xlu2 %v3986_v28, %s5440_s24 }
 0x6ec   : > { %v4018_v42 = vpop.permute.xlu1 %4017  ;;  %v3480_v57 = vpop.permute.xlu0 %3479  ;;  %v3291_v4 = vadd.f32 %v8318_v3, %v3147_v44 }
 0x6ed   : > { %v4086_v40 = vadd.f32 %v4018_v42, %v3942_v53  ;;  %v3876_v49 = vpop.permute.xlu2 %3875  ;;  %v3546_v24 = vadd.f32 %v3480_v57, %v3402_v6 }
 0x6ee   : > { %v3401_v31 = vadd.f32 %v8446_v36, %v3291_v4  ;;  %v3447_v36 = vld [vmem:[#allocation2 + $0x83] sm:$0xff] }
 0x6ef   : > { %v4120_v23 = vpack.c.bf16 %v4086_v40, %v4085_v56 }
 0x6f0   : > { %v3545_v14 = vadd.f32 %v3478_v8, %v3401_v31  ;;  %v3987_v8 = vld [vmem:[#allocation2 + $0x86] sm:$0xff]  ;;  %v3989_v31 = vld [vmem:[#allocation2 + $0x96] sm:$0xff] }
 0x6f1   : > { %4214 = vmatmul.bf16.gmra.mxu2 %v4120_v23  ;;  %v3005_v23 = vld [vmem:[#allocation2 + $0x30] sm:$0xff] }
 0x6f2   : > { %3747 = vrot.lane.b32.xlu1 %v3591_v59, %s5441_s25  ;;  %3891 = vrot.lane.b32.xlu0 %v3843_v26, %s5451_s26  ;;  %v3149_v30 = vadd.f32 %v8185_v45, %v3005_v23  ;;  %v3845_v45 = vld [vmem:[#allocation2 + $0x95] sm:$0xff]  ;;  %v3596_v23 = vld [vmem:[#allocation2 + $0xac] sm:$0xff] }
 0x6f3   : > { %3637 = vrot.lane.b32.xlu2 %v3589_v22, %s5450_s17  ;;  %v3690_v22 = vadd.f32 %v3624_v5, %v3546_v24  ;;  %v3593_v24 = vld [vmem:[#allocation2 + $0x94] sm:$0xff] }
 0x6f4   : > { %v3622_v29 = vpop.permute.xlu1 %3621  ;;  %v3732_v15 = vpop.permute.xlu0 %3731  ;;  %v3293_v44 = vadd.f32 %v8308_v43, %v3149_v30  ;;  %v3848_v30 = vld [vmem:[#allocation2 + $0xad] sm:$0xff] }
 0x6f5   : > { %v4022_v37 = vpop.permute.xlu2 %4021  ;;  %v3689_v50 = vadd.f32 %v3622_v29, %v3545_v14 }
 0x6f6   : > { %v3403_v6 = vadd.f32 %v8438_v2, %v3293_v44  ;;  %v3990_v2 = vld [vmem:[#allocation2 + $0x9e] sm:$0xff] }
 0x6f7   : > { %v3799_v34 = vadd.f32 %v3732_v15, %v3689_v50  ;;  %v3846_v50 = vld [vmem:[#allocation2 + $0x9d] sm:$0xff] }
 0x6f9   : > { %v3943_v28 = vadd.f32 %v3876_v49, %v3799_v34 }
 0x6fa   : > { %3893 = vrot.lane.b32.xlu1 %v3844_v51, %s5451_s26  ;;  %4037 = vrot.lane.b32.xlu0 %v3988_v47, %s5440_s24 }
 0x6fb   : > { %3749 = vrot.lane.b32.xlu2 %v3592_v62, %s5441_s25 }
 0x6fc   : > { %v3734_v3 = vpop.permute.xlu1 %3733  ;;  %v3878_v48 = vpop.permute.xlu0 %3877 }
 0x6fd   : > { %v3800_v9 = vadd.f32 %v3734_v3, %v3690_v22  ;;  %v3626_v20 = vpop.permute.xlu2 %3625 }
 0x6ff   : > { %v3944_v38 = vadd.f32 %v3878_v48, %v3800_v9 }
 0x701   : > { %v4088_v5 = vadd.f32 %v4022_v37, %v3944_v38 }
 0x702   : > { %3497 = vrot.lane.b32.xlu1 %v3447_v36, %s5439_s18  ;;  %3641 = vrot.lane.b32.xlu0 %v3591_v59, %s5450_s17  ;;  %v3006_v59 = vld [vmem:[#allocation2 + $0x38] sm:$0xff] }
 0x703   : > { %4035 = vrot.lane.b32.xlu2 %v3987_v8, %s5440_s24  ;;  %v3150_v26 = vadd.f32 %v8183_v35, %v3006_v59 }
 0x704   : > { %v4020_v53 = vpop.permute.xlu1 %4019  ;;  %v3482_v56 = vpop.permute.xlu0 %3481 }
 0x705   : > { %v4087_v42 = vadd.f32 %v4020_v53, %v3943_v28  ;;  %v3738_v40 = vpop.permute.xlu2 %3737  ;;  %v3294_v4 = vadd.f32 %v8330_v1, %v3150_v26  ;;  %v3547_v37 = vadd.f32 %v3482_v56, %v3403_v6  ;;  %v3595_v28 = vld [vmem:[#allocation2 + $0xa4] sm:$0xff]  ;;  %v3449_v53 = vld [vmem:[#allocation2 + $0x93] sm:$0xff] }
 0x707   : > { %v4121_v57 = vpack.c.bf16 %v4088_v5, %v4087_v42  ;;  %v3404_v15 = vadd.f32 %v8456_v25, %v3294_v4  ;;  %v3691_v43 = vadd.f32 %v3626_v20, %v3547_v37  ;;  %v3450_v25 = vld [vmem:[#allocation2 + $0x9b] sm:$0xff]  ;;  %v3991_v37 = vld [vmem:[#allocation2 + $0xa6] sm:$0xff] }
 0x709   : > { %4219 = vmatmul.bf16.gmra.mxu2 %v4121_v57 }
 0x70a   : > { %3643 = vrot.lane.b32.xlu1 %v3592_v62, %s5450_s17  ;;  %3753 = vrot.lane.b32.xlu0 %v3594_v21, %s5441_s25 }
 0x70b   : > { %3499 = vrot.lane.b32.xlu2 %v3448_v0, %s5439_s18  ;;  %v3008_v0 = vld [vmem:[#allocation2 + $0x48] sm:$0xff] }
 0x70c   : > { %v3484_v49 = vpop.permute.xlu1 %3483  ;;  %v3628_v11 = vpop.permute.xlu0 %3627  ;;  %v3152_v59 = vadd.f32 %v8203_v46, %v3008_v0  ;;  %v3451_v46 = vld [vmem:[#allocation2 + $0xa3] sm:$0xff] }
 0x70d   : > { %v4024_v29 = vpop.permute.xlu2 %4023  ;;  %v3548_v14 = vadd.f32 %v3484_v49, %v3404_v15 }
 0x70e   : > { %v3296_v44 = vadd.f32 %v8320_v10, %v3152_v59 }
 0x70f   : > { %v3692_v1 = vadd.f32 %v3628_v11, %v3548_v14 }
 0x710   : > { %v3406_v4 = vadd.f32 %v8448_v41, %v3296_v44  ;;  %v3452_v41 = vld [vmem:[#allocation2 + $0xab] sm:$0xff] }
 0x711   : > { %v3802_v3 = vadd.f32 %v3738_v40, %v3692_v1  ;;  %v3007_v40 = vld [vmem:[#allocation2 + $0x40] sm:$0xff] }
 0x712   : > { %3895 = vrot.lane.b32.xlu1 %v3845_v45, %s5451_s26  ;;  %4039 = vrot.lane.b32.xlu0 %v3989_v31, %s5440_s24  ;;  %v3151_v57 = vadd.f32 %v8151_v7, %v3007_v40 }
 0x713   : > { %3751 = vrot.lane.b32.xlu2 %v3593_v24, %s5441_s25 }
 0x714   : > { %v3736_v35 = vpop.permute.xlu1 %3735  ;;  %v3880_v51 = vpop.permute.xlu0 %3879  ;;  %v3295_v49 = vadd.f32 %v8340_v12, %v3151_v57  ;;  %v3847_v12 = vld [vmem:[#allocation2 + $0xa5] sm:$0xff]  ;;  %v3850_v57 = vld [vmem:[#allocation2 + $0xbd] sm:$0xff] }
 0x715   : > { %v3488_v47 = vpop.permute.xlu2 %3487  ;;  %v3801_v62 = vadd.f32 %v3736_v35, %v3691_v43  ;;  %v3992_v43 = vld [vmem:[#allocation2 + $0xae] sm:$0xff] }
 0x716   : > { %v3405_v11 = vadd.f32 %v8463_v18, %v3295_v49  ;;  %v3550_v15 = vadd.f32 %v3488_v47, %v3406_v4 }
 0x717   : > { %v3945_v22 = vadd.f32 %v3880_v51, %v3801_v62 }
 0x719   : > { %v4089_v36 = vadd.f32 %v4024_v29, %v3945_v22  ;;  %v3010_v22 = vld [vmem:[#allocation2 + $0x58] sm:$0xff] }
 0x71a   : > { %4041 = vrot.lane.b32.xlu1 %v3990_v2, %s5440_s24  ;;  %3503 = vrot.lane.b32.xlu0 %v3450_v25, %s5439_s18 }
 0x71b   : > { %3897 = vrot.lane.b32.xlu2 %v3846_v50, %s5451_s26 }
 0x71c   : > { %v3882_v9 = vpop.permute.xlu1 %3881  ;;  %v4026_v34 = vpop.permute.xlu0 %4025 }
 0x71d   : > { %v3946_v48 = vadd.f32 %v3882_v9, %v3802_v3  ;;  %v3740_v38 = vpop.permute.xlu2 %3739  ;;  %v3154_v3 = vadd.f32 %v8169_v27, %v3010_v22  ;;  %v3597_v9 = vld [vmem:[#allocation2 + $0xb4] sm:$0xff] }
 0x71f   : > { %v4090_v20 = vadd.f32 %v4026_v34, %v3946_v48  ;;  %v3009_v48 = vld [vmem:[#allocation2 + $0x50] sm:$0xff] }
 0x720   : > { %v3849_v34 = vld [vmem:[#allocation2 + $0xb5] sm:$0xff] }
 0x721   : > { %v4122_v8 = vpack.c.bf16 %v4090_v20, %v4089_v36  ;;  %v3298_v20 = vadd.f32 %v8352_v13, %v3154_v3  ;;  %v3598_v13 = vld [vmem:[#allocation2 + $0xbc] sm:$0xff] }
 0x722   : > { %3645 = vrot.lane.b32.xlu1 %v3593_v24, %s5450_s17  ;;  %3755 = vrot.lane.b32.xlu0 %v3595_v28, %s5441_s25  ;;  %v5419_v3 = vld [vmem:[#allocation2 + $0xfa] sm:$0xff] }
 0x723   : > { %3501 = vrot.lane.b32.xlu2 %v3449_v53, %s5439_s18  ;;  %4224 = vmatmul.bf16.gmra.mxu2 %v4122_v8  ;;  %v3408_v53 = vadd.f32 %v8476_v32, %v3298_v20 }
 0x724   : > { %v3486_v42 = vpop.permute.xlu1 %3485  ;;  %v3630_v56 = vpop.permute.xlu0 %3629 }
 0x725   : > { %v3886_v5 = vpop.permute.xlu2 %3885  ;;  %v3549_v6 = vadd.f32 %v3486_v42, %v3405_v11 }
 0x727   : > { %v3693_v45 = vadd.f32 %v3630_v56, %v3549_v6 }
 0x729   : > { %v3803_v14 = vadd.f32 %v3740_v38, %v3693_v45  ;;  %v3153_v38 = vadd.f32 %v8201_v58, %v3009_v48  ;;  %v3994_v58 = vld [vmem:[#allocation2 + $0xbe] sm:$0xff] }
 0x72a   : > { %3757 = vrot.lane.b32.xlu1 %v3596_v23, %s5441_s25  ;;  %3901 = vrot.lane.b32.xlu0 %v3848_v30, %s5451_s26 }
 0x72b   : > { %3647 = vrot.lane.b32.xlu2 %v3594_v21, %s5450_s17  ;;  %v3297_v8 = vadd.f32 %v8342_v60, %v3153_v38 }
 0x72c   : > { %v3632_v26 = vpop.permute.xlu1 %3631  ;;  %v3742_v29 = vpop.permute.xlu0 %3741 }
 0x72d   : > { %v3490_v7 = vpop.permute.xlu2 %3489  ;;  %v3694_v31 = vadd.f32 %v3632_v26, %v3550_v15  ;;  %v3407_v56 = vadd.f32 %v8465_v52, %v3297_v8  ;;  %v3453_v52 = vld [vmem:[#allocation2 + $0xb3] sm:$0xff] }
 0x72e   : > { %v3993_v26 = vld [vmem:[#allocation2 + $0xb6] sm:$0xff] }
 0x72f   : > { %v3804_v24 = vadd.f32 %v3742_v29, %v3694_v31  ;;  %v3551_v40 = vadd.f32 %v3490_v7, %v3407_v56  ;;  %v3012_v31 = vld [vmem:[#allocation2 + $0x68] sm:$0xff]  ;;  %v5420_v56 = vld [vmem:[#allocation2 + $0xf2] sm:$0xff] }
 0x731   : > { %v3948_v51 = vadd.f32 %v3886_v5, %v3804_v24 }
 0x732   : > { %4043 = vrot.lane.b32.xlu1 %v3991_v37, %s5440_s24  ;;  %3505 = vrot.lane.b32.xlu0 %v3451_v46, %s5439_s18  ;;  %v3011_v37 = vld [vmem:[#allocation2 + $0x60] sm:$0xff]  ;;  %v3600_v46 = vld [vmem:[#allocation2 + $0xcc] sm:$0xff] }
 0x733   : > { %3899 = vrot.lane.b32.xlu2 %v3847_v12, %s5451_s26  ;;  %v3454_v12 = vld [vmem:[#allocation2 + $0xbb] sm:$0xff]  ;;  %v3155_v45 = vadd.f32 %v8221_v63, %v3011_v37  ;;  %v3851_v63 = vld [vmem:[#allocation2 + $0xc5] sm:$0xff] }
 0x734   : > { %v3884_v10 = vpop.permute.xlu1 %3883  ;;  %v4028_v21 = vpop.permute.xlu0 %4027 }
 0x735   : > { %v3636_v18 = vpop.permute.xlu2 %3635  ;;  %v3947_v35 = vadd.f32 %v3884_v10, %v3803_v14 }
 0x737   : > { %v4091_v1 = vadd.f32 %v4028_v21, %v3947_v35  ;;  %v3156_v21 = vadd.f32 %v8219_v55, %v3012_v31 }
 0x739   : > { %v3300_v35 = vadd.f32 %v8354_v19, %v3156_v21  ;;  %v8668_v21 = vld [vmem:[#allocation2 + $0xdc] sm:$0xff] }
 0x73a   : > { %3507 = vrot.lane.b32.xlu1 %v3452_v41, %s5439_s18  ;;  %3651 = vrot.lane.b32.xlu0 %v3596_v23, %s5450_s17 }
 0x73b   : > { %4045 = vrot.lane.b32.xlu2 %v3992_v43, %s5440_s24  ;;  %v3410_v43 = vadd.f32 %v8478_v54, %v3300_v35  ;;  %v3852_v54 = vld [vmem:[#allocation2 + $0xcd] sm:$0xff] }
 0x73c   : > { %v4030_v47 = vpop.permute.xlu1 %4029  ;;  %v3492_v2 = vpop.permute.xlu0 %3491 }
 0x73d   : > { %v4092_v62 = vadd.f32 %v4030_v47, %v3948_v51  ;;  %v3888_v25 = vpop.permute.xlu2 %3887  ;;  %v3552_v5 = vadd.f32 %v3492_v2, %v3408_v53  ;;  %v3995_v47 = vld [vmem:[#allocation2 + $0xc6] sm:$0xff] }
 0x73e   : > { %v3455_v53 = vld [vmem:[#allocation2 + $0xc3] sm:$0xff] }
 0x73f   : > { %v4123_v50 = vpack.c.bf16 %v4092_v62, %v4091_v1  ;;  %v3599_v1 = vld [vmem:[#allocation2 + $0xc4] sm:$0xff] }
 0x741   : > { %4229 = vmatmul.bf16.gmra.mxu2 %v4123_v50 }
 0x742   : > { %3759 = vrot.lane.b32.xlu1 %v3597_v9, %s5441_s25  ;;  %3903 = vrot.lane.b32.xlu0 %v3849_v34, %s5451_s26 }
 0x743   : > { %3649 = vrot.lane.b32.xlu2 %v3595_v28, %s5450_s17  ;;  %v3696_v28 = vadd.f32 %v3636_v18, %v3552_v5  ;;  %v3299_v18 = vadd.f32 %v8332_v17, %v3155_v45 }
 0x744   : > { %v3634_v36 = vpop.permute.xlu1 %3633  ;;  %v3744_v27 = vpop.permute.xlu0 %3743 }
 0x745   : > { %v4034_v42 = vpop.permute.xlu2 %4033  ;;  %v3695_v23 = vadd.f32 %v3634_v36, %v3551_v40  ;;  %v3409_v41 = vadd.f32 %v8458_v61, %v3299_v18  ;;  %v3996_v61 = vld [vmem:[#allocation2 + $0xce] sm:$0xff] }
 0x746   : > { %v8672_v18 = vld [vmem:[#allocation2 + $0x10c] sm:$0xff] }
 0x747   : > { %v3805_v59 = vadd.f32 %v3744_v27, %v3695_v23  ;;  %v3462_v23 = vld [vmem:[#allocation2 + $0xfb] sm:$0xff] }
 0x749   : > { %v3949_v44 = vadd.f32 %v3888_v25, %v3805_v59  ;;  %v10401_v59 = vld [vmem:[#allocation96_spill] sm:$0xff] }
 0x74a   : > { %3905 = vrot.lane.b32.xlu1 %v3850_v57, %s5451_s26  ;;  %4049 = vrot.lane.b32.xlu0 %v3994_v58, %s5440_s24  ;;  %v3013_v58 = vld [vmem:[#allocation2 + $0x70] sm:$0xff] }
 0x74b   : > { %3761 = vrot.lane.b32.xlu2 %v3598_v13, %s5441_s25 }
 0x74c   : > { %v3746_v60 = vpop.permute.xlu1 %3745  ;;  %v3890_v32 = vpop.permute.xlu0 %3889 }
 0x74d   : > { %v3806_v0 = vadd.f32 %v3746_v60, %v3696_v28  ;;  %v3638_v30 = vpop.permute.xlu2 %3637  ;;  %v3014_v28 = vld [vmem:[#allocation2 + $0x78] sm:$0xff]  ;;  %v3456_v60 = vld [vmem:[#allocation2 + $0xcb] sm:$0xff] }
 0x74f   : > { %v3950_v49 = vadd.f32 %v3890_v32, %v3806_v0  ;;  %v3158_v0 = vadd.f32 %v8239_v39, %v3014_v28  ;;  %v8663_v39 = vld [vmem:[#allocation2 + $0xd4] sm:$0xff] }
 0x751   : > { %v4094_v29 = vadd.f32 %v4034_v42, %v3950_v49  ;;  %v3461_v42 = vld [vmem:[#allocation2 + $0xf3] sm:$0xff]  ;;  %v3302_v49 = vadd.f32 %v10401_v59, %v3158_v0 }
 0x752   : > { %3509 = vrot.lane.b32.xlu1 %v3453_v52, %s5439_s18  ;;  %3653 = vrot.lane.b32.xlu0 %v3597_v9, %s5450_s17  ;;  %v10402_v52 = vld [vmem:[#allocation163_spill] sm:$0xff]  ;;  %v3997_v59 = vld [vmem:[#allocation2 + $0xd6] sm:$0xff] }
 0x753   : > { %4047 = vrot.lane.b32.xlu2 %v3993_v26, %s5440_s24 }
 0x754   : > { %v4032_v11 = vpop.permute.xlu1 %4031  ;;  %v3494_v4 = vpop.permute.xlu0 %3493 }
 0x755   : > { %v4093_v7 = vadd.f32 %v4032_v11, %v3949_v44  ;;  %v3750_v6 = vpop.permute.xlu2 %3749  ;;  %v3553_v51 = vadd.f32 %v3494_v4, %v3409_v41  ;;  %v10403_v11 = vld [vmem:[#allocation104_spill] sm:$0xff] }
 0x757   : > { %v4124_v15 = vpack.c.bf16 %v4094_v29, %v4093_v7  ;;  %v3697_v17 = vadd.f32 %v3638_v30, %v3553_v51  ;;  %v3412_v29 = vadd.f32 %v10403_v11, %v3302_v49  ;;  %v5421_v49 = vld [vmem:[#allocation2 + $0xda] sm:$0xff] }
 0x759   : > { %4234 = vmatmul.bf16.gmra.mxu2 %v4124_v15 }
 0x75a   : > { %3655 = vrot.lane.b32.xlu1 %v3598_v13, %s5450_s17  ;;  %3765 = vrot.lane.b32.xlu0 %v3600_v46, %s5441_s25  ;;  %v3157_v13 = vadd.f32 %v8187_v33, %v3013_v58 }
 0x75b   : > { %3511 = vrot.lane.b32.xlu2 %v3454_v12, %s5439_s18 }
 0x75c   : > { %v3496_v10 = vpop.permute.xlu1 %3495  ;;  %v3640_v24 = vpop.permute.xlu0 %3639  ;;  %v3301_v32 = vadd.f32 %v8364_v16, %v3157_v13 }
 0x75d   : > { %v4036_v14 = vpop.permute.xlu2 %4035  ;;  %v3554_v62 = vadd.f32 %v3496_v10, %v3410_v43 }
 0x75e   : > { %v3411_v26 = vadd.f32 %v10402_v52, %v3301_v32 }
 0x75f   : > { %v3698_v19 = vadd.f32 %v3640_v24, %v3554_v62  ;;  %v8674_v24 = vld [vmem:[#allocation2 + $0xfc] sm:$0xff]  ;;  %v10404_v62 = vld [vmem:[#allocation71_spill] sm:$0xff] }
 0x761   : > { %v3808_v9 = vadd.f32 %v3750_v6, %v3698_v19  ;;  %v8659_v6 = vld [vmem:[#allocation2 + $0xf4] sm:$0xff]  ;;  %v8682_v19 = vld [vmem:[#allocation2 + $0x104] sm:$0xff] }
 0x762   : > { %3907 = vrot.lane.b32.xlu1 %v3851_v63, %s5451_s26  ;;  %4051 = vrot.lane.b32.xlu0 %v3995_v47, %s5440_s24 }
 0x763   : > { %3763 = vrot.lane.b32.xlu2 %v3599_v1, %s5441_s25 }
 0x764   : > { %v3748_v55 = vpop.permute.xlu1 %3747  ;;  %v3892_v2 = vpop.permute.xlu0 %3891 }
 0x765   : > { %v3500_v25 = vpop.permute.xlu2 %3499  ;;  %v3807_v50 = vadd.f32 %v3748_v55, %v3697_v17  ;;  %v3853_v17 = vld [vmem:[#allocation2 + $0xd5] sm:$0xff] }
 0x766   : > { %v3556_v4 = vadd.f32 %v3500_v25, %v3412_v29  ;;  %v3859_v25 = vld [vmem:[#allocation2 + $0x105] sm:$0xff] }
 0x767   : > { %v3951_v22 = vadd.f32 %v3892_v2, %v3807_v50  ;;  %v3015_v2 = vld [vmem:[#allocation2 + $0x80] sm:$0xff]  ;;  %v10405_v50 = vld [vmem:[#allocation85_spill] sm:$0xff] }
 0x769   : > { %v4095_v36 = vadd.f32 %v4036_v14, %v3951_v22 }
 0x76a   : > { %4053 = vrot.lane.b32.xlu1 %v3996_v61, %s5440_s24  ;;  %3383 = vrot.lane.b32.xlu0 %v5419_v3, %s5449_s23  ;;  %v3159_v61 = vadd.f32 %v10405_v50, %v3015_v2  ;;  %v3464_v50 = vld [vmem:[#allocation2 + $0x10b] sm:$0xff] }
 0x76b   : > { %3909 = vrot.lane.b32.xlu2 %v3852_v54, %s5451_s26  ;;  %v10406_v54 = vld [vmem:[#allocation86_spill] sm:$0xff] }
 0x76c   : > { %v3894_v48 = vpop.permute.xlu1 %3893  ;;  %v4038_v38 = vpop.permute.xlu0 %4037 }
 0x76d   : > { %v3952_v34 = vadd.f32 %v3894_v48, %v3808_v9  ;;  %v3752_v20 = vpop.permute.xlu2 %3751  ;;  %v10407_v9 = vld [vmem:[#allocation167_spill] sm:$0xff] }
 0x76e   : > { %v3303_v48 = vadd.f32 %v10407_v9, %v3159_v61 }
 0x76f   : > { %v4096_v8 = vadd.f32 %v4038_v38, %v3952_v34  ;;  %v10408_v34 = vld [vmem:[#allocation98_spill] sm:$0xff] }
 0x771   : > { %v4125_v27 = vpack.c.bf16 %v4096_v8, %v4095_v36  ;;  %v10409_v8 = vld [vmem:[#allocation171_spill] sm:$0xff] }
 0x772   : > { %3513 = vrot.lane.b32.xlu1 %v3455_v53, %s5439_s18  ;;  %3525 = vrot.lane.b32.xlu0 %v3461_v42, %s5439_s18  ;;  %v3413_v53 = vadd.f32 %v10409_v8, %v3303_v48 }
 0x773   : > { %3381 = vrot.lane.b32.xlu2 %v5420_v56, %s5449_s23  ;;  %4239 = vmatmul.bf16.gmra.mxu2 %v4125_v27  ;;  %v3860_v56 = vld [vmem:[#allocation2 + $0x10d] sm:$0xff] }
 0x774   : > { %v3498_v5 = vpop.permute.xlu1 %3497  ;;  %v3642_v40 = vpop.permute.xlu0 %3641 }
 0x775   : > { %v3898_v57 = vpop.permute.xlu2 %3897  ;;  %v3555_v7 = vadd.f32 %v3498_v5, %v3411_v26  ;;  %v3998_v5 = vld [vmem:[#allocation2 + $0xde] sm:$0xff] }
 0x777   : > { %v3699_v16 = vadd.f32 %v3642_v40, %v3555_v7  ;;  %v3854_v40 = vld [vmem:[#allocation2 + $0xdd] sm:$0xff] }
 0x779   : > { %v3809_v31 = vadd.f32 %v3752_v20, %v3699_v16  ;;  %v5422_v16 = vld [vmem:[#allocation2 + $0x102] sm:$0xff] }
 0x77a   : > { %3527 = vrot.lane.b32.xlu1 %v3462_v23, %s5439_s18  ;;  %3659 = vrot.lane.b32.xlu0 %v3600_v46, %s5450_s17 }
 0x77b   : > { %3515 = vrot.lane.b32.xlu2 %v3456_v60, %s5439_s18 }
 0x77c   : > { %v3644_v30 = vpop.permute.xlu1 %3643  ;;  %v3754_v44 = vpop.permute.xlu0 %3753 }
 0x77d   : > { %v3502_v33 = vpop.permute.xlu2 %3501  ;;  %v3700_v15 = vadd.f32 %v3644_v30, %v3556_v4  ;;  %v4003_v30 = vld [vmem:[#allocation2 + $0x106] sm:$0xff]  ;;  %v3017_v4 = vld [vmem:[#allocation2 + $0x90] sm:$0xff] }
 0x77e   : > { %v3557_v42 = vadd.f32 %v3502_v33, %v3413_v53 }
 0x77f   : > { %v3810_v45 = vadd.f32 %v3754_v44, %v3700_v15  ;;  %v3457_v15 = vld [vmem:[#allocation2 + $0xd3] sm:$0xff] }
 0x781   : > { %v3954_v14 = vadd.f32 %v3898_v57, %v3810_v45  ;;  %v3018_v45 = vld [vmem:[#allocation2 + $0x98] sm:$0xff] }
 0x782   : > { %3669 = vrot.lane.b32.xlu1 %v8659_v6, %s5450_s17  ;;  %3767 = vrot.lane.b32.xlu0 %v8663_v39, %s5441_s25 }
 0x783   : > { %3657 = vrot.lane.b32.xlu2 %v3599_v1, %s5450_s17  ;;  %v3016_v1 = vld [vmem:[#allocation2 + $0x88] sm:$0xff] }
 0x784   : > { %v3896_v37 = vpop.permute.xlu1 %3895  ;;  %v4040_v46 = vpop.permute.xlu0 %4039  ;;  %v3160_v55 = vadd.f32 %v10404_v62, %v3016_v1  ;;  %v10414_v1 = vld [vmem:[#allocation118_spill] sm:$0xff] }
 0x785   : > { %v3648_v12 = vpop.permute.xlu2 %3647  ;;  %v3953_v10 = vadd.f32 %v3896_v37, %v3809_v31  ;;  %v4004_v37 = vld [vmem:[#allocation2 + $0x10e] sm:$0xff] }
 0x786   : > { %v3304_v22 = vadd.f32 %v10406_v54, %v3160_v55  ;;  %v10415_v55 = vld [vmem:[#allocation107_spill] sm:$0xff] }
 0x787   : > { %v4097_v41 = vadd.f32 %v4040_v46, %v3953_v10  ;;  %v10410_v46 = vld [vmem:[#allocation80_spill] sm:$0xff]  ;;  %v10411_v10 = vld [vmem:[#allocation91_spill] sm:$0xff] }
 0x788   : > { %v3414_v38 = vadd.f32 %v10408_v34, %v3304_v22  ;;  %v5423_v54 = vld [vmem:[#allocation2 + $0x10a] sm:$0xff] }
 0x78a   : > { %3769 = vrot.lane.b32.xlu1 %v8668_v21, %s5441_s25  ;;  %3781 = vrot.lane.b32.xlu0 %v8672_v18, %s5441_s25 }
 0x78b   : > { %3671 = vrot.lane.b32.xlu2 %v8674_v24, %s5450_s17 }
 0x78c   : > { %v4042_v35 = vpop.permute.xlu1 %4041  ;;  %v3504_v51 = vpop.permute.xlu0 %3503 }
 0x78d   : > { %v4098_v43 = vadd.f32 %v4042_v35, %v3954_v14  ;;  %v3900_v63 = vpop.permute.xlu2 %3899  ;;  %v3558_v27 = vadd.f32 %v3504_v51, %v3414_v38  ;;  %v3162_v14 = vadd.f32 %v10411_v10, %v3018_v45  ;;  %v10412_v35 = vld [vmem:[#allocation161_spill] sm:$0xff] }
 0x78e   : > { %v3862_v45 = vld [vmem:[#allocation2 + $0x11d] sm:$0xff] }
 0x78f   : > { %v4126_v47 = vpack.c.bf16 %v4098_v43, %v4097_v41  ;;  %v3702_v58 = vadd.f32 %v3648_v12, %v3558_v27  ;;  %v3161_v12 = vadd.f32 %v10410_v46, %v3017_v4 }
 0x791   : > { %4244 = vmatmul.bf16.gmra.mxu2 %v4126_v47  ;;  %v3305_v41 = vadd.f32 %v10412_v35, %v3161_v12  ;;  %v3856_v12 = vld [vmem:[#allocation2 + $0xed] sm:$0xff] }
 0x792   : > { %3911 = vrot.lane.b32.xlu1 %v3853_v17, %s5451_s26  ;;  %3923 = vrot.lane.b32.xlu0 %v3859_v25, %s5451_s26  ;;  %v3458_v25 = vld [vmem:[#allocation2 + $0xdb] sm:$0xff] }
 0x793   : > { %3779 = vrot.lane.b32.xlu2 %v8682_v19, %s5441_s25  ;;  %v3415_v62 = vadd.f32 %v10414_v1, %v3305_v41  ;;  %v3999_v1 = vld [vmem:[#allocation2 + $0xe6] sm:$0xff] }
 0x794   : > { %v3646_v3 = vpop.permute.xlu1 %3645  ;;  %v3756_v20 = vpop.permute.xlu0 %3755 }
 0x795   : > { %v4046_v36 = vpop.permute.xlu2 %4045  ;;  %v3701_v57 = vadd.f32 %v3646_v3, %v3557_v42 }
 0x797   : > { %v3811_v0 = vadd.f32 %v3756_v20, %v3701_v57  ;;  %v3463_v20 = vld [vmem:[#allocation2 + $0x103] sm:$0xff] }
 0x799   : > { %v3955_v52 = vadd.f32 %v3900_v63, %v3811_v0  ;;  %v10413_v63 = vld [vmem:[#allocation90_spill] sm:$0xff]  ;;  %v8724_v0 = vld [vmem:[#allocation2 + $0x114] sm:$0xff] }
 0x79a   : > { %3925 = vrot.lane.b32.xlu1 %v3860_v56, %s5451_s26  ;;  %4057 = vrot.lane.b32.xlu0 %v3998_v5, %s5440_s24  ;;  %v3306_v47 = vadd.f32 %v10413_v63, %v3162_v14 }
 0x79b   : > { %3913 = vrot.lane.b32.xlu2 %v3854_v40, %s5451_s26 }
 0x79c   : > { %v3758_v13 = vpop.permute.xlu1 %3757  ;;  %v3902_v28 = vpop.permute.xlu0 %3901  ;;  %v3416_v17 = vadd.f32 %v10415_v55, %v3306_v47  ;;  %v3861_v55 = vld [vmem:[#allocation2 + $0x115] sm:$0xff] }
 0x79d   : > { %v3812_v23 = vadd.f32 %v3758_v13, %v3702_v58  ;;  %v3650_v60 = vpop.permute.xlu2 %3649  ;;  %v8717_v58 = vld [vmem:[#allocation2 + $0xec] sm:$0xff] }
 0x79f   : > { %v3956_v32 = vadd.f32 %v3902_v28, %v3812_v23  ;;  %v3019_v23 = vld [vmem:[#allocation2 + $0xa0] sm:$0xff] }
 0x7a0   : > { %v10416_v28 = vld [vmem:[#allocation78_spill] sm:$0xff] }
 0x7a1   : > { %v4100_v44 = vadd.f32 %v4046_v36, %v3956_v32  ;;  %v3020_v32 = vld [vmem:[#allocation2 + $0xa8] sm:$0xff] }
 0x7a2   : > { %4067 = vrot.lane.b32.xlu1 %v4003_v30, %s5440_s24  ;;  %3375 = vrot.lane.b32.xlu0 %v5421_v49, %s5449_s23  ;;  %v8728_v30 = vld [vmem:[#allocation2 + $0xe4] sm:$0xff] }
 0x7a3   : > { %4055 = vrot.lane.b32.xlu2 %v3997_v59, %s5440_s24  ;;  %v10417_v59 = vld [vmem:[#allocation165_spill] sm:$0xff] }
 0x7a4   : > { %v4044_v26 = vpop.permute.xlu1 %4043  ;;  %v3506_v11 = vpop.permute.xlu0 %3505  ;;  %v3164_v49 = vadd.f32 %v10417_v59, %v3020_v32  ;;  %v3022_v59 = vld [vmem:[#allocation2 + $0xb8] sm:$0xff] }
 0x7a5   : > { %v4099_v33 = vadd.f32 %v4044_v26, %v3955_v52  ;;  %v3762_v29 = vpop.permute.xlu2 %3761  ;;  %v3559_v2 = vadd.f32 %v3506_v11, %v3415_v62  ;;  %v10418_v52 = vld [vmem:[#allocation99_spill] sm:$0xff]  ;;  %v10420_v11 = vld [vmem:[#allocation152_spill] sm:$0xff] }
 0x7a6   : > { %v4005_v62 = vld [vmem:[#allocation2 + $0x116] sm:$0xff] }
 0x7a7   : > { %v4127_v7 = vpack.c.bf16 %v4100_v44, %v4099_v33  ;;  %v3703_v3 = vadd.f32 %v3650_v60, %v3559_v2  ;;  %v3163_v60 = vadd.f32 %v10416_v28, %v3019_v23  ;;  %v10419_v44 = vld [vmem:[#allocation188_spill] sm:$0xff] }
 0x7a8   : > { %v3308_v33 = vadd.f32 %v10419_v44, %v3164_v49  ;;  %v3465_v23 = vld [vmem:[#allocation2 + $0x113] sm:$0xff]  ;;  %v10424_v44 = vld [vmem:[#allocation103_spill] sm:$0xff] }
 0x7a9   : > { %4249 = vmatmul.bf16.gmra.mxu2 %v4127_v7  ;;  %v3021_v28 = vld [vmem:[#allocation2 + $0xb0] sm:$0xff] }
 0x7aa   : > { %3385 = vrot.lane.b32.xlu1 %v5422_v16, %s5449_s23  ;;  %3517 = vrot.lane.b32.xlu0 %v3457_v15, %s5439_s18  ;;  %v10421_v16 = vld [vmem:[#allocation112_spill] sm:$0xff] }
 0x7ab   : > { %4069 = vrot.lane.b32.xlu2 %v4004_v37, %s5440_s24  ;;  %v3418_v15 = vadd.f32 %v10421_v16, %v3308_v33  ;;  %v3028_v16 = vld [vmem:[#allocation2 + $0xe8] sm:$0xff] }
 0x7ac   : > { %v3508_v31 = vpop.permute.xlu1 %3507  ;;  %v3652_v43 = vpop.permute.xlu0 %3651 }
 0x7ad   : > { %v4048_v51 = vpop.permute.xlu2 %4047  ;;  %v3560_v61 = vadd.f32 %v3508_v31, %v3416_v17  ;;  %v8741_v31 = vld [vmem:[#allocation2 + $0x11c] sm:$0xff] }
 0x7af   : > { %v3704_v34 = vadd.f32 %v3652_v43, %v3560_v61 }
 0x7b1   : > { %v3814_v8 = vadd.f32 %v3762_v29, %v3704_v34 }
 0x7b2   : > { %3519 = vrot.lane.b32.xlu1 %v3458_v25, %s5439_s18  ;;  %3531 = vrot.lane.b32.xlu0 %v3464_v50, %s5439_s18 }
 0x7b3   : > { %3387 = vrot.lane.b32.xlu2 %v5423_v54, %s5449_s23 }
 0x7b4   : > { %v3760_v22 = vpop.permute.xlu1 %3759  ;;  %v3904_v9 = vpop.permute.xlu0 %3903 }
 0x7b5   : > { %v3512_v48 = vpop.permute.xlu2 %3511  ;;  %v3813_v38 = vadd.f32 %v3760_v22, %v3703_v3  ;;  %v4006_v3 = vld [vmem:[#allocation2 + $0x11e] sm:$0xff] }
 0x7b6   : > { %v3562_v46 = vadd.f32 %v3512_v48, %v3418_v15  ;;  %v5424_v48 = vld [vmem:[#allocation2 + $0xea] sm:$0xff]  ;;  %v10427_v15 = vld [vmem:[#allocation117_spill] sm:$0xff] }
 0x7b7   : > { %v3957_v36 = vadd.f32 %v3904_v9, %v3813_v38  ;;  %v4000_v9 = vld [vmem:[#allocation2 + $0xee] sm:$0xff] }
 0x7b9   : > { %v4101_v5 = vadd.f32 %v4048_v51, %v3957_v36  ;;  %v5425_v36 = vld [vmem:[#allocation2 + $0x112] sm:$0xff] }
 0x7ba   : > { %3661 = vrot.lane.b32.xlu1 %v8663_v39, %s5450_s17  ;;  %3673 = vrot.lane.b32.xlu0 %v8682_v19, %s5450_s17 }
 0x7bb   : > { %3529 = vrot.lane.b32.xlu2 %v3463_v20, %s5439_s18 }
 0x7bc   : > { %v3906_v53 = vpop.permute.xlu1 %3905  ;;  %v4050_v42 = vpop.permute.xlu0 %4049 }
 0x7bd   : > { %v3958_v27 = vadd.f32 %v3906_v53, %v3814_v8  ;;  %v3764_v56 = vpop.permute.xlu2 %3763  ;;  %v3459_v8 = vld [vmem:[#allocation2 + $0xe3] sm:$0xff] }
 0x7be   : > { %v5426_v53 = vld [vmem:[#allocation2 + $0xe2] sm:$0xff] }
 0x7bf   : > { %v4102_v40 = vadd.f32 %v4050_v42, %v3958_v27 }
 0x7c1   : > { %v4128_v57 = vpack.c.bf16 %v4102_v40, %v4101_v5  ;;  %v3460_v5 = vld [vmem:[#allocation2 + $0xeb] sm:$0xff]  ;;  %v3466_v40 = vld [vmem:[#allocation2 + $0x11b] sm:$0xff] }
 0x7c2   : > { %3675 = vrot.lane.b32.xlu1 %v8672_v18, %s5450_s17  ;;  %3773 = vrot.lane.b32.xlu0 %v8717_v58, %s5441_s25  ;;  %v3855_v18 = vld [vmem:[#allocation2 + $0xe5] sm:$0xff] }
 0x7c3   : > { %3663 = vrot.lane.b32.xlu2 %v8668_v21, %s5450_s17  ;;  %4254 = vmatmul.bf16.gmra.mxu2 %v4128_v57  ;;  %v3307_v21 = vadd.f32 %v10418_v52, %v3163_v60  ;;  %v5427_v57 = vld [vmem:[#allocation2 + $0x11a] sm:$0xff] }
 0x7c4   : > { %v3510_v39 = vpop.permute.xlu1 %3509  ;;  %v3654_v19 = vpop.permute.xlu0 %3653  ;;  %v10422_v60 = vld [vmem:[#allocation158_spill] sm:$0xff] }
 0x7c5   : > { %v3910_v13 = vpop.permute.xlu2 %3909  ;;  %v3417_v29 = vadd.f32 %v10420_v11, %v3307_v21  ;;  %v3165_v32 = vadd.f32 %v10422_v60, %v3021_v28  ;;  %v10423_v21 = vld [vmem:[#allocation77_spill] sm:$0xff]  ;;  %v10425_v11 = vld [vmem:[#allocation106_spill] sm:$0xff] }
 0x7c7   : > { %v3561_v37 = vadd.f32 %v3510_v39, %v3417_v29  ;;  %v3309_v33 = vadd.f32 %v10424_v44, %v3165_v32  ;;  %v4007_v32 = vld [vmem:[#allocation2 + $0x126] sm:$0xff]  ;;  %v4002_v44 = vld [vmem:[#allocation2 + $0xfe] sm:$0xff] }
 0x7c9   : > { %v3705_v10 = vadd.f32 %v3654_v19, %v3561_v37 }
 0x7ca   : > { %3783 = vrot.lane.b32.xlu1 %v8724_v0, %s5441_s25  ;;  %3915 = vrot.lane.b32.xlu0 %v3855_v18, %s5451_s26 }
 0x7cb   : > { %3771 = vrot.lane.b32.xlu2 %v8728_v30, %s5441_s25  ;;  %v3815_v63 = vadd.f32 %v3764_v56, %v3705_v10 }
 0x7cc   : > { %v3656_v26 = vpop.permute.xlu1 %3655  ;;  %v3766_v7 = vpop.permute.xlu0 %3765 }
 0x7cd   : > { %v8737_v4 = vpop.permute.xlu2 %3381  ;;  %v3706_v14 = vadd.f32 %v3656_v26, %v3562_v46  ;;  %v3166_v26 = vadd.f32 %v10423_v21, %v3022_v59  ;;  %v10428_v46 = vld [vmem:[#allocation88_spill] sm:$0xff] }
 0x7ce   : > { %v4008_v21 = vld [vmem:[#allocation2 + $0x12e] sm:$0xff] }
 0x7cf   : > { %v3816_v51 = vadd.f32 %v3766_v7, %v3706_v14  ;;  %v3310_v29 = vadd.f32 %v10425_v11, %v3166_v26  ;;  %v3324_v26 = vld [vmem:[#allocation2 + $0x12a] sm:$0xff] }
 0x7d1   : > { %v3960_v17 = vadd.f32 %v3910_v13, %v3816_v51  ;;  %v3420_v37 = vadd.f32 %v10427_v15, %v3310_v29  ;;  %v10430_v51 = vld [vmem:[#allocation95_spill] sm:$0xff] }
 0x7d2   : > { %3917 = vrot.lane.b32.xlu1 %v3856_v12, %s5451_s26  ;;  %3929 = vrot.lane.b32.xlu0 %v3862_v45, %s5451_s26  ;;  %v3172_v12 = vadd.f32 %v10428_v46, %v3028_v16  ;;  %v3027_v45 = vld [vmem:[#allocation2 + $0xe0] sm:$0xff] }
 0x7d3   : > { %3785 = vrot.lane.b32.xlu2 %v8741_v31, %s5441_s25  ;;  %v3323_v16 = vld [vmem:[#allocation2 + $0x122] sm:$0xff] }
 0x7d4   : > { %v3908_v35 = vpop.permute.xlu1 %3907  ;;  %v4052_v41 = vpop.permute.xlu0 %4051 }
 0x7d5   : > { %v8746_v43 = vpop.permute.xlu2 %3515  ;;  %v3959_v47 = vadd.f32 %v3908_v35, %v3815_v63  ;;  %v10429_v35 = vld [vmem:[#allocation83_spill] sm:$0xff]  ;;  %v3316_v63 = vadd.f32 %v10430_v51, %v3172_v12 }
 0x7d6   : > { %v3564_v10 = vadd.f32 %v8746_v43, %v3420_v37  ;;  %v3857_v43 = vld [vmem:[#allocation2 + $0xf5] sm:$0xff] }
 0x7d7   : > { %v4103_v25 = vadd.f32 %v4052_v41, %v3959_v47  ;;  %v3171_v41 = vadd.f32 %v10429_v35, %v3027_v45  ;;  %v3865_v37 = vld [vmem:[#allocation2 + $0x135] sm:$0xff]  ;;  %v4010_v35 = vld [vmem:[#allocation2 + $0x13e] sm:$0xff] }
 0x7da   : > { %4059 = vrot.lane.b32.xlu1 %v3999_v1, %s5440_s24  ;;  %4071 = vrot.lane.b32.xlu0 %v4005_v62, %s5440_s24 }
 0x7db   : > { %3927 = vrot.lane.b32.xlu2 %v3861_v55, %s5451_s26  ;;  %v10431_v55 = vld [vmem:[#allocation189_spill] sm:$0xff] }
 0x7dc   : > { %v4054_v2 = vpop.permute.xlu1 %4053  ;;  %v3384_v61 = vpop.permute.xlu0 %3383 }
 0x7dd   : > { %v4104_v50 = vadd.f32 %v4054_v2, %v3960_v17  ;;  %v3658_v54 = vpop.permute.xlu2 %3657  ;;  %v3315_v17 = vadd.f32 %v10431_v55, %v3171_v41  ;;  %v3426_v2 = vadd.f32 %v3384_v61, %v3316_v63  ;;  %v3721_v63 = vld [vmem:[#allocation2 + $0x134] sm:$0xff] }
 0x7df   : > { %v4129_v22 = vpack.c.bf16 %v4104_v50, %v4103_v25  ;;  %v3425_v50 = vadd.f32 %v8737_v4, %v3315_v17  ;;  %v3024_v17 = vld [vmem:[#allocation2 + $0xc8] sm:$0xff] }
 0x7e1   : > { %4259 = vmatmul.bf16.gmra.mxu2 %v4129_v22  ;;  %v3611_v22 = vld [vmem:[#allocation2 + $0x124] sm:$0xff] }
 0x7e2   : > { %4073 = vrot.lane.b32.xlu1 %v4006_v3, %s5440_s24  ;;  %3379 = vrot.lane.b32.xlu0 %v5424_v48, %s5449_s23 }
 0x7e3   : > { %4061 = vrot.lane.b32.xlu2 %v4000_v9, %s5440_s24 }
 0x7e4   : > { %v3514_v34 = vpop.permute.xlu1 %3513  ;;  %v3526_v38 = vpop.permute.xlu0 %3525 }
 0x7e5   : > { %v8754_v20 = vpop.permute.xlu2 %3671  ;;  %v3569_v9 = vadd.f32 %v3526_v38, %v3425_v50 }
 0x7ea   : > { %3389 = vrot.lane.b32.xlu1 %v5425_v36, %s5449_s23  ;;  %3521 = vrot.lane.b32.xlu0 %v3459_v8, %s5439_s18 }
 0x7eb   : > { %3377 = vrot.lane.b32.xlu2 %v5426_v53, %s5449_s23 }
 0x7ec   : > { %v3528_v27 = vpop.permute.xlu1 %3527  ;;  %v3660_v42 = vpop.permute.xlu0 %3659 }
 0x7ed   : > { %v8759_v56 = vpop.permute.xlu2 %3779  ;;  %v3708_v62 = vadd.f32 %v3660_v42, %v3564_v10  ;;  %v3468_v10 = vld [vmem:[#allocation2 + $0x12b] sm:$0xff] }
 0x7f2   : > { %3523 = vrot.lane.b32.xlu1 %v3460_v5, %s5439_s18  ;;  %3535 = vrot.lane.b32.xlu0 %v3466_v40, %s5439_s18  ;;  %v3858_v40 = vld [vmem:[#allocation2 + $0xfd] sm:$0xff] }
 0x7f3   : > { %3391 = vrot.lane.b32.xlu2 %v5427_v57, %s5449_s23  ;;  %v3612_v57 = vld [vmem:[#allocation2 + $0x12c] sm:$0xff] }
 0x7f4   : > { %v3670_v39 = vpop.permute.xlu1 %3669  ;;  %v3768_v19 = vpop.permute.xlu0 %3767 }
 0x7f5   : > { %v3914_v13 = vpop.permute.xlu2 %3913 }
 0x7fa   : > { %3665 = vrot.lane.b32.xlu1 %v8728_v30, %s5450_s17  ;;  %3677 = vrot.lane.b32.xlu0 %v8724_v0, %s5450_s17  ;;  %v10426_v30 = vld [vmem:[#allocation113_spill] sm:$0xff] }
 0x7fb   : > { %3533 = vrot.lane.b32.xlu2 %v3465_v23, %s5439_s18  ;;  %v3419_v7 = vadd.f32 %v10426_v30, %v3309_v33  ;;  %v3467_v30 = vld [vmem:[#allocation2 + $0x123] sm:$0xff] }
 0x7fc   : > { %v3770_v18 = vpop.permute.xlu1 %3769  ;;  %v3782_v49 = vpop.permute.xlu0 %3781 }
 0x7fd   : > { %v4056_v52 = vpop.permute.xlu2 %4055  ;;  %v3563_v0 = vadd.f32 %v3514_v34, %v3419_v7  ;;  %v3713_v34 = vadd.f32 %v3670_v39, %v3569_v9  ;;  %v8808_v7 = vpop.f32.mrf.mxu2 }
 0x7ff   : > { %v3823_v5 = vadd.f32 %v8759_v56, %v3713_v34  ;;  %v4001_v56 = vld [vmem:[#allocation2 + $0xf6] sm:$0xff] }
 0x800   : > { %v10435_v34 = vld [vmem:[#allocation97_spill] sm:$0xff] }
 0x802   : > { %3679 = vrot.lane.b32.xlu1 %v8741_v31, %s5450_s17  ;;  %3777 = vrot.lane.b32.xlu0 %v8674_v24, %s5441_s25  ;;  %v3707_v31 = vadd.f32 %v3658_v54, %v3563_v0  ;;  %v3818_v24 = vadd.f32 %v3770_v18, %v3708_v62  ;;  %v3863_v18 = vld [vmem:[#allocation2 + $0x125] sm:$0xff]  ;;  %v3866_v0 = vld [vmem:[#allocation2 + $0x13d] sm:$0xff] }
 0x803   : > { %3667 = vrot.lane.b32.xlu2 %v8717_v58, %s5450_s17  ;;  %v3570_v58 = vadd.f32 %v3528_v27, %v3426_v2  ;;  %v5386_v45 = vpack.i.bf16 %v3866_v0, %v3865_v37  ;;  %v10432_v2 = vld [vmem:[#allocation187_spill] sm:$0xff] }
 0x804   : > { %v3912_v14 = vpop.permute.xlu1 %3911  ;;  %v3924_v47 = vpop.permute.xlu0 %3923  ;;  %v3817_v25 = vadd.f32 %v3768_v19, %v3707_v31  ;;  %v3962_v48 = vadd.f32 %v3914_v13, %v3818_v24  ;;  %v3023_v24 = vld [vmem:[#allocation2 + $0xc0] sm:$0xff] }
 0x805   : > { %v4070_v1 = vpop.permute.xlu2 %4069  ;;  %v3714_v61 = vadd.f32 %v8754_v20, %v3570_v58  ;;  %v3967_v19 = vadd.f32 %v3924_v47, %v3823_v5  ;;  %v8816_v41 = vpop.f32.mrf.mxu2  ;;  %v3722_v47 = vld [vmem:[#allocation2 + $0x13c] sm:$0xff]  ;;  %v10437_v5 = vld [vmem:[#allocation92_spill] sm:$0xff] }
 0x806   : > { %v3961_v3 = vadd.f32 %v3912_v14, %v3817_v25  ;;  %v4009_v14 = vld [vmem:[#allocation2 + $0x136] sm:$0xff]  ;;  %v5381_v55 = vpack.i.bf16 %v3722_v47, %v3721_v63  ;;  %v3168_v25 = vadd.f32 %v10432_v2, %v3024_v17 }
 0x807   : > { %v3824_v27 = vadd.f32 %v3782_v49, %v3714_v61  ;;  %v5391_v31 = vpack.i.bf16 %v4010_v35, %v4009_v14 }
 0x808   : > { %v4105_v4 = vadd.f32 %v4056_v52, %v3961_v3 }
 0x80a   : > { %3787 = vrot.lane.b32.xlu1 %v3611_v22, %s5441_s25  ;;  %3919 = vrot.lane.b32.xlu0 %v3857_v43, %s5451_s26  ;;  %v10434_v43 = vld [vmem:[#allocation108_spill] sm:$0xff] }
 0x80b   : > { %3775 = vrot.lane.b32.xlu2 %v8659_v6, %s5441_s25  ;;  %v3864_v6 = vld [vmem:[#allocation2 + $0x12d] sm:$0xff]  ;;  %v3312_v9 = vadd.f32 %v10434_v43, %v3168_v25 }
 0x80c   : > { %v3926_v54 = vpop.permute.xlu1 %3925  ;;  %v4058_v36 = vpop.permute.xlu0 %4057 }
 0x80d   : > { %v8792_v8 = vpop.permute.xlu2 %3387  ;;  %v4106_v53 = vadd.f32 %v4058_v36, %v3962_v48  ;;  %v3968_v38 = vadd.f32 %v3926_v54, %v3824_v27  ;;  %v8821_v50 = vpop.f32.mrf.mxu2 }
 0x80f   : > { %v4130_v42 = vpack.c.bf16 %v4106_v53, %v4105_v4  ;;  %v4112_v39 = vadd.f32 %v4070_v1, %v3968_v38  ;;  %v10436_v4 = vld [vmem:[#allocation111_spill] sm:$0xff] }
 0x811   : > { %4264 = vmatmul.bf16.gmra.mxu2 %v4130_v42  ;;  %v3029_v42 = vld [vmem:[#allocation2 + $0xf0] sm:$0xff] }
 0x812   : > { %3921 = vrot.lane.b32.xlu1 %v3858_v40, %s5451_s26  ;;  %3933 = vrot.lane.b32.xlu0 %v3864_v6, %s5451_s26  ;;  %v3173_v38 = vadd.f32 %v10437_v5, %v3029_v42  ;;  %v3030_v6 = vld [vmem:[#allocation2 + $0xf8] sm:$0xff]  ;;  %v3025_v5 = vld [vmem:[#allocation2 + $0xd0] sm:$0xff] }
 0x813   : > { %3789 = vrot.lane.b32.xlu2 %v3612_v57, %s5441_s25 }
 0x814   : > { %v4068_v20 = vpop.permute.xlu1 %4067  ;;  %v3376_v23 = vpop.permute.xlu0 %3375 }
 0x815   : > { %v4111_v13 = vadd.f32 %v4068_v20, %v3967_v19  ;;  %v8798_v28 = vpop.permute.xlu2 %3529  ;;  %v3422_v36 = vadd.f32 %v3376_v23, %v3312_v9  ;;  %v10438_v19 = vld [vmem:[#allocation89_spill] sm:$0xff]  ;;  %v10440_v23 = vld [vmem:[#allocation102_spill] sm:$0xff] }
 0x816   : > { %v3174_v20 = vadd.f32 %v10438_v19, %v3030_v6  ;;  %v10442_v6 = vld [vmem:[#allocation94_spill] sm:$0xff]  ;;  %v10443_v19 = vld [vmem:[#allocation105_spill] sm:$0xff] }
 0x817   : > { %v4133_v60 = vpack.c.bf16 %v4112_v39, %v4111_v13  ;;  %v10439_v39 = vld [vmem:[#allocation168_spill] sm:$0xff] }
 0x818   : > { %v3317_v13 = vadd.f32 %v10439_v39, %v3173_v38 }
 0x819   : > { %4279 = vmatmul.bf16.vlgmr.msra.gmra.mxu3 %v4133_v60 }
 0x81a   : > { %4063 = vrot.lane.b32.xlu1 %v4001_v56, %s5440_s24  ;;  %4075 = vrot.lane.b32.xlu0 %v4007_v32, %s5440_s24 }
 0x81b   : > { %3931 = vrot.lane.b32.xlu2 %v3863_v18, %s5451_s26 }
 0x81c   : > { %v8803_v59 = vpop.permute.xlu1 %3385  ;;  %v3518_v49 = vpop.permute.xlu0 %3517 }
 0x81d   : > { %v3664_v52 = vpop.permute.xlu2 %3663 }
 0x822   : > { %4077 = vrot.lane.b32.xlu1 %v4008_v21, %s5440_s24  ;;  %3395 = vrot.lane.b32.xlu0 %v3324_v26, %s5449_s23  ;;  %v8830_v21 = vpop.f32.mrf.mxu2  ;;  %v3318_v26 = vadd.f32 %v10440_v23, %v3174_v20 }
 0x823   : > { %4065 = vrot.lane.b32.xlu2 %v4002_v44, %s5440_s24  ;;  %v3427_v44 = vadd.f32 %v8803_v59, %v3317_v13 }
 0x824   : > { %v3520_v33 = vpop.permute.xlu1 %3519  ;;  %v3532_v11 = vpop.permute.xlu0 %3531 }
 0x825   : > { %v3772_v29 = vpop.permute.xlu2 %3771  ;;  %v3566_v27 = vadd.f32 %v3520_v33, %v3422_v36  ;;  %v3571_v0 = vadd.f32 %v8798_v28, %v3427_v44  ;;  %v3031_v44 = vld [vmem:[#allocation2 + $0x100] sm:$0xff] }
 0x827   : > { %v3710_v56 = vadd.f32 %v3664_v52, %v3566_v27  ;;  %v10441_v27 = vld [vmem:[#allocation74_spill] sm:$0xff] }
 0x82a   : > { %3537 = vrot.lane.b32.xlu1 %v3467_v30, %s5439_s18  ;;  %3681 = vrot.lane.b32.xlu0 %v3611_v22, %s5450_s17  ;;  %v10433_v22 = vld [vmem:[#allocation191_spill] sm:$0xff]  ;;  %v3428_v30 = vadd.f32 %v8792_v8, %v3318_v26 }
 0x82b   : > { %3393 = vrot.lane.b32.xlu2 %v3323_v16, %s5449_s23  ;;  %v3167_v3 = vadd.f32 %v10433_v22, %v3023_v24 }
 0x82c   : > { %v3662_v15 = vpop.permute.xlu1 %3661  ;;  %v3674_v46 = vpop.permute.xlu0 %3673  ;;  %v3572_v37 = vadd.f32 %v3532_v11, %v3428_v30 }
 0x82d   : > { %v3786_v12 = vpop.permute.xlu2 %3785  ;;  %v3311_v61 = vadd.f32 %v10435_v34, %v3167_v3 }
 0x82f   : > { %v3421_v53 = vadd.f32 %v10436_v4, %v3311_v61 }
 0x831   : > { %v3565_v40 = vadd.f32 %v3518_v49, %v3421_v53  ;;  %v3026_v53 = vld [vmem:[#allocation2 + $0xd8] sm:$0xff] }
 0x832   : > { %3683 = vrot.lane.b32.xlu1 %v3612_v57, %s5450_s17  ;;  %5387 = vrot.lane.b32.xlu0 %v5386_v45, %s5451_s26  ;;  %v3170_v42 = vadd.f32 %v10441_v27, %v3026_v53  ;;  %s5141_s17 = smul.u32 288, %s10625_s14 }
 0x833   : > { %3539 = vrot.lane.b32.xlu2 %v3468_v10, %s5439_s18  ;;  %v3709_v60 = vadd.f32 %v3662_v15, %v3565_v40  ;;  %v3715_v15 = vadd.f32 %v3674_v46, %v3571_v0 }
 0x834   : > { %v3676_v51 = vpop.permute.xlu1 %3675  ;;  %v3774_v1 = vpop.permute.xlu0 %3773  ;;  %v3314_v20 = vadd.f32 %v10443_v19, %v3170_v42  ;;  %s9346_s16 = scalar_lea.vmem %s9545_s10, %s5141_s17 }
 0x835   : > { %v3928_v62 = vpop.permute.xlu2 %3927  ;;  %v3820_v33 = vadd.f32 %v3774_v1, %v3710_v56  ;;  %v3819_v49 = vadd.f32 %v3772_v29, %v3709_v60  ;;  %v3716_v52 = vadd.f32 %v3676_v51, %v3572_v37  ;;  %v10444_v60 = vld [vmem:[#allocation170_spill] sm:$0xff] }
 0x837   : > { %v3826_v1 = vadd.f32 %v3786_v12, %v3716_v52 }
 0x83a   : > { %5392 = vrot.lane.b32.xlu1 %v5391_v31, %s5440_s24  ;;  %v8836_v31 = vpop.f32.mrf.mxu2 }
 0x83b   : > { %5382 = vrot.lane.b32.xlu2 %v5381_v55, %s5441_s25 }
 0x83c   : > { %v3784_v58 = vpop.permute.xlu1 %3783  ;;  %v3916_v54 = vpop.permute.xlu0 %3915 }
 0x83d   : > { %v4062_v48 = vpop.permute.xlu2 %4061  ;;  %v3963_v45 = vadd.f32 %v3916_v54, %v3819_v49  ;;  %v3825_v55 = vadd.f32 %v3784_v58, %v3715_v15  ;;  %v10447_v15 = vld [vmem:[#allocation109_spill] sm:$0xff] }
 0x83f   : > { %v3969_v29 = vadd.f32 %v3928_v62, %v3825_v55  ;;  %v10448_v55 = vld [vmem:[#allocation100_spill] sm:$0xff] }
 0x842   : > { %v8838_v46 = vpop.f32.mrf.mxu2 }
 0x844   : > { %v3918_v57 = vpop.permute.xlu1 %3917  ;;  %v3930_v32 = vpop.permute.xlu0 %3929 }
 0x845   : > { %v3378_v18 = vpop.permute.xlu2 %3377  ;;  %v3964_v16 = vadd.f32 %v3918_v57, %v3820_v33  ;;  %v3970_v8 = vadd.f32 %v3930_v32, %v3826_v1  ;;  %v3169_v57 = vadd.f32 %v10442_v6, %v3025_v5  ;;  %v10445_v33 = vld [vmem:[#allocation145_spill] sm:$0xff] }
 0x846   : > { %v3175_v30 = vadd.f32 %v10445_v33, %v3031_v44 }
 0x847   : > { %v4108_v14 = vadd.f32 %v4062_v48, %v3964_v16  ;;  %v3313_v56 = vadd.f32 %v10444_v60, %v3169_v57  ;;  %v3032_v16 = vld [vmem:[#allocation2 + $0x108] sm:$0xff] }
 0x848   : > { %v3319_v52 = vadd.f32 %v10447_v15, %v3175_v30 }
 0x849   : > { %v3423_v23 = vadd.f32 %v3378_v18, %v3313_v56  ;;  %v3033_v56 = vld [vmem:[#allocation2 + $0x110] sm:$0xff] }
 0x84a   : > { %v8840_v3 = vpop.f32.mrf.mxu2 }
 0x84c   : > { %v4060_v10 = vpop.permute.xlu1 %4059  ;;  %v4072_v63 = vpop.permute.xlu0 %4071 }
 0x84d   : > { %v4107_v35 = vadd.f32 %v4060_v10, %v3963_v45  ;;  %v3392_v47 = vpop.permute.xlu2 %3391  ;;  %v4113_v11 = vadd.f32 %v4072_v63, %v3969_v29  ;;  %v10446_v45 = vld [vmem:[#allocation150_spill] sm:$0xff] }
 0x84e   : > { %v3176_v10 = vadd.f32 %v10446_v45, %v3032_v16 }
 0x84f   : > { %v4131_v59 = vpack.c.bf16 %v4108_v14, %v4107_v35 }
 0x851   : > { %4269 = vmatmul.bf16.gmra.mxu2 %v4131_v59  ;;  %v3320_v59 = vadd.f32 %v10448_v55, %v3176_v10 }
 0x852   : > { %v8842_v12 = vpop.f32.mrf.mxu2 }
 0x853   : > { %v3430_v29 = vadd.f32 %v3392_v47, %v3320_v59 }
 0x854   : > { %v4074_v17 = vpop.permute.xlu1 %4073  ;;  %v3380_v28 = vpop.permute.xlu0 %3379 }
 0x855   : > { %v4114_v2 = vadd.f32 %v4074_v17, %v3970_v8  ;;  %v3534_v25 = vpop.permute.xlu2 %3533  ;;  %v3424_v32 = vadd.f32 %v3380_v28, %v3314_v20 }
 0x857   : > { %v4134_v24 = vpack.c.bf16 %v4114_v2, %v4113_v11 }
 0x859   : > { %4284 = vmatmul.bf16.gmra.mxu3 %v4134_v24 }
 0x85a   : > { %v8844_v34 = vpop.f32.mrf.mxu2 }
 0x85c   : > { %v3390_v51 = vpop.permute.xlu1 %3389  ;;  %v3522_v22 = vpop.permute.xlu0 %3521 }
 0x85d   : > { %v3668_v43 = vpop.permute.xlu2 %3667  ;;  %v3567_v49 = vadd.f32 %v3522_v22, %v3423_v23  ;;  %v3429_v1 = vadd.f32 %v3390_v51, %v3319_v52  ;;  %v10450_v23 = vld [vmem:[#allocation93_spill] sm:$0xff] }
 0x85f   : > { %v3573_v28 = vadd.f32 %v3534_v25, %v3429_v1 }
 0x862   : > { %v8847_v38 = vpop.f32.mrf.mxu2 }
 0x864   : > { %v3524_v58 = vpop.permute.xlu1 %3523  ;;  %v3536_v9 = vpop.permute.xlu0 %3535 }
 0x865   : > { %v3776_v54 = vpop.permute.xlu2 %3775  ;;  %v3568_v26 = vadd.f32 %v3524_v58, %v3424_v32  ;;  %v3574_v2 = vadd.f32 %v3536_v9, %v3430_v29 }
 0x867   : > { %v3712_v35 = vadd.f32 %v3668_v43, %v3568_v26  ;;  %v10451_v26 = vld [vmem:[#allocation115_spill] sm:$0xff] }
 0x86a   : > { %v8853_v37 = vpop.f32.mrf.mxu2 }
 0x86c   : > { %v3666_v62 = vpop.permute.xlu1 %3665  ;;  %v3678_v48 = vpop.permute.xlu0 %3677 }
 0x86d   : > { %v3790_v61 = vpop.permute.xlu2 %3789  ;;  %v3711_v14 = vadd.f32 %v3666_v62, %v3567_v49  ;;  %v3717_v58 = vadd.f32 %v3678_v48, %v3573_v28 }
 0x86f   : > { %v3821_v17 = vadd.f32 %v3776_v54, %v3711_v14 }
 0x872   : > { %v8858_v62 = vpop.f32.mrf.mxu2 }
 0x874   : > { %v3680_v36 = vpop.permute.xlu1 %3679  ;;  %v3778_v4 = vpop.permute.xlu0 %3777 }
 0x875   : > { %v3932_v13 = vpop.permute.xlu2 %3931  ;;  %v3822_v18 = vadd.f32 %v3778_v4, %v3712_v35  ;;  %v3718_v53 = vadd.f32 %v3680_v36, %v3574_v2  ;;  %v3034_v36 = vld [vmem:[#allocation2 + $0x118] sm:$0xff] }
 0x877   : > { %v3828_v57 = vadd.f32 %v3790_v61, %v3718_v53  ;;  %v3177_v61 = vadd.f32 %v10450_v23, %v3033_v56  ;;  %v4303_v56 = vsel %vm5767_vm2, %v8830_v21, 0.0  ;;  %v4304_v23 = vsel %vm5804_vm5, %v8836_v31, 0.0 }
 0x87a   : > { %v8860_v20 = vpop.f32.mrf.mxu2 }
 0x87c   : > { %v3788_v40 = vpop.permute.xlu1 %3787  ;;  %v3920_v39 = vpop.permute.xlu0 %3919 }
 0x87d   : > { %v4066_v8 = vpop.permute.xlu2 %4065  ;;  %v3965_v24 = vadd.f32 %v3920_v39, %v3821_v17  ;;  %v3827_v43 = vadd.f32 %v3788_v40, %v3717_v58  ;;  %v10449_v39 = vld [vmem:[#allocation87_spill] sm:$0xff] }
 0x87e   : > { %v3178_v60 = vadd.f32 %v10449_v39, %v3034_v36 }
 0x87f   : > { %v3971_v47 = vadd.f32 %v3932_v13, %v3827_v43  ;;  %v10452_v13 = vld [vmem:[#allocation101_spill] sm:$0xff] }
 0x880   : > { %v3322_v44 = vadd.f32 %v10451_v26, %v3178_v60  ;;  %v3321_v30 = vadd.f32 %v10452_v13, %v3177_v61  ;;  %v10458_v26 = vld [vmem:[#allocation13_spill] sm:$0xff]  ;;  %v10459_v13 = vld [vmem:[#allocation14_spill] sm:$0xff] }
 0x882   : > { %v8866_v16 = vpop.f32.mrf.mxu2 }
 0x884   : > { %v3922_v0 = vpop.permute.xlu1 %3921  ;;  %v3934_v63 = vpop.permute.xlu0 %3933 }
 0x885   : > { %v3966_v11 = vadd.f32 %v3922_v0, %v3822_v18  ;;  %v3394_v51 = vpop.permute.xlu2 %3393  ;;  %v3972_v4 = vadd.f32 %v3934_v63, %v3828_v57 }
 0x886   : > { %v3431_v0 = vadd.f32 %v3394_v51, %v3321_v30  ;;  %v4306_v30 = vsel %vm5871_vm15, %v8840_v3, 0.0 }
 0x887   : > { %v4110_v27 = vadd.f32 %v4066_v8, %v3966_v11 }
 0x88a   : > { %v8868_v1 = vpop.f32.mrf.mxu2 }
 0x88c   : > { %v4064_v22 = vpop.permute.xlu1 %4063  ;;  %v4076_v5 = vpop.permute.xlu0 %4075 }
 0x88d   : > { %v4109_v42 = vadd.f32 %v4064_v22, %v3965_v24  ;;  %v4115_v19 = vadd.f32 %v4076_v5, %v3971_v47  ;;  %v3540_v32 = vpop.permute.xlu2 %3539 }
 0x88f   : > { %v4132_v6 = vpack.c.bf16 %v4110_v27, %v4109_v42 }
 0x891   : > { %4274 = vmatmul.bf16.gmra.mxu2 %v4132_v6 }
 0x892   : > { %v8870_v42 = vpop.f32.mrf.mxu2 }
 0x894   : > { %v4078_v54 = vpop.permute.xlu1 %4077  ;;  %v3396_v25 = vpop.permute.xlu0 %3395 }
 0x895   : > { %v4116_v9 = vadd.f32 %v4078_v54, %v3972_v4  ;;  %v3432_v49 = vadd.f32 %v3396_v25, %v3322_v44  ;;  %v5383_v15 = vpop.permute.xlu2 %5382  ;;  %v4301_v54 = vsel %vm5688_vm10, %v8816_v41, 0.0  ;;  %v4305_v44 = vsel %vm5840_vm11, %v8838_v46, 0.0 }
 0x896   : > { %v5385_v14 = vunpack.i.h.bf16 %v5383_v15  ;;  %v5384_v59 = vunpack.i.l.bf16 %v5383_v15 }
 0x897   : > { %v4135_v48 = vpack.c.bf16 %v4116_v9, %v4115_v19  ;;  %v3576_v10 = vadd.f32 %v3540_v32, %v3432_v49  ;;  %v4300_v9 = vsel %vm5658_vm6, %v8808_v7, 0.0 }
 0x898   : > { %v4336_v36 = vadd.f32 %v4301_v54, %v4300_v9 }
 0x899   : > { %4289 = vmatmul.bf16.gmra.mxu3 %v4135_v48  ;;  %v4302_v48 = vsel %vm5727_vm14, %v8821_v50, 0.0 }
 0x89a   : > { %v8872_v5 = vpop.f32.mrf.mxu2  ;;  %v4337_v32 = vadd.f32 %v4336_v36, %v4302_v48  ;;  %v10473_v48 = vld [vmem:[#allocation26_spill] sm:$0xff] }
 0x89c   : > { %v3538_v40 = vpop.permute.xlu1 %3537  ;;  %v3682_v33 = vpop.permute.xlu0 %3681  ;;  %v4338_v61 = vadd.f32 %v4337_v32, %v4303_v56  ;;  %v10475_v32 = vld [vmem:[#allocation27_spill] sm:$0xff] }
 0x89d   : > { %v3575_v45 = vadd.f32 %v3538_v40, %v3431_v0  ;;  %v10457_v40 = vld [vmem:[#allocation11_spill] sm:$0xff]  ;;  %v10460_v0 = vld [vmem:[#allocation16_spill] sm:$0xff] }
 0x89f   : > { %v3719_v55 = vadd.f32 %v3682_v33, %v3575_v45  ;;  %v4339_v33 = vadd.f32 %v4338_v61, %v4304_v23  ;;  %v4307_v45 = vsel %vm5908_vm1, %v8842_v12, 0.0 }
 0x8a1   : > { %v3829_v17 = vadd.f32 %v5384_v59, %v3719_v55  ;;  %v4340_v49 = vadd.f32 %v4339_v33, %v4305_v44  ;;  %v4309_v55 = vsel %vm10299_vm0, %v8847_v38, 0.0  ;;  %v10478_v33 = vld [vmem:[#allocation29_spill] sm:$0xff] }
 0x8a2   : > { %v8874_v43 = vpop.f32.mrf.mxu2 }
 0x8a4   : > { %v3684_v52 = vpop.permute.xlu1 %3683  ;;  %v5388_v63 = vpop.permute.xlu0 %5387 }
 0x8a5   : > { %v3720_v35 = vadd.f32 %v3684_v52, %v3576_v10  ;;  %v5390_v8 = vunpack.i.h.bf16 %v5388_v63  ;;  %v5389_v29 = vunpack.i.l.bf16 %v5388_v63  ;;  %v4341_v10 = vadd.f32 %v4340_v49, %v4306_v30  ;;  %v10461_v52 = vld [vmem:[#allocation18_spill] sm:$0xff]  ;;  %v10462_v63 = vld [vmem:[#allocation19_spill] sm:$0xff] }
 0x8a7   : > { %v3830_v18 = vadd.f32 %v5385_v14, %v3720_v35  ;;  %v3973_v2 = vadd.f32 %v5389_v29, %v3829_v17  ;;  %v4308_v14 = vsel %vm10298_vm8, %v8844_v34, 0.0  ;;  %v4342_v35 = vadd.f32 %v4341_v10, %v4307_v45  ;;  %v8921_v17 = vpop.f32.mrf.mxu3  ;;  %v10481_v10 = vld [vmem:[#allocation30_spill] sm:$0xff] }
 0x8a8   : > { %10465 = vst [vmem:[#allocation116_spill] sm:$0xff] %v8921_v17 }
 0x8a9   : > { %v3974_v28 = vadd.f32 %v5390_v8, %v3830_v18  ;;  %v4343_v59 = vadd.f32 %v4342_v35, %v4308_v14  ;;  %v10463_v18 = vld [vmem:[#allocation20_spill] sm:$0xff] }
 0x8aa   : > { %v8876_v6 = vpop.f32.mrf.mxu2  ;;  %vm10464_vm15 = vnez %v10463_v18 }
 0x8ab   : > { %v4310_v8 = vsel %vm10464_vm15, %v8853_v37, 0.0  ;;  %v4344_v29 = vadd.f32 %v4343_v59, %v4309_v55  ;;  %vm10474_vm15 = vnez %v10473_v48  ;;  %v10483_v55 = vld [vmem:[#allocation32_spill] sm:$0xff] }
 0x8ac   : > { %v5393_v11 = vpop.permute.xlu1 %5392  ;;  %v4314_v36 = vsel %vm10474_vm15, %v8868_v1, 0.0  ;;  %vm10484_vm15 = vnez %v10483_v55 }
 0x8ad   : > { %v5395_v24 = vunpack.i.h.bf16 %v5393_v11  ;;  %v5394_v22 = vunpack.i.l.bf16 %v5393_v11  ;;  %v10466_v11 = vld [vmem:[#allocation21_spill] sm:$0xff]  ;;  %v4318_v59 = vsel %vm10484_vm15, %v8876_v6, 0.0 }
 0x8ae   : > { %vm10467_vm1 = vnez %v10466_v11 }
 0x8af   : > { %v4117_v58 = vadd.f32 %v5394_v22, %v3973_v2  ;;  %v4118_v53 = vadd.f32 %v5395_v24, %v3974_v28  ;;  %v4311_v2 = vsel %vm10467_vm1, %v8858_v62, 0.0  ;;  %v4345_v28 = vadd.f32 %v4344_v29, %v4310_v8  ;;  %v10469_v22 = vld [vmem:[#allocation22_spill] sm:$0xff]  ;;  %v8940_v44 = vpop.f32.mrf.mxu3 }
 0x8b0   : > { %vm10470_vm8 = vnez %v10469_v22  ;;  %vm10476_vm1 = vnez %v10475_v32  ;;  %10477 = vst [vmem:[#allocation143_spill] sm:$0xff] %v8940_v44  ;;  %v10485_v29 = vld [vmem:[#allocation34_spill] sm:$0xff] }
 0x8b1   : > { %v4136_v27 = vpack.c.bf16 %v4118_v53, %v4117_v58  ;;  %v4312_v58 = vsel %vm10470_vm8, %v8860_v20, 0.0  ;;  %v4346_v53 = vadd.f32 %v4345_v28, %v4311_v2  ;;  %v4315_v23 = vsel %vm10476_vm1, %v8870_v42, 0.0 }
 0x8b2   : > { %v8878_v57 = vpop.f32.mrf.mxu2  ;;  %vm10479_vm8 = vnez %v10478_v33  ;;  %vm10486_vm1 = vnez %v10485_v29 }
 0x8b3   : > { %4294 = vmatmul.bf16.gmra.mxu3 %v4136_v27  ;;  %v10471_v27 = vld [vmem:[#allocation24_spill] sm:$0xff]  ;;  %v4347_v9 = vadd.f32 %v4346_v53, %v4312_v58  ;;  %v4316_v30 = vsel %vm10479_vm8, %v8872_v5, 0.0  ;;  %v4319_v2 = vsel %vm10486_vm1, %v8878_v57, 0.0  ;;  %v10488_v53 = vld [vmem:[#allocation37_spill] sm:$0xff] }
 0x8b4   : > { %vm10472_vm0 = vnez %v10471_v27  ;;  %vm10489_vm8 = vnez %v10488_v53  ;;  %v10497_v53 = vld [vmem:[#allocation47_spill] sm:$0xff] }
 0x8b5   : > { %v4313_v54 = vsel %vm10472_vm0, %v8866_v16, 0.0  ;;  %vm10482_vm0 = vnez %v10481_v10 }
 0x8b6   : > { %v4348_v56 = vadd.f32 %v4347_v9, %v4313_v54  ;;  %v4317_v14 = vsel %vm10482_vm0, %v8874_v43, 0.0 }
 0x8b8   : > { %v4349_v61 = vadd.f32 %v4348_v56, %v4314_v36  ;;  %v10491_v56 = vld [vmem:[#allocation39_spill] sm:$0xff] }
 0x8b9   : > { %vm10492_vm0 = vnez %v10491_v56 }
 0x8ba   : > { %v8880_v51 = vpop.f32.mrf.mxu2  ;;  %v4350_v49 = vadd.f32 %v4349_v61, %v4315_v23 }
 0x8bb   : > { %v4320_v54 = vsel %vm10489_vm8, %v8880_v51, 0.0  ;;  %vm10498_vm8 = vnez %v10497_v53 }
 0x8bc   : > { %v4351_v35 = vadd.f32 %v4350_v49, %v4316_v30  ;;  %v10493_v30 = vld [vmem:[#allocation42_spill] sm:$0xff] }
 0x8bd   : > { %vm10494_vm15 = vnez %v10493_v30 }
 0x8be   : > { %v4352_v8 = vadd.f32 %v4351_v35, %v4317_v14  ;;  %v10495_v35 = vld [vmem:[#allocation45_spill] sm:$0xff] }
 0x8bf   : > { %vm10496_vm1 = vnez %v10495_v35 }
 0x8c0   : > { %v4353_v28 = vadd.f32 %v4352_v8, %v4318_v59 }
 0x8c2   : > { %v8882_v4 = vpop.f32.mrf.mxu2  ;;  %v4354_v9 = vadd.f32 %v4353_v28, %v4319_v2 }
 0x8c3   : > { %v4321_v23 = vsel %vm10492_vm0, %v8882_v4, 0.0 }
 0x8c4   : > { %v4355_v61 = vadd.f32 %v4354_v9, %v4320_v54 }
 0x8c6   : > { %v4356_v14 = vadd.f32 %v4355_v61, %v4321_v23  ;;  %v10502_v23 = vld [vmem:[#allocation51_spill] sm:$0xff] }
 0x8ca   : > { %v8893_v39 = vpop.f32.mrf.mxu2 }
 0x8cb   : > { %v4322_v49 = vsel %vm10494_vm15, %v8893_v39, 0.0  ;;  %vm10503_vm15 = vnez %v10502_v23 }
 0x8cc   : > { %v4357_v8 = vadd.f32 %v4356_v14, %v4322_v49  ;;  %v10504_v49 = vld [vmem:[#allocation55_spill] sm:$0xff] }
 0x8d2   : > { %v8910_v15 = vpop.f32.mrf.mxu2 }
 0x8d3   : > { %v4323_v59 = vsel %vm10496_vm1, %v8910_v15, 0.0  ;;  %vm10505_vm1 = vnez %v10504_v49 }
 0x8d4   : > { %v4358_v28 = vadd.f32 %v4357_v8, %v4323_v59 }
 0x8da   : > { %v8926_v24 = vpop.f32.mrf.mxu2 }
 0x8db   : > { %10468 = vst [vmem:[#allocation120_spill] sm:$0xff] %v8926_v24  ;;  %v4324_v2 = vsel %vm10498_vm8, %v8926_v24, 0.0  ;;  %v10507_v24 = vld [vmem:[#allocation4_spill] sm:$0xff] }
 0x8dc   : > { %v8956_v58 = vpop.f32.mrf.mxu3  ;;  %v4359_v9 = vadd.f32 %v4358_v28, %v4324_v2  ;;  %vm10508_vm8 = vnez %v10507_v24  ;;  %v10509_v28 = vld [vmem:[#allocation6_spill] sm:$0xff] }
 0x8dd   : > { %10487 = vst [vmem:[#allocation164_spill] sm:$0xff] %v8956_v58  ;;  %v4328_v56 = vsel %vm10508_vm8, %v8921_v17, 0.0 }
 0x8e2   : > { %v8945_v45 = vpop.f32.mrf.mxu2 }
 0x8e3   : > { %10480 = vst [vmem:[#allocation154_spill] sm:$0xff] %v8945_v45  ;;  %v4325_v54 = vsel %vm10333_vm7, %v8945_v45, 0.0  ;;  %vm10510_vm7 = vnez %v10509_v28 }
 0x8e4   : > { %v8975_v29 = vpop.f32.mrf.mxu3  ;;  %v4360_v35 = vadd.f32 %v4359_v9, %v4325_v54  ;;  %v4329_v45 = vsel %vm10510_vm7, %v8940_v44, 0.0  ;;  %v4330_v9 = vsel %vm10342_vm12, %v8956_v58, 0.0 }
 0x8e5   : > { %10499 = vst [vmem:[#allocation153_spill] sm:$0xff] %v8975_v29 }
 0x914   : > { %v8961_v36 = vpop.f32.mrf.mxu2 }
 0x915   : > { %10490 = vst [vmem:[#allocation173_spill] sm:$0xff] %v8961_v36  ;;  %v4326_v61 = vsel %vm10503_vm15, %v8961_v36, 0.0 }
 0x916   : > { %v4361_v53 = vadd.f32 %v4360_v35, %v4326_v61  ;;  %v4331_v35 = vsel %vm10292_vm3, %v8975_v29, 0.0 }
 0x91c   : > { %v8980_v30 = vpop.f32.mrf.mxu2  ;;  %v8988_v8 = vpop.f32.mrf.mxu3 }
 0x91d   : > { %10501 = vst [vmem:[#allocation160_spill] sm:$0xff] %v8980_v30  ;;  %v4327_v14 = vsel %vm10505_vm1, %v8980_v30, 0.0 }
 0x91e   : > { %v4362_v59 = vadd.f32 %v4361_v53, %v4327_v14  ;;  %10506 = vst [vmem:[#allocation110_spill] sm:$0xff] %v8988_v8 }
 0x920   : > { %v4363_v2 = vadd.f32 %v4362_v59, %v4328_v56  ;;  %v4332_v56 = vsel %vm10345_vm9, %v8988_v8, 0.0 }
 0x922   : > { %v4364_v23 = vadd.f32 %v4363_v2, %v4329_v45 }
 0x924   : > { %v4292_v36 = vpop.f32.mrf.mxu3  ;;  %v4365_v49 = vadd.f32 %v4364_v23, %v4330_v9  ;;  %v10516_v9 = vld [vmem:[#allocation25_spill] sm:$0xff] }
 0x925   : > { %v4333_v45 = vsel %vm10347_vm13, %v4292_v36, 0.0  ;;  %vm10517_vm12 = vnez %v10516_v9 }
 0x926   : > { %v4366_v61 = vadd.f32 %v4365_v49, %v4331_v35 }
 0x928   : > { %v4367_v59 = vadd.f32 %v4366_v61, %v4332_v56  ;;  %v10518_v61 = vld [vmem:[#allocation62_spill] sm:$0xff] }
 0x92a   : > { %v4368_v54 = vadd.f32 %v4367_v59, %v4333_v45 }
 0x936   : > { %v4295_v14 = vpop.f32.mrf.mxu3 }
 0x937   : > { %v4334_v44 = vsel %vm10348_vm4, %v4295_v14, 0.0 }
 0x938   : > { %v4369_v58 = vadd.f32 %v4368_v54, %v4334_v44 }
 0x93e   : > { %v4297_v23 = vpop.f32.mrf.mxu3 }
 0x93f   : > { %v4335_v53 = vsel %vm10517_vm12, %v4297_v23, 0.0 }
 0x940   : > { %v4370_v29 = vadd.f32 %v4369_v58, %v4335_v53 }
 0x942   : > { %v4371_v49 = vrot.slane %v4370_v29, 4 }
 0x944   : > { %v4372_v35 = vadd.f32 %v4371_v49, %v4370_v29 }
 0x946   : > { %v4373_v17 = vrot.slane %v4372_v35, 2 }
 0x948   : > { %v4374_v30 = vadd.f32 %v4373_v17, %v4372_v35 }
 0x94a   : > { %v4375_v24 = vrot.slane %v4374_v30, 1 }
 0x94c   : > { %v4376_v8 = vadd.f32 %v4375_v24, %v4374_v30 }
 0x94e   : > { %v9012_v56 = vmul.f32 %v4376_v8, %v10518_v61 }
 0x950   : > { %v9015_v28 = vsub.f32 %v4292_v36, %v9012_v56  ;;  %v9018_v59 = vsub.f32 %v4295_v14, %v9012_v56  ;;  %v9021_v44 = vsub.f32 %v4297_v23, %v9012_v56  ;;  %v9025_v58 = vsub.f32 %v8808_v7, %v9012_v56 }
 0x951   : > { %v9029_v17 = vsub.f32 %v8816_v41, %v9012_v56  ;;  %v9033_v24 = vsub.f32 %v8821_v50, %v9012_v56  ;;  %v9041_v30 = vsub.f32 %v8830_v21, %v9012_v56  ;;  %v9045_v7 = vsub.f32 %v8836_v31, %v9012_v56 }
 0x952   : > { %10519 = vst [vmem:[#allocation33_spill] sm:$0xff] %v9015_v28  ;;  %v4414_v29 = vmul.f32 %v9025_v58, %v9025_v58  ;;  %v9055_v54 = vsub.f32 %v8838_v46, %v9012_v56  ;;  %v9061_v31 = vsub.f32 %v8840_v3, %v9012_v56  ;;  %v9069_v49 = vsub.f32 %v8842_v12, %v9012_v56 }
 0x953   : > { %10520 = vst [vmem:[#allocation23_spill] sm:$0xff] %v9018_v59  ;;  %v4415_v36 = vmul.f32 %v9029_v17, %v9029_v17  ;;  %v4416_v41 = vmul.f32 %v9033_v24, %v9033_v24  ;;  %v4417_v21 = vmul.f32 %v9041_v30, %v9041_v30  ;;  %v4418_v14 = vmul.f32 %v9045_v7, %v9045_v7 }
 0x954   : > { %10521 = vst [vmem:[#allocation114_spill] sm:$0xff] %v9021_v44  ;;  %v4450_v50 = vsel %vm5658_vm6, %v4414_v29, 0.0  ;;  %v4419_v46 = vmul.f32 %v9055_v54, %v9055_v54  ;;  %v9077_v3 = vsub.f32 %v8844_v34, %v9012_v56  ;;  %v4420_v29 = vmul.f32 %v9061_v31, %v9061_v31 }
 0x955   : > { %v4451_v8 = vsel %vm5688_vm10, %v4415_v36, 0.0  ;;  %v4452_v45 = vsel %vm5727_vm14, %v4416_v41, 0.0  ;;  %v4453_v35 = vsel %vm5767_vm2, %v4417_v21, 0.0  ;;  %v4454_v36 = vsel %vm5804_vm5, %v4418_v14, 0.0 }
 0x956   : > { %v4486_v53 = vadd.f32 %v4451_v8, %v4450_v50  ;;  %v9085_v12 = vsub.f32 %v8847_v38, %v9012_v56  ;;  %v4421_v50 = vmul.f32 %v9069_v49, %v9069_v49  ;;  %v4455_v8 = vsel %vm5840_vm11, %v4419_v46, 0.0 }
 0x957   : > { %v9093_v34 = vsub.f32 %v8853_v37, %v9012_v56  ;;  %vm10522_vm5 = vnez %v10459_v13  ;;  %v9101_v38 = vsub.f32 %v8858_v62, %v9012_v56  ;;  %vm10523_vm11 = vnez %v10460_v0 }
 0x958   : > { %v4487_v23 = vadd.f32 %v4486_v53, %v4452_v45  ;;  %v4422_v53 = vmul.f32 %v9077_v3, %v9077_v3  ;;  %v4456_v14 = vsel %vm10522_vm5, %v4420_v29, 0.0  ;;  %v4457_v46 = vsel %vm10523_vm11, %v4421_v50, 0.0 }
 0x959   : > { %v9109_v37 = vsub.f32 %v8860_v20, %v9012_v56  ;;  %vm10524_vm5 = vnez %v10461_v52  ;;  %v9117_v62 = vsub.f32 %v8866_v16, %v9012_v56  ;;  %vm10525_vm11 = vnez %v10462_v63 }
 0x95a   : > { %v4488_v61 = vadd.f32 %v4487_v23, %v4453_v35  ;;  %v4423_v23 = vmul.f32 %v9085_v12, %v9085_v12  ;;  %v4458_v29 = vsel %vm10524_vm5, %v4422_v53, 0.0  ;;  %v9125_v20 = vsub.f32 %v8868_v1, %v9012_v56 }
 0x95b   : > { %vm10526_vm5 = vnez %v10463_v18  ;;  %v9133_v16 = vsub.f32 %v8870_v42, %v9012_v56  ;;  %v9141_v1 = vsub.f32 %v8872_v5, %v9012_v56  ;;  %v9149_v42 = vsub.f32 %v8874_v43, %v9012_v56 }
 0x95c   : > { %v4489_v41 = vadd.f32 %v4488_v61, %v4454_v36  ;;  %v4424_v61 = vmul.f32 %v9093_v34, %v9093_v34  ;;  %v4459_v50 = vsel %vm10525_vm11, %v4423_v23, 0.0  ;;  %vm10527_vm11 = vnez %v10466_v11 }
 0x95d   : > { %v9157_v5 = vsub.f32 %v8876_v6, %v9012_v56  ;;  %v9165_v43 = vsub.f32 %v8878_v57, %v9012_v56  ;;  %v9173_v6 = vsub.f32 %v8880_v51, %v9012_v56  ;;  %v9181_v57 = vsub.f32 %v8882_v4, %v9012_v56 }
 0x95e   : > { %v4490_v21 = vadd.f32 %v4489_v41, %v4455_v8  ;;  %v4425_v41 = vmul.f32 %v9101_v38, %v9101_v38  ;;  %v4460_v53 = vsel %vm10526_vm5, %v4424_v61, 0.0  ;;  %vm10528_vm5 = vnez %v10469_v22 }
 0x95f   : > { %v9189_v51 = vsub.f32 %v8893_v39, %v9012_v56  ;;  %v9197_v4 = vsub.f32 %v8910_v15, %v9012_v56  ;;  %v10537_v39 = vld [vmem:[#allocation120_spill] sm:$0xff]  ;;  %v10540_v15 = vld [vmem:[#allocation154_spill] sm:$0xff] }
 0x960   : > { %v4491_v45 = vadd.f32 %v4490_v21, %v4456_v14  ;;  %v4426_v21 = vmul.f32 %v9109_v37, %v9109_v37  ;;  %v4461_v23 = vsel %vm10527_vm11, %v4425_v41, 0.0  ;;  %vm10529_vm11 = vnez %v10471_v27 }
 0x962   : > { %v4492_v35 = vadd.f32 %v4491_v45, %v4457_v46  ;;  %v4427_v45 = vmul.f32 %v9117_v62, %v9117_v62  ;;  %v4462_v61 = vsel %vm10528_vm5, %v4426_v21, 0.0  ;;  %vm10530_vm5 = vnez %v10473_v48 }
 0x964   : > { %v4493_v36 = vadd.f32 %v4492_v35, %v4458_v29  ;;  %v4428_v35 = vmul.f32 %v9125_v20, %v9125_v20  ;;  %v4463_v41 = vsel %vm10529_vm11, %v4427_v45, 0.0  ;;  %vm10531_vm11 = vnez %v10475_v32 }
 0x966   : > { %v4494_v8 = vadd.f32 %v4493_v36, %v4459_v50  ;;  %v4429_v36 = vmul.f32 %v9133_v16, %v9133_v16  ;;  %v4464_v21 = vsel %vm10530_vm5, %v4428_v35, 0.0  ;;  %vm10532_vm5 = vnez %v10478_v33 }
 0x968   : > { %v4495_v14 = vadd.f32 %v4494_v8, %v4460_v53  ;;  %v4430_v8 = vmul.f32 %v9141_v1, %v9141_v1  ;;  %v4465_v45 = vsel %vm10531_vm11, %v4429_v36, 0.0  ;;  %vm10533_vm11 = vnez %v10481_v10 }
 0x96a   : > { %v4496_v46 = vadd.f32 %v4495_v14, %v4461_v23  ;;  %v4431_v14 = vmul.f32 %v9149_v42, %v9149_v42  ;;  %v4466_v35 = vsel %vm10532_vm5, %v4430_v8, 0.0  ;;  %vm10534_vm5 = vnez %v10483_v55 }
 0x96c   : > { %v4497_v29 = vadd.f32 %v4496_v46, %v4462_v61  ;;  %v4432_v46 = vmul.f32 %v9157_v5, %v9157_v5  ;;  %v4467_v36 = vsel %vm10533_vm11, %v4431_v14, 0.0  ;;  %v10535_v14 = vld [vmem:[#allocation34_spill] sm:$0xff] }
 0x96d   : > { %vm10536_vm11 = vnez %v10535_v14  ;;  %v4437_v14 = vmul.f32 %v9197_v4, %v9197_v4 }
 0x96e   : > { %v4498_v50 = vadd.f32 %v4497_v29, %v4463_v41  ;;  %v4433_v29 = vmul.f32 %v9165_v43, %v9165_v43  ;;  %v4468_v8 = vsel %vm10534_vm5, %v4432_v46, 0.0  ;;  %v10538_v46 = vld [vmem:[#allocation37_spill] sm:$0xff] }
 0x96f   : > { %vm10539_vm5 = vnez %v10538_v46 }
 0x970   : > { %v4499_v53 = vadd.f32 %v4498_v50, %v4464_v21  ;;  %v4434_v50 = vmul.f32 %v9173_v6, %v9173_v6 }
 0x972   : > { %v4500_v23 = vadd.f32 %v4499_v53, %v4465_v45  ;;  %v4435_v53 = vmul.f32 %v9181_v57, %v9181_v57  ;;  %v4469_v45 = vsel %vm10536_vm11, %v4433_v29, 0.0 }
 0x974   : > { %v4501_v61 = vadd.f32 %v4500_v23, %v4466_v35  ;;  %v9205_v35 = vsub.f32 %v10537_v39, %v9012_v56  ;;  %v10542_v39 = vld [vmem:[#allocation173_spill] sm:$0xff] }
 0x975   : > { %v9221_v55 = vsub.f32 %v10542_v39, %v9012_v56  ;;  %v10550_v39 = vld [vmem:[#allocation116_spill] sm:$0xff] }
 0x976   : > { %v4502_v41 = vadd.f32 %v4501_v61, %v4467_v36  ;;  %v4436_v61 = vmul.f32 %v9189_v51, %v9189_v51  ;;  %v4470_v36 = vsel %vm10539_vm5, %v4434_v50, 0.0  ;;  %v4438_v46 = vmul.f32 %v9205_v35, %v9205_v35  ;;  %v10544_v50 = vld [vmem:[#allocation42_spill] sm:$0xff] }
 0x977   : > { %10543 = vst [vmem:[#allocation123_spill] sm:$0xff] %v9221_v55  ;;  %vm10545_vm5 = vnez %v10544_v50  ;;  %v9237_v33 = vsub.f32 %v10550_v39, %v9012_v56  ;;  %v4440_v50 = vmul.f32 %v9221_v55, %v9221_v55  ;;  %v10558_v39 = vld [vmem:[#allocation164_spill] sm:$0xff] }
 0x978   : > { %v4503_v21 = vadd.f32 %v4502_v41, %v4468_v8  ;;  %v9213_v8 = vsub.f32 %v10540_v15, %v9012_v56  ;;  %v10546_v15 = vld [vmem:[#allocation160_spill] sm:$0xff]  ;;  %v9253_v48 = vsub.f32 %v10558_v39, %v9012_v56  ;;  %v10562_v39 = vld [vmem:[#allocation110_spill] sm:$0xff] }
 0x979   : > { %v9229_v10 = vsub.f32 %v10546_v15, %v9012_v56  ;;  %10551 = vst [vmem:[#allocation121_spill] sm:$0xff] %v9237_v33  ;;  %v10554_v15 = vld [vmem:[#allocation143_spill] sm:$0xff] }
 0x97a   : > { %v4504_v23 = vadd.f32 %v4503_v21, %v4469_v45  ;;  %v4471_v21 = vsel %vm10492_vm0, %v4435_v53, 0.0  ;;  %v4439_v29 = vmul.f32 %v9213_v8, %v9213_v8  ;;  %v10548_v53 = vld [vmem:[#allocation45_spill] sm:$0xff]  ;;  %v9245_v32 = vsub.f32 %v10554_v15, %v9012_v56 }
 0x97b   : > { %10547 = vst [vmem:[#allocation172_spill] sm:$0xff] %v9229_v10  ;;  %vm10549_vm0 = vnez %v10548_v53  ;;  %v4441_v53 = vmul.f32 %v9229_v10, %v9229_v10  ;;  %v10560_v15 = vld [vmem:[#allocation153_spill] sm:$0xff]  ;;  %v9269_v10 = vsub.f32 %v10562_v39, %v9012_v56  ;;  %v4447_v39 = vmul.f32 %v9015_v28, %v9015_v28  ;;  %v10570_v28 = vld [vmem:[#allocation76_spill] sm:$0xff] }
 0x97c   : > { %v4505_v41 = vadd.f32 %v4504_v23, %v4470_v36  ;;  %v4472_v23 = vsel %vm10545_vm5, %v4436_v61, 0.0  ;;  %v10552_v61 = vld [vmem:[#allocation47_spill] sm:$0xff]  ;;  %10555 = vst [vmem:[#allocation129_spill] sm:$0xff] %v9245_v32  ;;  %v9261_v55 = vsub.f32 %v10560_v15, %v9012_v56 }
 0x97d   : > { %vm10553_vm5 = vnez %v10552_v61  ;;  %v4442_v61 = vmul.f32 %v9237_v33, %v9237_v33 }
 0x97e   : > { %v4506_v45 = vadd.f32 %v4505_v41, %v4471_v21  ;;  %v4473_v41 = vsel %vm10549_vm0, %v4437_v14, 0.0  ;;  %v10556_v14 = vld [vmem:[#allocation48_spill] sm:$0xff]  ;;  %v4445_v15 = vmul.f32 %v9261_v55, %v9261_v55 }
 0x97f   : > { %vm10557_vm0 = vnez %v10556_v14  ;;  %v4443_v14 = vmul.f32 %v9245_v32, %v9245_v32 }
 0x980   : > { %v4507_v36 = vadd.f32 %v4506_v45, %v4472_v23  ;;  %v4474_v45 = vsel %vm10553_vm5, %v4438_v46, 0.0  ;;  %v4444_v46 = vmul.f32 %v9253_v48, %v9253_v48 }
 0x981   : > { %v4479_v32 = vsel %vm10510_vm7, %v4443_v14, 0.0 }
 0x982   : > { %v4508_v21 = vadd.f32 %v4507_v36, %v4473_v41  ;;  %v4475_v36 = vsel %vm10557_vm0, %v4439_v29, 0.0 }
 0x984   : > { %v4509_v23 = vadd.f32 %v4508_v21, %v4474_v45  ;;  %v4476_v21 = vsel %vm10503_vm15, %v4440_v50, 0.0 }
 0x986   : > { %v4510_v41 = vadd.f32 %v4509_v23, %v4475_v36  ;;  %v4477_v23 = vsel %vm10505_vm1, %v4441_v53, 0.0  ;;  %v4446_v53 = vmul.f32 %v9269_v10, %v9269_v10 }
 0x988   : > { %v4511_v45 = vadd.f32 %v4510_v41, %v4476_v21  ;;  %v4478_v41 = vsel %vm10508_vm8, %v4442_v61, 0.0  ;;  %v4481_v61 = vsel %vm10292_vm3, %v4445_v15, 0.0 }
 0x98a   : > { %v4512_v36 = vadd.f32 %v4511_v45, %v4477_v23  ;;  %v10565_v45 = vld [vmem:[#allocation8_spill] sm:$0xff] }
 0x98b   : > { %vm10566_vm1 = vnez %v10565_v45 }
 0x98c   : > { %v4513_v21 = vadd.f32 %v4512_v36, %v4478_v41  ;;  %v4480_v56 = vsel %vm10566_vm1, %v4444_v46, 0.0  ;;  %v4448_v41 = vmul.f32 %v9018_v59, %v9018_v59  ;;  %v4483_v46 = vsel %vm10347_vm13, %v4447_v39, 0.0 }
 0x98e   : > { %v4514_v29 = vadd.f32 %v4513_v21, %v4479_v32  ;;  %v4482_v32 = vsel %vm10345_vm9, %v4446_v53, 0.0  ;;  %v4449_v21 = vmul.f32 %v9021_v44, %v9021_v44 }
 0x990   : > { %v4515_v23 = vadd.f32 %v4514_v29, %v4480_v56  ;;  %v4484_v56 = vsel %vm10348_vm4, %v4448_v41, 0.0  ;;  %v4485_v15 = vsel %vm10517_vm12, %v4449_v21, 0.0 }
 0x992   : > { %v4516_v36 = vadd.f32 %v4515_v23, %v4481_v61 }
 0x994   : > { %v4517_v14 = vadd.f32 %v4516_v36, %v4482_v32 }
 0x996   : > { %v4518_v29 = vadd.f32 %v4517_v14, %v4483_v46 }
 0x998   : > { %v4519_v50 = vadd.f32 %v4518_v29, %v4484_v56 }
 0x99a   : > { %v4520_v23 = vadd.f32 %v4519_v50, %v4485_v15 }
 0x99c   : > { %v4521_v61 = vrot.slane %v4520_v23, 4 }
 0x99e   : > { %v4522_v59 = vadd.f32 %v4521_v61, %v4520_v23 }
 0x9a0   : > { %v4523_v33 = vrot.slane %v4522_v59, 2 }
 0x9a2   : > { %v4524_v53 = vadd.f32 %v4523_v33, %v4522_v59 }
 0x9a4   : > { %v4525_v36 = vrot.slane %v4524_v53, 1 }
 0x9a6   : > { %v4526_v32 = vadd.f32 %v4525_v36, %v4524_v53 }
 0x9a8   : > { %v4527_v44 = vmul.f32 %v4526_v32, %v10570_v28 }
 0x9aa   : > { %5409 = vrsqrt.f32 %v4527_v44  ;;  %vm4536_vm4 = vcmp.eq.f32.partialorder %v4527_v44, inf  ;;  %v4539_v56 = vand.u32 2147483648, %v4527_v44  ;;  %vm4538_vm12 = vcmp.eq.f32.partialorder %v4527_v44, 0.0 }
 0x9b0   : > { %v5410_v45 = vpop.eup %5409 }
 0x9b1   : > { %v4530_v39 = vmul.f32 %v5410_v45, %v4527_v44 }
 0x9b3   : > { %v4531_v14 = vmul.f32 %v5410_v45, %v4530_v39 }
 0x9b5   : > { %v4532_v46 = vmul.f32 0.5, %v4531_v14 }
 0x9b7   : > { %v4533_v2 = vsub.f32 1.5, %v4532_v46  ;;  %v9314_v46 = vld [vmem:[%s9544_s9] ss:$0 sm:$0xff] }
 0x9b9   : > { %v4534_v41 = vmul.f32 %v5410_v45, %v4533_v2  ;;  %v4528_v2 = vld [vmem:[%s9543_s8] sm:$0x1] }
 0x9bb   : > { %v4535_v29 = vmul.f32 %v4534_v41, %v4527_v44 }
 0x9bd   : > { %v4537_v21 = vsel %vm4536_vm4, %v4527_v44, %v4535_v29  ;;  %vm10575_vm4 = vnez %v10461_v52 }
 0x9be   : > { %v4540_v50 = vsel %vm4538_vm12, %v4539_v56, %v4537_v21  ;;  %vm10578_vm12 = vnez %v10466_v11 }
 0x9bf   : > { %v4541_v15 = vadd.f32 0.001, %v4540_v50 }
 0x9c1   : > { %5411 = vrsqrt.f32 %v4541_v15  ;;  %vm4548_vm9 = vweird.f32 %v4541_v15 }
 0x9c7   : > { %v5412_v33 = vpop.eup %5411 }
 0x9c8   : > { %v4543_v59 = vmul.f32 %v5412_v33, %v4541_v15  ;;  %vm4549_vm13 = vweird.f32 %v5412_v33 }
 0x9c9   : > { %vm4550_vm3 = vmor %vm4548_vm9, %vm4549_vm13  ;;  %vm10576_vm13 = vnez %v10462_v63  ;;  %vm10579_vm9 = vnez %v10469_v22 }
 0x9ca   : > { %v4544_v23 = vmul.f32 %v5412_v33, %v4543_v59 }
 0x9cc   : > { %v4545_v61 = vmul.f32 0.5, %v4544_v23 }
 0x9ce   : > { %v4546_v28 = vsub.f32 1.5, %v4545_v61 }
 0x9d0   : > { %v4547_v53 = vmul.f32 %v5412_v33, %v4546_v28 }
 0x9d2   : > { %v4551_v45 = vsel %vm4550_vm3, %v5412_v33, %v4547_v53  ;;  %vm10577_vm3 = vnez %v10463_v18 }
 0x9d3   : > { %v4552_v36 = vmul.f32 %v4551_v45, %v4528_v2 }
 0x9d5   : > { %v9303_v44 = vperm.slane %v4552_v36, 0 }
 0x9d7   : > { %v4556_v32 = vmul.f32 %v9303_v44, %v9025_v58  ;;  %v4557_v39 = vmul.f32 %v9303_v44, %v9029_v17  ;;  %v4558_v14 = vmul.f32 %v9303_v44, %v9033_v24  ;;  %v4559_v41 = vmul.f32 %v9303_v44, %v9041_v30 }
 0x9d8   : > { %v4560_v29 = vmul.f32 %v9303_v44, %v9045_v7  ;;  %v4561_v58 = vmul.f32 %v9303_v44, %v9055_v54  ;;  %v4562_v17 = vmul.f32 %v9303_v44, %v9061_v31  ;;  %v4563_v50 = vmul.f32 %v9303_v44, %v9069_v49 }
 0x9d9   : > { %v4596_v56 = vadd.f32 %v9314_v46, %v4556_v32  ;;  %v4597_v24 = vadd.f32 %v9314_v46, %v4557_v39  ;;  %v4598_v21 = vadd.f32 %v9314_v46, %v4558_v14  ;;  %v4599_v30 = vadd.f32 %v9314_v46, %v4559_v41 }
 0x9da   : > { %v4564_v7 = vmul.f32 %v9303_v44, %v9077_v3  ;;  %v4600_v54 = vadd.f32 %v9314_v46, %v4560_v29  ;;  %v4565_v31 = vmul.f32 %v9303_v44, %v9085_v12  ;;  %v4566_v15 = vmul.f32 %v9303_v44, %v9093_v34 }
 0x9db   : > { %v4601_v33 = vadd.f32 %v9314_v46, %v4561_v58  ;;  %v4602_v59 = vadd.f32 %v9314_v46, %v4562_v17  ;;  %v4632_v23 = vmax.f32 %v4596_v56, 0.0  ;;  %v4633_v49 = vmax.f32 %v4597_v24, 0.0 }
 0x9dc   : > { %v4634_v61 = vmax.f32 %v4598_v21, 0.0  ;;  %v4567_v28 = vmul.f32 %v9303_v44, %v9101_v38  ;;  %v4603_v3 = vadd.f32 %v9314_v46, %v4563_v50  ;;  %v4635_v53 = vmax.f32 %v4599_v30, 0.0 }
 0x9dd   : > { %v4568_v12 = vmul.f32 %v9303_v44, %v9109_v37  ;;  %v4569_v34 = vmul.f32 %v9303_v44, %v9117_v62  ;;  %v4604_v2 = vadd.f32 %v9314_v46, %v4564_v7  ;;  %v4636_v45 = vmax.f32 %v4600_v54, 0.0 }
 0x9de   : > { %v4570_v38 = vmul.f32 %v9303_v44, %v9125_v20  ;;  %v4605_v36 = vadd.f32 %v9314_v46, %v4565_v31  ;;  %v4606_v32 = vadd.f32 %v9314_v46, %v4566_v15  ;;  %v4637_v39 = vmax.f32 %v4601_v33, 0.0 }
 0x9df   : > { %v4638_v14 = vmax.f32 %v4602_v59, 0.0  ;;  %v4668_v37 = vsel %vm5658_vm6, %v4632_v23, 0.0  ;;  %v4669_v41 = vsel %vm5688_vm10, %v4633_v49, 0.0  ;;  %v4670_v62 = vsel %vm5727_vm14, %v4634_v61, 0.0 }
 0x9e0   : > { %v4571_v20 = vmul.f32 %v9303_v44, %v9133_v16  ;;  %v4607_v29 = vadd.f32 %v9314_v46, %v4567_v28  ;;  %v4639_v58 = vmax.f32 %v4603_v3, 0.0  ;;  %v4671_v17 = vsel %vm5767_vm2, %v4635_v53, 0.0  ;;  %4704 = vst [vmem:[%s9346_s16] sm:$0xff] %v4668_v37 }
 0x9e1   : > { %v4572_v19 = vmul.f32 %v9303_v44, %v9141_v1  ;;  %v4608_v47 = vadd.f32 %v9314_v46, %v4568_v12  ;;  %v4640_v56 = vmax.f32 %v4604_v2, 0.0  ;;  %vm10571_vm6 = vnez %v10457_v40  ;;  %4705 = vst [vmem:[%s9346_s16 + $0x8] sm:$0xff] %v4669_v41  ;;  %v10587_v41 = vld [vmem:[#allocation121_spill] sm:$0xff] }
 0x9e2   : > { %v4672_v25 = vsel %vm10571_vm6, %v4636_v45, 0.0  ;;  %v4573_v16 = vmul.f32 %v9303_v44, %v9149_v42  ;;  %v4609_v24 = vadd.f32 %v9314_v46, %v4569_v34  ;;  %v4641_v60 = vmax.f32 %v4605_v36, 0.0  ;;  %4706 = vst [vmem:[%s9346_s16 + $0x10] sm:$0xff] %v4670_v62 }
 0x9e3   : > { %vm10572_vm10 = vnez %v10458_v26  ;;  %v4574_v1 = vmul.f32 %v9303_v44, %v9157_v5  ;;  %v4610_v50 = vadd.f32 %v9314_v46, %v4570_v38  ;;  %v4642_v40 = vmax.f32 %v4606_v32, 0.0  ;;  %4707 = vst [vmem:[%s9346_s16 + $0x18] sm:$0xff] %v4671_v17  ;;  %v10582_v38 = vld [vmem:[#allocation26_spill] sm:$0xff] }
 0x9e4   : > { %v4673_v21 = vsel %vm10572_vm10, %v4637_v39, 0.0  ;;  %vm10573_vm14 = vnez %v10459_v13  ;;  %v4575_v42 = vmul.f32 %v9303_v44, %v9165_v43  ;;  %v4611_v7 = vadd.f32 %v9314_v46, %v4571_v20  ;;  %4708 = vst [vmem:[%s9346_s16 + $0x20] sm:$0xff] %v4672_v25 }
 0x9e5   : > { %v4674_v30 = vsel %vm10573_vm14, %v4638_v14, 0.0  ;;  %v4643_v26 = vmax.f32 %v4607_v29, 0.0  ;;  %vm10574_vm2 = vnez %v10460_v0  ;;  %v4576_v5 = vmul.f32 %v9303_v44, %v9173_v6  ;;  %4709 = vst [vmem:[%s9346_s16 + $0x28] sm:$0xff] %v4673_v21  ;;  %v10585_v14 = vld [vmem:[#allocation27_spill] sm:$0xff] }
 0x9e6   : > { %v4675_v54 = vsel %vm10574_vm2, %v4639_v58, 0.0  ;;  %v4612_v31 = vadd.f32 %v9314_v46, %v4572_v19  ;;  %v4644_v13 = vmax.f32 %v4608_v47, 0.0  ;;  %v4676_v15 = vsel %vm10575_vm4, %v4640_v56, 0.0  ;;  %4710 = vst [vmem:[%s9346_s16 + $0x30] sm:$0xff] %v4674_v30  ;;  %v10588_v58 = vld [vmem:[#allocation29_spill] sm:$0xff] }
 0x9e7   : > { %v4577_v43 = vmul.f32 %v9303_v44, %v9181_v57  ;;  %v4613_v33 = vadd.f32 %v9314_v46, %v4573_v16  ;;  %v4645_v0 = vmax.f32 %v4609_v24, 0.0  ;;  %v4677_v59 = vsel %vm10576_vm13, %v4641_v60, 0.0  ;;  %4711 = vst [vmem:[%s9346_s16 + $0x38] sm:$0xff] %v4675_v54  ;;  %v10590_v19 = vld [vmem:[#allocation129_spill] sm:$0xff]  ;;  %v10591_v16 = vld [vmem:[#allocation30_spill] sm:$0xff] }
 0x9e8   : > { %v4578_v6 = vmul.f32 %v9303_v44, %v9189_v51  ;;  %v4614_v23 = vadd.f32 %v9314_v46, %v4574_v1  ;;  %v4646_v52 = vmax.f32 %v4610_v50, 0.0  ;;  %v4678_v49 = vsel %vm10577_vm3, %v4642_v40, 0.0  ;;  %4712 = vst [vmem:[%s9346_s16 + $0x40] sm:$0xff] %v4676_v15  ;;  %v10593_v50 = vld [vmem:[#allocation32_spill] sm:$0xff] }
 0x9e9   : > { %v4579_v57 = vmul.f32 %v9303_v44, %v9197_v4  ;;  %v4615_v61 = vadd.f32 %v9314_v46, %v4575_v42  ;;  %v4647_v63 = vmax.f32 %v4611_v7, 0.0  ;;  %v4679_v28 = vsel %vm10578_vm12, %v4643_v26, 0.0  ;;  %4713 = vst [vmem:[%s9346_s16 + $0x48] sm:$0xff] %v4677_v59  ;;  %v10599_v59 = vld [vmem:[#allocation39_spill] sm:$0xff] }
 0x9ea   : > { %v4580_v51 = vmul.f32 %v9303_v44, %v9205_v35  ;;  %v4616_v3 = vadd.f32 %v9314_v46, %v4576_v5  ;;  %v4648_v18 = vmax.f32 %v4612_v31, 0.0  ;;  %v4680_v53 = vsel %vm10579_vm9, %v4644_v13, 0.0  ;;  %4714 = vst [vmem:[%s9346_s16 + $0x50] sm:$0xff] %v4678_v49  ;;  %v10581_v35 = vld [vmem:[#allocation123_spill] sm:$0xff]  ;;  %v10596_v13 = vld [vmem:[#allocation37_spill] sm:$0xff] }
 0x9eb   : > { %v4581_v4 = vmul.f32 %v9303_v44, %v9213_v8  ;;  %v4617_v12 = vadd.f32 %v9314_v46, %v4577_v43  ;;  %v4649_v11 = vmax.f32 %v4613_v33, 0.0  ;;  %vm10580_vm6 = vnez %v10471_v27  ;;  %4715 = vst [vmem:[%s9346_s16 + $0x58] sm:$0xff] %v4679_v28  ;;  %v10584_v8 = vld [vmem:[#allocation172_spill] sm:$0xff] }
 0x9ec   : > { %v4681_v34 = vsel %vm10580_vm6, %v4645_v0, 0.0  ;;  %v4582_v2 = vmul.f32 %v9303_v44, %v10581_v35  ;;  %v4618_v45 = vadd.f32 %v9314_v46, %v4578_v6  ;;  %v4650_v22 = vmax.f32 %v4614_v23, 0.0  ;;  %4716 = vst [vmem:[%s9346_s16 + $0x60] sm:$0xff] %v4680_v53 }
 0x9ed   : > { %vm10583_vm10 = vnez %v10582_v38  ;;  %v4583_v32 = vmul.f32 %v9303_v44, %v10584_v8  ;;  %v4619_v39 = vadd.f32 %v9314_v46, %v4579_v57  ;;  %v4651_v27 = vmax.f32 %v4615_v61, 0.0  ;;  %4717 = vst [vmem:[%s9346_s16 + $0x68] sm:$0xff] %v4681_v34  ;;  %v10602_v57 = vld [vmem:[#allocation42_spill] sm:$0xff] }
 0x9ee   : > { %v4682_v36 = vsel %vm10583_vm10, %v4646_v52, 0.0  ;;  %vm10586_vm14 = vnez %v10585_v14  ;;  %v4584_v62 = vmul.f32 %v9303_v44, %v10587_v41  ;;  %v4620_v20 = vadd.f32 %v9314_v46, %v4580_v51 }
 0x9ef   : > { %v4683_v37 = vsel %vm10586_vm14, %v4647_v63, 0.0  ;;  %v4652_v29 = vmax.f32 %v4616_v3, 0.0  ;;  %vm10589_vm2 = vnez %v10588_v58  ;;  %v4585_v47 = vmul.f32 %v9303_v44, %v10590_v19  ;;  %4718 = vst [vmem:[%s9346_s16 + $0x70] sm:$0xff] %v4682_v36  ;;  %v10604_v63 = vld [vmem:[#allocation114_spill] sm:$0xff] }
 0x9f0   : > { %v4684_v17 = vsel %vm10589_vm2, %v4648_v18, 0.0  ;;  %v4621_v56 = vadd.f32 %v9314_v46, %v4581_v4  ;;  %v4653_v25 = vmax.f32 %v4617_v12, 0.0  ;;  %vm10592_vm4 = vnez %v10591_v16  ;;  %4719 = vst [vmem:[%s9346_s16 + $0x78] sm:$0xff] %v4683_v37  ;;  %v10605_v18 = vld [vmem:[#allocation45_spill] sm:$0xff]  ;;  %v10617_v16 = vld [vmem:[#allocation12_spill] sm:$0xff] }
 0x9f1   : > { %v4685_v24 = vsel %vm10592_vm4, %v4649_v11, 0.0  ;;  %v4586_v60 = vmul.f32 %v9303_v44, %v9253_v48  ;;  %v4622_v21 = vadd.f32 %v9314_v46, %v4582_v2  ;;  %v4654_v1 = vmax.f32 %v4618_v45, 0.0  ;;  %4720 = vst [vmem:[%s9346_s16 + $0x80] sm:$0xff] %v4684_v17 }
 0x9f2   : > { %vm10594_vm13 = vnez %v10593_v50  ;;  %v4587_v30 = vmul.f32 %v9303_v44, %v9261_v55  ;;  %v4623_v42 = vadd.f32 %v9314_v46, %v4583_v32  ;;  %v4655_v7 = vmax.f32 %v4619_v39, 0.0  ;;  %4721 = vst [vmem:[%s9346_s16 + $0x88] sm:$0xff] %v4685_v24  ;;  %v10598_v55 = vld [vmem:[#allocation33_spill] sm:$0xff] }
 0x9f3   : > { %v4686_v40 = vsel %vm10594_vm13, %v4650_v22, 0.0  ;;  %v4687_v54 = vsel %vm10536_vm11, %v4651_v27, 0.0  ;;  %v4588_v48 = vmul.f32 %v9303_v44, %v9269_v10  ;;  %v4624_v5 = vadd.f32 %v9314_v46, %v4584_v62  ;;  %v10601_v10 = vld [vmem:[#allocation23_spill] sm:$0xff] }
 0x9f4   : > { %v4656_v31 = vmax.f32 %v4620_v20, 0.0  ;;  %vm10597_vm3 = vnez %v10596_v13  ;;  %v4589_v43 = vmul.f32 %v9303_v44, %v10598_v55  ;;  %v4625_v33 = vadd.f32 %v9314_v46, %v4585_v47  ;;  %4722 = vst [vmem:[%s9346_s16 + $0x90] sm:$0xff] %v4686_v40  ;;  %v10610_v27 = vld [vmem:[#allocation55_spill] sm:$0xff] }
 0x9f5   : > { %v4688_v15 = vsel %vm10597_vm3, %v4652_v29, 0.0  ;;  %v4657_v0 = vmax.f32 %v4621_v56, 0.0  ;;  %vm10600_vm11 = vnez %v10599_v59  ;;  %v4590_v23 = vmul.f32 %v9303_v44, %v10601_v10  ;;  %4723 = vst [vmem:[%s9346_s16 + $0x98] sm:$0xff] %v4687_v54  ;;  %v10615_v56 = vld [vmem:[#allocation10_spill] sm:$0xff] }
 0x9f6   : > { %v4689_v6 = vsel %vm10600_vm11, %v4653_v25, 0.0  ;;  %v4626_v52 = vadd.f32 %v9314_v46, %v4586_v60  ;;  %v4658_v49 = vmax.f32 %v4622_v21, 0.0  ;;  %vm10603_vm12 = vnez %v10602_v57  ;;  %4724 = vst [vmem:[%s9346_s16 + $0xa0] sm:$0xff] %v4688_v15  ;;  %v10619_v60 = vld [vmem:[#allocation15_spill] sm:$0xff] }
 0x9f7   : > { %v4690_v61 = vsel %vm10603_vm12, %v4654_v1, 0.0  ;;  %v4591_v28 = vmul.f32 %v9303_v44, %v10604_v63  ;;  %v4627_v51 = vadd.f32 %v9314_v46, %v4587_v30  ;;  %v4659_v3 = vmax.f32 %v4623_v42, 0.0  ;;  %4725 = vst [vmem:[%s9346_s16 + $0xa8] sm:$0xff] %v4689_v6  ;;  %v10621_v1 = vld [vmem:[#allocation17_spill] sm:$0xff] }
 0x9f8   : > { %vm10606_vm9 = vnez %v10605_v18  ;;  %v4628_v4 = vadd.f32 %v9314_v46, %v4588_v48  ;;  %v4660_v12 = vmax.f32 %v4624_v5, 0.0  ;;  %v4692_v34 = vsel %vm10553_vm5, %v4656_v31, 0.0  ;;  %4726 = vst [vmem:[%s9346_s16 + $0xb0] sm:$0xff] %v4690_v61 }
 0x9f9   : > { %v4691_v53 = vsel %vm10606_vm9, %v4655_v7, 0.0  ;;  %v4629_v35 = vadd.f32 %v9314_v46, %v4589_v43  ;;  %v4661_v44 = vmax.f32 %v4625_v33, 0.0  ;;  %v4693_v45 = vsel %vm10557_vm0, %v4657_v0, 0.0  ;;  %4728 = vst [vmem:[%s9346_s16 + $0xc0] sm:$0xff] %v4692_v34 }
 0x9fa   : > { %v4630_v22 = vadd.f32 %v9314_v46, %v4590_v23  ;;  %v4662_v38 = vmax.f32 %v4626_v52, 0.0  ;;  %v4694_v8 = vsel %vm10503_vm15, %v4658_v49, 0.0  ;;  %4727 = vst [vmem:[%s9346_s16 + $0xb8] sm:$0xff] %v4691_v53  ;;  %v4631_v32 = vadd.f32 %v9314_v46, %v4591_v28 }
 0x9fb   : > { %v4663_v39 = vmax.f32 %v4627_v51, 0.0  ;;  %vm10611_vm5 = vnez %v10610_v27  ;;  %v4664_v37 = vmax.f32 %v4628_v4, 0.0  ;;  %v4696_v62 = vsel %vm10508_vm8, %v4660_v12, 0.0  ;;  %4729 = vst [vmem:[%s9346_s16 + $0xc8] sm:$0xff] %v4693_v45 }
 0x9fc   : > { %v4695_v14 = vsel %vm10611_vm5, %v4659_v3, 0.0  ;;  %v4665_v20 = vmax.f32 %v4629_v35, 0.0  ;;  %v4697_v58 = vsel %vm10510_vm7, %v4661_v44, 0.0  ;;  %4730 = vst [vmem:[%s9346_s16 + $0xd0] sm:$0xff] %v4694_v8  ;;  %v4666_v46 = vmax.f32 %v4630_v22, 0.0 }
 0x9fd   : > { %v4698_v19 = vsel %vm10566_vm1, %v4662_v38, 0.0  ;;  %4731 = vst [vmem:[%s9346_s16 + $0xd8] sm:$0xff] %v4695_v14  ;;  %v4667_v47 = vmax.f32 %v4631_v32, 0.0  ;;  %vm10616_vm15 = vnez %v10615_v56  ;;  %vm10618_vm8 = vnez %v10617_v16 }
 0x9fe   : > { %v4699_v25 = vsel %vm10616_vm15, %v4663_v39, 0.0  ;;  %4732 = vst [vmem:[%s9346_s16 + $0xe0] sm:$0xff] %v4696_v62  ;;  %v4700_v24 = vsel %vm10618_vm8, %v4664_v37, 0.0  ;;  %vm10620_vm7 = vnez %v10619_v60  ;;  %vm10622_vm0 = vnez %v10621_v1 }
 0x9ff   : > { %4733 = vst [vmem:[%s9346_s16 + $0xe8] sm:$0xff] %v4697_v58  ;;  %v4701_v21 = vsel %vm10620_vm7, %v4665_v20, 0.0  ;;  %v4702_v50 = vsel %vm10622_vm0, %v4666_v46, 0.0  ;;  %vm10623_vm1 = vnez %v10516_v9 }
 0xa00   : > { %4734 = vst [vmem:[%s9346_s16 + $0xf0] sm:$0xff] %v4698_v19  ;;  %v4703_v40 = vsel %vm10623_vm1, %v4667_v47, 0.0 }
 0xa01   : > { %4735 = vst [vmem:[%s9346_s16 + $0xf8] sm:$0xff] %v4699_v25 }
 0xa02   : > { %4736 = vst [vmem:[%s9346_s16 + $0x100] sm:$0xff] %v4700_v24 }
 0xa03   : > { %4737 = vst [vmem:[%s9346_s16 + $0x108] sm:$0xff] %v4701_v21 }
 0xa04   : > { %4738 = vst [vmem:[%s9346_s16 + $0x110] sm:$0xff] %v4702_v50 }
 0xa05   : > { %4739 = vst [vmem:[%s9346_s16 + $0x118] sm:$0xff] %v4703_v40 }
 0xa06 PF: > { %s20_s13 = sadd.s32 1, %s5434_s13  }
 0xa07   : > { %p17_p4 = scmp.ge.s32.totalorder %s20_s13, 4  }
 0xa09   :  { %19 = sbr.rel (!%p17_p4) target bundleno = 1 (0x1), region = 93 }

</bundles_post_ra>
